<compile_context>
chip_gen: v7x
topology: tpu7x:2x2x1
jax: 0.10.0
libtpu: 0.0.40
codegen_flags: <defaults>
</compile_context>

<pallas_src>
import functools

import jax
import jax.numpy as jnp
from jax.experimental import pallas as pl
from jax.experimental.pallas import tpu as pltpu


def _round_up(x, m):
    return ((x + m - 1) // m) * m


def _vmem_limit_bytes(block_bytes):
    # Double-buffered blocks + slack, clamped to [16 MiB, 48 MiB] (v7x headroom).
    need = 2 * block_bytes + (4 << 20)
    return int(min(max(need, 16 << 20), 48 << 20))


# ----------------------------------------------------------------------------
# Pallas kernel: y = relu?(x @ w + b), tiled over rows.  bf16 MXU, f32 acc.
# ----------------------------------------------------------------------------
def _dense_kernel(x_ref, w_ref, b_ref, o_ref, *, relu):
    y = jnp.dot(x_ref[...], w_ref[...], preferred_element_type=jnp.float32)
    y = y + b_ref[...]                       # (1, N) f32 broadcast over (bm, N)
    if relu:
        y = jnp.maximum(y, 0.0)
    o_ref[...] = y.astype(o_ref.dtype)


def dense(x, w, b, *, relu=True, out_dtype=None, block_m=512):
    """x: (M, K) bf16, w: (K, N) bf16, b: (N,) f32 -> (M, N)."""
    M, K = x.shape
    K2, N = w.shape
    assert K == K2
    out_dtype = out_dtype or x.dtype
    bm = min(block_m, _round_up(M, 32))
    grid_m = pl.cdiv(M, bm)                  # last block may be partial (masked)
    blk = (bm * K * x.dtype.itemsize + K * N * w.dtype.itemsize + 4 * N
           + bm * N * jnp.dtype(out_dtype).itemsize)
    kernel = functools.partial(_dense_kernel, relu=relu)
    return pl.pallas_call(
        kernel,
        out_shape=jax.ShapeDtypeStruct((M, N), out_dtype),
        grid=(grid_m,),
        in_specs=[
            pl.BlockSpec((bm, K), lambda i: (i, 0)),   # row tile (pipelined)
            pl.BlockSpec((K, N), lambda i: (0, 0)),    # weight stays resident
            pl.BlockSpec((1, N), lambda i: (0, 0)),    # bias stays resident
        ],
        out_specs=pl.BlockSpec((bm, N), lambda i: (i, 0)),
        compiler_params=pltpu.CompilerParams(
            dimension_semantics=("parallel",),
            vmem_limit_bytes=_vmem_limit_bytes(blk),
        ),
    )(x, w, b.reshape(1, N).astype(jnp.float32))


# ----------------------------------------------------------------------------
# Fused fc1 + fc2 kernel: hidden stays in VMEM; output block is lane-dense.
# ----------------------------------------------------------------------------
def _fc_fused_kernel(x_ref, w1_ref, b1_ref, w2_ref, b2_ref, o_ref):
    h = jnp.dot(x_ref[...], w1_ref[...], preferred_element_type=jnp.float32)
    h = jnp.maximum(h + b1_ref[...], 0.0)                       # (bm, 512) f32
    y = jnp.dot(h.astype(w2_ref.dtype), w2_ref[...],
                preferred_element_type=jnp.float32)             # (bm, 128)
    o_ref[...] = (y + b2_ref[...]).astype(o_ref.dtype)


def fc_fused(x, w1, b1, w2p, b2p, *, block_m=512):
    """x: (M, 3136) bf16; w1: (3136, 512) bf16; w2p: (512, 128) bf16 (padded)."""
    M, K = x.shape
    _, H = w1.shape
    _, NP = w2p.shape
    bm = min(block_m, _round_up(M, 32))
    grid_m = pl.cdiv(M, bm)
    blk = (bm * K * x.dtype.itemsize + K * H * w1.dtype.itemsize + 4 * H
           + H * NP * w2p.dtype.itemsize + 4 * NP + 4 * bm * NP + 4 * bm * H)
    return pl.pallas_call(
        _fc_fused_kernel,
        out_shape=jax.ShapeDtypeStruct((M, NP), jnp.float32),
        grid=(grid_m,),
        in_specs=[
            pl.BlockSpec((bm, K), lambda i: (i, 0)),
            pl.BlockSpec((K, H), lambda i: (0, 0)),
            pl.BlockSpec((1, H), lambda i: (0, 0)),
            pl.BlockSpec((H, NP), lambda i: (0, 0)),
            pl.BlockSpec((1, NP), lambda i: (0, 0)),
        ],
        out_specs=pl.BlockSpec((bm, NP), lambda i: (i, 0)),
        compiler_params=pltpu.CompilerParams(
            dimension_semantics=("parallel",),
            vmem_limit_bytes=_vmem_limit_bytes(blk),
        ),
    )(x, w1, b1.reshape(1, H), w2p, b2p.reshape(1, NP))


# ----------------------------------------------------------------------------
# im2col glue (plain JAX, channels-last): NHWC -> (N*Ho*Wo, kh*kw*C).
# TODO(synk): for training-size batches, pull this gather into the kernel to
# avoid the k*k patch inflation in HBM; channels here (4/32/64) are too narrow
# for a lane-friendly in-kernel strided gather, so it stays as XLA glue.
# ----------------------------------------------------------------------------
def _im2col_nhwc(x, k, s):
    n, h, w, c = x.shape
    ho = (h - k) // s + 1
    wo = (w - k) // s + 1
    rows = (jnp.arange(ho) * s)[:, None] + jnp.arange(k)[None, :]   # (Ho, kh)
    cols = (jnp.arange(wo) * s)[:, None] + jnp.arange(k)[None, :]   # (Wo, kw)
    p = x[:, rows]                     # (N, Ho, kh, W, C)
    p = p[:, :, :, cols]               # (N, Ho, kh, Wo, kw, C)
    p = jnp.transpose(p, (0, 1, 3, 2, 4, 5))     # (N, Ho, Wo, kh, kw, C)
    return p.reshape(n * ho * wo, k * k * c), ho, wo


def conv2d_pallas(x, w2d, b, *, k, s):
    """x: (N, H, W, C) NHWC bf16; w2d: (kh*kw*C, O) bf16. Returns NHWC, ReLU'd."""
    n = x.shape[0]
    o = w2d.shape[1]
    patches, ho, wo = _im2col_nhwc(x, k, s)
    y = dense(patches, w2d, b, relu=True, out_dtype=jnp.bfloat16)
    return y.reshape(n, ho, wo, o)


# ----------------------------------------------------------------------------
# Parameters (PyTorch layout) + one-time host-side preprocessing.
# ----------------------------------------------------------------------------
def init_params(key, n_actions):
    ks = jax.random.split(key, 10)
    s = 0.02
    return {
        "w1": jax.random.normal(ks[0], (32, 4, 8, 8), jnp.float32) * s,
        "b1": jax.random.normal(ks[1], (32,), jnp.float32) * s,
        "w2": jax.random.normal(ks[2], (64, 32, 4, 4), jnp.float32) * s,
        "b2": jax.random.normal(ks[3], (64,), jnp.float32) * s,
        "w3": jax.random.normal(ks[4], (64, 64, 3, 3), jnp.float32) * s,
        "b3": jax.random.normal(ks[5], (64,), jnp.float32) * s,
        "wf1": jax.random.normal(ks[6], (7 * 7 * 64, 512), jnp.float32) * s,
        "bf1": jax.random.normal(ks[7], (512,), jnp.float32) * s,
        "wf2": jax.random.normal(ks[8], (512, n_actions), jnp.float32) * s,
        "bf2": jax.random.normal(ks[9], (n_actions,), jnp.float32) * s,
    }


def prepare_params(p, n_actions):
    """Host-side prep: bf16 HWIO-flattened conv weights, /255 folded into w1
    (weights only), fc1 rows permuted for the NHWC flatten, fc2 zero-padded to
    a lane-dense 128-wide output."""
    def conv_w(w):                                   # OIHW -> (kh*kw*I, O)
        o, i, kh, kw = w.shape
        return jnp.transpose(w, (2, 3, 1, 0)).reshape(kh * kw * i, o)

    n_pad = _round_up(n_actions, 128)
    wf2p = jnp.zeros((512, n_pad), jnp.float32).at[:, :n_actions].set(p["wf2"])
    bf2p = jnp.zeros((n_pad,), jnp.float32).at[:n_actions].set(p["bf2"])
    # torch flattens NCHW -> row index (c, h, w); our activations flatten (h, w, c).
    wf1p = jnp.transpose(p["wf1"].reshape(64, 7, 7, 512), (1, 2, 0, 3))
    wf1p = wf1p.reshape(7 * 7 * 64, 512)
    return {
        "w1": (conv_w(p["w1"]) / 255.0).astype(jnp.bfloat16),   # fold /255 into w1
        "b1": p["b1"],
        "w2": conv_w(p["w2"]).astype(jnp.bfloat16),
        "b2": p["b2"],
        "w3": conv_w(p["w3"]).astype(jnp.bfloat16),
        "b3": p["b3"],
        "wf1": wf1p.astype(jnp.bfloat16),
        "bf1": p["bf1"],
        "wf2": wf2p.astype(jnp.bfloat16),
        "bf2": bf2p,
    }


# ----------------------------------------------------------------------------
# DQN forward (Pallas) and pure-JAX f32 reference.
# ----------------------------------------------------------------------------
def dqn_forward(x, pp, *, n_actions):
    # x: (N, 4, 84, 84) f32 raw pixels (PyTorch NCHW convention).
    n = x.shape[0]
    y = jnp.transpose(x, (0, 2, 3, 1)).astype(jnp.bfloat16)        # NHWC bf16
    y = conv2d_pallas(y, pp["w1"], pp["b1"], k=8, s=4)             # (N,20,20,32)
    y = conv2d_pallas(y, pp["w2"], pp["b2"], k=4, s=2)             # (N, 9, 9,64)
    y = conv2d_pallas(y, pp["w3"], pp["b3"], k=3, s=1)             # (N, 7, 7,64)
    y = y.reshape(n, -1)                                           # (N,3136) (h,w,c)
    q = fc_fused(y, pp["wf1"], pp["bf1"], pp["wf2"], pp["bf2"])    # (N,128) f32
    return q[:, :n_actions]


def dqn_reference(x, p):
    dn = ("NCHW", "OIHW", "NCHW")
    y = x / 255.0
    y = jax.lax.conv_general_dilated(y, p["w1"], (4, 4), "VALID",
                                     dimension_numbers=dn) + p["b1"][None, :, None, None]
    y = jnp.maximum(y, 0.0)
    y = jax.lax.conv_general_dilated(y, p["w2"], (2, 2), "VALID",
                                     dimension_numbers=dn) + p["b2"][None, :, None, None]
    y = jnp.maximum(y, 0.0)
    y = jax.lax.conv_general_dilated(y, p["w3"], (1, 1), "VALID",
                                     dimension_numbers=dn) + p["b3"][None, :, None, None]
    y = jnp.maximum(y, 0.0)
    y = y.reshape(x.shape[0], -1)
    y = jnp.maximum(y @ p["wf1"] + p["bf1"], 0.0)
    return y @ p["wf2"] + p["bf2"]


if __name__ == "__main__":
    key = jax.random.PRNGKey(0)
    k_in, k_par = jax.random.split(key)

    # The 7*7*64 fc layer structurally requires 84x84 Atari frames.
    batch, n_actions = 2, 6
    x = jax.random.uniform(k_in, (batch, 4, 84, 84), jnp.float32, 0.0, 255.0)
    params = init_params(k_par, n_actions)
    prepped = prepare_params(params, n_actions)

    fwd = jax.jit(functools.partial(dqn_forward, n_actions=n_actions))
    q_pallas = jax.block_until_ready(fwd(x, prepped))
    q_ref = jax.block_until_ready(dqn_reference(x, params))

    assert q_pallas.shape == (batch, n_actions), q_pallas.shape
    max_err = float(jnp.max(jnp.abs(q_pallas - q_ref)))
    # bf16 MXU inputs with f32 accumulation vs. pure-f32 reference.
    assert jnp.allclose(q_pallas, q_ref, rtol=5e-2, atol=5e-3), max_err

    print("KERNEL_OK")
</pallas_src>

<mosaic_0001>
module attributes {stable_mosaic.version = 11 : i64} {
  func.func @_dense_kernel(%arg0: i32, %arg1: memref<512x256xbf16, #tpu.memory_space<vmem>>, %arg2: memref<256x32xbf16, #tpu.memory_space<vmem>>, %arg3: memref<1x32xf32, #tpu.memory_space<vmem>>, %arg4: memref<512x32xbf16, #tpu.memory_space<vmem>>) attributes {dimension_semantics = [#tpu.dimension_semantics<parallel>], iteration_bounds = array<i64: 2>, scalar_prefetch = 0 : i64, scratch_operands = 0 : i64, tpu.core_type = #tpu.core_type<tc>, window_params = [{transform_indices = @transform_0, window_bounds = array<i64: 512, 256>}, {pipeline_mode = #tpu.pipeline_mode<synchronous>, transform_indices = @transform_1, window_bounds = array<i64: 256, 32>}, {pipeline_mode = #tpu.pipeline_mode<synchronous>, transform_indices = @transform_2, window_bounds = array<i64: 1, 32>}, {transform_indices = @transform_3, window_bounds = array<i64: 512, 32>}]} {
    %c0 = arith.constant 0 : index
    %c0_0 = arith.constant 0 : index
    %0 = vector.load %arg1[%c0, %c0_0] : memref<512x256xbf16, #tpu.memory_space<vmem>>, vector<512x256xbf16>
    %c0_1 = arith.constant 0 : index
    %c0_2 = arith.constant 0 : index
    %1 = vector.load %arg2[%c0_1, %c0_2] : memref<256x32xbf16, #tpu.memory_space<vmem>>, vector<256x32xbf16>
    %cst = arith.constant dense<0.000000e+00> : vector<512x32xf32>
    %2 = tpu.matmul %0, %1, %cst {dimension_numbers = #tpu.dot_dimension_numbers<[1], [0], [0], [1], [0, 0, 1, 1], [], []>} : vector<512x256xbf16>, vector<256x32xbf16>, vector<512x32xf32> -> vector<512x32xf32>
    %c0_3 = arith.constant 0 : index
    %c0_4 = arith.constant 0 : index
    %3 = vector.load %arg3[%c0_3, %c0_4] : memref<1x32xf32, #tpu.memory_space<vmem>>, vector<1x32xf32>
    %4 = vector.broadcast %3 : vector<1x32xf32> to vector<512x32xf32>
    %5 = arith.addf %2, %4 : vector<512x32xf32>
    %cst_5 = arith.constant 0.000000e+00 : f32
    %6 = vector.broadcast %cst_5 : f32 to vector<512x32xf32>
    %7 = arith.maximumf %5, %6 : vector<512x32xf32>
    %8 = arith.truncf %7 : vector<512x32xf32> to vector<512x32xbf16>
    %c0_6 = arith.constant 0 : index
    %c0_7 = arith.constant 0 : index
    %9 = vector.load %arg4[%c0_6, %c0_7] : memref<512x32xbf16, #tpu.memory_space<vmem>>, vector<512x32xbf16>
    tpu.vector_store %arg4[%c0_6, %c0_7], %8 {strides = array<i32>} : memref<512x32xbf16, #tpu.memory_space<vmem>>, vector<512x32xbf16>,
    return
  }
  func.func @transform_0(%arg0: i32) -> (i32, i32) {
    %c0_i32 = arith.constant 0 : i32
    %c0_i32_0 = arith.constant 0 : i32
    return %arg0, %c0_i32 : i32, i32
  }
  func.func @transform_1(%arg0: i32) -> (i32, i32) {
    %c0_i32 = arith.constant 0 : i32
    %c0_i32_0 = arith.constant 0 : i32
    %c0_i32_1 = arith.constant 0 : i32
    return %c0_i32, %c0_i32_0 : i32, i32
  }
  func.func @transform_2(%arg0: i32) -> (i32, i32) {
    %c0_i32 = arith.constant 0 : i32
    %c0_i32_0 = arith.constant 0 : i32
    %c0_i32_1 = arith.constant 0 : i32
    return %c0_i32, %c0_i32_0 : i32, i32
  }
  func.func @transform_3(%arg0: i32) -> (i32, i32) {
    %c0_i32 = arith.constant 0 : i32
    %c0_i32_0 = arith.constant 0 : i32
    return %arg0, %c0_i32 : i32, i32
  }
}

module attributes {stable_mosaic.version = 11 : i64} {
  func.func @_dense_kernel(%arg0: i32, %arg1: memref<192x512xbf16, #tpu.memory_space<vmem>>, %arg2: memref<512x64xbf16, #tpu.memory_space<vmem>>, %arg3: memref<1x64xf32, #tpu.memory_space<vmem>>, %arg4: memref<192x64xbf16, #tpu.memory_space<vmem>>) attributes {dimension_semantics = [#tpu.dimension_semantics<parallel>], iteration_bounds = array<i64: 1>, scalar_prefetch = 0 : i64, scratch_operands = 0 : i64, tpu.core_type = #tpu.core_type<tc>, window_params = [{transform_indices = @transform_0, window_bounds = array<i64: 192, 512>}, {pipeline_mode = #tpu.pipeline_mode<synchronous>, transform_indices = @transform_1, window_bounds = array<i64: 512, 64>}, {pipeline_mode = #tpu.pipeline_mode<synchronous>, transform_indices = @transform_2, window_bounds = array<i64: 1, 64>}, {transform_indices = @transform_3, window_bounds = array<i64: 192, 64>}]} {
    %c0 = arith.constant 0 : index
    %c0_0 = arith.constant 0 : index
    %0 = vector.load %arg1[%c0, %c0_0] : memref<192x512xbf16, #tpu.memory_space<vmem>>, vector<192x512xbf16>
    %c0_1 = arith.constant 0 : index
    %c0_2 = arith.constant 0 : index
    %1 = vector.load %arg2[%c0_1, %c0_2] : memref<512x64xbf16, #tpu.memory_space<vmem>>, vector<512x64xbf16>
    %cst = arith.constant dense<0.000000e+00> : vector<192x64xf32>
    %2 = tpu.matmul %0, %1, %cst {dimension_numbers = #tpu.dot_dimension_numbers<[1], [0], [0], [1], [0, 0, 1, 1], [], []>} : vector<192x512xbf16>, vector<512x64xbf16>, vector<192x64xf32> -> vector<192x64xf32>
    %c0_3 = arith.constant 0 : index
    %c0_4 = arith.constant 0 : index
    %3 = vector.load %arg3[%c0_3, %c0_4] : memref<1x64xf32, #tpu.memory_space<vmem>>, vector<1x64xf32>
    %4 = vector.broadcast %3 : vector<1x64xf32> to vector<192x64xf32>
    %5 = arith.addf %2, %4 : vector<192x64xf32>
    %cst_5 = arith.constant 0.000000e+00 : f32
    %6 = vector.broadcast %cst_5 : f32 to vector<192x64xf32>
    %7 = arith.maximumf %5, %6 : vector<192x64xf32>
    %8 = arith.truncf %7 : vector<192x64xf32> to vector<192x64xbf16>
    %c0_6 = arith.constant 0 : index
    %c0_7 = arith.constant 0 : index
    %9 = vector.load %arg4[%c0_6, %c0_7] : memref<192x64xbf16, #tpu.memory_space<vmem>>, vector<192x64xbf16>
    tpu.vector_store %arg4[%c0_6, %c0_7], %8 {strides = array<i32>} : memref<192x64xbf16, #tpu.memory_space<vmem>>, vector<192x64xbf16>,
    return
  }
  func.func @transform_0(%arg0: i32) -> (i32, i32) {
    %c0_i32 = arith.constant 0 : i32
    %c0_i32_0 = arith.constant 0 : i32
    return %arg0, %c0_i32 : i32, i32
  }
  func.func @transform_1(%arg0: i32) -> (i32, i32) {
    %c0_i32 = arith.constant 0 : i32
    %c0_i32_0 = arith.constant 0 : i32
    %c0_i32_1 = arith.constant 0 : i32
    return %c0_i32, %c0_i32_0 : i32, i32
  }
  func.func @transform_2(%arg0: i32) -> (i32, i32) {
    %c0_i32 = arith.constant 0 : i32
    %c0_i32_0 = arith.constant 0 : i32
    %c0_i32_1 = arith.constant 0 : i32
    return %c0_i32, %c0_i32_0 : i32, i32
  }
  func.func @transform_3(%arg0: i32) -> (i32, i32) {
    %c0_i32 = arith.constant 0 : i32
    %c0_i32_0 = arith.constant 0 : i32
    return %arg0, %c0_i32 : i32, i32
  }
}

module attributes {stable_mosaic.version = 11 : i64} {
  func.func @_dense_kernel(%arg0: i32, %arg1: memref<128x576xbf16, #tpu.memory_space<vmem>>, %arg2: memref<576x64xbf16, #tpu.memory_space<vmem>>, %arg3: memref<1x64xf32, #tpu.memory_space<vmem>>, %arg4: memref<128x64xbf16, #tpu.memory_space<vmem>>) attributes {dimension_semantics = [#tpu.dimension_semantics<parallel>], iteration_bounds = array<i64: 1>, scalar_prefetch = 0 : i64, scratch_operands = 0 : i64, tpu.core_type = #tpu.core_type<tc>, window_params = [{transform_indices = @transform_0, window_bounds = array<i64: 128, 576>}, {pipeline_mode = #tpu.pipeline_mode<synchronous>, transform_indices = @transform_1, window_bounds = array<i64: 576, 64>}, {pipeline_mode = #tpu.pipeline_mode<synchronous>, transform_indices = @transform_2, window_bounds = array<i64: 1, 64>}, {transform_indices = @transform_3, window_bounds = array<i64: 128, 64>}]} {
    %c0 = arith.constant 0 : index
    %c0_0 = arith.constant 0 : index
    %0 = vector.load %arg1[%c0, %c0_0] : memref<128x576xbf16, #tpu.memory_space<vmem>>, vector<128x576xbf16>
    %c0_1 = arith.constant 0 : index
    %c0_2 = arith.constant 0 : index
    %1 = vector.load %arg2[%c0_1, %c0_2] : memref<576x64xbf16, #tpu.memory_space<vmem>>, vector<576x64xbf16>
    %cst = arith.constant dense<0.000000e+00> : vector<128x64xf32>
    %2 = tpu.matmul %0, %1, %cst {dimension_numbers = #tpu.dot_dimension_numbers<[1], [0], [0], [1], [0, 0, 1, 1], [], []>} : vector<128x576xbf16>, vector<576x64xbf16>, vector<128x64xf32> -> vector<128x64xf32>
    %c0_3 = arith.constant 0 : index
    %c0_4 = arith.constant 0 : index
    %3 = vector.load %arg3[%c0_3, %c0_4] : memref<1x64xf32, #tpu.memory_space<vmem>>, vector<1x64xf32>
    %4 = vector.broadcast %3 : vector<1x64xf32> to vector<128x64xf32>
    %5 = arith.addf %2, %4 : vector<128x64xf32>
    %cst_5 = arith.constant 0.000000e+00 : f32
    %6 = vector.broadcast %cst_5 : f32 to vector<128x64xf32>
    %7 = arith.maximumf %5, %6 : vector<128x64xf32>
    %8 = arith.truncf %7 : vector<128x64xf32> to vector<128x64xbf16>
    %c0_6 = arith.constant 0 : index
    %c0_7 = arith.constant 0 : index
    %9 = vector.load %arg4[%c0_6, %c0_7] : memref<128x64xbf16, #tpu.memory_space<vmem>>, vector<128x64xbf16>
    tpu.vector_store %arg4[%c0_6, %c0_7], %8 {strides = array<i32>} : memref<128x64xbf16, #tpu.memory_space<vmem>>, vector<128x64xbf16>,
    return
  }
  func.func @transform_0(%arg0: i32) -> (i32, i32) {
    %c0_i32 = arith.constant 0 : i32
    %c0_i32_0 = arith.constant 0 : i32
    return %arg0, %c0_i32 : i32, i32
  }
  func.func @transform_1(%arg0: i32) -> (i32, i32) {
    %c0_i32 = arith.constant 0 : i32
    %c0_i32_0 = arith.constant 0 : i32
    %c0_i32_1 = arith.constant 0 : i32
    return %c0_i32, %c0_i32_0 : i32, i32
  }
  func.func @transform_2(%arg0: i32) -> (i32, i32) {
    %c0_i32 = arith.constant 0 : i32
    %c0_i32_0 = arith.constant 0 : i32
    %c0_i32_1 = arith.constant 0 : i32
    return %c0_i32, %c0_i32_0 : i32, i32
  }
  func.func @transform_3(%arg0: i32) -> (i32, i32) {
    %c0_i32 = arith.constant 0 : i32
    %c0_i32_0 = arith.constant 0 : i32
    return %arg0, %c0_i32 : i32, i32
  }
}

module attributes {stable_mosaic.version = 11 : i64} {
  func.func @_fc_fused_kernel(%arg0: i32, %arg1: memref<32x3136xbf16, #tpu.memory_space<vmem>>, %arg2: memref<3136x512xbf16, #tpu.memory_space<vmem>>, %arg3: memref<1x512xf32, #tpu.memory_space<vmem>>, %arg4: memref<512x128xbf16, #tpu.memory_space<vmem>>, %arg5: memref<1x128xf32, #tpu.memory_space<vmem>>, %arg6: memref<32x128xf32, #tpu.memory_space<vmem>>) attributes {dimension_semantics = [#tpu.dimension_semantics<parallel>], iteration_bounds = array<i64: 1>, scalar_prefetch = 0 : i64, scratch_operands = 0 : i64, tpu.core_type = #tpu.core_type<tc>, window_params = [{transform_indices = @transform_0, window_bounds = array<i64: 32, 3136>}, {pipeline_mode = #tpu.pipeline_mode<synchronous>, transform_indices = @transform_1, window_bounds = array<i64: 3136, 512>}, {pipeline_mode = #tpu.pipeline_mode<synchronous>, transform_indices = @transform_2, window_bounds = array<i64: 1, 512>}, {pipeline_mode = #tpu.pipeline_mode<synchronous>, transform_indices = @transform_3, window_bounds = array<i64: 512, 128>}, {pipeline_mode = #tpu.pipeline_mode<synchronous>, transform_indices = @transform_4, window_bounds = array<i64: 1, 128>}, {transform_indices = @transform_5, window_bounds = array<i64: 32, 128>}]} {
    %c0 = arith.constant 0 : index
    %c0_0 = arith.constant 0 : index
    %0 = vector.load %arg1[%c0, %c0_0] : memref<32x3136xbf16, #tpu.memory_space<vmem>>, vector<32x3136xbf16>
    %c0_1 = arith.constant 0 : index
    %c0_2 = arith.constant 0 : index
    %1 = vector.load %arg2[%c0_1, %c0_2] : memref<3136x512xbf16, #tpu.memory_space<vmem>>, vector<3136x512xbf16>
    %cst = arith.constant dense<0.000000e+00> : vector<32x512xf32>
    %2 = tpu.matmul %0, %1, %cst {dimension_numbers = #tpu.dot_dimension_numbers<[1], [0], [0], [1], [0, 0, 1, 1], [], []>} : vector<32x3136xbf16>, vector<3136x512xbf16>, vector<32x512xf32> -> vector<32x512xf32>
    %c0_3 = arith.constant 0 : index
    %c0_4 = arith.constant 0 : index
    %3 = vector.load %arg3[%c0_3, %c0_4] : memref<1x512xf32, #tpu.memory_space<vmem>>, vector<1x512xf32>
    %4 = vector.broadcast %3 : vector<1x512xf32> to vector<32x512xf32>
    %5 = arith.addf %2, %4 : vector<32x512xf32>
    %cst_5 = arith.constant 0.000000e+00 : f32
    %6 = vector.broadcast %cst_5 : f32 to vector<32x512xf32>
    %7 = arith.maximumf %5, %6 : vector<32x512xf32>
    %8 = arith.truncf %7 : vector<32x512xf32> to vector<32x512xbf16>
    %c0_6 = arith.constant 0 : index
    %c0_7 = arith.constant 0 : index
    %9 = vector.load %arg4[%c0_6, %c0_7] : memref<512x128xbf16, #tpu.memory_space<vmem>>, vector<512x128xbf16>
    %cst_8 = arith.constant dense<0.000000e+00> : vector<32x128xf32>
    %10 = tpu.matmul %8, %9, %cst_8 {dimension_numbers = #tpu.dot_dimension_numbers<[1], [0], [0], [1], [0, 0, 1, 1], [], []>} : vector<32x512xbf16>, vector<512x128xbf16>, vector<32x128xf32> -> vector<32x128xf32>
    %c0_9 = arith.constant 0 : index
    %c0_10 = arith.constant 0 : index
    %11 = vector.load %arg5[%c0_9, %c0_10] : memref<1x128xf32, #tpu.memory_space<vmem>>, vector<1x128xf32>
    %12 = vector.broadcast %11 : vector<1x128xf32> to vector<32x128xf32>
    %13 = arith.addf %10, %12 : vector<32x128xf32>
    %c0_11 = arith.constant 0 : index
    %c0_12 = arith.constant 0 : index
    %14 = vector.load %arg6[%c0_11, %c0_12] : memref<32x128xf32, #tpu.memory_space<vmem>>, vector<32x128xf32>
    tpu.vector_store %arg6[%c0_11, %c0_12], %13 {strides = array<i32>} : memref<32x128xf32, #tpu.memory_space<vmem>>, vector<32x128xf32>,
    return
  }
  func.func @transform_0(%arg0: i32) -> (i32, i32) {
    %c0_i32 = arith.constant 0 : i32
    %c0_i32_0 = arith.constant 0 : i32
    return %arg0, %c0_i32 : i32, i32
  }
  func.func @transform_1(%arg0: i32) -> (i32, i32) {
    %c0_i32 = arith.constant 0 : i32
    %c0_i32_0 = arith.constant 0 : i32
    %c0_i32_1 = arith.constant 0 : i32
    return %c0_i32, %c0_i32_0 : i32, i32
  }
  func.func @transform_2(%arg0: i32) -> (i32, i32) {
    %c0_i32 = arith.constant 0 : i32
    %c0_i32_0 = arith.constant 0 : i32
    %c0_i32_1 = arith.constant 0 : i32
    return %c0_i32, %c0_i32_0 : i32, i32
  }
  func.func @transform_3(%arg0: i32) -> (i32, i32) {
    %c0_i32 = arith.constant 0 : i32
    %c0_i32_0 = arith.constant 0 : i32
    %c0_i32_1 = arith.constant 0 : i32
    return %c0_i32, %c0_i32_0 : i32, i32
  }
  func.func @transform_4(%arg0: i32) -> (i32, i32) {
    %c0_i32 = arith.constant 0 : i32
    %c0_i32_0 = arith.constant 0 : i32
    %c0_i32_1 = arith.constant 0 : i32
    return %c0_i32, %c0_i32_0 : i32, i32
  }
  func.func @transform_5(%arg0: i32) -> (i32, i32) {
    %c0_i32 = arith.constant 0 : i32
    %c0_i32_0 = arith.constant 0 : i32
    return %arg0, %c0_i32 : i32, i32
  }
}

</mosaic_0001>

<bundles_post_ra>
// kernel: dqn_forward.4
= control target key start
LH: loop header
LB: loop body
LE: loop exit
PB: predicated region body
PF: predicated region fallthrough
CT: control target
= control target key end

     0   :  { %s2440_s12 = smov 0   ;;  %s2442_s13 = smov 0   ;;  %s3022_s0 = inlined_call_operand.vmem [shape: bf16[800,256], index: 0, kind: input, shape index: {}]   ;;  %s3023_s1 = inlined_call_operand.vmem [shape: bf16[256,32], index: 1, kind: input, shape index: {}]   ;;  %s3024_s2 = inlined_call_operand.vmem [shape: f32[1,32], index: 2, kind: input, shape index: {}]   ;;  %s3025_s3 = inlined_call_operand.vmem [shape: bf16[800,32], index: 3, kind: output, shape index: {}]  }
   0x1   :  { %s2444_s14 = smov 0  }
   0x2 LB: > { %s2453_s15 = sadd.s32 4294967295, %s2385_s14   ;;  %s2455_s16 = sadd.s32 1, %s2385_s14   ;;  %s2385_s14 = sphi %s2444_s14, %s3032_s14   ;;  %s2381_s13 = sphi %s2442_s13, %s3031_s13   ;;  %s2377_s12 = sphi %s2440_s12, %s3030_s12  }
   0x3   : > { %s85_s17 = ssub.s32 %s2385_s14, %s2455_s16  ;;  %s88_s18 = sadd.s32 1, %s2381_s13 }
   0x4   : > { %p86_p0 = scmp.eq.s32.totalorder %s85_s17, 0  ;;  %p98_p1 = scmp.ne.s32.totalorder %s2381_s13, %s2377_s12 }
   0x5   : > { %p99_p2 = scmp.eq.s32.totalorder %s2453_s15, 1  ;;  %p1863_p3 = scmp.ge.s32.totalorder %s2385_s14, 1 }
   0x6   : > { %s2463_s19 = scalar_select %p86_p0, %s2381_s13, %s88_s18  }
   0x7   : > { %p2465_p4 = por %p99_p2, %p98_p1  ;;  %p149_p5 = scmp.lt.s32.totalorder %s2385_s14, 3 }
   0x9   : > { %p150_p6 = pnand %p1863_p3, %p149_p5 }
   0xa   : > { %v2219_v0 = vld [vmem:[%s3023_s1] sm:$0xff] (!%p150_p6)   ;;  %v2419_v1 = vmov (!%p150_p6), 0   ;;  %s2475_s23 = sshll.u32 (!%p150_p6), %s2453_s15, 6  ;;  %v2220_v2 = vld [vmem:[%s3023_s1 + $0x8] sm:$0xff] (!%p150_p6)   ;;  %v2221_v3 = vld [vmem:[%s3023_s1 + $0x10] sm:$0xff] (!%p150_p6)   ;;  %s175_s17 = sand.u32 (!%p150_p6), 1, %s2377_s12  }
   0xb   : > { %153 = sbr.rel (%p150_p6) target bundleno = 507 (0x1fb), region = 32  ;;  %720 = vmatprep.subr.bf16.mxu0 (!%p150_p6), %v2419_v1  ;;  %2098 = vmatprep.subr.bf16.mxu1 (!%p150_p6), %v2419_v1  ;;  %p184_p7 = scmp.lt.s32.totalorder (!%p150_p6), %s2475_s23, 99  ;;  %v2222_v4 = vld [vmem:[%s3023_s1 + $0x18] sm:$0xff] (!%p150_p6)   ;;  %v2223_v5 = vld [vmem:[%s3023_s1 + $0x20] sm:$0xff] (!%p150_p6)   ;;  %v2224_v7 = vld [vmem:[%s3023_s1 + $0x28] sm:$0xff] (!%p150_p6)   ;;  %vm1329_vm0 = vcmask (!%p150_p6), 257024  }
   0xc   : > { %721 = vmatpush1.bf16.msra.mxu0 (!%p150_p6), %v2219_v0  ;;  %2114 = vmatpush1.bf16.msra.mxu1 (!%p150_p6), %v2219_v0  ;;  %v2225_v9 = vld [vmem:[%s3023_s1 + $0x30] sm:$0xff] (!%p150_p6)   ;;  %v2226_v10 = vld [vmem:[%s3023_s1 + $0x38] sm:$0xff] (!%p150_p6)   ;;  %v2227_v11 = vld [vmem:[%s3023_s1 + $0x40] sm:$0xff] (!%p150_p6)   ;;  %s1864_s22 = sshll.u32 (!%p150_p6), %s175_s17, 8 }
   0xd   : > { %722 = vmatprep.subr.bf16.mxu0 (!%p150_p6), %v2419_v1  ;;  %2099 = vmatprep.subr.bf16.mxu1 (!%p150_p6), %v2419_v1  ;;  %v2228_v12 = vld [vmem:[%s3023_s1 + $0x48] sm:$0xff] (!%p150_p6)   ;;  %v2229_v13 = vld [vmem:[%s3023_s1 + $0x50] sm:$0xff] (!%p150_p6)   ;;  %v2230_v14 = vld [vmem:[%s3023_s1 + $0x58] sm:$0xff] (!%p150_p6)   ;;  %s2633_s12 = scalar_lea.vmem (!%p150_p6), [#allocation2], %s1864_s22  }
   0xe   : > { %v2231_v15 = vld [vmem:[%s3023_s1 + $0x60] sm:$0xff] (!%p150_p6)   ;;  %v2232_v16 = vld [vmem:[%s3023_s1 + $0x68] sm:$0xff] (!%p150_p6)   ;;  %v2233_v17 = vld [vmem:[%s3023_s1 + $0x70] sm:$0xff] (!%p150_p6)  }
   0xf   : > { %v2234_v18 = vld [vmem:[%s3023_s1 + $0x78] sm:$0xff] (!%p150_p6)  }
  0x10   : > { %723 = vmatpush1.bf16.msra.mxu0 (!%p150_p6), %v2220_v2  ;;  %2115 = vmatpush1.bf16.msra.mxu1 (!%p150_p6), %v2220_v2 }
  0x11   : > { %724 = vmatprep.subr.bf16.mxu0 (!%p150_p6), %v2419_v1  ;;  %2100 = vmatprep.subr.bf16.mxu1 (!%p150_p6), %v2419_v1 }
  0x12   : > { %s185_s28 = scalar_select %p184_p7, %s2475_s23, 99 }
  0x13   : > { %s2095_s24 = sshll.u32 (%p2465_p4), %s2453_s15, 8 }
  0x14   : > { %725 = vmatpush1.bf16.msra.mxu0 %v2221_v3  ;;  %2116 = vmatpush1.bf16.msra.mxu1 %v2221_v3  ;;  %s2030_s4 = sshll.u32 %s185_s28, 3  ;;  %s2830_s27 = scalar_lea.vmem (%p2465_p4), %s3025_s3, %s2095_s24  }
  0x15   : > { %726 = vmatprep.subr.bf16.mxu0 %v2419_v1  ;;  %2101 = vmatprep.subr.bf16.mxu1 %v2419_v1  ;;  %s2500_s9 = scalar_lea.vmem %s3022_s0, %s2030_s4 }
  0x16   : > { %v2237_v6 = vld [vmem:[%s2500_s9 + $0x4] ss:$8 sps:$4 sm:$0xff]   ;;  %v2235_v19 = vld [vmem:[%s2500_s9] ss:$8 sps:$4 sm:$0xff]   ;;  %v2241_v21 = vld [vmem:[%s2500_s9 + $0x14] ss:$8 sps:$4 sm:$0xff]  }
  0x17   : > { %v2240_v8 = vld [vmem:[%s2500_s9 + $0x104] ss:$8 sps:$4 sm:$0xff]   ;;  %752 = vmatprep.mubr.bf16.mxu0 %v2237_v6  ;;  %v2238_v20 = vld [vmem:[%s2500_s9 + $0x100] ss:$8 sps:$4 sm:$0xff]   ;;  %v2243_v22 = vld [vmem:[%s2500_s9 + $0x114] ss:$8 sps:$4 sm:$0xff]  }
  0x18   : > { %727 = vmatpush1.bf16.msra.mxu0 %v2222_v4  ;;  %2117 = vmatpush1.bf16.msra.mxu1 %v2222_v4  ;;  %v2245_v23 = vld [vmem:[%s2500_s9 + $0x10] ss:$8 sps:$4 sm:$0xff]   ;;  %v2247_v25 = vld [vmem:[%s2500_s9 + $0x24] ss:$8 sps:$4 sm:$0xff]   ;;  %v2251_v27 = vld [vmem:[%s2500_s9 + $0x20] ss:$8 sps:$4 sm:$0xff]  }
  0x19   : > { %728 = vmatprep.subr.bf16.mxu0 %v2419_v1  ;;  %2102 = vmatprep.subr.bf16.mxu1 %v2419_v1  ;;  %v2246_v24 = vld [vmem:[%s2500_s9 + $0x110] ss:$8 sps:$4 sm:$0xff]   ;;  %v2249_v26 = vld [vmem:[%s2500_s9 + $0x124] ss:$8 sps:$4 sm:$0xff]   ;;  %v2252_v28 = vld [vmem:[%s2500_s9 + $0x120] ss:$8 sps:$4 sm:$0xff]  }
  0x1a   : > { %880 = vmatprep.mubr.bf16.mxu1 %v2240_v8  ;;  %v2253_v29 = vld [vmem:[%s2500_s9 + $0x34] ss:$8 sps:$4 sm:$0xff]   ;;  %v2257_v31 = vld [vmem:[%s2500_s9 + $0x30] ss:$8 sps:$4 sm:$0xff]   ;;  %v2259_v33 = vld [vmem:[%s2500_s9 + $0x44] ss:$8 sps:$4 sm:$0xff]  }
  0x1b   : > { %v2255_v30 = vld [vmem:[%s2500_s9 + $0x134] ss:$8 sps:$4 sm:$0xff]   ;;  %v2258_v32 = vld [vmem:[%s2500_s9 + $0x130] ss:$8 sps:$4 sm:$0xff]   ;;  %v2261_v34 = vld [vmem:[%s2500_s9 + $0x144] ss:$8 sps:$4 sm:$0xff]  }
  0x1c   : > { %729 = vmatpush1.bf16.msra.mxu0 %v2223_v5  ;;  %2118 = vmatpush1.bf16.msra.mxu1 %v2223_v5  ;;  %v2263_v35 = vld [vmem:[%s2500_s9 + $0x40] ss:$8 sps:$4 sm:$0xff]   ;;  %v2265_v37 = vld [vmem:[%s2500_s9 + $0x54] ss:$8 sps:$4 sm:$0xff]   ;;  %v2269_v39 = vld [vmem:[%s2500_s9 + $0x50] ss:$8 sps:$4 sm:$0xff]  }
  0x1d   : > { %730 = vmatprep.subr.bf16.mxu0 %v2419_v1  ;;  %2103 = vmatprep.subr.bf16.mxu1 %v2419_v1  ;;  %v2264_v36 = vld [vmem:[%s2500_s9 + $0x140] ss:$8 sps:$4 sm:$0xff]   ;;  %v2267_v38 = vld [vmem:[%s2500_s9 + $0x154] ss:$8 sps:$4 sm:$0xff]   ;;  %v2270_v40 = vld [vmem:[%s2500_s9 + $0x150] ss:$8 sps:$4 sm:$0xff]  }
  0x1e   : > { %v2271_v41 = vld [vmem:[%s2500_s9 + $0x64] ss:$8 sps:$4 sm:$0xff]   ;;  %v2275_v43 = vld [vmem:[%s2500_s9 + $0x60] ss:$8 sps:$4 sm:$0xff]   ;;  %v2277_v45 = vld [vmem:[%s2500_s9 + $0x74] ss:$8 sps:$4 sm:$0xff]  }
  0x1f   : > { %v2273_v42 = vld [vmem:[%s2500_s9 + $0x164] ss:$8 sps:$4 sm:$0xff]   ;;  %v2276_v44 = vld [vmem:[%s2500_s9 + $0x160] ss:$8 sps:$4 sm:$0xff]   ;;  %v2279_v46 = vld [vmem:[%s2500_s9 + $0x174] ss:$8 sps:$4 sm:$0xff]  }
  0x20   : > { %731 = vmatpush1.bf16.msra.mxu0 %v2224_v7  ;;  %2119 = vmatpush1.bf16.msra.mxu1 %v2224_v7  ;;  %v2281_v47 = vld [vmem:[%s2500_s9 + $0x70] ss:$8 sps:$4 sm:$0xff]   ;;  %v2283_v49 = vld [vmem:[%s2500_s9 + $0x84] ss:$8 sps:$4 sm:$0xff]   ;;  %v2287_v51 = vld [vmem:[%s2500_s9 + $0x80] ss:$8 sps:$4 sm:$0xff]  }
  0x21   : > { %732 = vmatprep.subr.bf16.mxu0 %v2419_v1  ;;  %2104 = vmatprep.subr.bf16.mxu1 %v2419_v1  ;;  %v2282_v48 = vld [vmem:[%s2500_s9 + $0x170] ss:$8 sps:$4 sm:$0xff]   ;;  %v2285_v50 = vld [vmem:[%s2500_s9 + $0x184] ss:$8 sps:$4 sm:$0xff]   ;;  %v2288_v52 = vld [vmem:[%s2500_s9 + $0x180] ss:$8 sps:$4 sm:$0xff]  }
  0x22   : > { %v2289_v53 = vld [vmem:[%s2500_s9 + $0x94] ss:$8 sps:$4 sm:$0xff]   ;;  %v2293_v55 = vld [vmem:[%s2500_s9 + $0x90] ss:$8 sps:$4 sm:$0xff]   ;;  %v2295_v57 = vld [vmem:[%s2500_s9 + $0xa4] ss:$8 sps:$4 sm:$0xff]  }
  0x23   : > { %v2291_v54 = vld [vmem:[%s2500_s9 + $0x194] ss:$8 sps:$4 sm:$0xff]   ;;  %v2294_v56 = vld [vmem:[%s2500_s9 + $0x190] ss:$8 sps:$4 sm:$0xff]   ;;  %v2297_v58 = vld [vmem:[%s2500_s9 + $0x1a4] ss:$8 sps:$4 sm:$0xff]  }
  0x24   : > { %733 = vmatpush1.bf16.msra.mxu0 %v2225_v9  ;;  %2120 = vmatpush1.bf16.msra.mxu1 %v2225_v9  ;;  %v2299_v59 = vld [vmem:[%s2500_s9 + $0xa0] ss:$8 sps:$4 sm:$0xff]   ;;  %v2301_v61 = vld [vmem:[%s2500_s9 + $0xb4] ss:$8 sps:$4 sm:$0xff]   ;;  %v2305_v63 = vld [vmem:[%s2500_s9 + $0xb0] ss:$8 sps:$4 sm:$0xff]  }
  0x25   : > { %734 = vmatprep.subr.bf16.mxu0 %v2419_v1  ;;  %2105 = vmatprep.subr.bf16.mxu1 %v2419_v1  ;;  %v2300_v60 = vld [vmem:[%s2500_s9 + $0x1a0] ss:$8 sps:$4 sm:$0xff]   ;;  %v2303_v62 = vld [vmem:[%s2500_s9 + $0x1b4] ss:$8 sps:$4 sm:$0xff]   ;;  %v2306_v0 = vld [vmem:[%s2500_s9 + $0x1b0] ss:$8 sps:$4 sm:$0xff]  }
  0x26   : > { %v2309_v2 = vld [vmem:[%s2500_s9 + $0x1c4] ss:$8 sps:$4 sm:$0xff]   ;;  %v2311_v3 = vld [vmem:[%s2500_s9 + $0xc0] ss:$8 sps:$4 sm:$0xff]   ;;  %v2313_v5 = vld [vmem:[%s2500_s9 + $0xd4] ss:$8 sps:$4 sm:$0xff]  }
  0x27   : > { %v2312_v4 = vld [vmem:[%s2500_s9 + $0x1c0] ss:$8 sps:$4 sm:$0xff]   ;;  %v2315_v6 = vld [vmem:[%s2500_s9 + $0x1d4] ss:$8 sps:$4 sm:$0xff]   ;;  %v2317_v7 = vld [vmem:[%s2500_s9 + $0xd0] ss:$8 sps:$4 sm:$0xff]  }
  0x28   : > { %735 = vmatpush1.bf16.msra.mxu0 %v2226_v10  ;;  %2121 = vmatpush1.bf16.msra.mxu1 %v2226_v10  ;;  %v2318_v8 = vld [vmem:[%s2500_s9 + $0x1d0] ss:$8 sps:$4 sm:$0xff]   ;;  %v2319_v9 = vld [vmem:[%s2500_s9 + $0xe4] ss:$8 sps:$4 sm:$0xff]  }
  0x29   : > { %736 = vmatprep.subr.bf16.mxu0 %v2419_v1  ;;  %2106 = vmatprep.subr.bf16.mxu1 %v2419_v1  ;;  %v2321_v10 = vld [vmem:[%s2500_s9 + $0x1e4] ss:$8 sps:$4 sm:$0xff]  }
  0x2c   : > { %737 = vmatpush1.bf16.msra.mxu0 %v2227_v11  ;;  %2122 = vmatpush1.bf16.msra.mxu1 %v2227_v11  ;;  %v2323_v11 = vld [vmem:[%s2500_s9 + $0xe0] ss:$8 sps:$4 sm:$0xff]  }
  0x2d   : > { %738 = vmatprep.subr.bf16.mxu0 %v2419_v1  ;;  %2107 = vmatprep.subr.bf16.mxu1 %v2419_v1 }
  0x30   : > { %739 = vmatpush1.bf16.msra.mxu0 %v2228_v12  ;;  %2123 = vmatpush1.bf16.msra.mxu1 %v2228_v12  ;;  %v2324_v12 = vld [vmem:[%s2500_s9 + $0x1e0] ss:$8 sps:$4 sm:$0xff]  }
  0x31   : > { %740 = vmatprep.subr.bf16.mxu0 %v2419_v1  ;;  %2108 = vmatprep.subr.bf16.mxu1 %v2419_v1 }
  0x34   : > { %741 = vmatpush1.bf16.msra.mxu0 %v2229_v13  ;;  %2124 = vmatpush1.bf16.msra.mxu1 %v2229_v13  ;;  %v2325_v13 = vld [vmem:[%s2500_s9 + $0xf4] ss:$8 sps:$4 sm:$0xff]  }
  0x35   : > { %742 = vmatprep.subr.bf16.mxu0 %v2419_v1  ;;  %2109 = vmatprep.subr.bf16.mxu1 %v2419_v1 }
  0x38   : > { %743 = vmatpush1.bf16.msra.mxu0 %v2230_v14  ;;  %2125 = vmatpush1.bf16.msra.mxu1 %v2230_v14  ;;  %v2327_v14 = vld [vmem:[%s2500_s9 + $0x1f4] ss:$8 sps:$4 sm:$0xff]  }
  0x39   : > { %744 = vmatprep.subr.bf16.mxu0 %v2419_v1  ;;  %2110 = vmatprep.subr.bf16.mxu1 %v2419_v1 }
  0x3c   : > { %745 = vmatpush1.bf16.msra.mxu0 %v2231_v15  ;;  %2126 = vmatpush1.bf16.msra.mxu1 %v2231_v15  ;;  %v2329_v15 = vld [vmem:[%s2500_s9 + $0xf0] ss:$8 sps:$4 sm:$0xff]  }
  0x3d   : > { %746 = vmatprep.subr.bf16.mxu0 %v2419_v1  ;;  %2111 = vmatprep.subr.bf16.mxu1 %v2419_v1 }
  0x40   : > { %747 = vmatpush1.bf16.msra.mxu0 %v2232_v16  ;;  %2127 = vmatpush1.bf16.msra.mxu1 %v2232_v16  ;;  %v2330_v16 = vld [vmem:[%s2500_s9 + $0x1f0] ss:$8 sps:$4 sm:$0xff]  }
  0x41   : > { %748 = vmatprep.subr.bf16.mxu0 %v2419_v1  ;;  %2112 = vmatprep.subr.bf16.mxu1 %v2419_v1 }
  0x44   : > { %749 = vmatpush1.bf16.msra.mxu0 %v2233_v17  ;;  %2128 = vmatpush1.bf16.msra.mxu1 %v2233_v17  ;;  %v2627_v17 = vld [vmem:[%s3024_s2] ss:$0 sm:$0xff] }
  0x45   : > { %750 = vmatprep.subr.bf16.mxu0 %v2419_v1  ;;  %2113 = vmatprep.subr.bf16.mxu1 %v2419_v1  ;;  %v2307_v1 = vld [vmem:[%s2500_s9 + $0xc4] ss:$8 sps:$4 sm:$0xff]   ;;  %s1402_s9 = ssub.s32 (%p2465_p4), 100, %s2475_s23 }
  0x46   : > { %p1403_p8 = scmp.lt.s32.totalorder (%p2465_p4), %s1402_s9, 64 }
  0x48   : > { %751 = vmatpush1.bf16.msra.mxu0 %v2234_v18  ;;  %2129 = vmatpush1.bf16.msra.mxu1 %v2234_v18 }
  0x4b   : > { %753 = vmatmul.mubr.bf16.vlgmr.msra.gmra.mrb[0].mxu0 %v2235_v19  ;;  %881 = vmatmul.mubr.bf16.vlgmr.msra.gmra.mrb[0].mxu1 %v2238_v20 }
  0x4c   : > { %760 = vmatprep.mubr.bf16.mxu0 %v2241_v21  ;;  %888 = vmatprep.mubr.bf16.mxu1 %v2243_v22 }
  0x53   : > { %761 = vmatmul.mubr.bf16.gmra.mrb[4].mxu0 %v2245_v23  ;;  %889 = vmatmul.mubr.bf16.gmra.mrb[4].mxu1 %v2246_v24 }
  0x54   : > { %768 = vmatprep.mubr.bf16.mxu0 %v2247_v25  ;;  %896 = vmatprep.mubr.bf16.mxu1 %v2249_v26 }
  0x5b   : > { %769 = vmatmul.mubr.bf16.gmra.mrb[8].mxu0 %v2251_v27  ;;  %897 = vmatmul.mubr.bf16.gmra.mrb[8].mxu1 %v2252_v28 }
  0x5c   : > { %776 = vmatprep.mubr.bf16.mxu0 %v2253_v29  ;;  %904 = vmatprep.mubr.bf16.mxu1 %v2255_v30 }
  0x63   : > { %777 = vmatmul.mubr.bf16.gmra.mrb[12].mxu0 %v2257_v31  ;;  %905 = vmatmul.mubr.bf16.gmra.mrb[12].mxu1 %v2258_v32 }
  0x64   : > { %784 = vmatprep.mubr.bf16.mxu0 %v2259_v33  ;;  %912 = vmatprep.mubr.bf16.mxu1 %v2261_v34 }
  0x6b   : > { %785 = vmatmul.mubr.bf16.gmra.mrb[16].mxu0 %v2263_v35  ;;  %913 = vmatmul.mubr.bf16.gmra.mrb[16].mxu1 %v2264_v36 }
  0x6c   : > { %792 = vmatprep.mubr.bf16.mxu0 %v2265_v37  ;;  %920 = vmatprep.mubr.bf16.mxu1 %v2267_v38 }
  0x73   : > { %793 = vmatmul.mubr.bf16.gmra.mrb[20].mxu0 %v2269_v39  ;;  %921 = vmatmul.mubr.bf16.gmra.mrb[20].mxu1 %v2270_v40 }
  0x74   : > { %800 = vmatprep.mubr.bf16.mxu0 %v2271_v41  ;;  %928 = vmatprep.mubr.bf16.mxu1 %v2273_v42 }
  0x7b   : > { %801 = vmatmul.mubr.bf16.gmra.mrb[24].mxu0 %v2275_v43  ;;  %929 = vmatmul.mubr.bf16.gmra.mrb[24].mxu1 %v2276_v44 }
  0x7c   : > { %808 = vmatprep.mubr.bf16.mxu0 %v2277_v45  ;;  %936 = vmatprep.mubr.bf16.mxu1 %v2279_v46 }
  0x83   : > { %809 = vmatmul.mubr.bf16.gmra.mrb[28].mxu0 %v2281_v47  ;;  %937 = vmatmul.mubr.bf16.gmra.mrb[28].mxu1 %v2282_v48 }
  0x84   : > { %816 = vmatprep.mubr.bf16.mxu0 %v2283_v49  ;;  %944 = vmatprep.mubr.bf16.mxu1 %v2285_v50 }
  0x8b   : > { %817 = vmatmul.mubr.bf16.gmra.mrb[32].mxu0 %v2287_v51  ;;  %945 = vmatmul.mubr.bf16.gmra.mrb[32].mxu1 %v2288_v52 }
  0x8c   : > { %824 = vmatprep.mubr.bf16.mxu0 %v2289_v53  ;;  %952 = vmatprep.mubr.bf16.mxu1 %v2291_v54 }
  0x93   : > { %825 = vmatmul.mubr.bf16.gmra.mrb[36].mxu0 %v2293_v55  ;;  %953 = vmatmul.mubr.bf16.gmra.mrb[36].mxu1 %v2294_v56 }
  0x94   : > { %832 = vmatprep.mubr.bf16.mxu0 %v2295_v57  ;;  %960 = vmatprep.mubr.bf16.mxu1 %v2297_v58 }
  0x9b   : > { %833 = vmatmul.mubr.bf16.gmra.mrb[40].mxu0 %v2299_v59  ;;  %961 = vmatmul.mubr.bf16.gmra.mrb[40].mxu1 %v2300_v60 }
  0x9c   : > { %840 = vmatprep.mubr.bf16.mxu0 %v2301_v61  ;;  %968 = vmatprep.mubr.bf16.mxu1 %v2303_v62 }
  0xa3   : > { %841 = vmatmul.mubr.bf16.gmra.mrb[44].mxu0 %v2305_v63  ;;  %969 = vmatmul.mubr.bf16.gmra.mrb[44].mxu1 %v2306_v0 }
  0xa4   : > { %848 = vmatprep.mubr.bf16.mxu0 %v2307_v1  ;;  %976 = vmatprep.mubr.bf16.mxu1 %v2309_v2 }
  0xab   : > { %849 = vmatmul.mubr.bf16.gmra.mrb[48].mxu0 %v2311_v3  ;;  %977 = vmatmul.mubr.bf16.gmra.mrb[48].mxu1 %v2312_v4 }
  0xac   : > { %856 = vmatprep.mubr.bf16.mxu0 %v2313_v5  ;;  %984 = vmatprep.mubr.bf16.mxu1 %v2315_v6 }
  0xb3   : > { %857 = vmatmul.mubr.bf16.gmra.mrb[52].mxu0 %v2317_v7  ;;  %985 = vmatmul.mubr.bf16.gmra.mrb[52].mxu1 %v2318_v8 }
  0xb4   : > { %864 = vmatprep.mubr.bf16.mxu0 %v2319_v9  ;;  %992 = vmatprep.mubr.bf16.mxu1 %v2321_v10 }
  0xbb   : > { %865 = vmatmul.mubr.bf16.gmra.mrb[56].mxu0 %v2323_v11  ;;  %993 = vmatmul.mubr.bf16.gmra.mrb[56].mxu1 %v2324_v12 }
  0xbc   : > { %872 = vmatprep.mubr.bf16.mxu0 %v2325_v13  ;;  %1000 = vmatprep.mubr.bf16.mxu1 %v2327_v14 }
  0xc3   : > { %873 = vmatmul.mubr.bf16.gmra.mrb[60].mxu0 %v2329_v15  ;;  %1001 = vmatmul.mubr.bf16.gmra.mrb[60].mxu1 %v2330_v16 }
 0x11e   : > { %v754_v18 = vpop.f32.mrb[0].mxu0  ;;  %v882_v19 = vpop.f32.mrb[0].mxu1 }
 0x11f   : > { %v755_v20 = vadd.f32 %v2627_v17, %v754_v18  ;;  %v883_v21 = vadd.f32 %v2627_v17, %v882_v19  ;;  %v756_v22 = vpop.f32.mrb[1].mxu0  ;;  %v884_v23 = vpop.f32.mrb[1].mxu1 }
 0x120   : > { %v757_v24 = vpop.f32.mrb[2].mxu0  ;;  %v885_v25 = vpop.f32.mrb[2].mxu1 }
 0x121   : > { %v1009_v26 = vmax.f32 %v755_v20, 0.0  ;;  %v1041_v27 = vmax.f32 %v883_v21, 0.0  ;;  %v758_v28 = vadd.f32 %v2627_v17, %v757_v24  ;;  %v886_v29 = vadd.f32 %v2627_v17, %v885_v25  ;;  %v759_v30 = vpop.f32.mrb[3].mxu0  ;;  %v887_v31 = vpop.f32.mrb[3].mxu1 }
 0x123   : > { %v2031_v32 = vpack.c.bf16 %v1009_v26, %v1009_v26  ;;  %v2063_v33 = vpack.c.bf16 %v1041_v27, %v1041_v27  ;;  %v1010_v34 = vmax.f32 %v758_v28, 0.0  ;;  %v1042_v35 = vmax.f32 %v886_v29, 0.0 }
 0x125   : > { %1330 = vst.msk [vmem:[%s2633_s12] sm:$0xf] %vm1329_vm0, %v2031_v32  ;;  %1362 = vst.msk [vmem:[%s2633_s12 + $0x80] sm:$0xf] %vm1329_vm0, %v2063_v33  ;;  %v2032_v36 = vpack.c.bf16 %v1010_v34, %v1010_v34  ;;  %v2064_v37 = vpack.c.bf16 %v1042_v35, %v1042_v35 }
 0x126   : > { %v762_v38 = vpop.f32.mrb[4].mxu0  ;;  %v890_v39 = vpop.f32.mrb[4].mxu1 }
 0x127   : > { %1331 = vst.msk [vmem:[%s2633_s12 + $0x4] sm:$0xf] %vm1329_vm0, %v2032_v36  ;;  %1363 = vst.msk [vmem:[%s2633_s12 + $0x84] sm:$0xf] %vm1329_vm0, %v2064_v37  ;;  %v763_v40 = vadd.f32 %v2627_v17, %v762_v38  ;;  %v891_v41 = vadd.f32 %v2627_v17, %v890_v39  ;;  %v764_v42 = vpop.f32.mrb[5].mxu0  ;;  %v892_v43 = vpop.f32.mrb[5].mxu1 }
 0x128   : > { %v765_v44 = vpop.f32.mrb[6].mxu0  ;;  %v893_v45 = vpop.f32.mrb[6].mxu1 }
 0x129   : > { %v1011_v46 = vmax.f32 %v763_v40, 0.0  ;;  %v1043_v47 = vmax.f32 %v891_v41, 0.0  ;;  %v766_v48 = vadd.f32 %v2627_v17, %v765_v44  ;;  %v894_v49 = vadd.f32 %v2627_v17, %v893_v45  ;;  %v767_v50 = vpop.f32.mrb[7].mxu0  ;;  %v895_v51 = vpop.f32.mrb[7].mxu1 }
 0x12b   : > { %v2033_v52 = vpack.c.bf16 %v1011_v46, %v1011_v46  ;;  %v2065_v53 = vpack.c.bf16 %v1043_v47, %v1043_v47  ;;  %v1012_v54 = vmax.f32 %v766_v48, 0.0  ;;  %v1044_v55 = vmax.f32 %v894_v49, 0.0 }
 0x12d   : > { %1332 = vst.msk [vmem:[%s2633_s12 + $0x8] sm:$0xf] %vm1329_vm0, %v2033_v52  ;;  %1364 = vst.msk [vmem:[%s2633_s12 + $0x88] sm:$0xf] %vm1329_vm0, %v2065_v53  ;;  %v2034_v56 = vpack.c.bf16 %v1012_v54, %v1012_v54  ;;  %v2066_v57 = vpack.c.bf16 %v1044_v55, %v1044_v55 }
 0x12e   : > { %v770_v58 = vpop.f32.mrb[8].mxu0  ;;  %v898_v59 = vpop.f32.mrb[8].mxu1 }
 0x12f   : > { %1333 = vst.msk [vmem:[%s2633_s12 + $0xc] sm:$0xf] %vm1329_vm0, %v2034_v56  ;;  %1365 = vst.msk [vmem:[%s2633_s12 + $0x8c] sm:$0xf] %vm1329_vm0, %v2066_v57  ;;  %v771_v60 = vadd.f32 %v2627_v17, %v770_v58  ;;  %v899_v61 = vadd.f32 %v2627_v17, %v898_v59  ;;  %v772_v62 = vpop.f32.mrb[9].mxu0  ;;  %v900_v63 = vpop.f32.mrb[9].mxu1 }
 0x130   : > { %v773_v0 = vpop.f32.mrb[10].mxu0  ;;  %v901_v1 = vpop.f32.mrb[10].mxu1 }
 0x131   : > { %v1013_v2 = vmax.f32 %v771_v60, 0.0  ;;  %v1045_v3 = vmax.f32 %v899_v61, 0.0  ;;  %v774_v4 = vadd.f32 %v2627_v17, %v773_v0  ;;  %v902_v5 = vadd.f32 %v2627_v17, %v901_v1  ;;  %v775_v6 = vpop.f32.mrb[11].mxu0  ;;  %v903_v7 = vpop.f32.mrb[11].mxu1 }
 0x133   : > { %v2035_v8 = vpack.c.bf16 %v1013_v2, %v1013_v2  ;;  %v2067_v9 = vpack.c.bf16 %v1045_v3, %v1045_v3  ;;  %v1014_v10 = vmax.f32 %v774_v4, 0.0  ;;  %v1046_v11 = vmax.f32 %v902_v5, 0.0 }
 0x135   : > { %1334 = vst.msk [vmem:[%s2633_s12 + $0x10] sm:$0xf] %vm1329_vm0, %v2035_v8  ;;  %1366 = vst.msk [vmem:[%s2633_s12 + $0x90] sm:$0xf] %vm1329_vm0, %v2067_v9  ;;  %v2036_v12 = vpack.c.bf16 %v1014_v10, %v1014_v10  ;;  %v2068_v13 = vpack.c.bf16 %v1046_v11, %v1046_v11 }
 0x136   : > { %v778_v14 = vpop.f32.mrb[12].mxu0  ;;  %v906_v15 = vpop.f32.mrb[12].mxu1 }
 0x137   : > { %1335 = vst.msk [vmem:[%s2633_s12 + $0x14] sm:$0xf] %vm1329_vm0, %v2036_v12  ;;  %1367 = vst.msk [vmem:[%s2633_s12 + $0x94] sm:$0xf] %vm1329_vm0, %v2068_v13  ;;  %v779_v16 = vadd.f32 %v2627_v17, %v778_v14  ;;  %v907_v18 = vadd.f32 %v2627_v17, %v906_v15  ;;  %v780_v19 = vpop.f32.mrb[13].mxu0  ;;  %v908_v20 = vpop.f32.mrb[13].mxu1 }
 0x138   : > { %v781_v21 = vpop.f32.mrb[14].mxu0  ;;  %v909_v22 = vpop.f32.mrb[14].mxu1 }
 0x139   : > { %v1015_v23 = vmax.f32 %v779_v16, 0.0  ;;  %v1047_v24 = vmax.f32 %v907_v18, 0.0  ;;  %v782_v25 = vadd.f32 %v2627_v17, %v781_v21  ;;  %v910_v26 = vadd.f32 %v2627_v17, %v909_v22  ;;  %v783_v27 = vpop.f32.mrb[15].mxu0  ;;  %v911_v28 = vpop.f32.mrb[15].mxu1 }
 0x13b   : > { %v2037_v29 = vpack.c.bf16 %v1015_v23, %v1015_v23  ;;  %v2069_v30 = vpack.c.bf16 %v1047_v24, %v1047_v24  ;;  %v1016_v31 = vmax.f32 %v782_v25, 0.0  ;;  %v1048_v32 = vmax.f32 %v910_v26, 0.0 }
 0x13d   : > { %1336 = vst.msk [vmem:[%s2633_s12 + $0x18] sm:$0xf] %vm1329_vm0, %v2037_v29  ;;  %1368 = vst.msk [vmem:[%s2633_s12 + $0x98] sm:$0xf] %vm1329_vm0, %v2069_v30  ;;  %v2038_v33 = vpack.c.bf16 %v1016_v31, %v1016_v31  ;;  %v2070_v34 = vpack.c.bf16 %v1048_v32, %v1048_v32 }
 0x13e   : > { %v786_v35 = vpop.f32.mrb[16].mxu0  ;;  %v914_v36 = vpop.f32.mrb[16].mxu1 }
 0x13f   : > { %1337 = vst.msk [vmem:[%s2633_s12 + $0x1c] sm:$0xf] %vm1329_vm0, %v2038_v33  ;;  %1369 = vst.msk [vmem:[%s2633_s12 + $0x9c] sm:$0xf] %vm1329_vm0, %v2070_v34  ;;  %v787_v37 = vadd.f32 %v2627_v17, %v786_v35  ;;  %v915_v38 = vadd.f32 %v2627_v17, %v914_v36  ;;  %v788_v39 = vpop.f32.mrb[17].mxu0  ;;  %v916_v40 = vpop.f32.mrb[17].mxu1 }
 0x140   : > { %v789_v41 = vpop.f32.mrb[18].mxu0  ;;  %v917_v42 = vpop.f32.mrb[18].mxu1 }
 0x141   : > { %v1017_v43 = vmax.f32 %v787_v37, 0.0  ;;  %v1049_v44 = vmax.f32 %v915_v38, 0.0  ;;  %v790_v45 = vadd.f32 %v2627_v17, %v789_v41  ;;  %v918_v46 = vadd.f32 %v2627_v17, %v917_v42  ;;  %v791_v47 = vpop.f32.mrb[19].mxu0  ;;  %v919_v48 = vpop.f32.mrb[19].mxu1 }
 0x143   : > { %v2039_v49 = vpack.c.bf16 %v1017_v43, %v1017_v43  ;;  %v2071_v50 = vpack.c.bf16 %v1049_v44, %v1049_v44  ;;  %v1018_v51 = vmax.f32 %v790_v45, 0.0  ;;  %v1050_v52 = vmax.f32 %v918_v46, 0.0 }
 0x145   : > { %1338 = vst.msk [vmem:[%s2633_s12 + $0x20] sm:$0xf] %vm1329_vm0, %v2039_v49  ;;  %1370 = vst.msk [vmem:[%s2633_s12 + $0xa0] sm:$0xf] %vm1329_vm0, %v2071_v50  ;;  %v2040_v53 = vpack.c.bf16 %v1018_v51, %v1018_v51  ;;  %v2072_v54 = vpack.c.bf16 %v1050_v52, %v1050_v52 }
 0x146   : > { %v794_v55 = vpop.f32.mrb[20].mxu0  ;;  %v922_v56 = vpop.f32.mrb[20].mxu1 }
 0x147   : > { %1339 = vst.msk [vmem:[%s2633_s12 + $0x24] sm:$0xf] %vm1329_vm0, %v2040_v53  ;;  %1371 = vst.msk [vmem:[%s2633_s12 + $0xa4] sm:$0xf] %vm1329_vm0, %v2072_v54  ;;  %v795_v57 = vadd.f32 %v2627_v17, %v794_v55  ;;  %v923_v58 = vadd.f32 %v2627_v17, %v922_v56  ;;  %v796_v59 = vpop.f32.mrb[21].mxu0  ;;  %v924_v60 = vpop.f32.mrb[21].mxu1 }
 0x148   : > { %v797_v61 = vpop.f32.mrb[22].mxu0  ;;  %v925_v62 = vpop.f32.mrb[22].mxu1 }
 0x149   : > { %v1019_v63 = vmax.f32 %v795_v57, 0.0  ;;  %v1051_v0 = vmax.f32 %v923_v58, 0.0  ;;  %v798_v1 = vadd.f32 %v2627_v17, %v797_v61  ;;  %v926_v2 = vadd.f32 %v2627_v17, %v925_v62  ;;  %v799_v3 = vpop.f32.mrb[23].mxu0  ;;  %v927_v4 = vpop.f32.mrb[23].mxu1 }
 0x14b   : > { %v2041_v5 = vpack.c.bf16 %v1019_v63, %v1019_v63  ;;  %v2073_v6 = vpack.c.bf16 %v1051_v0, %v1051_v0  ;;  %v1020_v7 = vmax.f32 %v798_v1, 0.0  ;;  %v1052_v8 = vmax.f32 %v926_v2, 0.0 }
 0x14d   : > { %1340 = vst.msk [vmem:[%s2633_s12 + $0x28] sm:$0xf] %vm1329_vm0, %v2041_v5  ;;  %1372 = vst.msk [vmem:[%s2633_s12 + $0xa8] sm:$0xf] %vm1329_vm0, %v2073_v6  ;;  %v2042_v9 = vpack.c.bf16 %v1020_v7, %v1020_v7  ;;  %v2074_v10 = vpack.c.bf16 %v1052_v8, %v1052_v8 }
 0x14e   : > { %v802_v11 = vpop.f32.mrb[24].mxu0  ;;  %v930_v12 = vpop.f32.mrb[24].mxu1 }
 0x14f   : > { %1341 = vst.msk [vmem:[%s2633_s12 + $0x2c] sm:$0xf] %vm1329_vm0, %v2042_v9  ;;  %1373 = vst.msk [vmem:[%s2633_s12 + $0xac] sm:$0xf] %vm1329_vm0, %v2074_v10  ;;  %v803_v13 = vadd.f32 %v2627_v17, %v802_v11  ;;  %v931_v14 = vadd.f32 %v2627_v17, %v930_v12  ;;  %v804_v15 = vpop.f32.mrb[25].mxu0  ;;  %v932_v16 = vpop.f32.mrb[25].mxu1 }
 0x150   : > { %v805_v18 = vpop.f32.mrb[26].mxu0  ;;  %v933_v19 = vpop.f32.mrb[26].mxu1 }
 0x151   : > { %v1021_v20 = vmax.f32 %v803_v13, 0.0  ;;  %v1053_v21 = vmax.f32 %v931_v14, 0.0  ;;  %v806_v22 = vadd.f32 %v2627_v17, %v805_v18  ;;  %v934_v23 = vadd.f32 %v2627_v17, %v933_v19  ;;  %v807_v24 = vpop.f32.mrb[27].mxu0  ;;  %v935_v25 = vpop.f32.mrb[27].mxu1 }
 0x153   : > { %v2043_v26 = vpack.c.bf16 %v1021_v20, %v1021_v20  ;;  %v2075_v27 = vpack.c.bf16 %v1053_v21, %v1053_v21  ;;  %v1022_v28 = vmax.f32 %v806_v22, 0.0  ;;  %v1054_v29 = vmax.f32 %v934_v23, 0.0 }
 0x155   : > { %1342 = vst.msk [vmem:[%s2633_s12 + $0x30] sm:$0xf] %vm1329_vm0, %v2043_v26  ;;  %1374 = vst.msk [vmem:[%s2633_s12 + $0xb0] sm:$0xf] %vm1329_vm0, %v2075_v27  ;;  %v2044_v30 = vpack.c.bf16 %v1022_v28, %v1022_v28  ;;  %v2076_v31 = vpack.c.bf16 %v1054_v29, %v1054_v29 }
 0x156   : > { %v810_v32 = vpop.f32.mrb[28].mxu0  ;;  %v938_v33 = vpop.f32.mrb[28].mxu1 }
 0x157   : > { %1343 = vst.msk [vmem:[%s2633_s12 + $0x34] sm:$0xf] %vm1329_vm0, %v2044_v30  ;;  %1375 = vst.msk [vmem:[%s2633_s12 + $0xb4] sm:$0xf] %vm1329_vm0, %v2076_v31  ;;  %v811_v34 = vadd.f32 %v2627_v17, %v810_v32  ;;  %v939_v35 = vadd.f32 %v2627_v17, %v938_v33  ;;  %v812_v36 = vpop.f32.mrb[29].mxu0  ;;  %v940_v37 = vpop.f32.mrb[29].mxu1 }
 0x158   : > { %v813_v38 = vpop.f32.mrb[30].mxu0  ;;  %v941_v39 = vpop.f32.mrb[30].mxu1 }
 0x159   : > { %v1023_v40 = vmax.f32 %v811_v34, 0.0  ;;  %v1055_v41 = vmax.f32 %v939_v35, 0.0  ;;  %v814_v42 = vadd.f32 %v2627_v17, %v813_v38  ;;  %v942_v43 = vadd.f32 %v2627_v17, %v941_v39  ;;  %v815_v44 = vpop.f32.mrb[31].mxu0  ;;  %v943_v45 = vpop.f32.mrb[31].mxu1 }
 0x15b   : > { %v2045_v46 = vpack.c.bf16 %v1023_v40, %v1023_v40  ;;  %v2077_v47 = vpack.c.bf16 %v1055_v41, %v1055_v41  ;;  %v1024_v48 = vmax.f32 %v814_v42, 0.0  ;;  %v1056_v49 = vmax.f32 %v942_v43, 0.0 }
 0x15d   : > { %1344 = vst.msk [vmem:[%s2633_s12 + $0x38] sm:$0xf] %vm1329_vm0, %v2045_v46  ;;  %1376 = vst.msk [vmem:[%s2633_s12 + $0xb8] sm:$0xf] %vm1329_vm0, %v2077_v47  ;;  %v2046_v50 = vpack.c.bf16 %v1024_v48, %v1024_v48  ;;  %v2078_v51 = vpack.c.bf16 %v1056_v49, %v1056_v49 }
 0x15e   : > { %v818_v52 = vpop.f32.mrb[32].mxu0  ;;  %v946_v53 = vpop.f32.mrb[32].mxu1 }
 0x15f   : > { %1345 = vst.msk [vmem:[%s2633_s12 + $0x3c] sm:$0xf] %vm1329_vm0, %v2046_v50  ;;  %1377 = vst.msk [vmem:[%s2633_s12 + $0xbc] sm:$0xf] %vm1329_vm0, %v2078_v51  ;;  %v819_v54 = vadd.f32 %v2627_v17, %v818_v52  ;;  %v947_v55 = vadd.f32 %v2627_v17, %v946_v53  ;;  %v820_v56 = vpop.f32.mrb[33].mxu0  ;;  %v948_v57 = vpop.f32.mrb[33].mxu1 }
 0x160   : > { %v821_v58 = vpop.f32.mrb[34].mxu0  ;;  %v949_v59 = vpop.f32.mrb[34].mxu1 }
 0x161   : > { %v1025_v60 = vmax.f32 %v819_v54, 0.0  ;;  %v1057_v61 = vmax.f32 %v947_v55, 0.0  ;;  %v822_v62 = vadd.f32 %v2627_v17, %v821_v58  ;;  %v950_v63 = vadd.f32 %v2627_v17, %v949_v59  ;;  %v823_v0 = vpop.f32.mrb[35].mxu0  ;;  %v951_v1 = vpop.f32.mrb[35].mxu1 }
 0x163   : > { %v2047_v2 = vpack.c.bf16 %v1025_v60, %v1025_v60  ;;  %v2079_v3 = vpack.c.bf16 %v1057_v61, %v1057_v61  ;;  %v1026_v4 = vmax.f32 %v822_v62, 0.0  ;;  %v1058_v5 = vmax.f32 %v950_v63, 0.0 }
 0x165   : > { %1346 = vst.msk [vmem:[%s2633_s12 + $0x40] sm:$0xf] %vm1329_vm0, %v2047_v2  ;;  %1378 = vst.msk [vmem:[%s2633_s12 + $0xc0] sm:$0xf] %vm1329_vm0, %v2079_v3  ;;  %v2048_v6 = vpack.c.bf16 %v1026_v4, %v1026_v4  ;;  %v2080_v7 = vpack.c.bf16 %v1058_v5, %v1058_v5 }
 0x166   : > { %v826_v8 = vpop.f32.mrb[36].mxu0  ;;  %v954_v9 = vpop.f32.mrb[36].mxu1 }
 0x167   : > { %1347 = vst.msk [vmem:[%s2633_s12 + $0x44] sm:$0xf] %vm1329_vm0, %v2048_v6  ;;  %1379 = vst.msk [vmem:[%s2633_s12 + $0xc4] sm:$0xf] %vm1329_vm0, %v2080_v7  ;;  %v827_v10 = vadd.f32 %v2627_v17, %v826_v8  ;;  %v955_v11 = vadd.f32 %v2627_v17, %v954_v9  ;;  %v828_v12 = vpop.f32.mrb[37].mxu0  ;;  %v956_v13 = vpop.f32.mrb[37].mxu1 }
 0x168   : > { %v829_v14 = vpop.f32.mrb[38].mxu0  ;;  %v957_v15 = vpop.f32.mrb[38].mxu1 }
 0x169   : > { %v1027_v16 = vmax.f32 %v827_v10, 0.0  ;;  %v1059_v18 = vmax.f32 %v955_v11, 0.0  ;;  %v830_v19 = vadd.f32 %v2627_v17, %v829_v14  ;;  %v958_v20 = vadd.f32 %v2627_v17, %v957_v15  ;;  %v831_v21 = vpop.f32.mrb[39].mxu0  ;;  %v959_v22 = vpop.f32.mrb[39].mxu1 }
 0x16b   : > { %v2049_v23 = vpack.c.bf16 %v1027_v16, %v1027_v16  ;;  %v2081_v24 = vpack.c.bf16 %v1059_v18, %v1059_v18  ;;  %v1028_v25 = vmax.f32 %v830_v19, 0.0  ;;  %v1060_v26 = vmax.f32 %v958_v20, 0.0 }
 0x16d   : > { %1348 = vst.msk [vmem:[%s2633_s12 + $0x48] sm:$0xf] %vm1329_vm0, %v2049_v23  ;;  %1380 = vst.msk [vmem:[%s2633_s12 + $0xc8] sm:$0xf] %vm1329_vm0, %v2081_v24  ;;  %v2050_v27 = vpack.c.bf16 %v1028_v25, %v1028_v25  ;;  %v2082_v28 = vpack.c.bf16 %v1060_v26, %v1060_v26 }
 0x16e   : > { %v834_v29 = vpop.f32.mrb[40].mxu0  ;;  %v962_v30 = vpop.f32.mrb[40].mxu1 }
 0x16f   : > { %1349 = vst.msk [vmem:[%s2633_s12 + $0x4c] sm:$0xf] %vm1329_vm0, %v2050_v27  ;;  %1381 = vst.msk [vmem:[%s2633_s12 + $0xcc] sm:$0xf] %vm1329_vm0, %v2082_v28  ;;  %v835_v31 = vadd.f32 %v2627_v17, %v834_v29  ;;  %v963_v32 = vadd.f32 %v2627_v17, %v962_v30  ;;  %v836_v33 = vpop.f32.mrb[41].mxu0  ;;  %v964_v34 = vpop.f32.mrb[41].mxu1 }
 0x170   : > { %v837_v35 = vpop.f32.mrb[42].mxu0  ;;  %v965_v36 = vpop.f32.mrb[42].mxu1 }
 0x171   : > { %v1029_v37 = vmax.f32 %v835_v31, 0.0  ;;  %v1061_v38 = vmax.f32 %v963_v32, 0.0  ;;  %v838_v39 = vadd.f32 %v2627_v17, %v837_v35  ;;  %v966_v40 = vadd.f32 %v2627_v17, %v965_v36  ;;  %v839_v41 = vpop.f32.mrb[43].mxu0  ;;  %v967_v42 = vpop.f32.mrb[43].mxu1 }
 0x173   : > { %v2051_v43 = vpack.c.bf16 %v1029_v37, %v1029_v37  ;;  %v2083_v44 = vpack.c.bf16 %v1061_v38, %v1061_v38  ;;  %v1030_v45 = vmax.f32 %v838_v39, 0.0  ;;  %v1062_v46 = vmax.f32 %v966_v40, 0.0 }
 0x175   : > { %1350 = vst.msk [vmem:[%s2633_s12 + $0x50] sm:$0xf] %vm1329_vm0, %v2051_v43  ;;  %1382 = vst.msk [vmem:[%s2633_s12 + $0xd0] sm:$0xf] %vm1329_vm0, %v2083_v44  ;;  %v2052_v47 = vpack.c.bf16 %v1030_v45, %v1030_v45  ;;  %v2084_v48 = vpack.c.bf16 %v1062_v46, %v1062_v46 }
 0x176   : > { %v842_v49 = vpop.f32.mrb[44].mxu0  ;;  %v970_v50 = vpop.f32.mrb[44].mxu1 }
 0x177   : > { %1351 = vst.msk [vmem:[%s2633_s12 + $0x54] sm:$0xf] %vm1329_vm0, %v2052_v47  ;;  %1383 = vst.msk [vmem:[%s2633_s12 + $0xd4] sm:$0xf] %vm1329_vm0, %v2084_v48  ;;  %v843_v51 = vadd.f32 %v2627_v17, %v842_v49  ;;  %v971_v52 = vadd.f32 %v2627_v17, %v970_v50  ;;  %v844_v53 = vpop.f32.mrb[45].mxu0  ;;  %v972_v54 = vpop.f32.mrb[45].mxu1 }
 0x178   : > { %v845_v55 = vpop.f32.mrb[46].mxu0  ;;  %v973_v56 = vpop.f32.mrb[46].mxu1 }
 0x179   : > { %v1031_v57 = vmax.f32 %v843_v51, 0.0  ;;  %v1063_v58 = vmax.f32 %v971_v52, 0.0  ;;  %v846_v59 = vadd.f32 %v2627_v17, %v845_v55  ;;  %v974_v60 = vadd.f32 %v2627_v17, %v973_v56  ;;  %v847_v61 = vpop.f32.mrb[47].mxu0  ;;  %v975_v62 = vpop.f32.mrb[47].mxu1 }
 0x17b   : > { %v2053_v63 = vpack.c.bf16 %v1031_v57, %v1031_v57  ;;  %v2085_v0 = vpack.c.bf16 %v1063_v58, %v1063_v58  ;;  %v1032_v1 = vmax.f32 %v846_v59, 0.0  ;;  %v1064_v2 = vmax.f32 %v974_v60, 0.0 }
 0x17d   : > { %1352 = vst.msk [vmem:[%s2633_s12 + $0x58] sm:$0xf] %vm1329_vm0, %v2053_v63  ;;  %1384 = vst.msk [vmem:[%s2633_s12 + $0xd8] sm:$0xf] %vm1329_vm0, %v2085_v0  ;;  %v2054_v3 = vpack.c.bf16 %v1032_v1, %v1032_v1  ;;  %v2086_v4 = vpack.c.bf16 %v1064_v2, %v1064_v2 }
 0x17e   : > { %v850_v5 = vpop.f32.mrb[48].mxu0  ;;  %v978_v6 = vpop.f32.mrb[48].mxu1 }
 0x17f   : > { %1353 = vst.msk [vmem:[%s2633_s12 + $0x5c] sm:$0xf] %vm1329_vm0, %v2054_v3  ;;  %1385 = vst.msk [vmem:[%s2633_s12 + $0xdc] sm:$0xf] %vm1329_vm0, %v2086_v4  ;;  %v851_v7 = vadd.f32 %v2627_v17, %v850_v5  ;;  %v979_v8 = vadd.f32 %v2627_v17, %v978_v6  ;;  %v852_v9 = vpop.f32.mrb[49].mxu0  ;;  %v980_v10 = vpop.f32.mrb[49].mxu1 }
 0x180   : > { %v853_v11 = vpop.f32.mrb[50].mxu0  ;;  %v981_v12 = vpop.f32.mrb[50].mxu1 }
 0x181   : > { %v1033_v13 = vmax.f32 %v851_v7, 0.0  ;;  %v1065_v14 = vmax.f32 %v979_v8, 0.0  ;;  %v854_v15 = vadd.f32 %v2627_v17, %v853_v11  ;;  %v982_v16 = vadd.f32 %v2627_v17, %v981_v12  ;;  %v855_v18 = vpop.f32.mrb[51].mxu0  ;;  %v983_v19 = vpop.f32.mrb[51].mxu1 }
 0x183   : > { %v2055_v20 = vpack.c.bf16 %v1033_v13, %v1033_v13  ;;  %v2087_v21 = vpack.c.bf16 %v1065_v14, %v1065_v14  ;;  %v1034_v22 = vmax.f32 %v854_v15, 0.0  ;;  %v1066_v23 = vmax.f32 %v982_v16, 0.0 }
 0x185   : > { %1354 = vst.msk [vmem:[%s2633_s12 + $0x60] sm:$0xf] %vm1329_vm0, %v2055_v20  ;;  %1386 = vst.msk [vmem:[%s2633_s12 + $0xe0] sm:$0xf] %vm1329_vm0, %v2087_v21  ;;  %v2056_v24 = vpack.c.bf16 %v1034_v22, %v1034_v22  ;;  %v2088_v25 = vpack.c.bf16 %v1066_v23, %v1066_v23 }
 0x186   : > { %v858_v26 = vpop.f32.mrb[52].mxu0  ;;  %v986_v27 = vpop.f32.mrb[52].mxu1 }
 0x187   : > { %1355 = vst.msk [vmem:[%s2633_s12 + $0x64] sm:$0xf] %vm1329_vm0, %v2056_v24  ;;  %1387 = vst.msk [vmem:[%s2633_s12 + $0xe4] sm:$0xf] %vm1329_vm0, %v2088_v25  ;;  %v859_v28 = vadd.f32 %v2627_v17, %v858_v26  ;;  %v987_v29 = vadd.f32 %v2627_v17, %v986_v27  ;;  %v860_v30 = vpop.f32.mrb[53].mxu0  ;;  %v988_v31 = vpop.f32.mrb[53].mxu1 }
 0x188   : > { %v861_v32 = vpop.f32.mrb[54].mxu0  ;;  %v989_v33 = vpop.f32.mrb[54].mxu1 }
 0x189   : > { %v1035_v34 = vmax.f32 %v859_v28, 0.0  ;;  %v1067_v35 = vmax.f32 %v987_v29, 0.0  ;;  %v862_v36 = vadd.f32 %v2627_v17, %v861_v32  ;;  %v990_v37 = vadd.f32 %v2627_v17, %v989_v33  ;;  %v863_v38 = vpop.f32.mrb[55].mxu0  ;;  %v991_v39 = vpop.f32.mrb[55].mxu1 }
 0x18b   : > { %v2057_v40 = vpack.c.bf16 %v1035_v34, %v1035_v34  ;;  %v2089_v41 = vpack.c.bf16 %v1067_v35, %v1067_v35  ;;  %v1036_v42 = vmax.f32 %v862_v36, 0.0  ;;  %v1068_v43 = vmax.f32 %v990_v37, 0.0 }
 0x18d   : > { %1356 = vst.msk [vmem:[%s2633_s12 + $0x68] sm:$0xf] %vm1329_vm0, %v2057_v40  ;;  %1388 = vst.msk [vmem:[%s2633_s12 + $0xe8] sm:$0xf] %vm1329_vm0, %v2089_v41  ;;  %v2058_v44 = vpack.c.bf16 %v1036_v42, %v1036_v42  ;;  %v2090_v45 = vpack.c.bf16 %v1068_v43, %v1068_v43 }
 0x18e   : > { %v866_v46 = vpop.f32.mrb[56].mxu0  ;;  %v994_v47 = vpop.f32.mrb[56].mxu1 }
 0x18f   : > { %1357 = vst.msk [vmem:[%s2633_s12 + $0x6c] sm:$0xf] %vm1329_vm0, %v2058_v44  ;;  %1389 = vst.msk [vmem:[%s2633_s12 + $0xec] sm:$0xf] %vm1329_vm0, %v2090_v45  ;;  %v867_v48 = vadd.f32 %v2627_v17, %v866_v46  ;;  %v995_v49 = vadd.f32 %v2627_v17, %v994_v47  ;;  %v868_v50 = vpop.f32.mrb[57].mxu0  ;;  %v996_v51 = vpop.f32.mrb[57].mxu1 }
 0x190   : > { %v869_v52 = vpop.f32.mrb[58].mxu0  ;;  %v997_v53 = vpop.f32.mrb[58].mxu1 }
 0x191   : > { %v1037_v54 = vmax.f32 %v867_v48, 0.0  ;;  %v1069_v55 = vmax.f32 %v995_v49, 0.0  ;;  %v870_v56 = vadd.f32 %v2627_v17, %v869_v52  ;;  %v998_v57 = vadd.f32 %v2627_v17, %v997_v53  ;;  %v871_v58 = vpop.f32.mrb[59].mxu0  ;;  %v999_v59 = vpop.f32.mrb[59].mxu1 }
 0x193   : > { %v2059_v60 = vpack.c.bf16 %v1037_v54, %v1037_v54  ;;  %v2091_v61 = vpack.c.bf16 %v1069_v55, %v1069_v55  ;;  %v1038_v62 = vmax.f32 %v870_v56, 0.0  ;;  %v1070_v63 = vmax.f32 %v998_v57, 0.0 }
 0x195   : > { %1358 = vst.msk [vmem:[%s2633_s12 + $0x70] sm:$0xf] %vm1329_vm0, %v2059_v60  ;;  %1390 = vst.msk [vmem:[%s2633_s12 + $0xf0] sm:$0xf] %vm1329_vm0, %v2091_v61  ;;  %v2060_v0 = vpack.c.bf16 %v1038_v62, %v1038_v62  ;;  %v2092_v1 = vpack.c.bf16 %v1070_v63, %v1070_v63 }
 0x196   : > { %v874_v2 = vpop.f32.mrb[60].mxu0  ;;  %v1002_v3 = vpop.f32.mrb[60].mxu1 }
 0x197   : > { %1359 = vst.msk [vmem:[%s2633_s12 + $0x74] sm:$0xf] %vm1329_vm0, %v2060_v0  ;;  %1391 = vst.msk [vmem:[%s2633_s12 + $0xf4] sm:$0xf] %vm1329_vm0, %v2092_v1  ;;  %v875_v4 = vadd.f32 %v2627_v17, %v874_v2  ;;  %v1003_v5 = vadd.f32 %v2627_v17, %v1002_v3  ;;  %v876_v6 = vpop.f32.mrb[61].mxu0  ;;  %v1004_v7 = vpop.f32.mrb[61].mxu1 }
 0x198   : > { %v877_v8 = vpop.f32.mrb[62].mxu0  ;;  %v1005_v9 = vpop.f32.mrb[62].mxu1 }
 0x199   : > { %v1039_v10 = vmax.f32 %v875_v4, 0.0  ;;  %v1071_v11 = vmax.f32 %v1003_v5, 0.0  ;;  %v878_v12 = vadd.f32 %v2627_v17, %v877_v8  ;;  %v1006_v13 = vadd.f32 %v2627_v17, %v1005_v9  ;;  %v879_v14 = vpop.f32.mrb[63].mxu0  ;;  %v1007_v15 = vpop.f32.mrb[63].mxu1  ;;  %1400 = sbr.rel (!%p2465_p4) target bundleno = 507 (0x1fb), region = 36 }
 0x19b   : > { %v2061_v16 = vpack.c.bf16 %v1039_v10, %v1039_v10  ;;  %v2093_v18 = vpack.c.bf16 %v1071_v11, %v1071_v11  ;;  %v1040_v19 = vmax.f32 %v878_v12, 0.0  ;;  %v1072_v20 = vmax.f32 %v1006_v13, 0.0 }
 0x19d   : > { %1360 = vst.msk [vmem:[%s2633_s12 + $0x78] sm:$0xf] %vm1329_vm0, %v2061_v16  ;;  %1392 = vst.msk [vmem:[%s2633_s12 + $0xf8] sm:$0xf] %vm1329_vm0, %v2093_v18  ;;  %v2062_v21 = vpack.c.bf16 %v1040_v19, %v1040_v19  ;;  %v2094_v22 = vpack.c.bf16 %v1072_v20, %v1072_v20 }
 0x19f   : > { %1361 = vst.msk [vmem:[%s2633_s12 + $0x7c] sm:$0xf] %vm1329_vm0, %v2062_v21  ;;  %1393 = vst.msk [vmem:[%s2633_s12 + $0xfc] sm:$0xf] %vm1329_vm0, %v2094_v22 }
 0x1a0   : > { %s3034_s9 = smov (!%p1403_p8, %s1402_s9), 64 }
 0x1a1   : > { %s2015_s28 = sshll.u32 %s3034_s9, 6 }
 0x1a2   : > { %p2018_p9 = scmp.eq.s32.totalorder %s2015_s28, 0 }
 0x1a3   : > { %s2836_s29 = sshrl.u32 (!%p2018_p9), %s3034_s9, 6 }
 0x1a4   : > { %1411 = sbr.rel (%p2018_p9) target bundleno = 507 (0x1fb), region = 40  ;;  %p2019_p10 = scmp.le.s32.totalorder (!%p2018_p9), %s2836_s29, 0 }
 0x1ab   : > { %1816 = sbr.rel (%p2019_p10) target bundleno = 486 (0x1e6), region = 112  ;;  %s3027_s15 = smov (!%p2019_p10), %s2830_s27 }
 0x1ac   : > { %s3028_s20 = smov (!%p2019_p10), %s2633_s12  ;;  %s2845_s23 = smov (!%p2019_p10), 0  }
 0x1ad   : > { %s2847_s30 = smov (!%p2019_p10), 0  }
 0x1b2 LB: >> { %v1427_v17 = vld [vmem:[%s2393_s20] sm:$0xf]  ;;  %v1429_v23 = vld [vmem:[%s2393_s20 + $0x4] sm:$0xf]  ;;  %v1431_v24 = vld [vmem:[%s2393_s20 + $0x8] sm:$0xf]  ;;  %s2401_s30 = sphi %s2847_s30, %s1421_s30   ;;  %s2397_s23 = sphi %s2845_s23, %s3029_s23   ;;  %s2393_s20 = sphi %s3028_s20, %s1560_s20   ;;  %s2389_s15 = sphi %s3027_s15, %s1561_s15  }
 0x1b3   : >> { %1428 = vst [vmem:[%s2389_s15] sm:$0xf] %v1427_v17  ;;  %1430 = vst [vmem:[%s2389_s15 + $0x4] sm:$0xf] %v1429_v23  ;;  %v1433_v25 = vld [vmem:[%s2393_s20 + $0xc] sm:$0xf]  ;;  %s1555_s4 = sadd.s32 1, %s2397_s23 }
 0x1b4   : >> { %1432 = vst [vmem:[%s2389_s15 + $0x8] sm:$0xf] %v1431_v24  ;;  %v1435_v26 = vld [vmem:[%s2393_s20 + $0x10] sm:$0xf]  ;;  %v1437_v27 = vld [vmem:[%s2393_s20 + $0x14] sm:$0xf]  ;;  %p1556_p11 = scmp.ge.s32.totalorder %s1555_s4, %s2836_s29 }
 0x1b5   : >> { %1434 = vst [vmem:[%s2389_s15 + $0xc] sm:$0xf] %v1433_v25  ;;  %1436 = vst [vmem:[%s2389_s15 + $0x10] sm:$0xf] %v1435_v26  ;;  %v1439_v28 = vld [vmem:[%s2393_s20 + $0x18] sm:$0xf] }
 0x1b6   : >> { %1438 = vst [vmem:[%s2389_s15 + $0x14] sm:$0xf] %v1437_v27  ;;  %v1441_v29 = vld [vmem:[%s2393_s20 + $0x1c] sm:$0xf]  ;;  %v1443_v30 = vld [vmem:[%s2393_s20 + $0x20] sm:$0xf] }
 0x1b7   : >> { %1440 = vst [vmem:[%s2389_s15 + $0x18] sm:$0xf] %v1439_v28  ;;  %1442 = vst [vmem:[%s2389_s15 + $0x1c] sm:$0xf] %v1441_v29  ;;  %v1445_v31 = vld [vmem:[%s2393_s20 + $0x24] sm:$0xf] }
 0x1b8   : >> { %1444 = vst [vmem:[%s2389_s15 + $0x20] sm:$0xf] %v1443_v30  ;;  %v1447_v32 = vld [vmem:[%s2393_s20 + $0x28] sm:$0xf]  ;;  %v1449_v33 = vld [vmem:[%s2393_s20 + $0x2c] sm:$0xf] }
 0x1b9   : >> { %1446 = vst [vmem:[%s2389_s15 + $0x24] sm:$0xf] %v1445_v31  ;;  %1448 = vst [vmem:[%s2389_s15 + $0x28] sm:$0xf] %v1447_v32  ;;  %v1451_v34 = vld [vmem:[%s2393_s20 + $0x30] sm:$0xf] }
 0x1ba   : >> { %1450 = vst [vmem:[%s2389_s15 + $0x2c] sm:$0xf] %v1449_v33  ;;  %v1453_v35 = vld [vmem:[%s2393_s20 + $0x34] sm:$0xf]  ;;  %v1455_v36 = vld [vmem:[%s2393_s20 + $0x38] sm:$0xf] }
 0x1bb   : >> { %1452 = vst [vmem:[%s2389_s15 + $0x30] sm:$0xf] %v1451_v34  ;;  %1454 = vst [vmem:[%s2389_s15 + $0x34] sm:$0xf] %v1453_v35  ;;  %v1457_v37 = vld [vmem:[%s2393_s20 + $0x3c] sm:$0xf] }
 0x1bc   : >> { %1456 = vst [vmem:[%s2389_s15 + $0x38] sm:$0xf] %v1455_v36  ;;  %v1459_v38 = vld [vmem:[%s2393_s20 + $0x40] sm:$0xf]  ;;  %v1461_v39 = vld [vmem:[%s2393_s20 + $0x44] sm:$0xf] }
 0x1bd   : >> { %1458 = vst [vmem:[%s2389_s15 + $0x3c] sm:$0xf] %v1457_v37  ;;  %1460 = vst [vmem:[%s2389_s15 + $0x40] sm:$0xf] %v1459_v38  ;;  %v1463_v40 = vld [vmem:[%s2393_s20 + $0x48] sm:$0xf] }
 0x1be   : >> { %1462 = vst [vmem:[%s2389_s15 + $0x44] sm:$0xf] %v1461_v39  ;;  %v1465_v41 = vld [vmem:[%s2393_s20 + $0x4c] sm:$0xf]  ;;  %v1467_v42 = vld [vmem:[%s2393_s20 + $0x50] sm:$0xf] }
 0x1bf   : >> { %1464 = vst [vmem:[%s2389_s15 + $0x48] sm:$0xf] %v1463_v40  ;;  %1466 = vst [vmem:[%s2389_s15 + $0x4c] sm:$0xf] %v1465_v41  ;;  %v1469_v43 = vld [vmem:[%s2393_s20 + $0x54] sm:$0xf] }
 0x1c0   : >> { %1468 = vst [vmem:[%s2389_s15 + $0x50] sm:$0xf] %v1467_v42  ;;  %v1471_v44 = vld [vmem:[%s2393_s20 + $0x58] sm:$0xf]  ;;  %v1473_v45 = vld [vmem:[%s2393_s20 + $0x5c] sm:$0xf] }
 0x1c1   : >> { %1470 = vst [vmem:[%s2389_s15 + $0x54] sm:$0xf] %v1469_v43  ;;  %1472 = vst [vmem:[%s2389_s15 + $0x58] sm:$0xf] %v1471_v44  ;;  %v1475_v46 = vld [vmem:[%s2393_s20 + $0x60] sm:$0xf] }
 0x1c2   : >> { %1474 = vst [vmem:[%s2389_s15 + $0x5c] sm:$0xf] %v1473_v45  ;;  %v1477_v47 = vld [vmem:[%s2393_s20 + $0x64] sm:$0xf]  ;;  %v1479_v48 = vld [vmem:[%s2393_s20 + $0x68] sm:$0xf] }
 0x1c3   : >> { %1476 = vst [vmem:[%s2389_s15 + $0x60] sm:$0xf] %v1475_v46  ;;  %1478 = vst [vmem:[%s2389_s15 + $0x64] sm:$0xf] %v1477_v47  ;;  %v1481_v49 = vld [vmem:[%s2393_s20 + $0x6c] sm:$0xf] }
 0x1c4   : >> { %1480 = vst [vmem:[%s2389_s15 + $0x68] sm:$0xf] %v1479_v48  ;;  %v1483_v50 = vld [vmem:[%s2393_s20 + $0x70] sm:$0xf]  ;;  %v1485_v51 = vld [vmem:[%s2393_s20 + $0x74] sm:$0xf] }
 0x1c5   : >> { %1482 = vst [vmem:[%s2389_s15 + $0x6c] sm:$0xf] %v1481_v49  ;;  %1484 = vst [vmem:[%s2389_s15 + $0x70] sm:$0xf] %v1483_v50  ;;  %v1487_v52 = vld [vmem:[%s2393_s20 + $0x78] sm:$0xf] }
 0x1c6   : >> { %1486 = vst [vmem:[%s2389_s15 + $0x74] sm:$0xf] %v1485_v51  ;;  %v1489_v53 = vld [vmem:[%s2393_s20 + $0x7c] sm:$0xf]  ;;  %v1491_v54 = vld [vmem:[%s2393_s20 + $0x80] sm:$0xf] }
 0x1c7   : >> { %1488 = vst [vmem:[%s2389_s15 + $0x78] sm:$0xf] %v1487_v52  ;;  %1490 = vst [vmem:[%s2389_s15 + $0x7c] sm:$0xf] %v1489_v53  ;;  %v1493_v55 = vld [vmem:[%s2393_s20 + $0x84] sm:$0xf] }
 0x1c8   : >> { %1492 = vst [vmem:[%s2389_s15 + $0x80] sm:$0xf] %v1491_v54  ;;  %v1495_v56 = vld [vmem:[%s2393_s20 + $0x88] sm:$0xf]  ;;  %v1497_v57 = vld [vmem:[%s2393_s20 + $0x8c] sm:$0xf] }
 0x1c9   : >> { %1494 = vst [vmem:[%s2389_s15 + $0x84] sm:$0xf] %v1493_v55  ;;  %1496 = vst [vmem:[%s2389_s15 + $0x88] sm:$0xf] %v1495_v56  ;;  %v1499_v58 = vld [vmem:[%s2393_s20 + $0x90] sm:$0xf] }
 0x1ca   : >> { %1498 = vst [vmem:[%s2389_s15 + $0x8c] sm:$0xf] %v1497_v57  ;;  %v1501_v59 = vld [vmem:[%s2393_s20 + $0x94] sm:$0xf]  ;;  %v1503_v60 = vld [vmem:[%s2393_s20 + $0x98] sm:$0xf] }
 0x1cb   : >> { %1500 = vst [vmem:[%s2389_s15 + $0x90] sm:$0xf] %v1499_v58  ;;  %1502 = vst [vmem:[%s2389_s15 + $0x94] sm:$0xf] %v1501_v59  ;;  %v1505_v61 = vld [vmem:[%s2393_s20 + $0x9c] sm:$0xf] }
 0x1cc   : >> { %1504 = vst [vmem:[%s2389_s15 + $0x98] sm:$0xf] %v1503_v60  ;;  %v1507_v62 = vld [vmem:[%s2393_s20 + $0xa0] sm:$0xf]  ;;  %v1509_v63 = vld [vmem:[%s2393_s20 + $0xa4] sm:$0xf] }
 0x1cd   : >> { %1506 = vst [vmem:[%s2389_s15 + $0x9c] sm:$0xf] %v1505_v61  ;;  %1508 = vst [vmem:[%s2389_s15 + $0xa0] sm:$0xf] %v1507_v62  ;;  %v1511_v0 = vld [vmem:[%s2393_s20 + $0xa8] sm:$0xf] }
 0x1ce   : >> { %1510 = vst [vmem:[%s2389_s15 + $0xa4] sm:$0xf] %v1509_v63  ;;  %v1513_v1 = vld [vmem:[%s2393_s20 + $0xac] sm:$0xf]  ;;  %v1515_v2 = vld [vmem:[%s2393_s20 + $0xb0] sm:$0xf] }
 0x1cf   : >> { %1512 = vst [vmem:[%s2389_s15 + $0xa8] sm:$0xf] %v1511_v0  ;;  %1514 = vst [vmem:[%s2389_s15 + $0xac] sm:$0xf] %v1513_v1  ;;  %v1517_v3 = vld [vmem:[%s2393_s20 + $0xb4] sm:$0xf] }
 0x1d0   : >> { %1516 = vst [vmem:[%s2389_s15 + $0xb0] sm:$0xf] %v1515_v2  ;;  %v1519_v4 = vld [vmem:[%s2393_s20 + $0xb8] sm:$0xf]  ;;  %v1521_v5 = vld [vmem:[%s2393_s20 + $0xbc] sm:$0xf] }
 0x1d1   : >> { %1518 = vst [vmem:[%s2389_s15 + $0xb4] sm:$0xf] %v1517_v3  ;;  %1520 = vst [vmem:[%s2389_s15 + $0xb8] sm:$0xf] %v1519_v4  ;;  %v1523_v6 = vld [vmem:[%s2393_s20 + $0xc0] sm:$0xf] }
 0x1d2   : >> { %1522 = vst [vmem:[%s2389_s15 + $0xbc] sm:$0xf] %v1521_v5  ;;  %v1525_v7 = vld [vmem:[%s2393_s20 + $0xc4] sm:$0xf]  ;;  %v1527_v8 = vld [vmem:[%s2393_s20 + $0xc8] sm:$0xf] }
 0x1d3   : >> { %1524 = vst [vmem:[%s2389_s15 + $0xc0] sm:$0xf] %v1523_v6  ;;  %1526 = vst [vmem:[%s2389_s15 + $0xc4] sm:$0xf] %v1525_v7  ;;  %v1529_v9 = vld [vmem:[%s2393_s20 + $0xcc] sm:$0xf] }
 0x1d4   : >> { %1528 = vst [vmem:[%s2389_s15 + $0xc8] sm:$0xf] %v1527_v8  ;;  %v1531_v10 = vld [vmem:[%s2393_s20 + $0xd0] sm:$0xf]  ;;  %v1533_v11 = vld [vmem:[%s2393_s20 + $0xd4] sm:$0xf] }
 0x1d5   : >> { %1530 = vst [vmem:[%s2389_s15 + $0xcc] sm:$0xf] %v1529_v9  ;;  %1532 = vst [vmem:[%s2389_s15 + $0xd0] sm:$0xf] %v1531_v10  ;;  %v1535_v12 = vld [vmem:[%s2393_s20 + $0xd8] sm:$0xf] }
 0x1d6   : >> { %1534 = vst [vmem:[%s2389_s15 + $0xd4] sm:$0xf] %v1533_v11  ;;  %v1537_v13 = vld [vmem:[%s2393_s20 + $0xdc] sm:$0xf]  ;;  %v1539_v14 = vld [vmem:[%s2393_s20 + $0xe0] sm:$0xf] }
 0x1d7   : >> { %1536 = vst [vmem:[%s2389_s15 + $0xd8] sm:$0xf] %v1535_v12  ;;  %1538 = vst [vmem:[%s2389_s15 + $0xdc] sm:$0xf] %v1537_v13  ;;  %v1541_v15 = vld [vmem:[%s2393_s20 + $0xe4] sm:$0xf] }
 0x1d8   : >> { %1540 = vst [vmem:[%s2389_s15 + $0xe0] sm:$0xf] %v1539_v14  ;;  %v1543_v16 = vld [vmem:[%s2393_s20 + $0xe8] sm:$0xf]  ;;  %v1545_v18 = vld [vmem:[%s2393_s20 + $0xec] sm:$0xf] }
 0x1d9   : >> { %1542 = vst [vmem:[%s2389_s15 + $0xe4] sm:$0xf] %v1541_v15  ;;  %1544 = vst [vmem:[%s2389_s15 + $0xe8] sm:$0xf] %v1543_v16  ;;  %v1547_v19 = vld [vmem:[%s2393_s20 + $0xf0] sm:$0xf] }
 0x1da   : >> { %1546 = vst [vmem:[%s2389_s15 + $0xec] sm:$0xf] %v1545_v18  ;;  %v1549_v20 = vld [vmem:[%s2393_s20 + $0xf4] sm:$0xf]  ;;  %v1551_v21 = vld [vmem:[%s2393_s20 + $0xf8] sm:$0xf] }
 0x1db   : >> { %1548 = vst [vmem:[%s2389_s15 + $0xf0] sm:$0xf] %v1547_v19  ;;  %1550 = vst [vmem:[%s2389_s15 + $0xf4] sm:$0xf] %v1549_v20  ;;  %v1553_v22 = vld [vmem:[%s2393_s20 + $0xfc] sm:$0xf] }
 0x1dc   : >> { %1552 = vst [vmem:[%s2389_s15 + $0xf8] sm:$0xf] %v1551_v21  ;;  %1554 = vst [vmem:[%s2389_s15 + $0xfc] sm:$0xf] %v1553_v22  ;;  %s3036_s4 = smov (%p1556_p11, %s1555_s4), 0  ;;  %s1421_s30 = sadd.s32 1, %s2401_s30  }
 0x1dd   : >> { %s2020_s5 = sshll.u32 %s3036_s4, 8  ;;  %p1420_p12 = scmp.ge.s32.totalorder %s1421_s30, %s2836_s29 }
 0x1de   : >> { %s1560_s20 = scalar_lea.vmem %s2633_s12, %s2020_s5 [#allocation2]   ;;  %s1561_s15 = scalar_lea.vmem %s2830_s27, %s2020_s5  }
 0x1df   : >> { %s3029_s23 = smov %s3036_s4  ;;  %1423 = sbr.rel (!%p1420_p12) target bundleno = 434 (0x1b2), region = 118 }
 0x1e6 PF: > { %s3004_s6 = sand.u32 63, %s3034_s9   ;;  %s2096_s7 = sshll.u32 %s2836_s29, 8 }
 0x1e7   : > { %s1566_s8 = scalar_lea.vmem %s2633_s12, %s2096_s7 [#allocation2]   ;;  %s1568_s10 = scalar_lea.vmem %s2830_s27, %s2096_s7  }
 0x1e8   : > { %p2025_p13 = scmp.le.s32.totalorder %s3004_s6, 0 }
 0x1e9   : > { %s2403_s11 = smov (!%p2025_p13), %s1568_s10   ;;  %s2407_s14 = smov (!%p2025_p13), %s1566_s8  }
 0x1ea   : > { %1830 = sbr.rel (%p2025_p13) target bundleno = 507 (0x1fb), region = 123  ;;  %s2411_s17 = smov (!%p2025_p13), 0  }
 0x1eb   : > { %s2415_s18 = smov (!%p2025_p13), 0  }
 0x1f1 LB: >> { %v1578_v17 = vld [vmem:[%s2409_s14] sm:$0xf]  ;;  %s1580_s21 = sadd.s32 1, %s2413_s17  ;;  %s1572_s18 = sadd.s32 1, %s2417_s18   ;;  %s2417_s18 = sphi %s2415_s18, %s1572_s18   ;;  %s2413_s17 = sphi %s2411_s17, %s2412_s17   ;;  %s2409_s14 = sphi %s2407_s14, %s1585_s14   ;;  %s2405_s11 = sphi %s2403_s11, %s1586_s11  }
 0x1f2   : >> { %1579 = vst [vmem:[%s2405_s11] sm:$0xf] %v1578_v17  ;;  %p1581_p0 = scmp.ge.s32.totalorder %s1580_s21, %s3004_s6  ;;  %p1571_p1 = scmp.ge.s32.totalorder %s1572_s18, %s3004_s6 }
 0x1f4   : >> { %s3038_s21 = smov (%p1581_p0, %s1580_s21), 0  ;;  %1574 = sbr.rel (!%p1571_p1) target bundleno = 497 (0x1f1), region = 129 }
 0x1f5   : >> { %s2026_s22 = sshll.u32 %s3038_s21, 2  ;;  %s2412_s17 = smov %s3038_s21  }
 0x1f6   : >> { %s1585_s14 = scalar_lea.vmem %s1566_s8, %s2026_s22 [#allocation2]   ;;  %s1586_s11 = scalar_lea.vmem %s1568_s10, %s2026_s22  }
 0x1fb PF: > { %p10_p2 = scmp.ge.s32.totalorder %s2455_s16, 4   ;;  %s3030_s12 = smov %s2381_s13 }
 0x1fc   : > { %s3031_s13 = smov %s2463_s19  ;;  %s3032_s14 = smov %s2455_s16 }
 0x1fd   :  { %12 = sbr.rel (!%p10_p2) target bundleno = 2 (0x2), region = 140 }

// kernel: dqn_forward.5
= control target key start
LH: loop header
LB: loop body
LE: loop exit
PB: predicated region body
PF: predicated region fallthrough
CT: control target
= control target key end

     0   :  { %vm944_vm0 = vcmask 519168   ;;  %s1875_s0 = inlined_call_operand.vmem [shape: bf16[162,512], index: 0, kind: input, shape index: {}]   ;;  %s1876_s1 = inlined_call_operand.vmem [shape: bf16[512,64], index: 1, kind: input, shape index: {}]   ;;  %s1877_s2 = inlined_call_operand.vmem [shape: f32[1,64], index: 2, kind: input, shape index: {}]   ;;  %s1878_s3 = inlined_call_operand.vmem [shape: bf16[162,64], index: 3, kind: output, shape index: {}]  }
   0x1   :  { %v1401_v0 = vld [vmem:[%s1876_s1 + $0x40] sm:$0xff]   ;;  %v1405_v4 = vld [vmem:[%s1876_s1 + $0x48] sm:$0xff]   ;;  %v1409_v8 = vld [vmem:[%s1876_s1 + $0x50] sm:$0xff]  }
   0x2   :  { %v1402_v1 = vld [vmem:[%s1876_s1 + $0xc0] sm:$0xff]   ;;  %1225 = vmatprep.subr.bf16.mxu0 %v1401_v0  ;;  %v1406_v5 = vld [vmem:[%s1876_s1 + $0xc8] sm:$0xff]   ;;  %v1410_v9 = vld [vmem:[%s1876_s1 + $0xd0] sm:$0xff]  }
   0x3   :  { %v1403_v2 = vld [vmem:[%s1876_s1] sm:$0xff]   ;;  %1313 = vmatprep.subr.bf16.mxu1 %v1402_v1  ;;  %v1407_v6 = vld [vmem:[%s1876_s1 + $0x8] sm:$0xff]   ;;  %v1411_v10 = vld [vmem:[%s1876_s1 + $0x10] sm:$0xff]  }
   0x4   :  { %v1404_v3 = vld [vmem:[%s1876_s1 + $0x80] sm:$0xff]   ;;  %1226 = vmatpush3.bf16.msra.mxu0 %v1403_v2  ;;  %v1408_v7 = vld [vmem:[%s1876_s1 + $0x88] sm:$0xff]   ;;  %v1412_v11 = vld [vmem:[%s1876_s1 + $0x90] sm:$0xff]  }
   0x5   :  { %1314 = vmatpush3.bf16.msra.mxu1 %v1404_v3  ;;  %1227 = vmatprep.subr.bf16.mxu0 %v1405_v4  ;;  %v1413_v12 = vld [vmem:[%s1876_s1 + $0x58] sm:$0xff]   ;;  %v1417_v16 = vld [vmem:[%s1876_s1 + $0x60] sm:$0xff]   ;;  %v1421_v20 = vld [vmem:[%s1876_s1 + $0x68] sm:$0xff]  }
   0x6   :  { %1315 = vmatprep.subr.bf16.mxu1 %v1406_v5  ;;  %v1414_v13 = vld [vmem:[%s1876_s1 + $0xd8] sm:$0xff]   ;;  %v1418_v17 = vld [vmem:[%s1876_s1 + $0xe0] sm:$0xff]   ;;  %v1422_v21 = vld [vmem:[%s1876_s1 + $0xe8] sm:$0xff]  }
   0x7   :  { %v1415_v14 = vld [vmem:[%s1876_s1 + $0x18] sm:$0xff]   ;;  %v1419_v18 = vld [vmem:[%s1876_s1 + $0x20] sm:$0xff]   ;;  %v1423_v22 = vld [vmem:[%s1876_s1 + $0x28] sm:$0xff]  }
   0x8   :  { %1228 = vmatpush3.bf16.msra.mxu0 %v1407_v6  ;;  %v1416_v15 = vld [vmem:[%s1876_s1 + $0x98] sm:$0xff]   ;;  %v1420_v19 = vld [vmem:[%s1876_s1 + $0xa0] sm:$0xff]   ;;  %v1424_v23 = vld [vmem:[%s1876_s1 + $0xa8] sm:$0xff]  }
   0x9   :  { %1316 = vmatpush3.bf16.msra.mxu1 %v1408_v7  ;;  %1229 = vmatprep.subr.bf16.mxu0 %v1409_v8  ;;  %v1425_v24 = vld [vmem:[%s1876_s1 + $0x70] sm:$0xff]   ;;  %v1429_v28 = vld [vmem:[%s1876_s1 + $0x78] sm:$0xff]  }
   0xa   :  { %1317 = vmatprep.subr.bf16.mxu1 %v1410_v9  ;;  %v1426_v25 = vld [vmem:[%s1876_s1 + $0xf0] sm:$0xff]   ;;  %v1430_v29 = vld [vmem:[%s1876_s1 + $0xf8] sm:$0xff]  }
   0xb   :  { %v1427_v26 = vld [vmem:[%s1876_s1 + $0x30] sm:$0xff]   ;;  %v1431_v30 = vld [vmem:[%s1876_s1 + $0x38] sm:$0xff]  }
   0xc   :  { %1230 = vmatpush3.bf16.msra.mxu0 %v1411_v10  ;;  %v1428_v27 = vld [vmem:[%s1876_s1 + $0xb0] sm:$0xff]   ;;  %v1432_v31 = vld [vmem:[%s1876_s1 + $0xb8] sm:$0xff]  }
   0xd   :  { %1318 = vmatpush3.bf16.msra.mxu1 %v1412_v11  ;;  %1231 = vmatprep.subr.bf16.mxu0 %v1413_v12  ;;  %v1433_v32 = vld [vmem:[%s1875_s0] ss:$16 sps:$4 sm:$0xff]   ;;  %v1435_v33 = vld [vmem:[%s1875_s0 + $0x4] ss:$16 sps:$4 sm:$0xff]   ;;  %v1436_v34 = vld [vmem:[%s1875_s0 + $0x8] ss:$16 sps:$4 sm:$0xff]  }
   0xe   :  { %1319 = vmatprep.subr.bf16.mxu1 %v1414_v13  ;;  %v1438_v35 = vld [vmem:[%s1875_s0 + $0xc] ss:$16 sps:$4 sm:$0xff]   ;;  %598 = vmatprep.mubr.bf16.mxu0 %v1435_v33  ;;  %v1439_v36 = vld [vmem:[%s1875_s0 + $0x24] ss:$16 sps:$4 sm:$0xff]   ;;  %v1443_v38 = vld [vmem:[%s1875_s0 + $0x20] ss:$16 sps:$4 sm:$0xff]  }
   0xf   :  { %727 = vmatprep.mubr.bf16.mxu1 %v1438_v35  ;;  %v1441_v37 = vld [vmem:[%s1875_s0 + $0x2c] ss:$16 sps:$4 sm:$0xff]   ;;  %v1444_v39 = vld [vmem:[%s1875_s0 + $0x28] ss:$16 sps:$4 sm:$0xff]   ;;  %v1445_v40 = vld [vmem:[%s1875_s0 + $0x44] ss:$16 sps:$4 sm:$0xff]  }
  0x10   :  { %1232 = vmatpush3.bf16.msra.mxu0 %v1415_v14  ;;  %v1447_v41 = vld [vmem:[%s1875_s0 + $0x4c] ss:$16 sps:$4 sm:$0xff]   ;;  %v1449_v42 = vld [vmem:[%s1875_s0 + $0x40] ss:$16 sps:$4 sm:$0xff]   ;;  %v1450_v43 = vld [vmem:[%s1875_s0 + $0x48] ss:$16 sps:$4 sm:$0xff]  }
  0x11   :  { %1320 = vmatpush3.bf16.msra.mxu1 %v1416_v15  ;;  %1233 = vmatprep.subr.bf16.mxu0 %v1417_v16  ;;  %v1451_v44 = vld [vmem:[%s1875_s0 + $0x64] ss:$16 sps:$4 sm:$0xff]   ;;  %v1453_v45 = vld [vmem:[%s1875_s0 + $0x6c] ss:$16 sps:$4 sm:$0xff]   ;;  %v1455_v46 = vld [vmem:[%s1875_s0 + $0x60] ss:$16 sps:$4 sm:$0xff]  }
  0x12   :  { %1321 = vmatprep.subr.bf16.mxu1 %v1418_v17  ;;  %v1456_v47 = vld [vmem:[%s1875_s0 + $0x68] ss:$16 sps:$4 sm:$0xff]   ;;  %v1457_v48 = vld [vmem:[%s1875_s0 + $0x84] ss:$16 sps:$4 sm:$0xff]   ;;  %v1459_v49 = vld [vmem:[%s1875_s0 + $0x8c] ss:$16 sps:$4 sm:$0xff]  }
  0x13   :  { %v1461_v50 = vld [vmem:[%s1875_s0 + $0x80] ss:$16 sps:$4 sm:$0xff]   ;;  %v1462_v51 = vld [vmem:[%s1875_s0 + $0x88] ss:$16 sps:$4 sm:$0xff]   ;;  %v1463_v52 = vld [vmem:[%s1875_s0 + $0xa4] ss:$16 sps:$4 sm:$0xff]  }
  0x14   :  { %1234 = vmatpush3.bf16.msra.mxu0 %v1419_v18  ;;  %v1465_v53 = vld [vmem:[%s1875_s0 + $0xac] ss:$16 sps:$4 sm:$0xff]   ;;  %v1467_v54 = vld [vmem:[%s1875_s0 + $0xa0] ss:$16 sps:$4 sm:$0xff]   ;;  %v1468_v55 = vld [vmem:[%s1875_s0 + $0xa8] ss:$16 sps:$4 sm:$0xff]  }
  0x15   :  { %1322 = vmatpush3.bf16.msra.mxu1 %v1420_v19  ;;  %1235 = vmatprep.subr.bf16.mxu0 %v1421_v20  ;;  %v1469_v56 = vld [vmem:[%s1875_s0 + $0xc4] ss:$16 sps:$4 sm:$0xff]   ;;  %v1471_v57 = vld [vmem:[%s1875_s0 + $0xcc] ss:$16 sps:$4 sm:$0xff]   ;;  %v1473_v58 = vld [vmem:[%s1875_s0 + $0xc0] ss:$16 sps:$4 sm:$0xff]  }
  0x16   :  { %1323 = vmatprep.subr.bf16.mxu1 %v1422_v21  ;;  %v1474_v59 = vld [vmem:[%s1875_s0 + $0xc8] ss:$16 sps:$4 sm:$0xff]   ;;  %v1475_v60 = vld [vmem:[%s1875_s0 + $0xe4] ss:$16 sps:$4 sm:$0xff]   ;;  %v1477_v61 = vld [vmem:[%s1875_s0 + $0xec] ss:$16 sps:$4 sm:$0xff]  }
  0x17   :  { %v1479_v62 = vld [vmem:[%s1875_s0 + $0xe0] ss:$16 sps:$4 sm:$0xff]   ;;  %v1480_v63 = vld [vmem:[%s1875_s0 + $0xe8] ss:$16 sps:$4 sm:$0xff]   ;;  %v1481_v0 = vld [vmem:[%s1875_s0 + $0x104] ss:$16 sps:$4 sm:$0xff]  }
  0x18   :  { %1236 = vmatpush3.bf16.msra.mxu0 %v1423_v22  ;;  %v1483_v1 = vld [vmem:[%s1875_s0 + $0x10c] ss:$16 sps:$4 sm:$0xff]   ;;  %v1485_v2 = vld [vmem:[%s1875_s0 + $0x100] ss:$16 sps:$4 sm:$0xff]   ;;  %v1486_v3 = vld [vmem:[%s1875_s0 + $0x108] ss:$16 sps:$4 sm:$0xff]  }
  0x19   :  { %1324 = vmatpush3.bf16.msra.mxu1 %v1424_v23  ;;  %1237 = vmatprep.subr.bf16.mxu0 %v1425_v24  ;;  %v1487_v4 = vld [vmem:[%s1875_s0 + $0x124] ss:$16 sps:$4 sm:$0xff]   ;;  %v1489_v5 = vld [vmem:[%s1875_s0 + $0x12c] ss:$16 sps:$4 sm:$0xff]   ;;  %v1491_v6 = vld [vmem:[%s1875_s0 + $0x120] ss:$16 sps:$4 sm:$0xff]  }
  0x1a   :  { %1325 = vmatprep.subr.bf16.mxu1 %v1426_v25  ;;  %v1492_v7 = vld [vmem:[%s1875_s0 + $0x128] ss:$16 sps:$4 sm:$0xff]   ;;  %v1493_v8 = vld [vmem:[%s1875_s0 + $0x144] ss:$16 sps:$4 sm:$0xff]   ;;  %v1495_v9 = vld [vmem:[%s1875_s0 + $0x14c] ss:$16 sps:$4 sm:$0xff]  }
  0x1b   :  { %v1497_v10 = vld [vmem:[%s1875_s0 + $0x140] ss:$16 sps:$4 sm:$0xff]   ;;  %v1498_v11 = vld [vmem:[%s1875_s0 + $0x148] ss:$16 sps:$4 sm:$0xff]   ;;  %v1499_v12 = vld [vmem:[%s1875_s0 + $0x164] ss:$16 sps:$4 sm:$0xff]  }
  0x1c   :  { %1238 = vmatpush3.bf16.msra.mxu0 %v1427_v26  ;;  %v1501_v13 = vld [vmem:[%s1875_s0 + $0x16c] ss:$16 sps:$4 sm:$0xff]   ;;  %v1503_v14 = vld [vmem:[%s1875_s0 + $0x160] ss:$16 sps:$4 sm:$0xff]   ;;  %v1504_v15 = vld [vmem:[%s1875_s0 + $0x168] ss:$16 sps:$4 sm:$0xff]  }
  0x1d   :  { %1326 = vmatpush3.bf16.msra.mxu1 %v1428_v27  ;;  %1239 = vmatprep.subr.bf16.mxu0 %v1429_v28  ;;  %v1768_v18 = vld [vmem:[%s1877_s2] ss:$0 sm:$0xff] }
  0x1e   :  { %1327 = vmatprep.subr.bf16.mxu1 %v1430_v29 }
  0x20   :  { %1240 = vmatpush3.bf16.msra.mxu0 %v1431_v30 }
  0x21   :  { %1328 = vmatpush3.bf16.msra.mxu1 %v1432_v31 }
  0x23   :  { %599 = vmatmul.mubr.bf16.vlgmr.msra.gmra.mrb[0].mxu0 %v1433_v32 }
  0x24   :  { %728 = vmatmul.mubr.bf16.vlgmr.msra.gmra.mrb[0].mxu1 %v1436_v34  ;;  %606 = vmatprep.mubr.bf16.mxu0 %v1439_v36 }
  0x25   :  { %735 = vmatprep.mubr.bf16.mxu1 %v1441_v37 }
  0x2b   :  { %607 = vmatmul.mubr.bf16.gmra.mrb[4].mxu0 %v1443_v38 }
  0x2c   :  { %736 = vmatmul.mubr.bf16.gmra.mrb[4].mxu1 %v1444_v39  ;;  %614 = vmatprep.mubr.bf16.mxu0 %v1445_v40 }
  0x2d   :  { %743 = vmatprep.mubr.bf16.mxu1 %v1447_v41 }
  0x33   :  { %615 = vmatmul.mubr.bf16.gmra.mrb[8].mxu0 %v1449_v42 }
  0x34   :  { %744 = vmatmul.mubr.bf16.gmra.mrb[8].mxu1 %v1450_v43  ;;  %622 = vmatprep.mubr.bf16.mxu0 %v1451_v44 }
  0x35   :  { %751 = vmatprep.mubr.bf16.mxu1 %v1453_v45 }
  0x3b   :  { %623 = vmatmul.mubr.bf16.gmra.mrb[12].mxu0 %v1455_v46 }
  0x3c   :  { %752 = vmatmul.mubr.bf16.gmra.mrb[12].mxu1 %v1456_v47  ;;  %630 = vmatprep.mubr.bf16.mxu0 %v1457_v48 }
  0x3d   :  { %759 = vmatprep.mubr.bf16.mxu1 %v1459_v49 }
  0x43   :  { %631 = vmatmul.mubr.bf16.gmra.mrb[16].mxu0 %v1461_v50 }
  0x44   :  { %760 = vmatmul.mubr.bf16.gmra.mrb[16].mxu1 %v1462_v51  ;;  %638 = vmatprep.mubr.bf16.mxu0 %v1463_v52 }
  0x45   :  { %767 = vmatprep.mubr.bf16.mxu1 %v1465_v53 }
  0x4b   :  { %639 = vmatmul.mubr.bf16.gmra.mrb[20].mxu0 %v1467_v54 }
  0x4c   :  { %768 = vmatmul.mubr.bf16.gmra.mrb[20].mxu1 %v1468_v55  ;;  %646 = vmatprep.mubr.bf16.mxu0 %v1469_v56 }
  0x4d   :  { %775 = vmatprep.mubr.bf16.mxu1 %v1471_v57 }
  0x53   :  { %647 = vmatmul.mubr.bf16.gmra.mrb[24].mxu0 %v1473_v58 }
  0x54   :  { %776 = vmatmul.mubr.bf16.gmra.mrb[24].mxu1 %v1474_v59  ;;  %654 = vmatprep.mubr.bf16.mxu0 %v1475_v60 }
  0x55   :  { %783 = vmatprep.mubr.bf16.mxu1 %v1477_v61 }
  0x5b   :  { %655 = vmatmul.mubr.bf16.gmra.mrb[28].mxu0 %v1479_v62 }
  0x5c   :  { %784 = vmatmul.mubr.bf16.gmra.mrb[28].mxu1 %v1480_v63  ;;  %662 = vmatprep.mubr.bf16.mxu0 %v1481_v0 }
  0x5d   :  { %791 = vmatprep.mubr.bf16.mxu1 %v1483_v1 }
  0x63   :  { %663 = vmatmul.mubr.bf16.gmra.mrb[32].mxu0 %v1485_v2 }
  0x64   :  { %792 = vmatmul.mubr.bf16.gmra.mrb[32].mxu1 %v1486_v3  ;;  %670 = vmatprep.mubr.bf16.mxu0 %v1487_v4 }
  0x65   :  { %799 = vmatprep.mubr.bf16.mxu1 %v1489_v5 }
  0x6b   :  { %671 = vmatmul.mubr.bf16.gmra.mrb[36].mxu0 %v1491_v6 }
  0x6c   :  { %800 = vmatmul.mubr.bf16.gmra.mrb[36].mxu1 %v1492_v7  ;;  %678 = vmatprep.mubr.bf16.mxu0 %v1493_v8 }
  0x6d   :  { %807 = vmatprep.mubr.bf16.mxu1 %v1495_v9 }
  0x73   :  { %679 = vmatmul.mubr.bf16.gmra.mrb[40].mxu0 %v1497_v10 }
  0x74   :  { %808 = vmatmul.mubr.bf16.gmra.mrb[40].mxu1 %v1498_v11  ;;  %686 = vmatprep.mubr.bf16.mxu0 %v1499_v12 }
  0x75   :  { %815 = vmatprep.mubr.bf16.mxu1 %v1501_v13 }
  0x7b   :  { %687 = vmatmul.mubr.bf16.gmra.mrb[44].mxu0 %v1503_v14 }
  0x7c   :  { %816 = vmatmul.mubr.bf16.gmra.mrb[44].mxu1 %v1504_v15 }
  0xf6   :  { %v1241_v16 = vpop.f32.mrb[0].mxu0 }
  0xf7   :  { %v1329_v17 = vpop.f32.mrb[0].mxu1  ;;  %v1242_v19 = vpop.f32.mrb[1].mxu0 }
  0xf8   :  { %v1243_v20 = vadd.f32 %v1242_v19, %v1241_v16  ;;  %v1330_v21 = vpop.f32.mrb[1].mxu1  ;;  %v1244_v22 = vpop.f32.mrb[2].mxu0 }
  0xf9   :  { %v1331_v23 = vadd.f32 %v1330_v21, %v1329_v17  ;;  %v1332_v24 = vpop.f32.mrb[2].mxu1  ;;  %v1245_v25 = vpop.f32.mrb[3].mxu0 }
  0xfa   :  { %v601_v26 = vadd.f32 %v1243_v20, %v1768_v18  ;;  %v1246_v27 = vadd.f32 %v1245_v25, %v1244_v22  ;;  %v1333_v28 = vpop.f32.mrb[3].mxu1 }
  0xfb   :  { %v1334_v29 = vadd.f32 %v1333_v28, %v1332_v24 }
  0xfc   :  { %v730_v30 = vadd.f32 %v1331_v23, %v601_v26  ;;  %v604_v31 = vadd.f32 %v1246_v27, %v1768_v18 }
  0xfe   :  { %v824_v32 = vmax.f32 %v730_v30, 0.0  ;;  %v733_v33 = vadd.f32 %v1334_v29, %v604_v31  ;;  %v1247_v34 = vpop.f32.mrb[4].mxu0 }
  0xff   :  { %v1335_v35 = vpop.f32.mrb[4].mxu1  ;;  %v1248_v36 = vpop.f32.mrb[5].mxu0 }
 0x100   :  { %v1201_v37 = vpack.c.bf16 %v824_v32, %v824_v32  ;;  %v825_v38 = vmax.f32 %v733_v33, 0.0  ;;  %v1249_v39 = vadd.f32 %v1248_v36, %v1247_v34  ;;  %v1336_v40 = vpop.f32.mrb[5].mxu1  ;;  %v1250_v41 = vpop.f32.mrb[6].mxu0 }
 0x101   :  { %v1337_v42 = vadd.f32 %v1336_v40, %v1335_v35  ;;  %v1338_v43 = vpop.f32.mrb[6].mxu1  ;;  %v1251_v44 = vpop.f32.mrb[7].mxu0 }
 0x102   :  { %945 = vst.msk [vmem:[#allocation2] sm:$0xf] %vm944_vm0, %v1201_v37  ;;  %v1202_v45 = vpack.c.bf16 %v825_v38, %v825_v38  ;;  %v609_v46 = vadd.f32 %v1249_v39, %v1768_v18  ;;  %v1252_v47 = vadd.f32 %v1251_v44, %v1250_v41  ;;  %v1339_v48 = vpop.f32.mrb[7].mxu1 }
 0x103   :  { %v1340_v49 = vadd.f32 %v1339_v48, %v1338_v43 }
 0x104   :  { %946 = vst.msk [vmem:[#allocation2 + $0x4] sm:$0xf] %vm944_vm0, %v1202_v45  ;;  %v738_v50 = vadd.f32 %v1337_v42, %v609_v46  ;;  %v612_v51 = vadd.f32 %v1252_v47, %v1768_v18 }
 0x106   :  { %v826_v52 = vmax.f32 %v738_v50, 0.0  ;;  %v741_v53 = vadd.f32 %v1340_v49, %v612_v51  ;;  %v1253_v54 = vpop.f32.mrb[8].mxu0 }
 0x107   :  { %v1341_v55 = vpop.f32.mrb[8].mxu1  ;;  %v1254_v56 = vpop.f32.mrb[9].mxu0 }
 0x108   :  { %v1203_v57 = vpack.c.bf16 %v826_v52, %v826_v52  ;;  %v827_v58 = vmax.f32 %v741_v53, 0.0  ;;  %v1255_v59 = vadd.f32 %v1254_v56, %v1253_v54  ;;  %v1342_v60 = vpop.f32.mrb[9].mxu1  ;;  %v1256_v61 = vpop.f32.mrb[10].mxu0 }
 0x109   :  { %v986_v62 = vld [vmem:[#allocation2] sm:$0xf]  ;;  %v1343_v63 = vadd.f32 %v1342_v60, %v1341_v55  ;;  %v1344_v0 = vpop.f32.mrb[10].mxu1  ;;  %v1257_v1 = vpop.f32.mrb[11].mxu0 }
 0x10a   :  { %987 = vst [vmem:[%s1878_s3] sm:$0xf] %v986_v62  ;;  %947 = vst.msk [vmem:[#allocation2 + $0x8] sm:$0xf] %vm944_vm0, %v1203_v57  ;;  %v1204_v2 = vpack.c.bf16 %v827_v58, %v827_v58  ;;  %v617_v3 = vadd.f32 %v1255_v59, %v1768_v18  ;;  %v1258_v4 = vadd.f32 %v1257_v1, %v1256_v61  ;;  %v1345_v5 = vpop.f32.mrb[11].mxu1 }
 0x10b   :  { %v988_v6 = vld [vmem:[#allocation2 + $0x4] sm:$0xf]  ;;  %v1346_v7 = vadd.f32 %v1345_v5, %v1344_v0 }
 0x10c   :  { %989 = vst [vmem:[%s1878_s3 + $0x4] sm:$0xf] %v988_v6  ;;  %948 = vst.msk [vmem:[#allocation2 + $0xc] sm:$0xf] %vm944_vm0, %v1204_v2  ;;  %v746_v8 = vadd.f32 %v1343_v63, %v617_v3  ;;  %v620_v9 = vadd.f32 %v1258_v4, %v1768_v18 }
 0x10e   :  { %v828_v10 = vmax.f32 %v746_v8, 0.0  ;;  %v749_v11 = vadd.f32 %v1346_v7, %v620_v9  ;;  %v1259_v12 = vpop.f32.mrb[12].mxu0 }
 0x10f   :  { %v1347_v13 = vpop.f32.mrb[12].mxu1  ;;  %v1260_v14 = vpop.f32.mrb[13].mxu0 }
 0x110   :  { %v1205_v15 = vpack.c.bf16 %v828_v10, %v828_v10  ;;  %v829_v16 = vmax.f32 %v749_v11, 0.0  ;;  %v1261_v17 = vadd.f32 %v1260_v14, %v1259_v12  ;;  %v1348_v19 = vpop.f32.mrb[13].mxu1  ;;  %v1262_v20 = vpop.f32.mrb[14].mxu0 }
 0x111   :  { %v990_v21 = vld [vmem:[#allocation2 + $0x8] sm:$0xf]  ;;  %v1349_v22 = vadd.f32 %v1348_v19, %v1347_v13  ;;  %v1350_v23 = vpop.f32.mrb[14].mxu1  ;;  %v1263_v24 = vpop.f32.mrb[15].mxu0 }
 0x112   :  { %991 = vst [vmem:[%s1878_s3 + $0x8] sm:$0xf] %v990_v21  ;;  %949 = vst.msk [vmem:[#allocation2 + $0x10] sm:$0xf] %vm944_vm0, %v1205_v15  ;;  %v1206_v25 = vpack.c.bf16 %v829_v16, %v829_v16  ;;  %v625_v26 = vadd.f32 %v1261_v17, %v1768_v18  ;;  %v1264_v27 = vadd.f32 %v1263_v24, %v1262_v20  ;;  %v1351_v28 = vpop.f32.mrb[15].mxu1 }
 0x113   :  { %v992_v29 = vld [vmem:[#allocation2 + $0xc] sm:$0xf]  ;;  %v1352_v30 = vadd.f32 %v1351_v28, %v1350_v23 }
 0x114   :  { %993 = vst [vmem:[%s1878_s3 + $0xc] sm:$0xf] %v992_v29  ;;  %950 = vst.msk [vmem:[#allocation2 + $0x14] sm:$0xf] %vm944_vm0, %v1206_v25  ;;  %v754_v31 = vadd.f32 %v1349_v22, %v625_v26  ;;  %v628_v32 = vadd.f32 %v1264_v27, %v1768_v18 }
 0x116   :  { %v830_v33 = vmax.f32 %v754_v31, 0.0  ;;  %v757_v34 = vadd.f32 %v1352_v30, %v628_v32  ;;  %v1265_v35 = vpop.f32.mrb[16].mxu0 }
 0x117   :  { %v1353_v36 = vpop.f32.mrb[16].mxu1  ;;  %v1266_v37 = vpop.f32.mrb[17].mxu0 }
 0x118   :  { %v1207_v38 = vpack.c.bf16 %v830_v33, %v830_v33  ;;  %v831_v39 = vmax.f32 %v757_v34, 0.0  ;;  %v1267_v40 = vadd.f32 %v1266_v37, %v1265_v35  ;;  %v1354_v41 = vpop.f32.mrb[17].mxu1  ;;  %v1268_v42 = vpop.f32.mrb[18].mxu0 }
 0x119   :  { %v994_v43 = vld [vmem:[#allocation2 + $0x10] sm:$0xf]  ;;  %v1355_v44 = vadd.f32 %v1354_v41, %v1353_v36  ;;  %v1356_v45 = vpop.f32.mrb[18].mxu1  ;;  %v1269_v46 = vpop.f32.mrb[19].mxu0 }
 0x11a   :  { %995 = vst [vmem:[%s1878_s3 + $0x10] sm:$0xf] %v994_v43  ;;  %951 = vst.msk [vmem:[#allocation2 + $0x18] sm:$0xf] %vm944_vm0, %v1207_v38  ;;  %v1208_v47 = vpack.c.bf16 %v831_v39, %v831_v39  ;;  %v633_v48 = vadd.f32 %v1267_v40, %v1768_v18  ;;  %v1270_v49 = vadd.f32 %v1269_v46, %v1268_v42  ;;  %v1357_v50 = vpop.f32.mrb[19].mxu1 }
 0x11b   :  { %v996_v51 = vld [vmem:[#allocation2 + $0x14] sm:$0xf]  ;;  %v1358_v52 = vadd.f32 %v1357_v50, %v1356_v45 }
 0x11c   :  { %997 = vst [vmem:[%s1878_s3 + $0x14] sm:$0xf] %v996_v51  ;;  %952 = vst.msk [vmem:[#allocation2 + $0x1c] sm:$0xf] %vm944_vm0, %v1208_v47  ;;  %v762_v53 = vadd.f32 %v1355_v44, %v633_v48  ;;  %v636_v54 = vadd.f32 %v1270_v49, %v1768_v18 }
 0x11e   :  { %v832_v55 = vmax.f32 %v762_v53, 0.0  ;;  %v765_v56 = vadd.f32 %v1358_v52, %v636_v54  ;;  %v1271_v57 = vpop.f32.mrb[20].mxu0 }
 0x11f   :  { %v1359_v58 = vpop.f32.mrb[20].mxu1  ;;  %v1272_v59 = vpop.f32.mrb[21].mxu0 }
 0x120   :  { %v1209_v60 = vpack.c.bf16 %v832_v55, %v832_v55  ;;  %v833_v61 = vmax.f32 %v765_v56, 0.0  ;;  %v1273_v62 = vadd.f32 %v1272_v59, %v1271_v57  ;;  %v1360_v63 = vpop.f32.mrb[21].mxu1  ;;  %v1274_v0 = vpop.f32.mrb[22].mxu0 }
 0x121   :  { %v998_v1 = vld [vmem:[#allocation2 + $0x18] sm:$0xf]  ;;  %v1361_v2 = vadd.f32 %v1360_v63, %v1359_v58  ;;  %v1362_v3 = vpop.f32.mrb[22].mxu1  ;;  %v1275_v4 = vpop.f32.mrb[23].mxu0 }
 0x122   :  { %999 = vst [vmem:[%s1878_s3 + $0x18] sm:$0xf] %v998_v1  ;;  %953 = vst.msk [vmem:[#allocation2 + $0x20] sm:$0xf] %vm944_vm0, %v1209_v60  ;;  %v1210_v5 = vpack.c.bf16 %v833_v61, %v833_v61  ;;  %v641_v6 = vadd.f32 %v1273_v62, %v1768_v18  ;;  %v1276_v7 = vadd.f32 %v1275_v4, %v1274_v0  ;;  %v1363_v8 = vpop.f32.mrb[23].mxu1 }
 0x123   :  { %v1000_v9 = vld [vmem:[#allocation2 + $0x1c] sm:$0xf]  ;;  %v1364_v10 = vadd.f32 %v1363_v8, %v1362_v3 }
 0x124   :  { %1001 = vst [vmem:[%s1878_s3 + $0x1c] sm:$0xf] %v1000_v9  ;;  %954 = vst.msk [vmem:[#allocation2 + $0x24] sm:$0xf] %vm944_vm0, %v1210_v5  ;;  %v770_v11 = vadd.f32 %v1361_v2, %v641_v6  ;;  %v644_v12 = vadd.f32 %v1276_v7, %v1768_v18 }
 0x126   :  { %v834_v13 = vmax.f32 %v770_v11, 0.0  ;;  %v773_v14 = vadd.f32 %v1364_v10, %v644_v12  ;;  %v1277_v15 = vpop.f32.mrb[24].mxu0 }
 0x127   :  { %v1365_v16 = vpop.f32.mrb[24].mxu1  ;;  %v1278_v17 = vpop.f32.mrb[25].mxu0 }
 0x128   :  { %v1211_v19 = vpack.c.bf16 %v834_v13, %v834_v13  ;;  %v835_v20 = vmax.f32 %v773_v14, 0.0  ;;  %v1279_v21 = vadd.f32 %v1278_v17, %v1277_v15  ;;  %v1366_v22 = vpop.f32.mrb[25].mxu1  ;;  %v1280_v23 = vpop.f32.mrb[26].mxu0 }
 0x129   :  { %v1002_v24 = vld [vmem:[#allocation2 + $0x20] sm:$0xf]  ;;  %v1367_v25 = vadd.f32 %v1366_v22, %v1365_v16  ;;  %v1368_v26 = vpop.f32.mrb[26].mxu1  ;;  %v1281_v27 = vpop.f32.mrb[27].mxu0 }
 0x12a   :  { %1003 = vst [vmem:[%s1878_s3 + $0x20] sm:$0xf] %v1002_v24  ;;  %955 = vst.msk [vmem:[#allocation2 + $0x28] sm:$0xf] %vm944_vm0, %v1211_v19  ;;  %v1212_v28 = vpack.c.bf16 %v835_v20, %v835_v20  ;;  %v649_v29 = vadd.f32 %v1279_v21, %v1768_v18  ;;  %v1282_v30 = vadd.f32 %v1281_v27, %v1280_v23  ;;  %v1369_v31 = vpop.f32.mrb[27].mxu1 }
 0x12b   :  { %v1004_v32 = vld [vmem:[#allocation2 + $0x24] sm:$0xf]  ;;  %v1370_v33 = vadd.f32 %v1369_v31, %v1368_v26 }
 0x12c   :  { %1005 = vst [vmem:[%s1878_s3 + $0x24] sm:$0xf] %v1004_v32  ;;  %956 = vst.msk [vmem:[#allocation2 + $0x2c] sm:$0xf] %vm944_vm0, %v1212_v28  ;;  %v778_v34 = vadd.f32 %v1367_v25, %v649_v29  ;;  %v652_v35 = vadd.f32 %v1282_v30, %v1768_v18 }
 0x12e   :  { %v836_v36 = vmax.f32 %v778_v34, 0.0  ;;  %v781_v37 = vadd.f32 %v1370_v33, %v652_v35  ;;  %v1283_v38 = vpop.f32.mrb[28].mxu0 }
 0x12f   :  { %v1371_v39 = vpop.f32.mrb[28].mxu1  ;;  %v1284_v40 = vpop.f32.mrb[29].mxu0 }
 0x130   :  { %v1213_v41 = vpack.c.bf16 %v836_v36, %v836_v36  ;;  %v837_v42 = vmax.f32 %v781_v37, 0.0  ;;  %v1285_v43 = vadd.f32 %v1284_v40, %v1283_v38  ;;  %v1372_v44 = vpop.f32.mrb[29].mxu1  ;;  %v1286_v45 = vpop.f32.mrb[30].mxu0 }
 0x131   :  { %v1006_v46 = vld [vmem:[#allocation2 + $0x28] sm:$0xf]  ;;  %v1373_v47 = vadd.f32 %v1372_v44, %v1371_v39  ;;  %v1374_v48 = vpop.f32.mrb[30].mxu1  ;;  %v1287_v49 = vpop.f32.mrb[31].mxu0 }
 0x132   :  { %1007 = vst [vmem:[%s1878_s3 + $0x28] sm:$0xf] %v1006_v46  ;;  %957 = vst.msk [vmem:[#allocation2 + $0x30] sm:$0xf] %vm944_vm0, %v1213_v41  ;;  %v1214_v50 = vpack.c.bf16 %v837_v42, %v837_v42  ;;  %v657_v51 = vadd.f32 %v1285_v43, %v1768_v18  ;;  %v1288_v52 = vadd.f32 %v1287_v49, %v1286_v45  ;;  %v1375_v53 = vpop.f32.mrb[31].mxu1 }
 0x133   :  { %v1008_v54 = vld [vmem:[#allocation2 + $0x2c] sm:$0xf]  ;;  %v1376_v55 = vadd.f32 %v1375_v53, %v1374_v48 }
 0x134   :  { %1009 = vst [vmem:[%s1878_s3 + $0x2c] sm:$0xf] %v1008_v54  ;;  %958 = vst.msk [vmem:[#allocation2 + $0x34] sm:$0xf] %vm944_vm0, %v1214_v50  ;;  %v786_v56 = vadd.f32 %v1373_v47, %v657_v51  ;;  %v660_v57 = vadd.f32 %v1288_v52, %v1768_v18 }
 0x136   :  { %v838_v58 = vmax.f32 %v786_v56, 0.0  ;;  %v789_v59 = vadd.f32 %v1376_v55, %v660_v57  ;;  %v1289_v60 = vpop.f32.mrb[32].mxu0 }
 0x137   :  { %v1377_v61 = vpop.f32.mrb[32].mxu1  ;;  %v1290_v62 = vpop.f32.mrb[33].mxu0 }
 0x138   :  { %v1215_v63 = vpack.c.bf16 %v838_v58, %v838_v58  ;;  %v839_v0 = vmax.f32 %v789_v59, 0.0  ;;  %v1291_v1 = vadd.f32 %v1290_v62, %v1289_v60  ;;  %v1378_v2 = vpop.f32.mrb[33].mxu1  ;;  %v1292_v3 = vpop.f32.mrb[34].mxu0 }
 0x139   :  { %v1010_v4 = vld [vmem:[#allocation2 + $0x30] sm:$0xf]  ;;  %v1379_v5 = vadd.f32 %v1378_v2, %v1377_v61  ;;  %v1380_v6 = vpop.f32.mrb[34].mxu1  ;;  %v1293_v7 = vpop.f32.mrb[35].mxu0 }
 0x13a   :  { %1011 = vst [vmem:[%s1878_s3 + $0x30] sm:$0xf] %v1010_v4  ;;  %959 = vst.msk [vmem:[#allocation2 + $0x38] sm:$0xf] %vm944_vm0, %v1215_v63  ;;  %v1216_v8 = vpack.c.bf16 %v839_v0, %v839_v0  ;;  %v665_v9 = vadd.f32 %v1291_v1, %v1768_v18  ;;  %v1294_v10 = vadd.f32 %v1293_v7, %v1292_v3  ;;  %v1381_v11 = vpop.f32.mrb[35].mxu1 }
 0x13b   :  { %v1012_v12 = vld [vmem:[#allocation2 + $0x34] sm:$0xf]  ;;  %v1382_v13 = vadd.f32 %v1381_v11, %v1380_v6 }
 0x13c   :  { %1013 = vst [vmem:[%s1878_s3 + $0x34] sm:$0xf] %v1012_v12  ;;  %960 = vst.msk [vmem:[#allocation2 + $0x3c] sm:$0xf] %vm944_vm0, %v1216_v8  ;;  %v794_v14 = vadd.f32 %v1379_v5, %v665_v9  ;;  %v668_v15 = vadd.f32 %v1294_v10, %v1768_v18 }
 0x13e   :  { %v840_v16 = vmax.f32 %v794_v14, 0.0  ;;  %v797_v17 = vadd.f32 %v1382_v13, %v668_v15  ;;  %v1295_v19 = vpop.f32.mrb[36].mxu0 }
 0x13f   :  { %v1383_v20 = vpop.f32.mrb[36].mxu1  ;;  %v1296_v21 = vpop.f32.mrb[37].mxu0 }
 0x140   :  { %v1217_v22 = vpack.c.bf16 %v840_v16, %v840_v16  ;;  %v841_v23 = vmax.f32 %v797_v17, 0.0  ;;  %v1297_v24 = vadd.f32 %v1296_v21, %v1295_v19  ;;  %v1384_v25 = vpop.f32.mrb[37].mxu1  ;;  %v1298_v26 = vpop.f32.mrb[38].mxu0 }
 0x141   :  { %v1014_v27 = vld [vmem:[#allocation2 + $0x38] sm:$0xf]  ;;  %v1385_v28 = vadd.f32 %v1384_v25, %v1383_v20  ;;  %v1386_v29 = vpop.f32.mrb[38].mxu1  ;;  %v1299_v30 = vpop.f32.mrb[39].mxu0 }
 0x142   :  { %1015 = vst [vmem:[%s1878_s3 + $0x38] sm:$0xf] %v1014_v27  ;;  %961 = vst.msk [vmem:[#allocation2 + $0x40] sm:$0xf] %vm944_vm0, %v1217_v22  ;;  %v1218_v31 = vpack.c.bf16 %v841_v23, %v841_v23  ;;  %v673_v32 = vadd.f32 %v1297_v24, %v1768_v18  ;;  %v1300_v33 = vadd.f32 %v1299_v30, %v1298_v26  ;;  %v1387_v34 = vpop.f32.mrb[39].mxu1 }
 0x143   :  { %v1016_v35 = vld [vmem:[#allocation2 + $0x3c] sm:$0xf]  ;;  %v1388_v36 = vadd.f32 %v1387_v34, %v1386_v29 }
 0x144   :  { %1017 = vst [vmem:[%s1878_s3 + $0x3c] sm:$0xf] %v1016_v35  ;;  %962 = vst.msk [vmem:[#allocation2 + $0x44] sm:$0xf] %vm944_vm0, %v1218_v31  ;;  %v802_v37 = vadd.f32 %v1385_v28, %v673_v32  ;;  %v676_v38 = vadd.f32 %v1300_v33, %v1768_v18 }
 0x146   :  { %v842_v39 = vmax.f32 %v802_v37, 0.0  ;;  %v805_v40 = vadd.f32 %v1388_v36, %v676_v38  ;;  %v1301_v41 = vpop.f32.mrb[40].mxu0 }
 0x147   :  { %v1389_v42 = vpop.f32.mrb[40].mxu1  ;;  %v1302_v43 = vpop.f32.mrb[41].mxu0 }
 0x148   :  { %v1219_v44 = vpack.c.bf16 %v842_v39, %v842_v39  ;;  %v843_v45 = vmax.f32 %v805_v40, 0.0  ;;  %v1303_v46 = vadd.f32 %v1302_v43, %v1301_v41  ;;  %v1390_v47 = vpop.f32.mrb[41].mxu1  ;;  %v1304_v48 = vpop.f32.mrb[42].mxu0 }
 0x149   :  { %v1018_v49 = vld [vmem:[#allocation2 + $0x40] sm:$0xf]  ;;  %v1391_v50 = vadd.f32 %v1390_v47, %v1389_v42  ;;  %v1392_v51 = vpop.f32.mrb[42].mxu1  ;;  %v1305_v52 = vpop.f32.mrb[43].mxu0 }
 0x14a   :  { %1019 = vst [vmem:[%s1878_s3 + $0x40] sm:$0xf] %v1018_v49  ;;  %963 = vst.msk [vmem:[#allocation2 + $0x48] sm:$0xf] %vm944_vm0, %v1219_v44  ;;  %v1220_v53 = vpack.c.bf16 %v843_v45, %v843_v45  ;;  %v681_v54 = vadd.f32 %v1303_v46, %v1768_v18  ;;  %v1393_v55 = vpop.f32.mrb[43].mxu1 }
 0x14b   :  { %v1020_v56 = vld [vmem:[#allocation2 + $0x44] sm:$0xf] }
 0x14c   :  { %1021 = vst [vmem:[%s1878_s3 + $0x44] sm:$0xf] %v1020_v56  ;;  %964 = vst.msk [vmem:[#allocation2 + $0x4c] sm:$0xf] %vm944_vm0, %v1220_v53  ;;  %v810_v57 = vadd.f32 %v1391_v50, %v681_v54 }
 0x14e   :  { %v844_v58 = vmax.f32 %v810_v57, 0.0  ;;  %v1307_v59 = vpop.f32.mrb[44].mxu0 }
 0x14f   :  { %v1395_v60 = vpop.f32.mrb[44].mxu1  ;;  %v1308_v61 = vpop.f32.mrb[45].mxu0 }
 0x150   :  { %v1221_v62 = vpack.c.bf16 %v844_v58, %v844_v58  ;;  %v1396_v63 = vpop.f32.mrb[45].mxu1  ;;  %v1310_v0 = vpop.f32.mrb[46].mxu0 }
 0x151   :  { %v1022_v1 = vld [vmem:[#allocation2 + $0x48] sm:$0xf]  ;;  %v1398_v2 = vpop.f32.mrb[46].mxu1  ;;  %v1311_v3 = vpop.f32.mrb[47].mxu0 }
 0x152   :  { %1023 = vst [vmem:[%s1878_s3 + $0x48] sm:$0xf] %v1022_v1  ;;  %965 = vst.msk [vmem:[#allocation2 + $0x50] sm:$0xf] %vm944_vm0, %v1221_v62  ;;  %v1399_v18 = vpop.f32.mrb[47].mxu1 }
 0x153   :  { %v1024_v4 = vld [vmem:[#allocation2 + $0x4c] sm:$0xf] }
 0x154   :  { %1025 = vst [vmem:[%s1878_s3 + $0x4c] sm:$0xf] %v1024_v4 }
 0x159   :  { %v1026_v5 = vld [vmem:[#allocation2 + $0x50] sm:$0xf] }
 0x15a   :  { %1027 = vst [vmem:[%s1878_s3 + $0x50] sm:$0xf] %v1026_v5 }

// kernel: dqn_forward.6
= control target key start
LH: loop header
LB: loop body
LE: loop exit
PB: predicated region body
PF: predicated region fallthrough
CT: control target
= control target key end

     0   :  { %vm558_vm0 = vcmask 523264   ;;  %vm954_vm1 = vcmask 519168   ;;  %s1797_s0 = inlined_call_operand.vmem [shape: bf16[98,576], index: 0, kind: input, shape index: {}]   ;;  %s1798_s1 = inlined_call_operand.vmem [shape: bf16[576,64], index: 1, kind: input, shape index: {}]   ;;  %s1799_s2 = inlined_call_operand.vmem [shape: f32[1,64], index: 2, kind: input, shape index: {}]   ;;  %s1800_s3 = inlined_call_operand.vmem [shape: bf16[98,64], index: 3, kind: output, shape index: {}]  }
   0x1   :  { %v1355_v0 = vld [vmem:[%s1798_s1 + $0x40] sm:$0xff]   ;;  %v1359_v4 = vld [vmem:[%s1798_s1 + $0x48] sm:$0xff]   ;;  %v1363_v8 = vld [vmem:[%s1798_s1 + $0x50] sm:$0xff]  }
   0x2   :  { %v1356_v1 = vld [vmem:[%s1798_s1 + $0xc0] sm:$0xff]   ;;  %1183 = vmatprep.subr.bf16.mxu0 %v1355_v0  ;;  %v1360_v5 = vld [vmem:[%s1798_s1 + $0xc8] sm:$0xff]   ;;  %v1364_v9 = vld [vmem:[%s1798_s1 + $0xd0] sm:$0xff]  }
   0x3   :  { %v1357_v2 = vld [vmem:[%s1798_s1] sm:$0xff]   ;;  %1247 = vmatprep.subr.bf16.mxu1 %v1356_v1  ;;  %v1361_v6 = vld [vmem:[%s1798_s1 + $0x8] sm:$0xff]   ;;  %v1365_v10 = vld [vmem:[%s1798_s1 + $0x10] sm:$0xff]  }
   0x4   :  { %v1358_v3 = vld [vmem:[%s1798_s1 + $0x80] sm:$0xff]   ;;  %1184 = vmatpush3.bf16.msra.mxu0 %v1357_v2  ;;  %v1362_v7 = vld [vmem:[%s1798_s1 + $0x88] sm:$0xff]   ;;  %v1366_v11 = vld [vmem:[%s1798_s1 + $0x90] sm:$0xff]  }
   0x5   :  { %1248 = vmatpush3.bf16.msra.mxu1 %v1358_v3  ;;  %1185 = vmatprep.subr.bf16.mxu0 %v1359_v4  ;;  %v1367_v12 = vld [vmem:[%s1798_s1 + $0x58] sm:$0xff]   ;;  %v1371_v16 = vld [vmem:[%s1798_s1 + $0x60] sm:$0xff]   ;;  %v1375_v20 = vld [vmem:[%s1798_s1 + $0x68] sm:$0xff]  }
   0x6   :  { %1249 = vmatprep.subr.bf16.mxu1 %v1360_v5  ;;  %v1368_v13 = vld [vmem:[%s1798_s1 + $0xd8] sm:$0xff]   ;;  %v1372_v17 = vld [vmem:[%s1798_s1 + $0xe0] sm:$0xff]   ;;  %v1376_v21 = vld [vmem:[%s1798_s1 + $0xe8] sm:$0xff]  }
   0x7   :  { %v1369_v14 = vld [vmem:[%s1798_s1 + $0x18] sm:$0xff]   ;;  %v1373_v18 = vld [vmem:[%s1798_s1 + $0x20] sm:$0xff]   ;;  %v1377_v22 = vld [vmem:[%s1798_s1 + $0x28] sm:$0xff]  }
   0x8   :  { %1186 = vmatpush3.bf16.msra.mxu0 %v1361_v6  ;;  %v1370_v15 = vld [vmem:[%s1798_s1 + $0x98] sm:$0xff]   ;;  %v1374_v19 = vld [vmem:[%s1798_s1 + $0xa0] sm:$0xff]   ;;  %v1378_v23 = vld [vmem:[%s1798_s1 + $0xa8] sm:$0xff]  }
   0x9   :  { %1250 = vmatpush3.bf16.msra.mxu1 %v1362_v7  ;;  %1187 = vmatprep.subr.bf16.mxu0 %v1363_v8  ;;  %v1379_v24 = vld [vmem:[%s1798_s1 + $0x70] sm:$0xff]   ;;  %v1383_v28 = vld [vmem:[%s1798_s1 + $0x78] sm:$0xff]   ;;  %v1392_v35 = vld [vmem:[%s1797_s0 + $0xc] ss:$20 sps:$4 sm:$0xff]  }
   0xa   :  { %1251 = vmatprep.subr.bf16.mxu1 %v1364_v9  ;;  %v1380_v25 = vld [vmem:[%s1798_s1 + $0xf0] sm:$0xff]   ;;  %v1384_v29 = vld [vmem:[%s1798_s1 + $0xf8] sm:$0xff]   ;;  %v1393_v36 = vld [vmem:[%s1798_s1 + $0x100] sm:$0xff]   ;;  %712 = vmatprep.mubr.bf16.mxu1 %v1392_v35 }
   0xb   :  { %v1381_v26 = vld [vmem:[%s1798_s1 + $0x30] sm:$0xff]   ;;  %v1385_v30 = vld [vmem:[%s1798_s1 + $0x38] sm:$0xff]   ;;  %v1394_v37 = vld [vmem:[%s1797_s0 + $0x2c] ss:$20 sps:$4 sm:$0xff]  }
   0xc   :  { %1188 = vmatpush3.bf16.msra.mxu0 %v1365_v10  ;;  %v1382_v27 = vld [vmem:[%s1798_s1 + $0xb0] sm:$0xff]   ;;  %v1386_v31 = vld [vmem:[%s1798_s1 + $0xb8] sm:$0xff]   ;;  %v1406_v42 = vld [vmem:[%s1798_s1 + $0x108] sm:$0xff]  }
   0xd   :  { %1252 = vmatpush3.bf16.msra.mxu1 %v1366_v11  ;;  %1189 = vmatprep.subr.bf16.mxu0 %v1367_v12  ;;  %v1387_v32 = vld [vmem:[%s1797_s0] ss:$20 sps:$4 sm:$0xff]   ;;  %v1389_v33 = vld [vmem:[%s1797_s0 + $0x4] ss:$20 sps:$4 sm:$0xff]   ;;  %v1390_v34 = vld [vmem:[%s1797_s0 + $0x8] ss:$20 sps:$4 sm:$0xff]  }
   0xe   :  { %1253 = vmatprep.subr.bf16.mxu1 %v1368_v13  ;;  %615 = vmatprep.mubr.bf16.mxu0 %v1389_v33  ;;  %v1396_v38 = vld [vmem:[%s1797_s0 + $0x34] ss:$20 sps:$4 sm:$0xff]   ;;  %v1399_v40 = vld [vmem:[%s1797_s0 + $0x30] ss:$20 sps:$4 sm:$0xff]   ;;  %v1405_v45 = vld [vmem:[%s1797_s0 + $0x58] ss:$20 sps:$4 sm:$0xff]  }
   0xf   :  { %v1398_v39 = vld [vmem:[%s1797_s0 + $0x28] ss:$20 sps:$4 sm:$0xff]   ;;  %v1404_v44 = vld [vmem:[%s1797_s0 + $0x50] ss:$20 sps:$4 sm:$0xff]   ;;  %v1411_v50 = vld [vmem:[%s1797_s0 + $0x78] ss:$20 sps:$4 sm:$0xff]  }
  0x10   :  { %1190 = vmatpush3.bf16.msra.mxu0 %v1369_v14  ;;  %v1400_v41 = vld [vmem:[%s1797_s0 + $0x54] ss:$20 sps:$4 sm:$0xff]   ;;  %v1402_v43 = vld [vmem:[%s1797_s0 + $0x5c] ss:$20 sps:$4 sm:$0xff]   ;;  %v1409_v48 = vld [vmem:[%s1797_s0 + $0x84] ss:$20 sps:$4 sm:$0xff]  }
  0x11   :  { %1254 = vmatpush3.bf16.msra.mxu1 %v1370_v15  ;;  %1191 = vmatprep.subr.bf16.mxu0 %v1371_v16  ;;  %v1419_v46 = vld [vmem:[%s1798_s1 + $0x110] sm:$0xff]   ;;  %v1432_v49 = vld [vmem:[%s1798_s1 + $0x118] sm:$0xff]   ;;  %v1415_v53 = vld [vmem:[%s1797_s0 + $0xac] ss:$20 sps:$4 sm:$0xff]  }
  0x12   :  { %1255 = vmatprep.subr.bf16.mxu1 %v1372_v17  ;;  %v1407_v47 = vld [vmem:[%s1797_s0 + $0x7c] ss:$20 sps:$4 sm:$0xff]   ;;  %v1412_v51 = vld [vmem:[%s1797_s0 + $0x80] ss:$20 sps:$4 sm:$0xff]   ;;  %v1413_v52 = vld [vmem:[%s1797_s0 + $0xa4] ss:$20 sps:$4 sm:$0xff]  }
  0x13   :  { %v1417_v54 = vld [vmem:[%s1797_s0 + $0xa0] ss:$20 sps:$4 sm:$0xff]   ;;  %v1418_v55 = vld [vmem:[%s1797_s0 + $0xa8] ss:$20 sps:$4 sm:$0xff]   ;;  %v1425_v59 = vld [vmem:[%s1797_s0 + $0xd0] ss:$20 sps:$4 sm:$0xff]  }
  0x14   :  { %1192 = vmatpush3.bf16.msra.mxu0 %v1373_v18  ;;  %v1420_v56 = vld [vmem:[%s1797_s0 + $0xcc] ss:$20 sps:$4 sm:$0xff]   ;;  %v1422_v57 = vld [vmem:[%s1797_s0 + $0xd4] ss:$20 sps:$4 sm:$0xff]   ;;  %v1428_v61 = vld [vmem:[%s1797_s0 + $0xfc] ss:$20 sps:$4 sm:$0xff]  }
  0x15   :  { %1256 = vmatpush3.bf16.msra.mxu1 %v1374_v19  ;;  %1193 = vmatprep.subr.bf16.mxu0 %v1375_v20  ;;  %v1424_v58 = vld [vmem:[%s1797_s0 + $0xc8] ss:$20 sps:$4 sm:$0xff]   ;;  %v1430_v62 = vld [vmem:[%s1797_s0 + $0xf0] ss:$20 sps:$4 sm:$0xff]   ;;  %v1431_v63 = vld [vmem:[%s1797_s0 + $0xf8] ss:$20 sps:$4 sm:$0xff]  }
  0x16   :  { %1257 = vmatprep.subr.bf16.mxu1 %v1376_v21  ;;  %v1426_v60 = vld [vmem:[%s1797_s0 + $0xf4] ss:$20 sps:$4 sm:$0xff]   ;;  %v1433_v0 = vld [vmem:[%s1797_s0 + $0x11c] ss:$20 sps:$4 sm:$0xff]   ;;  %v1435_v1 = vld [vmem:[%s1797_s0 + $0x124] ss:$20 sps:$4 sm:$0xff]  }
  0x17   :  { %v1437_v2 = vld [vmem:[%s1797_s0 + $0x118] ss:$20 sps:$4 sm:$0xff]   ;;  %v1438_v3 = vld [vmem:[%s1797_s0 + $0x120] ss:$20 sps:$4 sm:$0xff]   ;;  %v1439_v4 = vld [vmem:[%s1797_s0 + $0x10] ss:$20 sps:$4 sm:$0xff]  }
  0x18   :  { %1194 = vmatpush3.bf16.msra.mxu0 %v1377_v22  ;;  %v1440_v5 = vld [vmem:[%s1797_s0 + $0xb0] ss:$20 sps:$4 sm:$0xff]   ;;  %v1441_v6 = vld [vmem:[%s1797_s0 + $0x38] ss:$20 sps:$4 sm:$0xff]   ;;  %v1443_v8 = vld [vmem:[%s1797_s0 + $0x60] ss:$20 sps:$4 sm:$0xff]  }
  0x19   :  { %1258 = vmatpush3.bf16.msra.mxu1 %v1378_v23  ;;  %1195 = vmatprep.subr.bf16.mxu0 %v1379_v24  ;;  %v1442_v7 = vld [vmem:[%s1797_s0 + $0xd8] ss:$20 sps:$4 sm:$0xff]   ;;  %v1444_v9 = vld [vmem:[%s1797_s0 + $0x100] ss:$20 sps:$4 sm:$0xff]   ;;  %v1445_v10 = vld [vmem:[%s1797_s0 + $0x88] ss:$20 sps:$4 sm:$0xff]  }
  0x1a   :  { %1259 = vmatprep.subr.bf16.mxu1 %v1380_v25  ;;  %v1446_v11 = vld [vmem:[%s1797_s0 + $0x128] ss:$20 sps:$4 sm:$0xff]   ;;  %v1706_v14 = vld [vmem:[%s1799_s2] ss:$0 sm:$0xff] }
  0x1c   :  { %1196 = vmatpush3.bf16.msra.mxu0 %v1381_v26 }
  0x1d   :  { %1260 = vmatpush3.bf16.msra.mxu1 %v1382_v27  ;;  %1197 = vmatprep.subr.bf16.mxu0 %v1383_v28 }
  0x1e   :  { %1261 = vmatprep.subr.bf16.mxu1 %v1384_v29 }
  0x20   :  { %1198 = vmatpush3.bf16.msra.mxu0 %v1385_v30 }
  0x21   :  { %1262 = vmatpush3.bf16.msra.mxu1 %v1386_v31  ;;  %1323 = vmatprep.subr.bf16.mxu0 %v1393_v36 }
  0x22   :  { %1347 = vmatprep.subr.bf16.mxu1 %v1393_v36 }
  0x23   :  { %616 = vmatmul.mubr.bf16.vlgmr.msra.gmra.mrb[0].mxu0 %v1387_v32 }
  0x24   :  { %713 = vmatmul.mubr.bf16.vlgmr.msra.gmra.mrb[0].mxu1 %v1390_v34  ;;  %1324 = vmatpush3.bf16.msra.mxu0 %v1393_v36 }
  0x25   :  { %1351 = vmatpush3.bf16.msra.mxu1 %v1393_v36  ;;  %623 = vmatprep.mubr.bf16.mxu0 %v1394_v37 }
  0x26   :  { %720 = vmatprep.mubr.bf16.mxu1 %v1396_v38  ;;  %1325 = vmatprep.subr.bf16.mxu0 %v1406_v42 }
  0x27   :  { %1348 = vmatprep.subr.bf16.mxu1 %v1406_v42 }
  0x28   :  { %1326 = vmatpush3.bf16.msra.mxu0 %v1406_v42 }
  0x29   :  { %1352 = vmatpush3.bf16.msra.mxu1 %v1406_v42  ;;  %1327 = vmatprep.subr.bf16.mxu0 %v1419_v46 }
  0x2a   :  { %1349 = vmatprep.subr.bf16.mxu1 %v1419_v46 }
  0x2b   :  { %624 = vmatmul.mubr.bf16.gmra.mrb[4].mxu0 %v1398_v39 }
  0x2c   :  { %721 = vmatmul.mubr.bf16.gmra.mrb[4].mxu1 %v1399_v40  ;;  %631 = vmatprep.mubr.bf16.mxu0 %v1400_v41 }
  0x2d   :  { %728 = vmatprep.mubr.bf16.mxu1 %v1402_v43  ;;  %1328 = vmatpush3.bf16.msra.mxu0 %v1419_v46 }
  0x2e   :  { %1353 = vmatpush3.bf16.msra.mxu1 %v1419_v46  ;;  %1329 = vmatprep.subr.bf16.mxu0 %v1432_v49 }
  0x2f   :  { %1350 = vmatprep.subr.bf16.mxu1 %v1432_v49 }
  0x31   :  { %1330 = vmatpush3.bf16.msra.mxu0 %v1432_v49 }
  0x32   :  { %1354 = vmatpush3.bf16.msra.mxu1 %v1432_v49 }
  0x33   :  { %632 = vmatmul.mubr.bf16.gmra.mrb[8].mxu0 %v1404_v44 }
  0x34   :  { %729 = vmatmul.mubr.bf16.gmra.mrb[8].mxu1 %v1405_v45  ;;  %639 = vmatprep.mubr.bf16.mxu0 %v1407_v47 }
  0x35   :  { %736 = vmatprep.mubr.bf16.mxu1 %v1409_v48 }
  0x3b   :  { %640 = vmatmul.mubr.bf16.gmra.mrb[12].mxu0 %v1411_v50 }
  0x3c   :  { %737 = vmatmul.mubr.bf16.gmra.mrb[12].mxu1 %v1412_v51  ;;  %647 = vmatprep.mubr.bf16.mxu0 %v1413_v52 }
  0x3d   :  { %744 = vmatprep.mubr.bf16.mxu1 %v1415_v53 }
  0x43   :  { %648 = vmatmul.mubr.bf16.gmra.mrb[16].mxu0 %v1417_v54 }
  0x44   :  { %745 = vmatmul.mubr.bf16.gmra.mrb[16].mxu1 %v1418_v55  ;;  %655 = vmatprep.mubr.bf16.mxu0 %v1420_v56 }
  0x45   :  { %752 = vmatprep.mubr.bf16.mxu1 %v1422_v57 }
  0x4b   :  { %656 = vmatmul.mubr.bf16.gmra.mrb[20].mxu0 %v1424_v58 }
  0x4c   :  { %753 = vmatmul.mubr.bf16.gmra.mrb[20].mxu1 %v1425_v59  ;;  %663 = vmatprep.mubr.bf16.mxu0 %v1426_v60 }
  0x4d   :  { %760 = vmatprep.mubr.bf16.mxu1 %v1428_v61 }
  0x53   :  { %664 = vmatmul.mubr.bf16.gmra.mrb[24].mxu0 %v1430_v62 }
  0x54   :  { %761 = vmatmul.mubr.bf16.gmra.mrb[24].mxu1 %v1431_v63  ;;  %671 = vmatprep.mubr.bf16.mxu0 %v1433_v0 }
  0x55   :  { %768 = vmatprep.mubr.bf16.mxu1 %v1435_v1 }
  0x5b   :  { %672 = vmatmul.mubr.bf16.gmra.mrb[28].mxu0 %v1437_v2 }
  0x5c   :  { %769 = vmatmul.mubr.bf16.gmra.mrb[28].mxu1 %v1438_v3  ;;  %1331 = vmatprep.mubr.msk.bf16.mxu0 %vm558_vm0, %v1439_v4 }
  0x5d   :  { %1339 = vmatprep.mubr.msk.bf16.mxu1 %vm558_vm0, %v1440_v5 }
  0x63   :  { %1332 = vmatmul.mubr.msk.bf16.vlgmr.msra.gmra.mrb[32].mxu0 %vm558_vm0, %v1441_v6 }
  0x64   :  { %1340 = vmatmul.mubr.msk.bf16.vlgmr.msra.gmra.mrb[32].mxu1 %vm558_vm0, %v1442_v7  ;;  %1335 = vmatprep.mubr.msk.bf16.mxu0 %vm558_vm0, %v1443_v8 }
  0x65   :  { %1343 = vmatprep.mubr.msk.bf16.mxu1 %vm558_vm0, %v1444_v9 }
  0x6b   :  { %1336 = vmatmul.mubr.msk.bf16.gmra.mrb[36].mxu0 %vm558_vm0, %v1445_v10 }
  0x6c   :  { %1344 = vmatmul.mubr.msk.bf16.gmra.mrb[36].mxu1 %vm558_vm0, %v1446_v11 }
  0xf6   :  { %v1199_v12 = vpop.f32.mrb[0].mxu0 }
  0xf7   :  { %v1263_v13 = vpop.f32.mrb[0].mxu1  ;;  %v1200_v15 = vpop.f32.mrb[1].mxu0 }
  0xf8   :  { %v1201_v16 = vadd.f32 %v1200_v15, %v1199_v12  ;;  %v1264_v17 = vpop.f32.mrb[1].mxu1  ;;  %v1202_v18 = vpop.f32.mrb[2].mxu0 }
  0xf9   :  { %v1265_v19 = vadd.f32 %v1264_v17, %v1263_v13  ;;  %v1266_v20 = vpop.f32.mrb[2].mxu1  ;;  %v1203_v21 = vpop.f32.mrb[3].mxu0 }
  0xfa   :  { %v618_v22 = vadd.f32 %v1201_v16, %v1706_v14  ;;  %v1204_v23 = vadd.f32 %v1203_v21, %v1202_v18  ;;  %v1267_v24 = vpop.f32.mrb[3].mxu1 }
  0xfb   :  { %v1268_v25 = vadd.f32 %v1267_v24, %v1266_v20 }
  0xfc   :  { %v621_v26 = vadd.f32 %v1204_v23, %v1706_v14  ;;  %v1710_v27 = vadd.f32 %v1265_v19, %v618_v22 }
  0xfe   :  { %v1205_v28 = vpop.f32.mrb[4].mxu0  ;;  %v1712_v29 = vadd.f32 %v1268_v25, %v621_v26 }
  0xff   :  { %v1269_v30 = vpop.f32.mrb[4].mxu1  ;;  %v1206_v31 = vpop.f32.mrb[5].mxu0 }
 0x100   :  { %v1207_v32 = vadd.f32 %v1206_v31, %v1205_v28  ;;  %v1270_v33 = vpop.f32.mrb[5].mxu1  ;;  %v1208_v34 = vpop.f32.mrb[6].mxu0 }
 0x101   :  { %v1271_v35 = vadd.f32 %v1270_v33, %v1269_v30  ;;  %v1272_v36 = vpop.f32.mrb[6].mxu1  ;;  %v1209_v37 = vpop.f32.mrb[7].mxu0 }
 0x102   :  { %v626_v38 = vadd.f32 %v1207_v32, %v1706_v14  ;;  %v1210_v39 = vadd.f32 %v1209_v37, %v1208_v34  ;;  %v1273_v40 = vpop.f32.mrb[7].mxu1 }
 0x103   :  { %v1274_v41 = vadd.f32 %v1273_v40, %v1272_v36 }
 0x104   :  { %v629_v42 = vadd.f32 %v1210_v39, %v1706_v14  ;;  %v1716_v43 = vadd.f32 %v1271_v35, %v626_v38 }
 0x106   :  { %v1211_v44 = vpop.f32.mrb[8].mxu0  ;;  %v1718_v45 = vadd.f32 %v1274_v41, %v629_v42 }
 0x107   :  { %v1275_v46 = vpop.f32.mrb[8].mxu1  ;;  %v1212_v47 = vpop.f32.mrb[9].mxu0 }
 0x108   :  { %v1213_v48 = vadd.f32 %v1212_v47, %v1211_v44  ;;  %v1276_v49 = vpop.f32.mrb[9].mxu1  ;;  %v1214_v50 = vpop.f32.mrb[10].mxu0 }
 0x109   :  { %v1277_v51 = vadd.f32 %v1276_v49, %v1275_v46  ;;  %v1278_v52 = vpop.f32.mrb[10].mxu1  ;;  %v1215_v53 = vpop.f32.mrb[11].mxu0 }
 0x10a   :  { %v634_v54 = vadd.f32 %v1213_v48, %v1706_v14  ;;  %v1216_v55 = vadd.f32 %v1215_v53, %v1214_v50  ;;  %v1279_v56 = vpop.f32.mrb[11].mxu1 }
 0x10b   :  { %v1280_v57 = vadd.f32 %v1279_v56, %v1278_v52 }
 0x10c   :  { %v637_v58 = vadd.f32 %v1216_v55, %v1706_v14  ;;  %v1722_v59 = vadd.f32 %v1277_v51, %v634_v54 }
 0x10e   :  { %v1217_v60 = vpop.f32.mrb[12].mxu0  ;;  %v1724_v61 = vadd.f32 %v1280_v57, %v637_v58 }
 0x10f   :  { %v1281_v62 = vpop.f32.mrb[12].mxu1  ;;  %v1218_v63 = vpop.f32.mrb[13].mxu0 }
 0x110   :  { %v1219_v0 = vadd.f32 %v1218_v63, %v1217_v60  ;;  %v1282_v1 = vpop.f32.mrb[13].mxu1  ;;  %v1220_v2 = vpop.f32.mrb[14].mxu0 }
 0x111   :  { %v1283_v3 = vadd.f32 %v1282_v1, %v1281_v62  ;;  %v1284_v4 = vpop.f32.mrb[14].mxu1  ;;  %v1221_v5 = vpop.f32.mrb[15].mxu0 }
 0x112   :  { %v642_v6 = vadd.f32 %v1219_v0, %v1706_v14  ;;  %v1222_v7 = vadd.f32 %v1221_v5, %v1220_v2  ;;  %v1285_v8 = vpop.f32.mrb[15].mxu1 }
 0x113   :  { %v1286_v9 = vadd.f32 %v1285_v8, %v1284_v4 }
 0x114   :  { %v645_v10 = vadd.f32 %v1222_v7, %v1706_v14  ;;  %v1728_v11 = vadd.f32 %v1283_v3, %v642_v6 }
 0x116   :  { %v1223_v12 = vpop.f32.mrb[16].mxu0  ;;  %v1730_v13 = vadd.f32 %v1286_v9, %v645_v10 }
 0x117   :  { %v1287_v15 = vpop.f32.mrb[16].mxu1  ;;  %v1224_v16 = vpop.f32.mrb[17].mxu0 }
 0x118   :  { %v1225_v17 = vadd.f32 %v1224_v16, %v1223_v12  ;;  %v1288_v18 = vpop.f32.mrb[17].mxu1  ;;  %v1226_v19 = vpop.f32.mrb[18].mxu0 }
 0x119   :  { %v1289_v20 = vadd.f32 %v1288_v18, %v1287_v15  ;;  %v1290_v21 = vpop.f32.mrb[18].mxu1  ;;  %v1227_v22 = vpop.f32.mrb[19].mxu0 }
 0x11a   :  { %v650_v23 = vadd.f32 %v1225_v17, %v1706_v14  ;;  %v1228_v24 = vadd.f32 %v1227_v22, %v1226_v19  ;;  %v1291_v25 = vpop.f32.mrb[19].mxu1 }
 0x11b   :  { %v1292_v26 = vadd.f32 %v1291_v25, %v1290_v21 }
 0x11c   :  { %v653_v28 = vadd.f32 %v1228_v24, %v1706_v14  ;;  %v747_v30 = vadd.f32 %v1289_v20, %v650_v23 }
 0x11e   :  { %v1229_v31 = vpop.f32.mrb[20].mxu0  ;;  %v750_v32 = vadd.f32 %v1292_v26, %v653_v28 }
 0x11f   :  { %v1293_v33 = vpop.f32.mrb[20].mxu1  ;;  %v1230_v34 = vpop.f32.mrb[21].mxu0 }
 0x120   :  { %v1231_v35 = vadd.f32 %v1230_v34, %v1229_v31  ;;  %v1294_v36 = vpop.f32.mrb[21].mxu1  ;;  %v1232_v37 = vpop.f32.mrb[22].mxu0 }
 0x121   :  { %v1295_v38 = vadd.f32 %v1294_v36, %v1293_v33  ;;  %v1296_v39 = vpop.f32.mrb[22].mxu1  ;;  %v1233_v40 = vpop.f32.mrb[23].mxu0 }
 0x122   :  { %v658_v41 = vadd.f32 %v1231_v35, %v1706_v14  ;;  %v1234_v42 = vadd.f32 %v1233_v40, %v1232_v37  ;;  %v1297_v44 = vpop.f32.mrb[23].mxu1 }
 0x123   :  { %v1298_v46 = vadd.f32 %v1297_v44, %v1296_v39 }
 0x124   :  { %v661_v47 = vadd.f32 %v1234_v42, %v1706_v14  ;;  %v755_v48 = vadd.f32 %v1295_v38, %v658_v41 }
 0x126   :  { %v1235_v49 = vpop.f32.mrb[24].mxu0  ;;  %v758_v50 = vadd.f32 %v1298_v46, %v661_v47 }
 0x127   :  { %v1299_v51 = vpop.f32.mrb[24].mxu1  ;;  %v1236_v52 = vpop.f32.mrb[25].mxu0 }
 0x128   :  { %v1237_v53 = vadd.f32 %v1236_v52, %v1235_v49  ;;  %v1300_v54 = vpop.f32.mrb[25].mxu1  ;;  %v1238_v55 = vpop.f32.mrb[26].mxu0 }
 0x129   :  { %v1301_v56 = vadd.f32 %v1300_v54, %v1299_v51  ;;  %v1302_v57 = vpop.f32.mrb[26].mxu1  ;;  %v1239_v58 = vpop.f32.mrb[27].mxu0 }
 0x12a   :  { %v666_v60 = vadd.f32 %v1237_v53, %v1706_v14  ;;  %v1303_v62 = vpop.f32.mrb[27].mxu1 }
 0x12c   :  { %v763_v63 = vadd.f32 %v1301_v56, %v666_v60 }
 0x12e   :  { %v1241_v0 = vpop.f32.mrb[28].mxu0 }
 0x12f   :  { %v1305_v1 = vpop.f32.mrb[28].mxu1  ;;  %v1242_v2 = vpop.f32.mrb[29].mxu0 }
 0x130   :  { %v1306_v3 = vpop.f32.mrb[29].mxu1  ;;  %v1244_v4 = vpop.f32.mrb[30].mxu0 }
 0x131   :  { %v1308_v5 = vpop.f32.mrb[30].mxu1  ;;  %v1245_v6 = vpop.f32.mrb[31].mxu0 }
 0x132   :  { %v1309_v7 = vpop.f32.mrb[31].mxu1 }
 0x136   :  { %v1333_v8 = vpop.f32.mrb[32].mxu0 }
 0x137   :  { %v820_v9 = vadd.f32 %v1333_v8, %v1716_v43  ;;  %v1341_v10 = vpop.f32.mrb[32].mxu1  ;;  %v811_v12 = vpop.f32.mrb[33].mxu0 }
 0x138   :  { %v852_v15 = vadd.f32 %v1341_v10, %v755_v48  ;;  %v812_v16 = vadd.f32 %v811_v12, %v1710_v27  ;;  %v843_v17 = vpop.f32.mrb[33].mxu1  ;;  %v1334_v14 = vpop.f32.mrb[34].mxu0 }
 0x139   :  { %v876_v18 = vmax.f32 %v820_v9, 0.0  ;;  %v844_v19 = vadd.f32 %v843_v17, %v747_v30  ;;  %v823_v20 = vadd.f32 %v1334_v14, %v1718_v45  ;;  %v1342_v21 = vpop.f32.mrb[34].mxu1  ;;  %v814_v22 = vpop.f32.mrb[35].mxu0 }
 0x13a   :  { %v884_v23 = vmax.f32 %v852_v15, 0.0  ;;  %v874_v24 = vmax.f32 %v812_v16, 0.0  ;;  %v855_v25 = vadd.f32 %v1342_v21, %v758_v50  ;;  %v815_v26 = vadd.f32 %v814_v22, %v1712_v29  ;;  %v846_v43 = vpop.f32.mrb[35].mxu1 }
 0x13b   :  { %v1169_v28 = vpack.c.bf16 %v876_v18, %v876_v18  ;;  %v882_v31 = vmax.f32 %v844_v19, 0.0  ;;  %v877_v33 = vmax.f32 %v823_v20, 0.0  ;;  %v847_v34 = vadd.f32 %v846_v43, %v750_v32 }
 0x13c   :  { %v1177_v27 = vpack.c.bf16 %v884_v23, %v884_v23  ;;  %v1167_v35 = vpack.c.bf16 %v874_v24, %v874_v24  ;;  %v885_v36 = vmax.f32 %v855_v25, 0.0  ;;  %v875_v37 = vmax.f32 %v815_v26, 0.0 }
 0x13d   :  { %957 = vst.msk [vmem:[#allocation2 + $0x8] sm:$0xf] %vm954_vm1, %v1169_v28  ;;  %v1175_v30 = vpack.c.bf16 %v882_v31, %v882_v31  ;;  %v1170_v45 = vpack.c.bf16 %v877_v33, %v877_v33  ;;  %v883_v38 = vmax.f32 %v847_v34, 0.0 }
 0x13e   :  { %965 = vst.msk [vmem:[#allocation2 + $0x28] sm:$0xf] %vm954_vm1, %v1177_v27  ;;  %955 = vst.msk [vmem:[#allocation2] sm:$0xf] %vm954_vm1, %v1167_v35  ;;  %v1178_v39 = vpack.c.bf16 %v885_v36, %v885_v36  ;;  %v1168_v29 = vpack.c.bf16 %v875_v37, %v875_v37  ;;  %v1337_v40 = vpop.f32.mrb[36].mxu0 }
 0x13f   :  { %963 = vst.msk [vmem:[#allocation2 + $0x20] sm:$0xf] %vm954_vm1, %v1175_v30  ;;  %958 = vst.msk [vmem:[#allocation2 + $0xc] sm:$0xf] %vm954_vm1, %v1170_v45  ;;  %v1176_v32 = vpack.c.bf16 %v883_v38, %v883_v38  ;;  %v836_v41 = vadd.f32 %v1337_v40, %v1728_v11  ;;  %v1345_v42 = vpop.f32.mrb[36].mxu1  ;;  %v827_v44 = vpop.f32.mrb[37].mxu0 }
 0x140   :  { %966 = vst.msk [vmem:[#allocation2 + $0x2c] sm:$0xf] %vm954_vm1, %v1178_v39  ;;  %956 = vst.msk [vmem:[#allocation2 + $0x4] sm:$0xf] %vm954_vm1, %v1168_v29  ;;  %v828_v46 = vadd.f32 %v827_v44, %v1722_v59  ;;  %v859_v47 = vpop.f32.mrb[37].mxu1  ;;  %v1338_v48 = vpop.f32.mrb[38].mxu0 }
 0x141   :  { %964 = vst.msk [vmem:[#allocation2 + $0x24] sm:$0xf] %vm954_vm1, %v1176_v32  ;;  %v880_v49 = vmax.f32 %v836_v41, 0.0  ;;  %v860_v50 = vadd.f32 %v859_v47, %v763_v63  ;;  %v839_v51 = vadd.f32 %v1338_v48, %v1730_v13  ;;  %v1346_v52 = vpop.f32.mrb[38].mxu1  ;;  %v830_v53 = vpop.f32.mrb[39].mxu0 }
 0x142   :  { %v878_v54 = vmax.f32 %v828_v46, 0.0  ;;  %v831_v11 = vadd.f32 %v830_v53, %v1724_v61  ;;  %v862_v55 = vpop.f32.mrb[39].mxu1 }
 0x143   :  { %v1173_v56 = vpack.c.bf16 %v880_v49, %v880_v49  ;;  %v886_v57 = vmax.f32 %v860_v50, 0.0  ;;  %v881_v58 = vmax.f32 %v839_v51, 0.0 }
 0x144   :  { %v992_v60 = vld [vmem:[#allocation2 + $0x8] sm:$0xf]  ;;  %v1171_v62 = vpack.c.bf16 %v878_v54, %v878_v54  ;;  %v879_v59 = vmax.f32 %v831_v11, 0.0 }
 0x145   :  { %993 = vst [vmem:[%s1800_s3 + $0x8] sm:$0xf] %v992_v60  ;;  %v1008_v0 = vld [vmem:[#allocation2 + $0x28] sm:$0xf]  ;;  %v988_v63 = vld [vmem:[#allocation2] sm:$0xf]  ;;  %v1179_v13 = vpack.c.bf16 %v886_v57, %v886_v57  ;;  %v1174_v1 = vpack.c.bf16 %v881_v58, %v881_v58 }
 0x146   :  { %961 = vst.msk [vmem:[#allocation2 + $0x18] sm:$0xf] %vm954_vm1, %v1173_v56  ;;  %1009 = vst [vmem:[%s1800_s3 + $0x28] sm:$0xf] %v1008_v0  ;;  %v1004_v61 = vld [vmem:[#allocation2 + $0x20] sm:$0xf]  ;;  %v1172_v3 = vpack.c.bf16 %v879_v59, %v879_v59 }
 0x147   :  { %989 = vst [vmem:[%s1800_s3] sm:$0xf] %v988_v63  ;;  %v994_v2 = vld [vmem:[#allocation2 + $0xc] sm:$0xf]  ;;  %959 = vst.msk [vmem:[#allocation2 + $0x10] sm:$0xf] %vm954_vm1, %v1171_v62 }
 0x148   :  { %1005 = vst [vmem:[%s1800_s3 + $0x20] sm:$0xf] %v1004_v61  ;;  %995 = vst [vmem:[%s1800_s3 + $0xc] sm:$0xf] %v994_v2  ;;  %v1010_v4 = vld [vmem:[#allocation2 + $0x2c] sm:$0xf] }
 0x149   :  { %v990_v5 = vld [vmem:[#allocation2 + $0x4] sm:$0xf]  ;;  %967 = vst.msk [vmem:[#allocation2 + $0x30] sm:$0xf] %vm954_vm1, %v1179_v13  ;;  %962 = vst.msk [vmem:[#allocation2 + $0x1c] sm:$0xf] %vm954_vm1, %v1174_v1 }
 0x14a   :  { %1011 = vst [vmem:[%s1800_s3 + $0x2c] sm:$0xf] %v1010_v4  ;;  %991 = vst [vmem:[%s1800_s3 + $0x4] sm:$0xf] %v990_v5  ;;  %v1006_v6 = vld [vmem:[#allocation2 + $0x24] sm:$0xf] }
 0x14b   :  { %960 = vst.msk [vmem:[#allocation2 + $0x14] sm:$0xf] %vm954_vm1, %v1172_v3  ;;  %1007 = vst [vmem:[%s1800_s3 + $0x24] sm:$0xf] %v1006_v6 }
 0x14d   :  { %v1000_v7 = vld [vmem:[#allocation2 + $0x18] sm:$0xf] }
 0x14e   :  { %1001 = vst [vmem:[%s1800_s3 + $0x18] sm:$0xf] %v1000_v7  ;;  %v996_v8 = vld [vmem:[#allocation2 + $0x10] sm:$0xf] }
 0x14f   :  { %997 = vst [vmem:[%s1800_s3 + $0x10] sm:$0xf] %v996_v8 }
 0x150   :  { %v1012_v9 = vld [vmem:[#allocation2 + $0x30] sm:$0xf]  ;;  %v1002_v10 = vld [vmem:[#allocation2 + $0x1c] sm:$0xf] }
 0x151   :  { %1013 = vst [vmem:[%s1800_s3 + $0x30] sm:$0xf] %v1012_v9  ;;  %1003 = vst [vmem:[%s1800_s3 + $0x1c] sm:$0xf] %v1002_v10 }
 0x152   :  { %v998_v12 = vld [vmem:[#allocation2 + $0x14] sm:$0xf] }
 0x153   :  { %999 = vst [vmem:[%s1800_s3 + $0x14] sm:$0xf] %v998_v12 }

// kernel: dqn_forward.7
= control target key start
LH: loop header
LB: loop body
LE: loop exit
PB: predicated region body
PF: predicated region fallthrough
CT: control target
= control target key end

     0   :  { %10 = vsyncpa [#allocation3], 0  ;;  %v872_v38 = vlaneseq  ;;  %v10030_v39 = vmov 1966171168   ;;  %vm5838_vm0 = vcmask 523264   ;;  %s12984_s0 = inlined_call_operand.vmem [shape: bf16[2,3136], index: 0, kind: input, shape index: {}]   ;;  %s12985_s1 = inlined_call_operand.vmem [shape: bf16[3136,512], index: 1, kind: input, shape index: {}]   ;;  %s12986_s2 = inlined_call_operand.vmem [shape: f32[1,512], index: 2, kind: input, shape index: {}]   ;;  %s12987_s3 = inlined_call_operand.vmem [shape: bf16[512,128], index: 3, kind: input, shape index: {}]   ;;  %s12988_s4 = inlined_call_operand.vmem [shape: f32[1,128], index: 4, kind: input, shape index: {}]   ;;  %s12989_s5 = inlined_call_operand.hbm [shape: f32[2,128], index: 5, kind: output, shape index: {}]  }
   0x1   :  { %v8718_v0 = vld [vmem:[%s12985_s1 + $0x4] ss:$16 sps:$4 sm:$0xff]   ;;  %v8720_v1 = vld [vmem:[%s12985_s1 + $0xc] ss:$16 sps:$4 sm:$0xff]   ;;  %v8722_v2 = vld [vmem:[%s12985_s1] ss:$16 sps:$4 sm:$0xff]   ;;  %v965_v40 = vunpack.c.l.s4 %v10030_v39 }
   0x2   :  { %v8723_v3 = vld [vmem:[%s12985_s1 + $0x8] ss:$16 sps:$4 sm:$0xff]   ;;  %5845 = vmatprep.subr.bf16.mxu0 %v8718_v0  ;;  %v8724_v4 = vld [vmem:[%s12985_s1 + $0x24] ss:$16 sps:$4 sm:$0xff]   ;;  %6534 = vmatprep.subr.bf16.mxu1 %v8720_v1  ;;  %v8726_v5 = vld [vmem:[%s12985_s1 + $0x2c] ss:$16 sps:$4 sm:$0xff]  }
   0x3   :  { %5846 = vmatpush1.bf16.msra.mxu0 %v8722_v2  ;;  %6535 = vmatpush1.bf16.msra.mxu1 %v8723_v3  ;;  %v8728_v6 = vld [vmem:[%s12985_s1 + $0x20] ss:$16 sps:$4 sm:$0xff]   ;;  %v8729_v7 = vld [vmem:[%s12985_s1 + $0x28] ss:$16 sps:$4 sm:$0xff]   ;;  %v8730_v8 = vld [vmem:[%s12985_s1 + $0x44] ss:$16 sps:$4 sm:$0xff]   ;;  %v966_v47 = vunpack.c.0.s8 %v965_v40 }
   0x4   :  { %5847 = vmatprep.subr.bf16.mxu0 %v8724_v4  ;;  %6536 = vmatprep.subr.bf16.mxu1 %v8726_v5  ;;  %v8732_v9 = vld [vmem:[%s12985_s1 + $0x4c] ss:$16 sps:$4 sm:$0xff]   ;;  %v8734_v10 = vld [vmem:[%s12985_s1 + $0x40] ss:$16 sps:$4 sm:$0xff]   ;;  %v8735_v11 = vld [vmem:[%s12985_s1 + $0x48] ss:$16 sps:$4 sm:$0xff]  }
   0x5   :  { %v8736_v12 = vld [vmem:[%s12985_s1 + $0x64] ss:$16 sps:$4 sm:$0xff]   ;;  %v8738_v13 = vld [vmem:[%s12985_s1 + $0x6c] ss:$16 sps:$4 sm:$0xff]   ;;  %v8740_v14 = vld [vmem:[%s12985_s1 + $0x60] ss:$16 sps:$4 sm:$0xff]  }
   0x6   :  { %v8741_v15 = vld [vmem:[%s12985_s1 + $0x68] ss:$16 sps:$4 sm:$0xff]   ;;  %v8742_v16 = vld [vmem:[%s12985_s1 + $0x84] ss:$16 sps:$4 sm:$0xff]   ;;  %v8744_v17 = vld [vmem:[%s12985_s1 + $0x8c] ss:$16 sps:$4 sm:$0xff]  }
   0x7   :  { %5848 = vmatpush1.bf16.msra.mxu0 %v8728_v6  ;;  %6537 = vmatpush1.bf16.msra.mxu1 %v8729_v7  ;;  %v8746_v18 = vld [vmem:[%s12985_s1 + $0x80] ss:$16 sps:$4 sm:$0xff]   ;;  %v8747_v19 = vld [vmem:[%s12985_s1 + $0x88] ss:$16 sps:$4 sm:$0xff]   ;;  %v8748_v20 = vld [vmem:[%s12985_s1 + $0xa4] ss:$16 sps:$4 sm:$0xff]  }
   0x8   :  { %5849 = vmatprep.subr.bf16.mxu0 %v8730_v8  ;;  %6538 = vmatprep.subr.bf16.mxu1 %v8732_v9  ;;  %v8750_v21 = vld [vmem:[%s12985_s1 + $0xac] ss:$16 sps:$4 sm:$0xff]   ;;  %v8752_v22 = vld [vmem:[%s12985_s1 + $0xa0] ss:$16 sps:$4 sm:$0xff]   ;;  %v8753_v23 = vld [vmem:[%s12985_s1 + $0xa8] ss:$16 sps:$4 sm:$0xff]  }
   0x9   :  { %v8754_v24 = vld [vmem:[%s12985_s1 + $0xc4] ss:$16 sps:$4 sm:$0xff]   ;;  %v8756_v25 = vld [vmem:[%s12985_s1 + $0xcc] ss:$16 sps:$4 sm:$0xff]   ;;  %v8758_v26 = vld [vmem:[%s12985_s1 + $0xc0] ss:$16 sps:$4 sm:$0xff]  }
   0xa   :  { %v8759_v27 = vld [vmem:[%s12985_s1 + $0xc8] ss:$16 sps:$4 sm:$0xff]   ;;  %v8760_v28 = vld [vmem:[%s12985_s1 + $0xe4] ss:$16 sps:$4 sm:$0xff]   ;;  %v8762_v29 = vld [vmem:[%s12985_s1 + $0xec] ss:$16 sps:$4 sm:$0xff]  }
   0xb   :  { %5850 = vmatpush1.bf16.msra.mxu0 %v8734_v10  ;;  %6539 = vmatpush1.bf16.msra.mxu1 %v8735_v11  ;;  %v8764_v30 = vld [vmem:[%s12985_s1 + $0xe0] ss:$16 sps:$4 sm:$0xff]   ;;  %v8765_v31 = vld [vmem:[%s12985_s1 + $0xe8] ss:$16 sps:$4 sm:$0xff]   ;;  %v8766_v32 = vld [vmem:[%s12985_s1 + $0x104] ss:$16 sps:$4 sm:$0xff]  }
   0xc   :  { %5851 = vmatprep.subr.bf16.mxu0 %v8736_v12  ;;  %6540 = vmatprep.subr.bf16.mxu1 %v8738_v13  ;;  %v8768_v33 = vld [vmem:[%s12985_s1 + $0x10c] ss:$16 sps:$4 sm:$0xff]   ;;  %v8770_v34 = vld [vmem:[%s12985_s1 + $0x100] ss:$16 sps:$4 sm:$0xff]   ;;  %v8771_v35 = vld [vmem:[%s12985_s1 + $0x108] ss:$16 sps:$4 sm:$0xff]  }
   0xd   :  { %v8772_v36 = vld [vmem:[%s12985_s1 + $0x124] ss:$16 sps:$4 sm:$0xff]   ;;  %v8774_v37 = vld [vmem:[%s12985_s1 + $0x12c] ss:$16 sps:$4 sm:$0xff]   ;;  %v8776_v41 = vld [vmem:[%s12985_s1 + $0x120] ss:$16 sps:$4 sm:$0xff]  }
   0xe   :  { %v8777_v42 = vld [vmem:[%s12985_s1 + $0x128] ss:$16 sps:$4 sm:$0xff]   ;;  %v8778_v43 = vld [vmem:[%s12985_s1 + $0x144] ss:$16 sps:$4 sm:$0xff]   ;;  %v8780_v44 = vld [vmem:[%s12985_s1 + $0x14c] ss:$16 sps:$4 sm:$0xff]  }
   0xf   :  { %5852 = vmatpush1.bf16.msra.mxu0 %v8740_v14  ;;  %6541 = vmatpush1.bf16.msra.mxu1 %v8741_v15  ;;  %v8782_v45 = vld [vmem:[%s12985_s1 + $0x140] ss:$16 sps:$4 sm:$0xff]   ;;  %v10194_v46 = vshrl.u32 %v872_v38, 7  ;;  %v8783_v48 = vld [vmem:[%s12985_s1 + $0x148] ss:$16 sps:$4 sm:$0xff]  }
  0x10   :  { %5853 = vmatprep.subr.bf16.mxu0 %v8742_v16  ;;  %6542 = vmatprep.subr.bf16.mxu1 %v8744_v17  ;;  %v8784_v49 = vld [vmem:[%s12985_s1 + $0x164] ss:$16 sps:$4 sm:$0xff]   ;;  %v8786_v50 = vld [vmem:[%s12985_s1 + $0x16c] ss:$16 sps:$4 sm:$0xff]   ;;  %v8788_v51 = vld [vmem:[%s12985_s1 + $0x160] ss:$16 sps:$4 sm:$0xff]  }
  0x11   :  { %v8789_v52 = vld [vmem:[%s12985_s1 + $0x168] ss:$16 sps:$4 sm:$0xff]   ;;  %v8790_v53 = vld [vmem:[%s12985_s1 + $0x184] ss:$16 sps:$4 sm:$0xff]   ;;  %v10215_v54 = vsub.s32 %v966_v47, %v10194_v46  ;;  %v8792_v56 = vld [vmem:[%s12985_s1 + $0x18c] ss:$16 sps:$4 sm:$0xff]  }
  0x12   :  { %v8814_v55 = vld [vmem:[%s12984_s0] ss:$25 sps:$4 sm:$0xff]   ;;  %v8817_v57 = vld [vmem:[%s12984_s0 + $0x32] ss:$25 sps:$4 sm:$0xff]  }
  0x13   :  { %5854 = vmatpush1.bf16.msra.mxu0 %v8746_v18  ;;  %6543 = vmatpush1.bf16.msra.mxu1 %v8747_v19  ;;  %v8820_v58 = vld [vmem:[%s12984_s0 + $0x64] ss:$25 sps:$4 sm:$0xff]   ;;  %v8823_v59 = vld [vmem:[%s12984_s0 + $0x96] ss:$25 sps:$4 sm:$0xff]   ;;  %v970_v60 = vrot.slane %v8814_v55, %v10215_v54  ;;  %v984_v62 = vrot.slane %v8817_v57, %v10215_v54 }
  0x14   :  { %5855 = vmatprep.subr.bf16.mxu0 %v8748_v20  ;;  %6544 = vmatprep.subr.bf16.mxu1 %v8750_v21  ;;  %v8794_v61 = vld [vmem:[%s12985_s1 + $0x180] ss:$16 sps:$4 sm:$0xff]   ;;  %v8795_v63 = vld [vmem:[%s12985_s1 + $0x188] ss:$16 sps:$4 sm:$0xff]   ;;  %v8796_v0 = vld [vmem:[%s12985_s1 + $0x1a4] ss:$16 sps:$4 sm:$0xff]   ;;  %v998_v1 = vrot.slane %v8820_v58, %v10215_v54  ;;  %v1012_v2 = vrot.slane %v8823_v59, %v10215_v54 }
  0x15   :  { %v8798_v3 = vld [vmem:[%s12985_s1 + $0x1ac] ss:$16 sps:$4 sm:$0xff]   ;;  %v1021_v4 = vcombine.high %v970_v60, %v984_v62  ;;  %v1020_v5 = vcombine.low %v970_v60, %v984_v62  ;;  %v8800_v8 = vld [vmem:[%s12985_s1 + $0x1a0] ss:$16 sps:$4 sm:$0xff]   ;;  %v8801_v10 = vld [vmem:[%s12985_s1 + $0x1a8] ss:$16 sps:$4 sm:$0xff]  }
  0x16   :  { %v1025_v6 = vcombine.high %v998_v1, %v1012_v2  ;;  %v1024_v7 = vcombine.low %v998_v1, %v1012_v2  ;;  %v8802_v11 = vld [vmem:[%s12985_s1 + $0x1c4] ss:$16 sps:$4 sm:$0xff]   ;;  %v8804_v15 = vld [vmem:[%s12985_s1 + $0x1cc] ss:$16 sps:$4 sm:$0xff]   ;;  %v8806_v18 = vld [vmem:[%s12985_s1 + $0x1c0] ss:$16 sps:$4 sm:$0xff]  }
  0x17   :  { %5856 = vmatpush1.bf16.msra.mxu0 %v8752_v22  ;;  %6545 = vmatpush1.bf16.msra.mxu1 %v8753_v23  ;;  %v10252_v9 = vrot.slane %v1021_v4, %v10215_v54  ;;  %v1034_v13 = vrot.slane %v1020_v5, %v10215_v54  ;;  %v8807_v19 = vld [vmem:[%s12985_s1 + $0x1c8] ss:$16 sps:$4 sm:$0xff]   ;;  %v8808_v20 = vld [vmem:[%s12985_s1 + $0x1e4] ss:$16 sps:$4 sm:$0xff]   ;;  %v8810_v21 = vld [vmem:[%s12985_s1 + $0x1ec] ss:$16 sps:$4 sm:$0xff]  }
  0x18   :  { %5857 = vmatprep.subr.bf16.mxu0 %v8754_v24  ;;  %6546 = vmatprep.subr.bf16.mxu1 %v8756_v25  ;;  %v10261_v12 = vrot.slane %v1025_v6, %v10215_v54  ;;  %v1062_v14 = vrot.slane %v1024_v7, %v10215_v54  ;;  %v8812_v22 = vld [vmem:[%s12985_s1 + $0x1e0] ss:$16 sps:$4 sm:$0xff]   ;;  %v8813_v23 = vld [vmem:[%s12985_s1 + $0x1e8] ss:$16 sps:$4 sm:$0xff]   ;;  %v8828_v24 = vld [vmem:[%s12985_s1 + $0x204] ss:$16 sps:$4 sm:$0xff]  }
  0x19   :  { %v8831_v25 = vld [vmem:[%s12985_s1 + $0x20c] ss:$16 sps:$4 sm:$0xff]   ;;  %v8844_v39 = vld [vmem:[%s12985_s1 + $0x260] ss:$16 sps:$4 sm:$0xff]   ;;  %v8847_v40 = vld [vmem:[%s12985_s1 + $0x268] ss:$16 sps:$4 sm:$0xff]  }
  0x1a   :  { %v1088_v16 = vcombine.low %v10252_v9, %v10261_v12  ;;  %v10270_v17 = vcombine.high %v1034_v13, %v1062_v14  ;;  %v8849_v38 = vld [vmem:[%s12985_s1 + $0x26c] ss:$16 sps:$4 sm:$0xff]   ;;  %v8870_v55 = vld [vmem:[%s12985_s1 + $0x2e4] ss:$16 sps:$4 sm:$0xff]   ;;  %v8868_v1 = vld [vmem:[%s12985_s1 + $0x2e0] ss:$16 sps:$4 sm:$0xff]  }
  0x1b   :  { %5858 = vmatpush1.bf16.msra.mxu0 %v8758_v26  ;;  %6547 = vmatpush1.bf16.msra.mxu1 %v8759_v27  ;;  %v1084_v26 = vcombine.low %v1034_v13, %v1062_v14  ;;  %v8826_v27 = vld [vmem:[%s12985_s1 + $0x200] ss:$16 sps:$4 sm:$0xff]   ;;  %v8861_v47 = vld [vmem:[%s12985_s1 + $0x2ac] ss:$16 sps:$4 sm:$0xff]   ;;  %v8871_v4 = vld [vmem:[%s12985_s1 + $0x2e8] ss:$16 sps:$4 sm:$0xff]  }
  0x1c   :  { %5859 = vmatprep.subr.bf16.mxu0 %v8760_v28  ;;  %6548 = vmatprep.subr.bf16.mxu1 %v8762_v29  ;;  %v8829_v28 = vld [vmem:[%s12985_s1 + $0x208] ss:$16 sps:$4 sm:$0xff]   ;;  %v8834_v29 = vld [vmem:[%s12985_s1 + $0x224] ss:$16 sps:$4 sm:$0xff]   ;;  %v8873_v60 = vld [vmem:[%s12985_s1 + $0x2ec] ss:$16 sps:$4 sm:$0xff]  }
  0x1d   :  { %5877 = vmatprep.mubr.bf16.mxu0 %v1088_v16  ;;  %6566 = vmatprep.mubr.bf16.mxu1 %v1088_v16  ;;  %v8912_v57 = vld [vmem:[%s12984_s0 + $0xfa] ss:$25 sps:$4 sm:$0xff]   ;;  %v8914_v58 = vld [vmem:[%s12984_s0 + $0x12c] ss:$25 sps:$4 sm:$0xff]  }
  0x1e   :  { %v8916_v59 = vld [vmem:[%s12984_s0 + $0x15e] ss:$25 sps:$4 sm:$0xff]   ;;  %v1441_v62 = vrot.slane %v8912_v57, %v10215_v54 }
  0x1f   :  { %5860 = vmatpush1.bf16.msra.mxu0 %v8764_v30  ;;  %6549 = vmatpush1.bf16.msra.mxu1 %v8765_v31  ;;  %v8837_v30 = vld [vmem:[%s12985_s1 + $0x22c] ss:$16 sps:$4 sm:$0xff]   ;;  %v8832_v31 = vld [vmem:[%s12985_s1 + $0x220] ss:$16 sps:$4 sm:$0xff]   ;;  %v8876_v5 = vld [vmem:[%s12985_s1 + $0x304] ss:$16 sps:$4 sm:$0xff]  }
  0x20   :  { %5861 = vmatprep.subr.bf16.mxu0 %v8766_v32  ;;  %6550 = vmatprep.subr.bf16.mxu1 %v8768_v33  ;;  %v8835_v32 = vld [vmem:[%s12985_s1 + $0x228] ss:$16 sps:$4 sm:$0xff]   ;;  %v8840_v33 = vld [vmem:[%s12985_s1 + $0x244] ss:$16 sps:$4 sm:$0xff]   ;;  %v8924_v57 = vld [vmem:[%s12985_s1 + $0x3e0] ss:$16 sps:$4 sm:$0xff]  }
  0x21   :  { %v8877_v16 = vld [vmem:[%s12985_s1 + $0x308] ss:$16 sps:$4 sm:$0xff]  }
  0x23   :  { %5862 = vmatpush1.bf16.msra.mxu0 %v8770_v34  ;;  %6551 = vmatpush1.bf16.msra.mxu1 %v8771_v35  ;;  %v8843_v34 = vld [vmem:[%s12985_s1 + $0x24c] ss:$16 sps:$4 sm:$0xff]   ;;  %v8838_v35 = vld [vmem:[%s12985_s1 + $0x240] ss:$16 sps:$4 sm:$0xff]  }
  0x24   :  { %5863 = vmatprep.subr.bf16.mxu0 %v8772_v36  ;;  %6552 = vmatprep.subr.bf16.mxu1 %v8774_v37  ;;  %v8841_v36 = vld [vmem:[%s12985_s1 + $0x248] ss:$16 sps:$4 sm:$0xff]   ;;  %v8846_v37 = vld [vmem:[%s12985_s1 + $0x264] ss:$16 sps:$4 sm:$0xff]  }
  0x27   :  { %5864 = vmatpush1.bf16.msra.mxu0 %v8776_v41  ;;  %6553 = vmatpush1.bf16.msra.mxu1 %v8777_v42  ;;  %v8852_v41 = vld [vmem:[%s12985_s1 + $0x284] ss:$16 sps:$4 sm:$0xff]   ;;  %v8855_v42 = vld [vmem:[%s12985_s1 + $0x28c] ss:$16 sps:$4 sm:$0xff]  }
  0x28   :  { %5865 = vmatprep.subr.bf16.mxu0 %v8778_v43  ;;  %6554 = vmatprep.subr.bf16.mxu1 %v8780_v44  ;;  %v8850_v43 = vld [vmem:[%s12985_s1 + $0x280] ss:$16 sps:$4 sm:$0xff]   ;;  %v8853_v44 = vld [vmem:[%s12985_s1 + $0x288] ss:$16 sps:$4 sm:$0xff]  }
  0x2b   :  { %5866 = vmatpush1.bf16.msra.mxu0 %v8782_v45  ;;  %6555 = vmatpush1.bf16.msra.mxu1 %v8783_v48  ;;  %v8858_v45 = vld [vmem:[%s12985_s1 + $0x2a4] ss:$16 sps:$4 sm:$0xff]   ;;  %v8856_v48 = vld [vmem:[%s12985_s1 + $0x2a0] ss:$16 sps:$4 sm:$0xff]  }
  0x2c   :  { %5867 = vmatprep.subr.bf16.mxu0 %v8784_v49  ;;  %6556 = vmatprep.subr.bf16.mxu1 %v8786_v50  ;;  %v8859_v49 = vld [vmem:[%s12985_s1 + $0x2a8] ss:$16 sps:$4 sm:$0xff]   ;;  %v8864_v50 = vld [vmem:[%s12985_s1 + $0x2c4] ss:$16 sps:$4 sm:$0xff]  }
  0x2f   :  { %5868 = vmatpush1.bf16.msra.mxu0 %v8788_v51  ;;  %6557 = vmatpush1.bf16.msra.mxu1 %v8789_v52  ;;  %v8867_v51 = vld [vmem:[%s12985_s1 + $0x2cc] ss:$16 sps:$4 sm:$0xff]   ;;  %v8862_v52 = vld [vmem:[%s12985_s1 + $0x2c0] ss:$16 sps:$4 sm:$0xff]  }
  0x30   :  { %5869 = vmatprep.subr.bf16.mxu0 %v8790_v53  ;;  %6558 = vmatprep.subr.bf16.mxu1 %v8792_v56  ;;  %v8865_v53 = vld [vmem:[%s12985_s1 + $0x2c8] ss:$16 sps:$4 sm:$0xff]  }
  0x31   :  { %v8910_v56 = vld [vmem:[%s12984_s0 + $0xc8] ss:$25 sps:$4 sm:$0xff]  }
  0x33   :  { %5870 = vmatpush1.bf16.msra.mxu0 %v8794_v61  ;;  %6559 = vmatpush1.bf16.msra.mxu1 %v8795_v63  ;;  %v1427_v61 = vrot.slane %v8910_v56, %v10215_v54  ;;  %v1455_v63 = vrot.slane %v8914_v58, %v10215_v54 }
  0x34   :  { %5871 = vmatprep.subr.bf16.mxu0 %v8796_v0  ;;  %6560 = vmatprep.subr.bf16.mxu1 %v8798_v3  ;;  %v1469_v0 = vrot.slane %v8916_v59, %v10215_v54 }
  0x35   :  { %v1478_v2 = vcombine.high %v1427_v61, %v1441_v62  ;;  %v1477_v3 = vcombine.low %v1427_v61, %v1441_v62  ;;  %v8932_v61 = vld [vmem:[%s12985_s1 + $0x404] ss:$16 sps:$4 sm:$0xff]   ;;  %v8935_v62 = vld [vmem:[%s12985_s1 + $0x40c] ss:$16 sps:$4 sm:$0xff]  }
  0x36   :  { %v1482_v6 = vcombine.high %v1455_v63, %v1469_v0  ;;  %v1481_v7 = vcombine.low %v1455_v63, %v1469_v0 }
  0x37   :  { %5872 = vmatpush1.bf16.msra.mxu0 %v8800_v8  ;;  %6561 = vmatpush1.bf16.msra.mxu1 %v8801_v10  ;;  %v8879_v8 = vld [vmem:[%s12985_s1 + $0x30c] ss:$16 sps:$4 sm:$0xff]   ;;  %v10409_v10 = vrot.slane %v1478_v2, %v10215_v54 }
  0x38   :  { %5873 = vmatprep.subr.bf16.mxu0 %v8802_v11  ;;  %6562 = vmatprep.subr.bf16.mxu1 %v8804_v15  ;;  %v10412_v11 = vrot.slane %v1477_v3, %v10215_v54  ;;  %v10415_v13 = vrot.slane %v1482_v6, %v10215_v54  ;;  %v10418_v14 = vrot.slane %v1481_v7, %v10215_v54  ;;  %v8874_v15 = vld [vmem:[%s12985_s1 + $0x300] ss:$16 sps:$4 sm:$0xff]   ;;  %v8941_v7 = vld [vmem:[%s12985_s1 + $0x42c] ss:$16 sps:$4 sm:$0xff]  }
  0x3b   :  { %5874 = vmatpush1.bf16.msra.mxu0 %v8806_v18  ;;  %6563 = vmatpush1.bf16.msra.mxu1 %v8807_v19  ;;  %v8882_v18 = vld [vmem:[%s12985_s1 + $0x324] ss:$16 sps:$4 sm:$0xff]   ;;  %v1545_v19 = vcombine.low %v10409_v10, %v10415_v13 }
  0x3c   :  { %5875 = vmatprep.subr.bf16.mxu0 %v8808_v20  ;;  %6564 = vmatprep.subr.bf16.mxu1 %v8810_v21  ;;  %v1541_v20 = vcombine.low %v10412_v11, %v10418_v14  ;;  %v8885_v21 = vld [vmem:[%s12985_s1 + $0x32c] ss:$16 sps:$4 sm:$0xff]  }
  0x3f   :  { %5876 = vmatpush1.bf16.msra.mxu0 %v8812_v22  ;;  %6565 = vmatpush1.bf16.msra.mxu1 %v8813_v23  ;;  %v1089_v22 = vcombine.high %v10252_v9, %v10261_v12  ;;  %v8880_v23 = vld [vmem:[%s12985_s1 + $0x320] ss:$16 sps:$4 sm:$0xff]   ;;  %v8891_v9 = vld [vmem:[%s12985_s1 + $0x34c] ss:$16 sps:$4 sm:$0xff]  }
  0x40   :  { %5898 = vmatprep.subr.bf16.mxu0 %v8828_v24  ;;  %6587 = vmatprep.subr.bf16.mxu1 %v8831_v25  ;;  %v8883_v24 = vld [vmem:[%s12985_s1 + $0x328] ss:$16 sps:$4 sm:$0xff]   ;;  %v8888_v25 = vld [vmem:[%s12985_s1 + $0x344] ss:$16 sps:$4 sm:$0xff]   ;;  %v8886_v12 = vld [vmem:[%s12985_s1 + $0x340] ss:$16 sps:$4 sm:$0xff]  }
  0x42   :  { %5878 = vmatmul.mubr.bf16.vlgmr.msra.gmra.mrb[0].mxu0 %v1084_v26  ;;  %6567 = vmatmul.mubr.bf16.vlgmr.msra.gmra.mrb[0].mxu1 %v1084_v26  ;;  %v8889_v26 = vld [vmem:[%s12985_s1 + $0x348] ss:$16 sps:$4 sm:$0xff]  }
  0x43   :  { %5899 = vmatpush1.bf16.msra.mxu0 %v8826_v27  ;;  %6588 = vmatpush1.bf16.msra.mxu1 %v8829_v28  ;;  %v8894_v27 = vld [vmem:[%s12985_s1 + $0x364] ss:$16 sps:$4 sm:$0xff]   ;;  %v8897_v28 = vld [vmem:[%s12985_s1 + $0x36c] ss:$16 sps:$4 sm:$0xff]  }
  0x44   :  { %5900 = vmatprep.subr.bf16.mxu0 %v8834_v29  ;;  %6589 = vmatprep.subr.bf16.mxu1 %v8837_v30  ;;  %v8892_v29 = vld [vmem:[%s12985_s1 + $0x360] ss:$16 sps:$4 sm:$0xff]   ;;  %v8895_v30 = vld [vmem:[%s12985_s1 + $0x368] ss:$16 sps:$4 sm:$0xff]  }
  0x45   :  { %5887 = vmatprep.mubr.bf16.mxu0 %v1545_v19  ;;  %6576 = vmatprep.mubr.bf16.mxu1 %v1545_v19  ;;  %v8942_v19 = vld [vmem:[%s12985_s1 + $0x440] ss:$16 sps:$4 sm:$0xff]  }
  0x47   :  { %5901 = vmatpush1.bf16.msra.mxu0 %v8832_v31  ;;  %6590 = vmatpush1.bf16.msra.mxu1 %v8835_v32  ;;  %v8900_v31 = vld [vmem:[%s12985_s1 + $0x384] ss:$16 sps:$4 sm:$0xff]   ;;  %v8903_v32 = vld [vmem:[%s12985_s1 + $0x38c] ss:$16 sps:$4 sm:$0xff]  }
  0x48   :  { %5902 = vmatprep.subr.bf16.mxu0 %v8840_v33  ;;  %6591 = vmatprep.subr.bf16.mxu1 %v8843_v34  ;;  %v8898_v33 = vld [vmem:[%s12985_s1 + $0x380] ss:$16 sps:$4 sm:$0xff]  }
  0x49   :  { %v8816_v34 = vld [vmem:[%s12984_s0 + $0x4] ss:$25 sps:$4 sm:$0xff]  }
  0x4a   :  { %6577 = vmatmul.mubr.bf16.gmra.mrb[4].mxu1 %v1541_v20  ;;  %5888 = vmatmul.mubr.bf16.gmra.mrb[4].mxu0 %v1541_v20  ;;  %v8945_v20 = vld [vmem:[%s12985_s1 + $0x448] ss:$16 sps:$4 sm:$0xff]  }
  0x4b   :  { %5903 = vmatpush1.bf16.msra.mxu0 %v8838_v35  ;;  %6592 = vmatpush1.bf16.msra.mxu1 %v8841_v36  ;;  %v8819_v35 = vld [vmem:[%s12984_s0 + $0x36] ss:$25 sps:$4 sm:$0xff]  }
  0x4c   :  { %5904 = vmatprep.subr.bf16.mxu0 %v8846_v37  ;;  %6593 = vmatprep.subr.bf16.mxu1 %v8849_v38  ;;  %v8901_v36 = vld [vmem:[%s12985_s1 + $0x388] ss:$16 sps:$4 sm:$0xff]   ;;  %v8906_v37 = vld [vmem:[%s12985_s1 + $0x3a4] ss:$16 sps:$4 sm:$0xff]  }
  0x4d   :  { %5930 = vmatprep.mubr.bf16.mxu0 %v1089_v22  ;;  %6619 = vmatprep.mubr.bf16.mxu1 %v1089_v22  ;;  %v8822_v38 = vld [vmem:[%s12984_s0 + $0x68] ss:$25 sps:$4 sm:$0xff]  }
  0x4e   :  { %v8948_v22 = vld [vmem:[%s12985_s1 + $0x460] ss:$16 sps:$4 sm:$0xff]  }
  0x4f   :  { %5905 = vmatpush1.bf16.msra.mxu0 %v8844_v39  ;;  %6594 = vmatpush1.bf16.msra.mxu1 %v8847_v40  ;;  %v8909_v39 = vld [vmem:[%s12985_s1 + $0x3ac] ss:$16 sps:$4 sm:$0xff]  }
  0x50   :  { %5906 = vmatprep.subr.bf16.mxu0 %v8852_v41  ;;  %6595 = vmatprep.subr.bf16.mxu1 %v8855_v42  ;;  %v8825_v40 = vld [vmem:[%s12984_s0 + $0x9a] ss:$25 sps:$4 sm:$0xff]  }
  0x51   :  { %v8904_v41 = vld [vmem:[%s12985_s1 + $0x3a0] ss:$16 sps:$4 sm:$0xff]   ;;  %v8907_v42 = vld [vmem:[%s12985_s1 + $0x3a8] ss:$16 sps:$4 sm:$0xff]  }
  0x53   :  { %5907 = vmatpush1.bf16.msra.mxu0 %v8850_v43  ;;  %6596 = vmatpush1.bf16.msra.mxu1 %v8853_v44  ;;  %v8920_v43 = vld [vmem:[%s12985_s1 + $0x3c4] ss:$16 sps:$4 sm:$0xff]   ;;  %v8923_v44 = vld [vmem:[%s12985_s1 + $0x3cc] ss:$16 sps:$4 sm:$0xff]  }
  0x54   :  { %5908 = vmatprep.subr.bf16.mxu0 %v8858_v45  ;;  %6597 = vmatprep.subr.bf16.mxu1 %v8861_v47  ;;  %v977_v45 = vrot.slane %v8816_v34, %v10215_v54  ;;  %v991_v47 = vrot.slane %v8819_v35, %v10215_v54  ;;  %v8974_v34 = vld [vmem:[%s12985_s1 + $0x4e4] ss:$16 sps:$4 sm:$0xff]   ;;  %v8977_v35 = vld [vmem:[%s12985_s1 + $0x4ec] ss:$16 sps:$4 sm:$0xff]  }
  0x56   :  { %v1022_v58 = vcombine.low %v977_v45, %v991_v47 }
  0x57   :  { %5909 = vmatpush1.bf16.msra.mxu0 %v8856_v48  ;;  %6598 = vmatpush1.bf16.msra.mxu1 %v8859_v49  ;;  %v1005_v48 = vrot.slane %v8822_v38, %v10215_v54  ;;  %v1019_v49 = vrot.slane %v8825_v40, %v10215_v54  ;;  %v8980_v38 = vld [vmem:[%s12985_s1 + $0x504] ss:$16 sps:$4 sm:$0xff]   ;;  %v8978_v40 = vld [vmem:[%s12985_s1 + $0x500] ss:$16 sps:$4 sm:$0xff]  }
  0x58   :  { %5910 = vmatprep.subr.bf16.mxu0 %v8864_v50  ;;  %6599 = vmatprep.subr.bf16.mxu1 %v8867_v51  ;;  %v8918_v50 = vld [vmem:[%s12985_s1 + $0x3c0] ss:$16 sps:$4 sm:$0xff]   ;;  %v8921_v51 = vld [vmem:[%s12985_s1 + $0x3c8] ss:$16 sps:$4 sm:$0xff]   ;;  %v10544_v2 = vrot.slane %v1022_v58, %v10215_v54  ;;  %v9007_v58 = vld [vmem:[%s12985_s1 + $0x58c] ss:$16 sps:$4 sm:$0xff]  }
  0x59   :  { %v1027_v56 = vcombine.high %v1005_v48, %v1019_v49  ;;  %v1026_v59 = vcombine.low %v1005_v48, %v1019_v49  ;;  %v8995_v48 = vld [vmem:[%s12985_s1 + $0x54c] ss:$16 sps:$4 sm:$0xff]   ;;  %v8990_v49 = vld [vmem:[%s12985_s1 + $0x540] ss:$16 sps:$4 sm:$0xff]  }
  0x5b   :  { %5911 = vmatpush1.bf16.msra.mxu0 %v8862_v52  ;;  %6600 = vmatpush1.bf16.msra.mxu1 %v8865_v53  ;;  %v8926_v52 = vld [vmem:[%s12985_s1 + $0x3e4] ss:$16 sps:$4 sm:$0xff]   ;;  %v8929_v53 = vld [vmem:[%s12985_s1 + $0x3ec] ss:$16 sps:$4 sm:$0xff]   ;;  %v1083_v0 = vrot.slane %v1027_v56, %v10215_v54  ;;  %v10547_v3 = vrot.slane %v1026_v59, %v10215_v54 }
  0x5c   :  { %5912 = vmatprep.subr.bf16.mxu0 %v8870_v55  ;;  %6601 = vmatprep.subr.bf16.mxu1 %v8873_v60  ;;  %v1023_v55 = vcombine.high %v977_v45, %v991_v47  ;;  %v8927_v60 = vld [vmem:[%s12985_s1 + $0x3e8] ss:$16 sps:$4 sm:$0xff]   ;;  %v8992_v47 = vld [vmem:[%s12985_s1 + $0x544] ss:$16 sps:$4 sm:$0xff]  }
  0x5d   :  { %v8987_v45 = vld [vmem:[%s12985_s1 + $0x528] ss:$16 sps:$4 sm:$0xff]   ;;  %v9004_v56 = vld [vmem:[%s12985_s1 + $0x584] ss:$16 sps:$4 sm:$0xff]  }
  0x5e   :  { %v1055_v63 = vrot.slane %v1023_v55, %v10215_v54  ;;  %v8999_v55 = vld [vmem:[%s12985_s1 + $0x568] ss:$16 sps:$4 sm:$0xff]  }
  0x5f   :  { %5913 = vmatpush1.bf16.msra.mxu0 %v8868_v1  ;;  %6602 = vmatpush1.bf16.msra.mxu1 %v8871_v4  ;;  %v8930_v1 = vld [vmem:[%s12985_s1 + $0x400] ss:$16 sps:$4 sm:$0xff]   ;;  %v8933_v4 = vld [vmem:[%s12985_s1 + $0x408] ss:$16 sps:$4 sm:$0xff]  }
  0x60   :  { %5914 = vmatprep.subr.bf16.mxu0 %v8876_v5  ;;  %6603 = vmatprep.subr.bf16.mxu1 %v8879_v8  ;;  %v8938_v5 = vld [vmem:[%s12985_s1 + $0x424] ss:$16 sps:$4 sm:$0xff]   ;;  %v10555_v6 = vcombine.high %v1055_v63, %v1083_v0  ;;  %v1546_v8 = vcombine.high %v10409_v10, %v10415_v13  ;;  %v8947_v13 = vld [vmem:[%s12985_s1 + $0x44c] ss:$16 sps:$4 sm:$0xff]  }
  0x61   :  { %v8944_v10 = vld [vmem:[%s12985_s1 + $0x444] ss:$16 sps:$4 sm:$0xff]  }
  0x62   :  { %v9110_v59 = vld [vmem:[%s12984_s0 + $0xcc] ss:$25 sps:$4 sm:$0xff]  }
  0x63   :  { %5915 = vmatpush1.bf16.msra.mxu0 %v8874_v15  ;;  %6604 = vmatpush1.bf16.msra.mxu1 %v8877_v16  ;;  %v10564_v15 = vcombine.high %v10544_v2, %v10547_v3  ;;  %v8936_v16 = vld [vmem:[%s12985_s1 + $0x420] ss:$16 sps:$4 sm:$0xff]  }
  0x64   :  { %5916 = vmatprep.subr.bf16.mxu0 %v8882_v18  ;;  %6605 = vmatprep.subr.bf16.mxu1 %v8885_v21  ;;  %v8939_v18 = vld [vmem:[%s12985_s1 + $0x428] ss:$16 sps:$4 sm:$0xff]   ;;  %v8950_v21 = vld [vmem:[%s12985_s1 + $0x464] ss:$16 sps:$4 sm:$0xff]  }
  0x67   :  { %5917 = vmatpush1.bf16.msra.mxu0 %v8880_v23  ;;  %6606 = vmatpush1.bf16.msra.mxu1 %v8883_v24  ;;  %v8951_v23 = vld [vmem:[%s12985_s1 + $0x468] ss:$16 sps:$4 sm:$0xff]   ;;  %v8956_v24 = vld [vmem:[%s12985_s1 + $0x484] ss:$16 sps:$4 sm:$0xff]  }
  0x68   :  { %5918 = vmatprep.subr.bf16.mxu0 %v8888_v25  ;;  %6607 = vmatprep.subr.bf16.mxu1 %v8891_v9  ;;  %v8959_v25 = vld [vmem:[%s12985_s1 + $0x48c] ss:$16 sps:$4 sm:$0xff]   ;;  %v8954_v9 = vld [vmem:[%s12985_s1 + $0x480] ss:$16 sps:$4 sm:$0xff]  }
  0x6b   :  { %5919 = vmatpush1.bf16.msra.mxu0 %v8886_v12  ;;  %6608 = vmatpush1.bf16.msra.mxu1 %v8889_v26  ;;  %v8957_v12 = vld [vmem:[%s12985_s1 + $0x488] ss:$16 sps:$4 sm:$0xff]   ;;  %v8962_v26 = vld [vmem:[%s12985_s1 + $0x4a4] ss:$16 sps:$4 sm:$0xff]  }
  0x6c   :  { %5920 = vmatprep.subr.bf16.mxu0 %v8894_v27  ;;  %6609 = vmatprep.subr.bf16.mxu1 %v8897_v28  ;;  %v8965_v27 = vld [vmem:[%s12985_s1 + $0x4ac] ss:$16 sps:$4 sm:$0xff]   ;;  %v8960_v28 = vld [vmem:[%s12985_s1 + $0x4a0] ss:$16 sps:$4 sm:$0xff]  }
  0x6f   :  { %5921 = vmatpush1.bf16.msra.mxu0 %v8892_v29  ;;  %6610 = vmatpush1.bf16.msra.mxu1 %v8895_v30  ;;  %v8963_v29 = vld [vmem:[%s12985_s1 + $0x4a8] ss:$16 sps:$4 sm:$0xff]   ;;  %v8968_v30 = vld [vmem:[%s12985_s1 + $0x4c4] ss:$16 sps:$4 sm:$0xff]  }
  0x70   :  { %5922 = vmatprep.subr.bf16.mxu0 %v8900_v31  ;;  %6611 = vmatprep.subr.bf16.mxu1 %v8903_v32  ;;  %v8971_v31 = vld [vmem:[%s12985_s1 + $0x4cc] ss:$16 sps:$4 sm:$0xff]   ;;  %v8966_v32 = vld [vmem:[%s12985_s1 + $0x4c0] ss:$16 sps:$4 sm:$0xff]  }
  0x73   :  { %5923 = vmatpush1.bf16.msra.mxu0 %v8898_v33  ;;  %6612 = vmatpush1.bf16.msra.mxu1 %v8901_v36  ;;  %v8969_v33 = vld [vmem:[%s12985_s1 + $0x4c8] ss:$16 sps:$4 sm:$0xff]   ;;  %v8972_v36 = vld [vmem:[%s12985_s1 + $0x4e0] ss:$16 sps:$4 sm:$0xff]  }
  0x74   :  { %5924 = vmatprep.subr.bf16.mxu0 %v8906_v37  ;;  %6613 = vmatprep.subr.bf16.mxu1 %v8909_v39  ;;  %v8975_v37 = vld [vmem:[%s12985_s1 + $0x4e8] ss:$16 sps:$4 sm:$0xff]   ;;  %v8983_v39 = vld [vmem:[%s12985_s1 + $0x50c] ss:$16 sps:$4 sm:$0xff]  }
  0x77   :  { %5925 = vmatpush1.bf16.msra.mxu0 %v8904_v41  ;;  %6614 = vmatpush1.bf16.msra.mxu1 %v8907_v42  ;;  %v8981_v41 = vld [vmem:[%s12985_s1 + $0x508] ss:$16 sps:$4 sm:$0xff]   ;;  %v8986_v42 = vld [vmem:[%s12985_s1 + $0x524] ss:$16 sps:$4 sm:$0xff]  }
  0x78   :  { %5926 = vmatprep.subr.bf16.mxu0 %v8920_v43  ;;  %6615 = vmatprep.subr.bf16.mxu1 %v8923_v44  ;;  %v8989_v43 = vld [vmem:[%s12985_s1 + $0x52c] ss:$16 sps:$4 sm:$0xff]   ;;  %v8984_v44 = vld [vmem:[%s12985_s1 + $0x520] ss:$16 sps:$4 sm:$0xff]  }
  0x7b   :  { %5927 = vmatpush1.bf16.msra.mxu0 %v8918_v50  ;;  %6616 = vmatpush1.bf16.msra.mxu1 %v8921_v51  ;;  %v8993_v50 = vld [vmem:[%s12985_s1 + $0x548] ss:$16 sps:$4 sm:$0xff]   ;;  %v8998_v51 = vld [vmem:[%s12985_s1 + $0x564] ss:$16 sps:$4 sm:$0xff]  }
  0x7c   :  { %5928 = vmatprep.subr.bf16.mxu0 %v8926_v52  ;;  %6617 = vmatprep.subr.bf16.mxu1 %v8929_v53  ;;  %v9001_v52 = vld [vmem:[%s12985_s1 + $0x56c] ss:$16 sps:$4 sm:$0xff]   ;;  %v8996_v53 = vld [vmem:[%s12985_s1 + $0x560] ss:$16 sps:$4 sm:$0xff]  }
  0x7f   :  { %5929 = vmatpush1.bf16.msra.mxu0 %v8924_v57  ;;  %6618 = vmatpush1.bf16.msra.mxu1 %v8927_v60  ;;  %v9002_v57 = vld [vmem:[%s12985_s1 + $0x580] ss:$16 sps:$4 sm:$0xff]  }
  0x80   :  { %5951 = vmatprep.subr.bf16.mxu0 %v8932_v61  ;;  %6640 = vmatprep.subr.bf16.mxu1 %v8935_v62  ;;  %v9111_v60 = vld [vmem:[%s12984_s0 + $0xfe] ss:$25 sps:$4 sm:$0xff]   ;;  %v9112_v61 = vld [vmem:[%s12984_s0 + $0x130] ss:$25 sps:$4 sm:$0xff]  }
  0x81   :  { %v9113_v62 = vld [vmem:[%s12984_s0 + $0x162] ss:$25 sps:$4 sm:$0xff]  }
  0x82   :  { %5931 = vmatmul.mubr.bf16.vlgmr.msra.gmra.mrb[0].mxu0 %v10270_v17  ;;  %6620 = vmatmul.mubr.bf16.vlgmr.msra.gmra.mrb[0].mxu1 %v10270_v17  ;;  %v1542_v17 = vcombine.high %v10412_v11, %v10418_v14  ;;  %v8953_v11 = vld [vmem:[%s12985_s1 + $0x46c] ss:$16 sps:$4 sm:$0xff]   ;;  %v1090_v14 = vcombine.low %v1055_v63, %v1083_v0  ;;  %v9005_v63 = vld [vmem:[%s12985_s1 + $0x588] ss:$16 sps:$4 sm:$0xff]   ;;  %v9010_v0 = vld [vmem:[%s12985_s1 + $0x5a4] ss:$16 sps:$4 sm:$0xff]  }
  0x83   :  { %5952 = vmatpush1.bf16.msra.mxu0 %v8930_v1  ;;  %6641 = vmatpush1.bf16.msra.mxu1 %v8933_v4  ;;  %v1434_v1 = vrot.slane %v9110_v59, %v10215_v54  ;;  %v1448_v4 = vrot.slane %v9111_v60, %v10215_v54  ;;  %v9065_v59 = vld [vmem:[%s12985_s1 + $0x6c8] ss:$16 sps:$4 sm:$0xff]   ;;  %v9070_v60 = vld [vmem:[%s12985_s1 + $0x6e4] ss:$16 sps:$4 sm:$0xff]  }
  0x84   :  { %5953 = vmatprep.subr.bf16.mxu0 %v8938_v5  ;;  %6642 = vmatprep.subr.bf16.mxu1 %v8941_v7  ;;  %v1462_v5 = vrot.slane %v9112_v61, %v10215_v54  ;;  %v9013_v7 = vld [vmem:[%s12985_s1 + $0x5ac] ss:$16 sps:$4 sm:$0xff]  }
  0x85   :  { %5940 = vmatprep.mubr.bf16.mxu0 %v1546_v8  ;;  %6629 = vmatprep.mubr.bf16.mxu1 %v1546_v8  ;;  %v1476_v8 = vrot.slane %v9113_v62, %v10215_v54  ;;  %v9073_v61 = vld [vmem:[%s12985_s1 + $0x6ec] ss:$16 sps:$4 sm:$0xff]   ;;  %v9068_v62 = vld [vmem:[%s12985_s1 + $0x6e0] ss:$16 sps:$4 sm:$0xff]  }
  0x87   :  { %5954 = vmatpush1.bf16.msra.mxu0 %v8936_v16  ;;  %6643 = vmatpush1.bf16.msra.mxu1 %v8939_v18  ;;  %v1480_v16 = vcombine.high %v1434_v1, %v1448_v4  ;;  %v9008_v18 = vld [vmem:[%s12985_s1 + $0x5a0] ss:$16 sps:$4 sm:$0xff]  }
  0x88   :  { %5955 = vmatprep.subr.bf16.mxu0 %v8944_v10  ;;  %6644 = vmatprep.subr.bf16.mxu1 %v8947_v13  ;;  %v1484_v10 = vcombine.high %v1462_v5, %v1476_v8  ;;  %v1479_v13 = vcombine.low %v1434_v1, %v1448_v4  ;;  %v9074_v1 = vld [vmem:[%s12985_s1 + $0x700] ss:$16 sps:$4 sm:$0xff]   ;;  %v9079_v4 = vld [vmem:[%s12985_s1 + $0x70c] ss:$16 sps:$4 sm:$0xff]  }
  0x8a   :  { %5941 = vmatmul.mubr.bf16.gmra.mrb[4].mxu0 %v1542_v17  ;;  %6630 = vmatmul.mubr.bf16.gmra.mrb[4].mxu1 %v1542_v17  ;;  %v1483_v17 = vcombine.low %v1462_v5, %v1476_v8  ;;  %v9077_v5 = vld [vmem:[%s12985_s1 + $0x708] ss:$16 sps:$4 sm:$0xff]   ;;  %v9085_v8 = vld [vmem:[%s12985_s1 + $0x72c] ss:$16 sps:$4 sm:$0xff]  }
  0x8b   :  { %5956 = vmatpush1.bf16.msra.mxu0 %v8942_v19  ;;  %6645 = vmatpush1.bf16.msra.mxu1 %v8945_v20  ;;  %v9011_v19 = vld [vmem:[%s12985_s1 + $0x5a8] ss:$16 sps:$4 sm:$0xff]   ;;  %v9016_v20 = vld [vmem:[%s12985_s1 + $0x5c4] ss:$16 sps:$4 sm:$0xff]  }
  0x8c   :  { %5957 = vmatprep.subr.bf16.mxu0 %v8950_v21  ;;  %6646 = vmatprep.subr.bf16.mxu1 %v8953_v11  ;;  %v9019_v21 = vld [vmem:[%s12985_s1 + $0x5cc] ss:$16 sps:$4 sm:$0xff]   ;;  %v1512_v11 = vrot.slane %v1480_v16, %v10215_v54  ;;  %v9080_v16 = vld [vmem:[%s12985_s1 + $0x720] ss:$16 sps:$4 sm:$0xff]  }
  0x8d   :  { %5983 = vmatprep.mubr.bf16.mxu0 %v1090_v14  ;;  %6672 = vmatprep.mubr.bf16.mxu1 %v1090_v14  ;;  %v1540_v14 = vrot.slane %v1484_v10, %v10215_v54  ;;  %v9088_v10 = vld [vmem:[%s12985_s1 + $0x744] ss:$16 sps:$4 sm:$0xff]  }
  0x8f   :  { %5958 = vmatpush1.bf16.msra.mxu0 %v8948_v22  ;;  %6647 = vmatpush1.bf16.msra.mxu1 %v8951_v23  ;;  %v9014_v22 = vld [vmem:[%s12985_s1 + $0x5c0] ss:$16 sps:$4 sm:$0xff]   ;;  %v1498_v23 = vrot.slane %v1479_v13, %v10215_v54  ;;  %v9091_v13 = vld [vmem:[%s12985_s1 + $0x74c] ss:$16 sps:$4 sm:$0xff]  }
  0x90   :  { %5959 = vmatprep.subr.bf16.mxu0 %v8956_v24  ;;  %6648 = vmatprep.subr.bf16.mxu1 %v8959_v25  ;;  %v1526_v24 = vrot.slane %v1483_v17, %v10215_v54  ;;  %v9017_v25 = vld [vmem:[%s12985_s1 + $0x5c8] ss:$16 sps:$4 sm:$0xff]   ;;  %v9086_v17 = vld [vmem:[%s12985_s1 + $0x740] ss:$16 sps:$4 sm:$0xff]  }
  0x93   :  { %5960 = vmatpush1.bf16.msra.mxu0 %v8954_v9  ;;  %6649 = vmatpush1.bf16.msra.mxu1 %v8957_v12  ;;  %v9022_v9 = vld [vmem:[%s12985_s1 + $0x5e4] ss:$16 sps:$4 sm:$0xff]   ;;  %v10755_v12 = vcombine.high %v1512_v11, %v1540_v14 }
  0x94   :  { %5961 = vmatprep.subr.bf16.mxu0 %v8962_v26  ;;  %6650 = vmatprep.subr.bf16.mxu1 %v8965_v27  ;;  %v9025_v26 = vld [vmem:[%s12985_s1 + $0x5ec] ss:$16 sps:$4 sm:$0xff]   ;;  %v10760_v27 = vcombine.high %v1498_v23, %v1526_v24 }
  0x97   :  { %5962 = vmatpush1.bf16.msra.mxu0 %v8960_v28  ;;  %6651 = vmatpush1.bf16.msra.mxu1 %v8963_v29  ;;  %v9020_v28 = vld [vmem:[%s12985_s1 + $0x5e0] ss:$16 sps:$4 sm:$0xff]   ;;  %v9023_v29 = vld [vmem:[%s12985_s1 + $0x5e8] ss:$16 sps:$4 sm:$0xff]  }
  0x98   :  { %5963 = vmatprep.subr.bf16.mxu0 %v8968_v30  ;;  %6652 = vmatprep.subr.bf16.mxu1 %v8971_v31  ;;  %v9028_v30 = vld [vmem:[%s12985_s1 + $0x604] ss:$16 sps:$4 sm:$0xff]   ;;  %v9031_v31 = vld [vmem:[%s12985_s1 + $0x60c] ss:$16 sps:$4 sm:$0xff]  }
  0x9b   :  { %5964 = vmatpush1.bf16.msra.mxu0 %v8966_v32  ;;  %6653 = vmatpush1.bf16.msra.mxu1 %v8969_v33  ;;  %v1086_v32 = vcombine.low %v10544_v2, %v10547_v3  ;;  %v9026_v33 = vld [vmem:[%s12985_s1 + $0x600] ss:$16 sps:$4 sm:$0xff]   ;;  %v9037_v2 = vld [vmem:[%s12985_s1 + $0x62c] ss:$16 sps:$4 sm:$0xff]   ;;  %v1547_v3 = vcombine.low %v1512_v11, %v1540_v14  ;;  %v9095_v14 = vld [vmem:[%s12985_s1 + $0x768] ss:$16 sps:$4 sm:$0xff]  }
  0x9c   :  { %5965 = vmatprep.subr.bf16.mxu0 %v8974_v34  ;;  %6654 = vmatprep.subr.bf16.mxu1 %v8977_v35  ;;  %v9029_v34 = vld [vmem:[%s12985_s1 + $0x608] ss:$16 sps:$4 sm:$0xff]   ;;  %v9034_v35 = vld [vmem:[%s12985_s1 + $0x624] ss:$16 sps:$4 sm:$0xff]   ;;  %v9092_v11 = vld [vmem:[%s12985_s1 + $0x760] ss:$16 sps:$4 sm:$0xff]  }
  0x9f   :  { %5966 = vmatpush1.bf16.msra.mxu0 %v8972_v36  ;;  %6655 = vmatpush1.bf16.msra.mxu1 %v8975_v37  ;;  %v9032_v36 = vld [vmem:[%s12985_s1 + $0x620] ss:$16 sps:$4 sm:$0xff]   ;;  %v9035_v37 = vld [vmem:[%s12985_s1 + $0x628] ss:$16 sps:$4 sm:$0xff]  }
  0xa0   :  { %5967 = vmatprep.subr.bf16.mxu0 %v8980_v38  ;;  %6656 = vmatprep.subr.bf16.mxu1 %v8983_v39  ;;  %v9040_v38 = vld [vmem:[%s12985_s1 + $0x644] ss:$16 sps:$4 sm:$0xff]   ;;  %v9043_v39 = vld [vmem:[%s12985_s1 + $0x64c] ss:$16 sps:$4 sm:$0xff]  }
  0xa3   :  { %5968 = vmatpush1.bf16.msra.mxu0 %v8978_v40  ;;  %6657 = vmatpush1.bf16.msra.mxu1 %v8981_v41  ;;  %v1543_v40 = vcombine.low %v1498_v23, %v1526_v24  ;;  %v9038_v41 = vld [vmem:[%s12985_s1 + $0x640] ss:$16 sps:$4 sm:$0xff]   ;;  %v9103_v24 = vld [vmem:[%s12985_s1 + $0x78c] ss:$16 sps:$4 sm:$0xff]  }
  0xa4   :  { %5969 = vmatprep.subr.bf16.mxu0 %v8986_v42  ;;  %6658 = vmatprep.subr.bf16.mxu1 %v8989_v43  ;;  %v9041_v42 = vld [vmem:[%s12985_s1 + $0x648] ss:$16 sps:$4 sm:$0xff]   ;;  %v9046_v43 = vld [vmem:[%s12985_s1 + $0x664] ss:$16 sps:$4 sm:$0xff]   ;;  %v9098_v23 = vld [vmem:[%s12985_s1 + $0x780] ss:$16 sps:$4 sm:$0xff]  }
  0xa7   :  { %5970 = vmatpush1.bf16.msra.mxu0 %v8984_v44  ;;  %6659 = vmatpush1.bf16.msra.mxu1 %v8987_v45  ;;  %v9049_v44 = vld [vmem:[%s12985_s1 + $0x66c] ss:$16 sps:$4 sm:$0xff]   ;;  %v9044_v45 = vld [vmem:[%s12985_s1 + $0x660] ss:$16 sps:$4 sm:$0xff]  }
  0xa8   :  { %5971 = vmatprep.subr.bf16.mxu0 %v8992_v47  ;;  %6660 = vmatprep.subr.bf16.mxu1 %v8995_v48  ;;  %v9047_v47 = vld [vmem:[%s12985_s1 + $0x668] ss:$16 sps:$4 sm:$0xff]   ;;  %v9052_v48 = vld [vmem:[%s12985_s1 + $0x684] ss:$16 sps:$4 sm:$0xff]  }
  0xab   :  { %5972 = vmatpush1.bf16.msra.mxu0 %v8990_v49  ;;  %6661 = vmatpush1.bf16.msra.mxu1 %v8993_v50  ;;  %v9055_v49 = vld [vmem:[%s12985_s1 + $0x68c] ss:$16 sps:$4 sm:$0xff]   ;;  %v9050_v50 = vld [vmem:[%s12985_s1 + $0x680] ss:$16 sps:$4 sm:$0xff]  }
  0xac   :  { %5973 = vmatprep.subr.bf16.mxu0 %v8998_v51  ;;  %6662 = vmatprep.subr.bf16.mxu1 %v9001_v52  ;;  %v9053_v51 = vld [vmem:[%s12985_s1 + $0x688] ss:$16 sps:$4 sm:$0xff]   ;;  %v9058_v52 = vld [vmem:[%s12985_s1 + $0x6a4] ss:$16 sps:$4 sm:$0xff]  }
  0xaf   :  { %5974 = vmatpush1.bf16.msra.mxu0 %v8996_v53  ;;  %6663 = vmatpush1.bf16.msra.mxu1 %v8999_v55  ;;  %v9056_v53 = vld [vmem:[%s12985_s1 + $0x6a0] ss:$16 sps:$4 sm:$0xff]   ;;  %v9059_v55 = vld [vmem:[%s12985_s1 + $0x6a8] ss:$16 sps:$4 sm:$0xff]  }
  0xb0   :  { %5975 = vmatprep.subr.bf16.mxu0 %v9004_v56  ;;  %6664 = vmatprep.subr.bf16.mxu1 %v9007_v58  ;;  %v9064_v56 = vld [vmem:[%s12985_s1 + $0x6c4] ss:$16 sps:$4 sm:$0xff]   ;;  %v9062_v58 = vld [vmem:[%s12985_s1 + $0x6c0] ss:$16 sps:$4 sm:$0xff]  }
  0xb3   :  { %5976 = vmatpush1.bf16.msra.mxu0 %v9002_v57  ;;  %6665 = vmatpush1.bf16.msra.mxu1 %v9005_v63  ;;  %v9067_v57 = vld [vmem:[%s12985_s1 + $0x6cc] ss:$16 sps:$4 sm:$0xff]   ;;  %v9071_v63 = vld [vmem:[%s12985_s1 + $0x6e8] ss:$16 sps:$4 sm:$0xff]  }
  0xb4   :  { %5977 = vmatprep.subr.bf16.mxu0 %v9010_v0  ;;  %6666 = vmatprep.subr.bf16.mxu1 %v9013_v7  ;;  %v9076_v0 = vld [vmem:[%s12985_s1 + $0x704] ss:$16 sps:$4 sm:$0xff]  }
  0xb5   :  { %v9082_v7 = vld [vmem:[%s12985_s1 + $0x724] ss:$16 sps:$4 sm:$0xff]  }
  0xb7   :  { %5978 = vmatpush1.bf16.msra.mxu0 %v9008_v18  ;;  %6667 = vmatpush1.bf16.msra.mxu1 %v9011_v19  ;;  %v9083_v18 = vld [vmem:[%s12985_s1 + $0x728] ss:$16 sps:$4 sm:$0xff]  }
  0xb8   :  { %5979 = vmatprep.subr.bf16.mxu0 %v9016_v20  ;;  %6668 = vmatprep.subr.bf16.mxu1 %v9019_v21  ;;  %v9089_v19 = vld [vmem:[%s12985_s1 + $0x748] ss:$16 sps:$4 sm:$0xff]   ;;  %v9094_v20 = vld [vmem:[%s12985_s1 + $0x764] ss:$16 sps:$4 sm:$0xff]   ;;  %v9097_v21 = vld [vmem:[%s12985_s1 + $0x76c] ss:$16 sps:$4 sm:$0xff]  }
  0xbb   :  { %5980 = vmatpush1.bf16.msra.mxu0 %v9014_v22  ;;  %6669 = vmatpush1.bf16.msra.mxu1 %v9017_v25  ;;  %v9100_v22 = vld [vmem:[%s12985_s1 + $0x784] ss:$16 sps:$4 sm:$0xff]   ;;  %v9101_v25 = vld [vmem:[%s12985_s1 + $0x788] ss:$16 sps:$4 sm:$0xff]  }
  0xbc   :  { %5981 = vmatprep.subr.bf16.mxu0 %v9022_v9  ;;  %6670 = vmatprep.subr.bf16.mxu1 %v9025_v26  ;;  %v9106_v9 = vld [vmem:[%s12985_s1 + $0x7a4] ss:$16 sps:$4 sm:$0xff]   ;;  %v9109_v26 = vld [vmem:[%s12985_s1 + $0x7ac] ss:$16 sps:$4 sm:$0xff]  }
  0xbf   :  { %5982 = vmatpush1.bf16.msra.mxu0 %v9020_v28  ;;  %6671 = vmatpush1.bf16.msra.mxu1 %v9023_v29  ;;  %v9222_v28 = vld [vmem:[%s12984_s0 + $0x8] ss:$25 sps:$4 sm:$0xff]   ;;  %v9224_v29 = vld [vmem:[%s12984_s0 + $0x3a] ss:$25 sps:$4 sm:$0xff]  }
  0xc0   :  { %6004 = vmatprep.subr.bf16.mxu0 %v9028_v30  ;;  %6693 = vmatprep.subr.bf16.mxu1 %v9031_v31  ;;  %v9226_v30 = vld [vmem:[%s12984_s0 + $0x6c] ss:$25 sps:$4 sm:$0xff]   ;;  %v9228_v31 = vld [vmem:[%s12984_s0 + $0x9e] ss:$25 sps:$4 sm:$0xff]  }
  0xc2   :  { %5984 = vmatmul.mubr.bf16.vlgmr.msra.gmra.mrb[0].mxu0 %v1086_v32  ;;  %6673 = vmatmul.mubr.bf16.vlgmr.msra.gmra.mrb[0].mxu1 %v1086_v32  ;;  %v9104_v32 = vld [vmem:[%s12985_s1 + $0x7a0] ss:$16 sps:$4 sm:$0xff]  }
  0xc3   :  { %6005 = vmatpush1.bf16.msra.mxu0 %v9026_v33  ;;  %6694 = vmatpush1.bf16.msra.mxu1 %v9029_v34  ;;  %v9107_v33 = vld [vmem:[%s12985_s1 + $0x7a8] ss:$16 sps:$4 sm:$0xff]   ;;  %v9116_v34 = vld [vmem:[%s12985_s1 + $0x7c4] ss:$16 sps:$4 sm:$0xff]  }
  0xc4   :  { %6006 = vmatprep.subr.bf16.mxu0 %v9034_v35  ;;  %6695 = vmatprep.subr.bf16.mxu1 %v9037_v2  ;;  %v9119_v35 = vld [vmem:[%s12985_s1 + $0x7cc] ss:$16 sps:$4 sm:$0xff]   ;;  %v1106_v2 = vrot.slane %v9222_v28, %v10215_v54 }
  0xc5   :  { %5993 = vmatprep.mubr.bf16.mxu0 %v1547_v3  ;;  %6682 = vmatprep.mubr.bf16.mxu1 %v1547_v3  ;;  %v1120_v3 = vrot.slane %v9224_v29, %v10215_v54  ;;  %v9179_v28 = vld [vmem:[%s12985_s1 + $0x90c] ss:$16 sps:$4 sm:$0xff]   ;;  %v9174_v29 = vld [vmem:[%s12985_s1 + $0x900] ss:$16 sps:$4 sm:$0xff]  }
  0xc7   :  { %6007 = vmatpush1.bf16.msra.mxu0 %v9032_v36  ;;  %6696 = vmatpush1.bf16.msra.mxu1 %v9035_v37  ;;  %v1134_v36 = vrot.slane %v9226_v30, %v10215_v54  ;;  %v1148_v37 = vrot.slane %v9228_v31, %v10215_v54  ;;  %v9177_v30 = vld [vmem:[%s12985_s1 + $0x908] ss:$16 sps:$4 sm:$0xff]   ;;  %v9182_v31 = vld [vmem:[%s12985_s1 + $0x924] ss:$16 sps:$4 sm:$0xff]  }
  0xc8   :  { %6008 = vmatprep.subr.bf16.mxu0 %v9040_v38  ;;  %6697 = vmatprep.subr.bf16.mxu1 %v9043_v39  ;;  %v9114_v38 = vld [vmem:[%s12985_s1 + $0x7c0] ss:$16 sps:$4 sm:$0xff]   ;;  %v9117_v39 = vld [vmem:[%s12985_s1 + $0x7c8] ss:$16 sps:$4 sm:$0xff]  }
  0xca   :  { %5994 = vmatmul.mubr.bf16.gmra.mrb[4].mxu0 %v1543_v40  ;;  %6683 = vmatmul.mubr.bf16.gmra.mrb[4].mxu1 %v1543_v40  ;;  %v9122_v40 = vld [vmem:[%s12985_s1 + $0x7e4] ss:$16 sps:$4 sm:$0xff]  }
  0xcb   :  { %6009 = vmatpush1.bf16.msra.mxu0 %v9038_v41  ;;  %6698 = vmatpush1.bf16.msra.mxu1 %v9041_v42  ;;  %v9125_v41 = vld [vmem:[%s12985_s1 + $0x7ec] ss:$16 sps:$4 sm:$0xff]   ;;  %v1157_v42 = vcombine.high %v1106_v2, %v1120_v3 }
  0xcc   :  { %6010 = vmatprep.subr.bf16.mxu0 %v9046_v43  ;;  %6699 = vmatprep.subr.bf16.mxu1 %v9049_v44  ;;  %v1161_v43 = vcombine.high %v1134_v36, %v1148_v37  ;;  %v9120_v44 = vld [vmem:[%s12985_s1 + $0x7e0] ss:$16 sps:$4 sm:$0xff]  }
  0xcd   :  { %6036 = vmatprep.mubr.bf16.mxu0 %v10555_v6  ;;  %6725 = vmatprep.mubr.bf16.mxu1 %v10555_v6  ;;  %v9061_v6 = vld [vmem:[%s12985_s1 + $0x6ac] ss:$16 sps:$4 sm:$0xff]  }
  0xcf   :  { %6011 = vmatpush1.bf16.msra.mxu0 %v9044_v45  ;;  %6700 = vmatpush1.bf16.msra.mxu1 %v9047_v47  ;;  %v1156_v45 = vcombine.low %v1106_v2, %v1120_v3  ;;  %v1160_v47 = vcombine.low %v1134_v36, %v1148_v37  ;;  %v9186_v2 = vld [vmem:[%s12985_s1 + $0x940] ss:$16 sps:$4 sm:$0xff]   ;;  %v9191_v3 = vld [vmem:[%s12985_s1 + $0x94c] ss:$16 sps:$4 sm:$0xff]   ;;  %v9189_v36 = vld [vmem:[%s12985_s1 + $0x948] ss:$16 sps:$4 sm:$0xff]  }
  0xd0   :  { %6012 = vmatprep.subr.bf16.mxu0 %v9052_v48  ;;  %6701 = vmatprep.subr.bf16.mxu1 %v9055_v49  ;;  %v9123_v48 = vld [vmem:[%s12985_s1 + $0x7e8] ss:$16 sps:$4 sm:$0xff]   ;;  %v9128_v49 = vld [vmem:[%s12985_s1 + $0x804] ss:$16 sps:$4 sm:$0xff]  }
  0xd1   :  { %v9194_v37 = vld [vmem:[%s12985_s1 + $0x964] ss:$16 sps:$4 sm:$0xff]  }
  0xd3   :  { %6013 = vmatpush1.bf16.msra.mxu0 %v9050_v50  ;;  %6702 = vmatpush1.bf16.msra.mxu1 %v9053_v51  ;;  %v9131_v50 = vld [vmem:[%s12985_s1 + $0x80c] ss:$16 sps:$4 sm:$0xff]   ;;  %v1184_v51 = vrot.slane %v1157_v42, %v10215_v54 }
  0xd4   :  { %6014 = vmatprep.subr.bf16.mxu0 %v9058_v52  ;;  %6703 = vmatprep.subr.bf16.mxu1 %v9061_v6  ;;  %v1212_v52 = vrot.slane %v1161_v43, %v10215_v54  ;;  %v9126_v6 = vld [vmem:[%s12985_s1 + $0x800] ss:$16 sps:$4 sm:$0xff]  }
  0xd5   :  { %v9320_v42 = vld [vmem:[%s12984_s0 + $0x166] ss:$25 sps:$4 sm:$0xff]  }
  0xd6   :  { %v9192_v43 = vld [vmem:[%s12985_s1 + $0x960] ss:$16 sps:$4 sm:$0xff]  }
  0xd7   :  { %6015 = vmatpush1.bf16.msra.mxu0 %v9056_v53  ;;  %6704 = vmatpush1.bf16.msra.mxu1 %v9059_v55  ;;  %v10992_v53 = vrot.slane %v1156_v45, %v10215_v54  ;;  %v10995_v55 = vrot.slane %v1160_v47, %v10215_v54  ;;  %v9200_v45 = vld [vmem:[%s12985_s1 + $0x984] ss:$16 sps:$4 sm:$0xff]   ;;  %v9203_v47 = vld [vmem:[%s12985_s1 + $0x98c] ss:$16 sps:$4 sm:$0xff]  }
  0xd8   :  { %6016 = vmatprep.subr.bf16.mxu0 %v9064_v56  ;;  %6705 = vmatprep.subr.bf16.mxu1 %v9067_v57  ;;  %v9129_v56 = vld [vmem:[%s12985_s1 + $0x808] ss:$16 sps:$4 sm:$0xff]   ;;  %v9134_v57 = vld [vmem:[%s12985_s1 + $0x824] ss:$16 sps:$4 sm:$0xff]  }
  0xdb   :  { %6017 = vmatpush1.bf16.msra.mxu0 %v9062_v58  ;;  %6706 = vmatpush1.bf16.msra.mxu1 %v9065_v59  ;;  %v11003_v58 = vcombine.high %v1184_v51, %v1212_v52  ;;  %v9137_v59 = vld [vmem:[%s12985_s1 + $0x82c] ss:$16 sps:$4 sm:$0xff]  }
  0xdc   :  { %6018 = vmatprep.subr.bf16.mxu0 %v9070_v60  ;;  %6707 = vmatprep.subr.bf16.mxu1 %v9073_v61  ;;  %v11010_v60 = vcombine.high %v10992_v53, %v10995_v55  ;;  %v9132_v61 = vld [vmem:[%s12985_s1 + $0x820] ss:$16 sps:$4 sm:$0xff]  }
  0xdf   :  { %6019 = vmatpush1.bf16.msra.mxu0 %v9068_v62  ;;  %6708 = vmatpush1.bf16.msra.mxu1 %v9071_v63  ;;  %v9135_v62 = vld [vmem:[%s12985_s1 + $0x828] ss:$16 sps:$4 sm:$0xff]   ;;  %v9140_v63 = vld [vmem:[%s12985_s1 + $0x844] ss:$16 sps:$4 sm:$0xff]  }
  0xe0   :  { %6020 = vmatprep.subr.bf16.mxu0 %v9076_v0  ;;  %6709 = vmatprep.subr.bf16.mxu1 %v9079_v4  ;;  %v9143_v0 = vld [vmem:[%s12985_s1 + $0x84c] ss:$16 sps:$4 sm:$0xff]   ;;  %v9146_v4 = vld [vmem:[%s12985_s1 + $0x864] ss:$16 sps:$4 sm:$0xff]  }
  0xe3   :  { %6021 = vmatpush1.bf16.msra.mxu0 %v9074_v1  ;;  %6710 = vmatpush1.bf16.msra.mxu1 %v9077_v5  ;;  %v9141_v1 = vld [vmem:[%s12985_s1 + $0x848] ss:$16 sps:$4 sm:$0xff]   ;;  %v9149_v5 = vld [vmem:[%s12985_s1 + $0x86c] ss:$16 sps:$4 sm:$0xff]  }
  0xe4   :  { %6022 = vmatprep.subr.bf16.mxu0 %v9082_v7  ;;  %6711 = vmatprep.subr.bf16.mxu1 %v9085_v8  ;;  %v1224_v7 = vcombine.low %v1184_v51, %v1212_v52  ;;  %v9147_v8 = vld [vmem:[%s12985_s1 + $0x868] ss:$16 sps:$4 sm:$0xff]   ;;  %v1605_v51 = vrot.slane %v9320_v42, %v10215_v54  ;;  %v9198_v52 = vld [vmem:[%s12985_s1 + $0x980] ss:$16 sps:$4 sm:$0xff]  }
  0xe5   :  { %v9266_v42 = vld [vmem:[%s12985_s1 + $0xac0] ss:$16 sps:$4 sm:$0xff]  }
  0xe7   :  { %6023 = vmatpush1.bf16.msra.mxu0 %v9080_v16  ;;  %6712 = vmatpush1.bf16.msra.mxu1 %v9083_v18  ;;  %v9152_v16 = vld [vmem:[%s12985_s1 + $0x884] ss:$16 sps:$4 sm:$0xff]   ;;  %v9155_v18 = vld [vmem:[%s12985_s1 + $0x88c] ss:$16 sps:$4 sm:$0xff]  }
  0xe8   :  { %6024 = vmatprep.subr.bf16.mxu0 %v9088_v10  ;;  %6713 = vmatprep.subr.bf16.mxu1 %v9091_v13  ;;  %v9153_v10 = vld [vmem:[%s12985_s1 + $0x888] ss:$16 sps:$4 sm:$0xff]   ;;  %v9158_v13 = vld [vmem:[%s12985_s1 + $0x8a4] ss:$16 sps:$4 sm:$0xff]  }
  0xeb   :  { %6025 = vmatpush1.bf16.msra.mxu0 %v9086_v17  ;;  %6714 = vmatpush1.bf16.msra.mxu1 %v9089_v19  ;;  %v9161_v17 = vld [vmem:[%s12985_s1 + $0x8ac] ss:$16 sps:$4 sm:$0xff]   ;;  %v9156_v19 = vld [vmem:[%s12985_s1 + $0x8a0] ss:$16 sps:$4 sm:$0xff]  }
  0xec   :  { %6026 = vmatprep.subr.bf16.mxu0 %v9094_v20  ;;  %6715 = vmatprep.subr.bf16.mxu1 %v9097_v21  ;;  %v9159_v20 = vld [vmem:[%s12985_s1 + $0x8a8] ss:$16 sps:$4 sm:$0xff]   ;;  %v9164_v21 = vld [vmem:[%s12985_s1 + $0x8c4] ss:$16 sps:$4 sm:$0xff]  }
  0xef   :  { %6027 = vmatpush1.bf16.msra.mxu0 %v9092_v11  ;;  %6716 = vmatpush1.bf16.msra.mxu1 %v9095_v14  ;;  %v9167_v11 = vld [vmem:[%s12985_s1 + $0x8cc] ss:$16 sps:$4 sm:$0xff]   ;;  %v9162_v14 = vld [vmem:[%s12985_s1 + $0x8c0] ss:$16 sps:$4 sm:$0xff]  }
  0xf0   :  { %6028 = vmatprep.subr.bf16.mxu0 %v9100_v22  ;;  %6717 = vmatprep.subr.bf16.mxu1 %v9103_v24  ;;  %v9165_v22 = vld [vmem:[%s12985_s1 + $0x8c8] ss:$16 sps:$4 sm:$0xff]   ;;  %v9173_v24 = vld [vmem:[%s12985_s1 + $0x8ec] ss:$16 sps:$4 sm:$0xff]  }
  0xf3   :  { %6029 = vmatpush1.bf16.msra.mxu0 %v9098_v23  ;;  %6718 = vmatpush1.bf16.msra.mxu1 %v9101_v25  ;;  %v9170_v23 = vld [vmem:[%s12985_s1 + $0x8e4] ss:$16 sps:$4 sm:$0xff]   ;;  %v9168_v25 = vld [vmem:[%s12985_s1 + $0x8e0] ss:$16 sps:$4 sm:$0xff]  }
  0xf4   :  { %6030 = vmatprep.subr.bf16.mxu0 %v9106_v9  ;;  %6719 = vmatprep.subr.bf16.mxu1 %v9109_v26  ;;  %v9171_v9 = vld [vmem:[%s12985_s1 + $0x8e8] ss:$16 sps:$4 sm:$0xff]   ;;  %v9176_v26 = vld [vmem:[%s12985_s1 + $0x904] ss:$16 sps:$4 sm:$0xff]  }
  0xf7   :  { %6031 = vmatpush1.bf16.msra.mxu0 %v9104_v32  ;;  %6720 = vmatpush1.bf16.msra.mxu1 %v9107_v33  ;;  %v9185_v32 = vld [vmem:[%s12985_s1 + $0x92c] ss:$16 sps:$4 sm:$0xff]   ;;  %v9180_v33 = vld [vmem:[%s12985_s1 + $0x920] ss:$16 sps:$4 sm:$0xff]  }
  0xf8   :  { %6032 = vmatprep.subr.bf16.mxu0 %v9116_v34  ;;  %6721 = vmatprep.subr.bf16.mxu1 %v9119_v35  ;;  %v9183_v34 = vld [vmem:[%s12985_s1 + $0x928] ss:$16 sps:$4 sm:$0xff]   ;;  %v9188_v35 = vld [vmem:[%s12985_s1 + $0x944] ss:$16 sps:$4 sm:$0xff]  }
  0xfb   :  { %6033 = vmatpush1.bf16.msra.mxu0 %v9114_v38  ;;  %6722 = vmatpush1.bf16.msra.mxu1 %v9117_v39  ;;  %v9197_v38 = vld [vmem:[%s12985_s1 + $0x96c] ss:$16 sps:$4 sm:$0xff]  }
  0xfc   :  { %6034 = vmatprep.subr.bf16.mxu0 %v9122_v40  ;;  %6723 = vmatprep.subr.bf16.mxu1 %v9125_v41  ;;  %v9314_v39 = vld [vmem:[%s12984_s0 + $0xd0] ss:$25 sps:$4 sm:$0xff]   ;;  %v9316_v40 = vld [vmem:[%s12984_s0 + $0x102] ss:$25 sps:$4 sm:$0xff]  }
  0xfd   :  { %v9318_v41 = vld [vmem:[%s12984_s0 + $0x134] ss:$25 sps:$4 sm:$0xff]  }
  0xff   :  { %6035 = vmatpush1.bf16.msra.mxu0 %v9120_v44  ;;  %6724 = vmatpush1.bf16.msra.mxu1 %v9123_v48  ;;  %v9195_v44 = vld [vmem:[%s12985_s1 + $0x968] ss:$16 sps:$4 sm:$0xff]   ;;  %v1563_v48 = vrot.slane %v9314_v39, %v10215_v54  ;;  %v9260_v39 = vld [vmem:[%s12985_s1 + $0xaa0] ss:$16 sps:$4 sm:$0xff]  }
 0x100   :  { %6057 = vmatprep.subr.bf16.mxu0 %v9128_v49  ;;  %6746 = vmatprep.subr.bf16.mxu1 %v9131_v50  ;;  %v1577_v49 = vrot.slane %v9316_v40, %v10215_v54  ;;  %v1591_v50 = vrot.slane %v9318_v41, %v10215_v54  ;;  %v9263_v40 = vld [vmem:[%s12985_s1 + $0xaa8] ss:$16 sps:$4 sm:$0xff]   ;;  %v9268_v41 = vld [vmem:[%s12985_s1 + $0xac4] ss:$16 sps:$4 sm:$0xff]  }
 0x102   :  { %6037 = vmatmul.mubr.bf16.vlgmr.msra.gmra.mrb[0].mxu0 %v10564_v15  ;;  %6726 = vmatmul.mubr.bf16.vlgmr.msra.gmra.mrb[0].mxu1 %v10564_v15  ;;  %v9138_v15 = vld [vmem:[%s12985_s1 + $0x840] ss:$16 sps:$4 sm:$0xff]  }
 0x103   :  { %6058 = vmatpush1.bf16.msra.mxu0 %v9126_v6  ;;  %6747 = vmatpush1.bf16.msra.mxu1 %v9129_v56  ;;  %v9201_v6 = vld [vmem:[%s12985_s1 + $0x988] ss:$16 sps:$4 sm:$0xff]   ;;  %v9206_v56 = vld [vmem:[%s12985_s1 + $0x9a4] ss:$16 sps:$4 sm:$0xff]  }
 0x104   :  { %6059 = vmatprep.subr.bf16.mxu0 %v9134_v57  ;;  %6748 = vmatprep.subr.bf16.mxu1 %v9137_v59  ;;  %v9209_v57 = vld [vmem:[%s12985_s1 + $0x9ac] ss:$16 sps:$4 sm:$0xff]   ;;  %v1614_v59 = vcombine.high %v1563_v48, %v1577_v49 }
 0x105   :  { %6046 = vmatprep.mubr.bf16.mxu0 %v10755_v12  ;;  %6735 = vmatprep.mubr.bf16.mxu1 %v10755_v12  ;;  %v9144_v12 = vld [vmem:[%s12985_s1 + $0x860] ss:$16 sps:$4 sm:$0xff]  }
 0x107   :  { %6060 = vmatpush1.bf16.msra.mxu0 %v9132_v61  ;;  %6749 = vmatpush1.bf16.msra.mxu1 %v9135_v62  ;;  %v1618_v61 = vcombine.high %v1591_v50, %v1605_v51  ;;  %v9204_v62 = vld [vmem:[%s12985_s1 + $0x9a0] ss:$16 sps:$4 sm:$0xff]  }
 0x108   :  { %6061 = vmatprep.subr.bf16.mxu0 %v9140_v63  ;;  %6750 = vmatprep.subr.bf16.mxu1 %v9143_v0  ;;  %v1613_v63 = vcombine.low %v1563_v48, %v1577_v49  ;;  %v1617_v0 = vcombine.low %v1591_v50, %v1605_v51  ;;  %v9277_v48 = vld [vmem:[%s12985_s1 + $0xaec] ss:$16 sps:$4 sm:$0xff]   ;;  %v9275_v49 = vld [vmem:[%s12985_s1 + $0xae8] ss:$16 sps:$4 sm:$0xff]   ;;  %v9280_v50 = vld [vmem:[%s12985_s1 + $0xb04] ss:$16 sps:$4 sm:$0xff]  }
 0x109   :  { %v9278_v51 = vld [vmem:[%s12985_s1 + $0xb00] ss:$16 sps:$4 sm:$0xff]  }
 0x10a   :  { %6047 = vmatmul.mubr.bf16.gmra.mrb[4].mxu0 %v10760_v27  ;;  %6736 = vmatmul.mubr.bf16.gmra.mrb[4].mxu1 %v10760_v27  ;;  %v9150_v27 = vld [vmem:[%s12985_s1 + $0x880] ss:$16 sps:$4 sm:$0xff]  }
 0x10b   :  { %6062 = vmatpush1.bf16.msra.mxu0 %v9138_v15  ;;  %6751 = vmatpush1.bf16.msra.mxu1 %v9141_v1  ;;  %v9207_v15 = vld [vmem:[%s12985_s1 + $0x9a8] ss:$16 sps:$4 sm:$0xff]   ;;  %v9212_v1 = vld [vmem:[%s12985_s1 + $0x9c4] ss:$16 sps:$4 sm:$0xff]  }
 0x10c   :  { %6063 = vmatprep.subr.bf16.mxu0 %v9146_v4  ;;  %6752 = vmatprep.subr.bf16.mxu1 %v9149_v5  ;;  %v9215_v4 = vld [vmem:[%s12985_s1 + $0x9cc] ss:$16 sps:$4 sm:$0xff]   ;;  %v1641_v5 = vrot.slane %v1614_v59, %v10215_v54 }
 0x10d   :  { %6089 = vmatprep.mubr.bf16.mxu0 %v1224_v7  ;;  %6778 = vmatprep.mubr.bf16.mxu1 %v1224_v7  ;;  %v1669_v7 = vrot.slane %v1618_v61, %v10215_v54  ;;  %v9289_v59 = vld [vmem:[%s12985_s1 + $0xb2c] ss:$16 sps:$4 sm:$0xff]   ;;  %v9287_v61 = vld [vmem:[%s12985_s1 + $0xb28] ss:$16 sps:$4 sm:$0xff]  }
 0x10f   :  { %6064 = vmatpush1.bf16.msra.mxu0 %v9144_v12  ;;  %6753 = vmatpush1.bf16.msra.mxu1 %v9147_v8  ;;  %v9210_v12 = vld [vmem:[%s12985_s1 + $0x9c0] ss:$16 sps:$4 sm:$0xff]   ;;  %v1627_v8 = vrot.slane %v1613_v63, %v10215_v54 }
 0x110   :  { %6065 = vmatprep.subr.bf16.mxu0 %v9152_v16  ;;  %6754 = vmatprep.subr.bf16.mxu1 %v9155_v18  ;;  %v1655_v16 = vrot.slane %v1617_v0, %v10215_v54  ;;  %v9213_v18 = vld [vmem:[%s12985_s1 + $0x9c8] ss:$16 sps:$4 sm:$0xff]   ;;  %v9290_v63 = vld [vmem:[%s12985_s1 + $0xb40] ss:$16 sps:$4 sm:$0xff]   ;;  %v9295_v0 = vld [vmem:[%s12985_s1 + $0xb4c] ss:$16 sps:$4 sm:$0xff]  }
 0x113   :  { %6066 = vmatpush1.bf16.msra.mxu0 %v9150_v27  ;;  %6755 = vmatpush1.bf16.msra.mxu1 %v9153_v10  ;;  %v9218_v27 = vld [vmem:[%s12985_s1 + $0x9e4] ss:$16 sps:$4 sm:$0xff]   ;;  %v11203_v10 = vcombine.high %v1641_v5, %v1669_v7 }
 0x114   :  { %6067 = vmatprep.subr.bf16.mxu0 %v9158_v13  ;;  %6756 = vmatprep.subr.bf16.mxu1 %v9161_v17  ;;  %v9221_v13 = vld [vmem:[%s12985_s1 + $0x9ec] ss:$16 sps:$4 sm:$0xff]   ;;  %v11208_v17 = vcombine.high %v1627_v8, %v1655_v16 }
 0x117   :  { %6068 = vmatpush1.bf16.msra.mxu0 %v9156_v19  ;;  %6757 = vmatpush1.bf16.msra.mxu1 %v9159_v20  ;;  %v9216_v19 = vld [vmem:[%s12985_s1 + $0x9e0] ss:$16 sps:$4 sm:$0xff]   ;;  %v9219_v20 = vld [vmem:[%s12985_s1 + $0x9e8] ss:$16 sps:$4 sm:$0xff]  }
 0x118   :  { %6069 = vmatprep.subr.bf16.mxu0 %v9164_v21  ;;  %6758 = vmatprep.subr.bf16.mxu1 %v9167_v11  ;;  %v9232_v21 = vld [vmem:[%s12985_s1 + $0xa04] ss:$16 sps:$4 sm:$0xff]   ;;  %v9230_v11 = vld [vmem:[%s12985_s1 + $0xa00] ss:$16 sps:$4 sm:$0xff]  }
 0x11b   :  { %6070 = vmatpush1.bf16.msra.mxu0 %v9162_v14  ;;  %6759 = vmatpush1.bf16.msra.mxu1 %v9165_v22  ;;  %v9235_v14 = vld [vmem:[%s12985_s1 + $0xa0c] ss:$16 sps:$4 sm:$0xff]   ;;  %v1220_v22 = vcombine.low %v10992_v53, %v10995_v55  ;;  %v1681_v55 = vcombine.low %v1641_v5, %v1669_v7  ;;  %v9299_v7 = vld [vmem:[%s12985_s1 + $0xb68] ss:$16 sps:$4 sm:$0xff]  }
 0x11c   :  { %6071 = vmatprep.subr.bf16.mxu0 %v9170_v23  ;;  %6760 = vmatprep.subr.bf16.mxu1 %v9173_v24  ;;  %v9233_v23 = vld [vmem:[%s12985_s1 + $0xa08] ss:$16 sps:$4 sm:$0xff]   ;;  %v9238_v24 = vld [vmem:[%s12985_s1 + $0xa24] ss:$16 sps:$4 sm:$0xff]   ;;  %v9241_v53 = vld [vmem:[%s12985_s1 + $0xa2c] ss:$16 sps:$4 sm:$0xff]  }
 0x11d   :  { %v9301_v5 = vld [vmem:[%s12985_s1 + $0xb6c] ss:$16 sps:$4 sm:$0xff]  }
 0x11f   :  { %6072 = vmatpush1.bf16.msra.mxu0 %v9168_v25  ;;  %6761 = vmatpush1.bf16.msra.mxu1 %v9171_v9  ;;  %v9236_v25 = vld [vmem:[%s12985_s1 + $0xa20] ss:$16 sps:$4 sm:$0xff]   ;;  %v9239_v9 = vld [vmem:[%s12985_s1 + $0xa28] ss:$16 sps:$4 sm:$0xff]  }
 0x120   :  { %6073 = vmatprep.subr.bf16.mxu0 %v9176_v26  ;;  %6762 = vmatprep.subr.bf16.mxu1 %v9179_v28  ;;  %v9244_v26 = vld [vmem:[%s12985_s1 + $0xa44] ss:$16 sps:$4 sm:$0xff]   ;;  %v9242_v28 = vld [vmem:[%s12985_s1 + $0xa40] ss:$16 sps:$4 sm:$0xff]  }
 0x123   :  { %6074 = vmatpush1.bf16.msra.mxu0 %v9174_v29  ;;  %6763 = vmatpush1.bf16.msra.mxu1 %v9177_v30  ;;  %v9247_v29 = vld [vmem:[%s12985_s1 + $0xa4c] ss:$16 sps:$4 sm:$0xff]   ;;  %v1677_v30 = vcombine.low %v1627_v8, %v1655_v16  ;;  %v9302_v8 = vld [vmem:[%s12985_s1 + $0xb80] ss:$16 sps:$4 sm:$0xff]  }
 0x124   :  { %6075 = vmatprep.subr.bf16.mxu0 %v9182_v31  ;;  %6764 = vmatprep.subr.bf16.mxu1 %v9185_v32  ;;  %v9245_v31 = vld [vmem:[%s12985_s1 + $0xa48] ss:$16 sps:$4 sm:$0xff]   ;;  %v9250_v32 = vld [vmem:[%s12985_s1 + $0xa64] ss:$16 sps:$4 sm:$0xff]   ;;  %v9307_v16 = vld [vmem:[%s12985_s1 + $0xb8c] ss:$16 sps:$4 sm:$0xff]  }
 0x127   :  { %6076 = vmatpush1.bf16.msra.mxu0 %v9180_v33  ;;  %6765 = vmatpush1.bf16.msra.mxu1 %v9183_v34  ;;  %v9248_v33 = vld [vmem:[%s12985_s1 + $0xa60] ss:$16 sps:$4 sm:$0xff]   ;;  %v9253_v34 = vld [vmem:[%s12985_s1 + $0xa6c] ss:$16 sps:$4 sm:$0xff]  }
 0x128   :  { %6077 = vmatprep.subr.bf16.mxu0 %v9188_v35  ;;  %6766 = vmatprep.subr.bf16.mxu1 %v9191_v3  ;;  %v9251_v35 = vld [vmem:[%s12985_s1 + $0xa68] ss:$16 sps:$4 sm:$0xff]   ;;  %v9254_v3 = vld [vmem:[%s12985_s1 + $0xa80] ss:$16 sps:$4 sm:$0xff]  }
 0x12b   :  { %6078 = vmatpush1.bf16.msra.mxu0 %v9186_v2  ;;  %6767 = vmatpush1.bf16.msra.mxu1 %v9189_v36  ;;  %v9256_v2 = vld [vmem:[%s12985_s1 + $0xa84] ss:$16 sps:$4 sm:$0xff]   ;;  %v9259_v36 = vld [vmem:[%s12985_s1 + $0xa8c] ss:$16 sps:$4 sm:$0xff]  }
 0x12c   :  { %6079 = vmatprep.subr.bf16.mxu0 %v9194_v37  ;;  %6768 = vmatprep.subr.bf16.mxu1 %v9197_v38  ;;  %v9257_v37 = vld [vmem:[%s12985_s1 + $0xa88] ss:$16 sps:$4 sm:$0xff]   ;;  %v9262_v38 = vld [vmem:[%s12985_s1 + $0xaa4] ss:$16 sps:$4 sm:$0xff]  }
 0x12f   :  { %6080 = vmatpush1.bf16.msra.mxu0 %v9192_v43  ;;  %6769 = vmatpush1.bf16.msra.mxu1 %v9195_v44  ;;  %v9271_v43 = vld [vmem:[%s12985_s1 + $0xacc] ss:$16 sps:$4 sm:$0xff]   ;;  %v9269_v44 = vld [vmem:[%s12985_s1 + $0xac8] ss:$16 sps:$4 sm:$0xff]  }
 0x130   :  { %6081 = vmatprep.subr.bf16.mxu0 %v9200_v45  ;;  %6770 = vmatprep.subr.bf16.mxu1 %v9203_v47  ;;  %v9274_v45 = vld [vmem:[%s12985_s1 + $0xae4] ss:$16 sps:$4 sm:$0xff]   ;;  %v9272_v47 = vld [vmem:[%s12985_s1 + $0xae0] ss:$16 sps:$4 sm:$0xff]  }
 0x133   :  { %6082 = vmatpush1.bf16.msra.mxu0 %v9198_v52  ;;  %6771 = vmatpush1.bf16.msra.mxu1 %v9201_v6  ;;  %v9283_v52 = vld [vmem:[%s12985_s1 + $0xb0c] ss:$16 sps:$4 sm:$0xff]   ;;  %v9281_v6 = vld [vmem:[%s12985_s1 + $0xb08] ss:$16 sps:$4 sm:$0xff]  }
 0x134   :  { %6083 = vmatprep.subr.bf16.mxu0 %v9206_v56  ;;  %6772 = vmatprep.subr.bf16.mxu1 %v9209_v57  ;;  %v9286_v56 = vld [vmem:[%s12985_s1 + $0xb24] ss:$16 sps:$4 sm:$0xff]   ;;  %v9284_v57 = vld [vmem:[%s12985_s1 + $0xb20] ss:$16 sps:$4 sm:$0xff]  }
 0x137   :  { %6084 = vmatpush1.bf16.msra.mxu0 %v9204_v62  ;;  %6773 = vmatpush1.bf16.msra.mxu1 %v9207_v15  ;;  %v9292_v62 = vld [vmem:[%s12985_s1 + $0xb44] ss:$16 sps:$4 sm:$0xff]   ;;  %v9293_v15 = vld [vmem:[%s12985_s1 + $0xb48] ss:$16 sps:$4 sm:$0xff]  }
 0x138   :  { %6085 = vmatprep.subr.bf16.mxu0 %v9212_v1  ;;  %6774 = vmatprep.subr.bf16.mxu1 %v9215_v4  ;;  %v9298_v1 = vld [vmem:[%s12985_s1 + $0xb64] ss:$16 sps:$4 sm:$0xff]   ;;  %v9296_v4 = vld [vmem:[%s12985_s1 + $0xb60] ss:$16 sps:$4 sm:$0xff]  }
 0x13b   :  { %6086 = vmatpush1.bf16.msra.mxu0 %v9210_v12  ;;  %6775 = vmatpush1.bf16.msra.mxu1 %v9213_v18  ;;  %v9304_v12 = vld [vmem:[%s12985_s1 + $0xb84] ss:$16 sps:$4 sm:$0xff]   ;;  %v9305_v18 = vld [vmem:[%s12985_s1 + $0xb88] ss:$16 sps:$4 sm:$0xff]  }
 0x13c   :  { %6087 = vmatprep.subr.bf16.mxu0 %v9218_v27  ;;  %6776 = vmatprep.subr.bf16.mxu1 %v9221_v13  ;;  %v9310_v27 = vld [vmem:[%s12985_s1 + $0xba4] ss:$16 sps:$4 sm:$0xff]   ;;  %v9308_v13 = vld [vmem:[%s12985_s1 + $0xba0] ss:$16 sps:$4 sm:$0xff]  }
 0x13f   :  { %6088 = vmatpush1.bf16.msra.mxu0 %v9216_v19  ;;  %6777 = vmatpush1.bf16.msra.mxu1 %v9219_v20  ;;  %v9313_v19 = vld [vmem:[%s12985_s1 + $0xbac] ss:$16 sps:$4 sm:$0xff]  }
 0x140   :  { %6110 = vmatprep.subr.bf16.mxu0 %v9232_v21  ;;  %6799 = vmatprep.subr.bf16.mxu1 %v9235_v14  ;;  %v9430_v20 = vld [vmem:[%s12984_s0 + $0xc] ss:$25 sps:$4 sm:$0xff]   ;;  %v9431_v21 = vld [vmem:[%s12984_s0 + $0x3e] ss:$25 sps:$4 sm:$0xff]  }
 0x141   :  { %v9433_v14 = vld [vmem:[%s12984_s0 + $0xa2] ss:$25 sps:$4 sm:$0xff]  }
 0x142   :  { %6090 = vmatmul.mubr.bf16.vlgmr.msra.gmra.mrb[0].mxu0 %v1220_v22  ;;  %6779 = vmatmul.mubr.bf16.vlgmr.msra.gmra.mrb[0].mxu1 %v1220_v22  ;;  %v9311_v22 = vld [vmem:[%s12985_s1 + $0xba8] ss:$16 sps:$4 sm:$0xff]  }
 0x143   :  { %6111 = vmatpush1.bf16.msra.mxu0 %v9230_v11  ;;  %6800 = vmatpush1.bf16.msra.mxu1 %v9233_v23  ;;  %v9432_v11 = vld [vmem:[%s12984_s0 + $0x70] ss:$25 sps:$4 sm:$0xff]   ;;  %v9324_v23 = vld [vmem:[%s12985_s1 + $0xbc4] ss:$16 sps:$4 sm:$0xff]  }
 0x144   :  { %6112 = vmatprep.subr.bf16.mxu0 %v9238_v24  ;;  %6801 = vmatprep.subr.bf16.mxu1 %v9241_v53  ;;  %v9322_v24 = vld [vmem:[%s12985_s1 + $0xbc0] ss:$16 sps:$4 sm:$0xff]   ;;  %v1113_v53 = vrot.slane %v9430_v20, %v10215_v54  ;;  %v9387_v20 = vld [vmem:[%s12985_s1 + $0xd0c] ss:$16 sps:$4 sm:$0xff]  }
 0x145   :  { %6099 = vmatprep.mubr.bf16.mxu0 %v1681_v55  ;;  %6788 = vmatprep.mubr.bf16.mxu1 %v1681_v55  ;;  %v1127_v55 = vrot.slane %v9431_v21, %v10215_v54  ;;  %v9385_v21 = vld [vmem:[%s12985_s1 + $0xd08] ss:$16 sps:$4 sm:$0xff]  }
 0x147   :  { %6113 = vmatpush1.bf16.msra.mxu0 %v9236_v25  ;;  %6802 = vmatpush1.bf16.msra.mxu1 %v9239_v9  ;;  %v9327_v25 = vld [vmem:[%s12985_s1 + $0xbcc] ss:$16 sps:$4 sm:$0xff]   ;;  %v1141_v9 = vrot.slane %v9432_v11, %v10215_v54  ;;  %v9390_v11 = vld [vmem:[%s12985_s1 + $0xd24] ss:$16 sps:$4 sm:$0xff]  }
 0x148   :  { %6114 = vmatprep.subr.bf16.mxu0 %v9244_v26  ;;  %6803 = vmatprep.subr.bf16.mxu1 %v9247_v29  ;;  %v1155_v26 = vrot.slane %v9433_v14, %v10215_v54  ;;  %v9330_v29 = vld [vmem:[%s12985_s1 + $0xbe4] ss:$16 sps:$4 sm:$0xff]   ;;  %v9388_v14 = vld [vmem:[%s12985_s1 + $0xd20] ss:$16 sps:$4 sm:$0xff]  }
 0x14a   :  { %6100 = vmatmul.mubr.bf16.gmra.mrb[4].mxu0 %v1677_v30  ;;  %6789 = vmatmul.mubr.bf16.gmra.mrb[4].mxu1 %v1677_v30  ;;  %v9328_v30 = vld [vmem:[%s12985_s1 + $0xbe0] ss:$16 sps:$4 sm:$0xff]  }
 0x14b   :  { %6115 = vmatpush1.bf16.msra.mxu0 %v9242_v28  ;;  %6804 = vmatpush1.bf16.msra.mxu1 %v9245_v31  ;;  %v9325_v28 = vld [vmem:[%s12985_s1 + $0xbc8] ss:$16 sps:$4 sm:$0xff]   ;;  %v9333_v31 = vld [vmem:[%s12985_s1 + $0xbec] ss:$16 sps:$4 sm:$0xff]  }
 0x14c   :  { %6116 = vmatprep.subr.bf16.mxu0 %v9250_v32  ;;  %6805 = vmatprep.subr.bf16.mxu1 %v9253_v34  ;;  %v1159_v32 = vcombine.high %v1113_v53, %v1127_v55  ;;  %v1158_v34 = vcombine.low %v1113_v53, %v1127_v55  ;;  %v9399_v53 = vld [vmem:[%s12985_s1 + $0xd4c] ss:$16 sps:$4 sm:$0xff]   ;;  %v9397_v55 = vld [vmem:[%s12985_s1 + $0xd48] ss:$16 sps:$4 sm:$0xff]  }
 0x14d   :  { %6142 = vmatprep.mubr.bf16.mxu0 %v11003_v58  ;;  %6831 = vmatprep.mubr.bf16.mxu1 %v11003_v58  ;;  %v9265_v58 = vld [vmem:[%s12985_s1 + $0xaac] ss:$16 sps:$4 sm:$0xff]  }
 0x14f   :  { %6117 = vmatpush1.bf16.msra.mxu0 %v9248_v33  ;;  %6806 = vmatpush1.bf16.msra.mxu1 %v9251_v35  ;;  %v1163_v33 = vcombine.high %v1141_v9, %v1155_v26  ;;  %v1162_v35 = vcombine.low %v1141_v9, %v1155_v26  ;;  %v9402_v9 = vld [vmem:[%s12985_s1 + $0xd64] ss:$16 sps:$4 sm:$0xff]   ;;  %v9405_v26 = vld [vmem:[%s12985_s1 + $0xd6c] ss:$16 sps:$4 sm:$0xff]  }
 0x150   :  { %6118 = vmatprep.subr.bf16.mxu0 %v9256_v2  ;;  %6807 = vmatprep.subr.bf16.mxu1 %v9259_v36  ;;  %v9331_v2 = vld [vmem:[%s12985_s1 + $0xbe8] ss:$16 sps:$4 sm:$0xff]   ;;  %v9334_v36 = vld [vmem:[%s12985_s1 + $0xc00] ss:$16 sps:$4 sm:$0xff]  }
 0x153   :  { %6119 = vmatpush1.bf16.msra.mxu0 %v9254_v3  ;;  %6808 = vmatpush1.bf16.msra.mxu1 %v9257_v37  ;;  %v9336_v3 = vld [vmem:[%s12985_s1 + $0xc04] ss:$16 sps:$4 sm:$0xff]   ;;  %v9339_v37 = vld [vmem:[%s12985_s1 + $0xc0c] ss:$16 sps:$4 sm:$0xff]  }
 0x154   :  { %6120 = vmatprep.subr.bf16.mxu0 %v9262_v38  ;;  %6809 = vmatprep.subr.bf16.mxu1 %v9265_v58  ;;  %v1191_v38 = vrot.slane %v1159_v32, %v10215_v54  ;;  %v11440_v58 = vrot.slane %v1158_v34, %v10215_v54  ;;  %v9521_v32 = vld [vmem:[%s12984_s0 + $0x16a] ss:$25 sps:$4 sm:$0xff]  }
 0x155   :  { %v9408_v34 = vld [vmem:[%s12985_s1 + $0xd84] ss:$16 sps:$4 sm:$0xff]  }
 0x157   :  { %6121 = vmatpush1.bf16.msra.mxu0 %v9260_v39  ;;  %6810 = vmatpush1.bf16.msra.mxu1 %v9263_v40  ;;  %v1219_v39 = vrot.slane %v1163_v33, %v10215_v54  ;;  %v11443_v40 = vrot.slane %v1162_v35, %v10215_v54  ;;  %v9403_v33 = vld [vmem:[%s12985_s1 + $0xd68] ss:$16 sps:$4 sm:$0xff]   ;;  %v9406_v35 = vld [vmem:[%s12985_s1 + $0xd80] ss:$16 sps:$4 sm:$0xff]  }
 0x158   :  { %6122 = vmatprep.subr.bf16.mxu0 %v9268_v41  ;;  %6811 = vmatprep.subr.bf16.mxu1 %v9271_v43  ;;  %v9337_v41 = vld [vmem:[%s12985_s1 + $0xc08] ss:$16 sps:$4 sm:$0xff]  }
 0x159   :  { %v11451_v43 = vcombine.high %v1191_v38, %v1219_v39 }
 0x15b   :  { %6123 = vmatpush1.bf16.msra.mxu0 %v9266_v42  ;;  %6812 = vmatpush1.bf16.msra.mxu1 %v9269_v44  ;;  %v9342_v42 = vld [vmem:[%s12985_s1 + $0xc24] ss:$16 sps:$4 sm:$0xff]   ;;  %v9340_v44 = vld [vmem:[%s12985_s1 + $0xc20] ss:$16 sps:$4 sm:$0xff]  }
 0x15c   :  { %6124 = vmatprep.subr.bf16.mxu0 %v9274_v45  ;;  %6813 = vmatprep.subr.bf16.mxu1 %v9277_v48  ;;  %v9345_v45 = vld [vmem:[%s12985_s1 + $0xc2c] ss:$16 sps:$4 sm:$0xff]   ;;  %v9343_v48 = vld [vmem:[%s12985_s1 + $0xc28] ss:$16 sps:$4 sm:$0xff]  }
 0x15f   :  { %6125 = vmatpush1.bf16.msra.mxu0 %v9272_v47  ;;  %6814 = vmatpush1.bf16.msra.mxu1 %v9275_v49  ;;  %v11461_v47 = vcombine.high %v11440_v58, %v11443_v40  ;;  %v9348_v49 = vld [vmem:[%s12985_s1 + $0xc44] ss:$16 sps:$4 sm:$0xff]  }
 0x160   :  { %6126 = vmatprep.subr.bf16.mxu0 %v9280_v50  ;;  %6815 = vmatprep.subr.bf16.mxu1 %v9283_v52  ;;  %v9346_v50 = vld [vmem:[%s12985_s1 + $0xc40] ss:$16 sps:$4 sm:$0xff]   ;;  %v9354_v52 = vld [vmem:[%s12985_s1 + $0xc64] ss:$16 sps:$4 sm:$0xff]  }
 0x163   :  { %6127 = vmatpush1.bf16.msra.mxu0 %v9278_v51  ;;  %6816 = vmatpush1.bf16.msra.mxu1 %v9281_v6  ;;  %v9351_v51 = vld [vmem:[%s12985_s1 + $0xc4c] ss:$16 sps:$4 sm:$0xff]   ;;  %v9352_v6 = vld [vmem:[%s12985_s1 + $0xc60] ss:$16 sps:$4 sm:$0xff]  }
 0x164   :  { %6128 = vmatprep.subr.bf16.mxu0 %v9286_v56  ;;  %6817 = vmatprep.subr.bf16.mxu1 %v9289_v59  ;;  %v1226_v56 = vcombine.low %v1191_v38, %v1219_v39  ;;  %v9360_v59 = vld [vmem:[%s12985_s1 + $0xc84] ss:$16 sps:$4 sm:$0xff]   ;;  %v1612_v38 = vrot.slane %v9521_v32, %v10215_v54  ;;  %v9409_v39 = vld [vmem:[%s12985_s1 + $0xd88] ss:$16 sps:$4 sm:$0xff]   ;;  %v9475_v32 = vld [vmem:[%s12985_s1 + $0xecc] ss:$16 sps:$4 sm:$0xff]  }
 0x167   :  { %6129 = vmatpush1.bf16.msra.mxu0 %v9284_v57  ;;  %6818 = vmatpush1.bf16.msra.mxu1 %v9287_v61  ;;  %v9355_v57 = vld [vmem:[%s12985_s1 + $0xc68] ss:$16 sps:$4 sm:$0xff]   ;;  %v9358_v61 = vld [vmem:[%s12985_s1 + $0xc80] ss:$16 sps:$4 sm:$0xff]  }
 0x168   :  { %6130 = vmatprep.subr.bf16.mxu0 %v9292_v62  ;;  %6819 = vmatprep.subr.bf16.mxu1 %v9295_v0  ;;  %v9363_v62 = vld [vmem:[%s12985_s1 + $0xc8c] ss:$16 sps:$4 sm:$0xff]   ;;  %v9364_v0 = vld [vmem:[%s12985_s1 + $0xca0] ss:$16 sps:$4 sm:$0xff]  }
 0x16b   :  { %6131 = vmatpush1.bf16.msra.mxu0 %v9290_v63  ;;  %6820 = vmatpush1.bf16.msra.mxu1 %v9293_v15  ;;  %v9366_v63 = vld [vmem:[%s12985_s1 + $0xca4] ss:$16 sps:$4 sm:$0xff]   ;;  %v9369_v15 = vld [vmem:[%s12985_s1 + $0xcac] ss:$16 sps:$4 sm:$0xff]  }
 0x16c   :  { %6132 = vmatprep.subr.bf16.mxu0 %v9298_v1  ;;  %6821 = vmatprep.subr.bf16.mxu1 %v9301_v5  ;;  %v9367_v1 = vld [vmem:[%s12985_s1 + $0xca8] ss:$16 sps:$4 sm:$0xff]   ;;  %v9370_v5 = vld [vmem:[%s12985_s1 + $0xcc0] ss:$16 sps:$4 sm:$0xff]  }
 0x16f   :  { %6133 = vmatpush1.bf16.msra.mxu0 %v9296_v4  ;;  %6822 = vmatpush1.bf16.msra.mxu1 %v9299_v7  ;;  %v9372_v4 = vld [vmem:[%s12985_s1 + $0xcc4] ss:$16 sps:$4 sm:$0xff]   ;;  %v9375_v7 = vld [vmem:[%s12985_s1 + $0xccc] ss:$16 sps:$4 sm:$0xff]  }
 0x170   :  { %6134 = vmatprep.subr.bf16.mxu0 %v9304_v12  ;;  %6823 = vmatprep.subr.bf16.mxu1 %v9307_v16  ;;  %v9373_v12 = vld [vmem:[%s12985_s1 + $0xcc8] ss:$16 sps:$4 sm:$0xff]   ;;  %v9376_v16 = vld [vmem:[%s12985_s1 + $0xce0] ss:$16 sps:$4 sm:$0xff]  }
 0x173   :  { %6135 = vmatpush1.bf16.msra.mxu0 %v9302_v8  ;;  %6824 = vmatpush1.bf16.msra.mxu1 %v9305_v18  ;;  %v9378_v8 = vld [vmem:[%s12985_s1 + $0xce4] ss:$16 sps:$4 sm:$0xff]   ;;  %v9381_v18 = vld [vmem:[%s12985_s1 + $0xcec] ss:$16 sps:$4 sm:$0xff]  }
 0x174   :  { %6136 = vmatprep.subr.bf16.mxu0 %v9310_v27  ;;  %6825 = vmatprep.subr.bf16.mxu1 %v9313_v19  ;;  %v9379_v27 = vld [vmem:[%s12985_s1 + $0xce8] ss:$16 sps:$4 sm:$0xff]   ;;  %v9382_v19 = vld [vmem:[%s12985_s1 + $0xd00] ss:$16 sps:$4 sm:$0xff]  }
 0x177   :  { %6137 = vmatpush1.bf16.msra.mxu0 %v9308_v13  ;;  %6826 = vmatpush1.bf16.msra.mxu1 %v9311_v22  ;;  %v9384_v13 = vld [vmem:[%s12985_s1 + $0xd04] ss:$16 sps:$4 sm:$0xff]   ;;  %v9393_v22 = vld [vmem:[%s12985_s1 + $0xd2c] ss:$16 sps:$4 sm:$0xff]  }
 0x178   :  { %6138 = vmatprep.subr.bf16.mxu0 %v9324_v23  ;;  %6827 = vmatprep.subr.bf16.mxu1 %v9327_v25  ;;  %v9391_v23 = vld [vmem:[%s12985_s1 + $0xd28] ss:$16 sps:$4 sm:$0xff]   ;;  %v9394_v25 = vld [vmem:[%s12985_s1 + $0xd40] ss:$16 sps:$4 sm:$0xff]  }
 0x17b   :  { %6139 = vmatpush1.bf16.msra.mxu0 %v9322_v24  ;;  %6828 = vmatpush1.bf16.msra.mxu1 %v9325_v28  ;;  %v9396_v24 = vld [vmem:[%s12985_s1 + $0xd44] ss:$16 sps:$4 sm:$0xff]  }
 0x17c   :  { %6140 = vmatprep.subr.bf16.mxu0 %v9330_v29  ;;  %6829 = vmatprep.subr.bf16.mxu1 %v9333_v31  ;;  %v9518_v28 = vld [vmem:[%s12984_s0 + $0xd4] ss:$25 sps:$4 sm:$0xff]   ;;  %v9519_v29 = vld [vmem:[%s12984_s0 + $0x106] ss:$25 sps:$4 sm:$0xff]  }
 0x17d   :  { %v9400_v31 = vld [vmem:[%s12985_s1 + $0xd60] ss:$16 sps:$4 sm:$0xff]  }
 0x17f   :  { %6141 = vmatpush1.bf16.msra.mxu0 %v9328_v30  ;;  %6830 = vmatpush1.bf16.msra.mxu1 %v9331_v2  ;;  %v9520_v30 = vld [vmem:[%s12984_s0 + $0x138] ss:$25 sps:$4 sm:$0xff]   ;;  %v9411_v2 = vld [vmem:[%s12985_s1 + $0xd8c] ss:$16 sps:$4 sm:$0xff]  }
 0x180   :  { %6163 = vmatprep.subr.bf16.mxu0 %v9336_v3  ;;  %6852 = vmatprep.subr.bf16.mxu1 %v9339_v37  ;;  %v1570_v3 = vrot.slane %v9518_v28, %v10215_v54  ;;  %v1598_v37 = vrot.slane %v9520_v30, %v10215_v54  ;;  %v9464_v28 = vld [vmem:[%s12985_s1 + $0xea0] ss:$16 sps:$4 sm:$0xff]   ;;  %v9472_v30 = vld [vmem:[%s12985_s1 + $0xec4] ss:$16 sps:$4 sm:$0xff]  }
 0x182   :  { %6143 = vmatmul.mubr.bf16.vlgmr.msra.gmra.mrb[0].mxu0 %v11010_v60  ;;  %6832 = vmatmul.mubr.bf16.vlgmr.msra.gmra.mrb[0].mxu1 %v11010_v60  ;;  %v9349_v60 = vld [vmem:[%s12985_s1 + $0xc48] ss:$16 sps:$4 sm:$0xff]  }
 0x183   :  { %6164 = vmatpush1.bf16.msra.mxu0 %v9334_v36  ;;  %6853 = vmatpush1.bf16.msra.mxu1 %v9337_v41  ;;  %v1584_v36 = vrot.slane %v9519_v29, %v10215_v54  ;;  %v9414_v41 = vld [vmem:[%s12985_s1 + $0xda4] ss:$16 sps:$4 sm:$0xff]   ;;  %v9467_v29 = vld [vmem:[%s12985_s1 + $0xea8] ss:$16 sps:$4 sm:$0xff]  }
 0x184   :  { %6165 = vmatprep.subr.bf16.mxu0 %v9342_v42  ;;  %6854 = vmatprep.subr.bf16.mxu1 %v9345_v45  ;;  %v9412_v42 = vld [vmem:[%s12985_s1 + $0xda0] ss:$16 sps:$4 sm:$0xff]  }
 0x185   :  { %6152 = vmatprep.mubr.bf16.mxu0 %v11203_v10  ;;  %6841 = vmatprep.mubr.bf16.mxu1 %v11203_v10  ;;  %v9357_v10 = vld [vmem:[%s12985_s1 + $0xc6c] ss:$16 sps:$4 sm:$0xff]   ;;  %v1616_v45 = vcombine.high %v1570_v3, %v1584_v36 }
 0x187   :  { %6166 = vmatpush1.bf16.msra.mxu0 %v9340_v44  ;;  %6855 = vmatpush1.bf16.msra.mxu1 %v9343_v48  ;;  %v9417_v44 = vld [vmem:[%s12985_s1 + $0xdac] ss:$16 sps:$4 sm:$0xff]   ;;  %v1620_v48 = vcombine.high %v1598_v37, %v1612_v38 }
 0x188   :  { %6167 = vmatprep.subr.bf16.mxu0 %v9348_v49  ;;  %6856 = vmatprep.subr.bf16.mxu1 %v9351_v51  ;;  %v1615_v49 = vcombine.low %v1570_v3, %v1584_v36  ;;  %v9415_v51 = vld [vmem:[%s12985_s1 + $0xda8] ss:$16 sps:$4 sm:$0xff]   ;;  %v9484_v36 = vld [vmem:[%s12985_s1 + $0xf04] ss:$16 sps:$4 sm:$0xff]  }
 0x189   :  { %v9479_v3 = vld [vmem:[%s12985_s1 + $0xee8] ss:$16 sps:$4 sm:$0xff]  }
 0x18a   :  { %6153 = vmatmul.mubr.bf16.gmra.mrb[4].mxu0 %v11208_v17  ;;  %6842 = vmatmul.mubr.bf16.gmra.mrb[4].mxu1 %v11208_v17  ;;  %v9361_v17 = vld [vmem:[%s12985_s1 + $0xc88] ss:$16 sps:$4 sm:$0xff]  }
 0x18b   :  { %6168 = vmatpush1.bf16.msra.mxu0 %v9346_v50  ;;  %6857 = vmatpush1.bf16.msra.mxu1 %v9349_v60  ;;  %v1619_v50 = vcombine.low %v1598_v37, %v1612_v38  ;;  %v9420_v60 = vld [vmem:[%s12985_s1 + $0xdc4] ss:$16 sps:$4 sm:$0xff]   ;;  %v9482_v37 = vld [vmem:[%s12985_s1 + $0xf00] ss:$16 sps:$4 sm:$0xff]   ;;  %v9487_v38 = vld [vmem:[%s12985_s1 + $0xf0c] ss:$16 sps:$4 sm:$0xff]  }
 0x18c   :  { %6169 = vmatprep.subr.bf16.mxu0 %v9354_v52  ;;  %6858 = vmatprep.subr.bf16.mxu1 %v9357_v10  ;;  %v9418_v52 = vld [vmem:[%s12985_s1 + $0xdc0] ss:$16 sps:$4 sm:$0xff]   ;;  %v1648_v10 = vrot.slane %v1616_v45, %v10215_v54  ;;  %v9491_v45 = vld [vmem:[%s12985_s1 + $0xf28] ss:$16 sps:$4 sm:$0xff]  }
 0x18d   :  { %6195 = vmatprep.mubr.bf16.mxu0 %v1226_v56  ;;  %6884 = vmatprep.mubr.bf16.mxu1 %v1226_v56  ;;  %v1676_v56 = vrot.slane %v1620_v48, %v10215_v54  ;;  %v9496_v48 = vld [vmem:[%s12985_s1 + $0xf44] ss:$16 sps:$4 sm:$0xff]  }
 0x18f   :  { %6170 = vmatpush1.bf16.msra.mxu0 %v9352_v6  ;;  %6859 = vmatpush1.bf16.msra.mxu1 %v9355_v57  ;;  %v9423_v6 = vld [vmem:[%s12985_s1 + $0xdcc] ss:$16 sps:$4 sm:$0xff]   ;;  %v1634_v57 = vrot.slane %v1615_v49, %v10215_v54  ;;  %v9494_v49 = vld [vmem:[%s12985_s1 + $0xf40] ss:$16 sps:$4 sm:$0xff]  }
 0x190   :  { %6171 = vmatprep.subr.bf16.mxu0 %v9360_v59  ;;  %6860 = vmatprep.subr.bf16.mxu1 %v9363_v62  ;;  %v1662_v59 = vrot.slane %v1619_v50, %v10215_v54  ;;  %v9426_v62 = vld [vmem:[%s12985_s1 + $0xde4] ss:$16 sps:$4 sm:$0xff]   ;;  %v9499_v50 = vld [vmem:[%s12985_s1 + $0xf4c] ss:$16 sps:$4 sm:$0xff]  }
 0x193   :  { %6172 = vmatpush1.bf16.msra.mxu0 %v9358_v61  ;;  %6861 = vmatpush1.bf16.msra.mxu1 %v9361_v17  ;;  %v9421_v61 = vld [vmem:[%s12985_s1 + $0xdc8] ss:$16 sps:$4 sm:$0xff]   ;;  %v11651_v17 = vcombine.high %v1648_v10, %v1676_v56 }
 0x194   :  { %6173 = vmatprep.subr.bf16.mxu0 %v9366_v63  ;;  %6862 = vmatprep.subr.bf16.mxu1 %v9369_v15  ;;  %v9429_v63 = vld [vmem:[%s12985_s1 + $0xdec] ss:$16 sps:$4 sm:$0xff]   ;;  %v9424_v15 = vld [vmem:[%s12985_s1 + $0xde0] ss:$16 sps:$4 sm:$0xff]  }
 0x197   :  { %6174 = vmatpush1.bf16.msra.mxu0 %v9364_v0  ;;  %6863 = vmatpush1.bf16.msra.mxu1 %v9367_v1  ;;  %v11656_v0 = vcombine.high %v1634_v57, %v1662_v59  ;;  %v9427_v1 = vld [vmem:[%s12985_s1 + $0xde8] ss:$16 sps:$4 sm:$0xff]  }
 0x198   :  { %6175 = vmatprep.subr.bf16.mxu0 %v9372_v4  ;;  %6864 = vmatprep.subr.bf16.mxu1 %v9375_v7  ;;  %v9436_v4 = vld [vmem:[%s12985_s1 + $0xe04] ss:$16 sps:$4 sm:$0xff]   ;;  %v9439_v7 = vld [vmem:[%s12985_s1 + $0xe0c] ss:$16 sps:$4 sm:$0xff]  }
 0x19b   :  { %6176 = vmatpush1.bf16.msra.mxu0 %v9370_v5  ;;  %6865 = vmatpush1.bf16.msra.mxu1 %v9373_v12  ;;  %v9434_v5 = vld [vmem:[%s12985_s1 + $0xe00] ss:$16 sps:$4 sm:$0xff]   ;;  %v1222_v12 = vcombine.low %v11440_v58, %v11443_v40  ;;  %v9445_v58 = vld [vmem:[%s12985_s1 + $0xe2c] ss:$16 sps:$4 sm:$0xff]   ;;  %v1683_v40 = vcombine.low %v1648_v10, %v1676_v56  ;;  %v9503_v10 = vld [vmem:[%s12985_s1 + $0xf68] ss:$16 sps:$4 sm:$0xff]  }
 0x19c   :  { %6177 = vmatprep.subr.bf16.mxu0 %v9378_v8  ;;  %6866 = vmatprep.subr.bf16.mxu1 %v9381_v18  ;;  %v9437_v8 = vld [vmem:[%s12985_s1 + $0xe08] ss:$16 sps:$4 sm:$0xff]   ;;  %v9440_v18 = vld [vmem:[%s12985_s1 + $0xe20] ss:$16 sps:$4 sm:$0xff]   ;;  %v9508_v56 = vld [vmem:[%s12985_s1 + $0xf84] ss:$16 sps:$4 sm:$0xff]  }
 0x19f   :  { %6178 = vmatpush1.bf16.msra.mxu0 %v9376_v16  ;;  %6867 = vmatpush1.bf16.msra.mxu1 %v9379_v27  ;;  %v9442_v16 = vld [vmem:[%s12985_s1 + $0xe24] ss:$16 sps:$4 sm:$0xff]   ;;  %v9443_v27 = vld [vmem:[%s12985_s1 + $0xe28] ss:$16 sps:$4 sm:$0xff]  }
 0x1a0   :  { %6179 = vmatprep.subr.bf16.mxu0 %v9384_v13  ;;  %6868 = vmatprep.subr.bf16.mxu1 %v9387_v20  ;;  %v9448_v13 = vld [vmem:[%s12985_s1 + $0xe44] ss:$16 sps:$4 sm:$0xff]   ;;  %v9451_v20 = vld [vmem:[%s12985_s1 + $0xe4c] ss:$16 sps:$4 sm:$0xff]  }
 0x1a3   :  { %6180 = vmatpush1.bf16.msra.mxu0 %v9382_v19  ;;  %6869 = vmatpush1.bf16.msra.mxu1 %v9385_v21  ;;  %v9446_v19 = vld [vmem:[%s12985_s1 + $0xe40] ss:$16 sps:$4 sm:$0xff]   ;;  %v1679_v21 = vcombine.low %v1634_v57, %v1662_v59  ;;  %v9511_v59 = vld [vmem:[%s12985_s1 + $0xf8c] ss:$16 sps:$4 sm:$0xff]  }
 0x1a4   :  { %6181 = vmatprep.subr.bf16.mxu0 %v9390_v11  ;;  %6870 = vmatprep.subr.bf16.mxu1 %v9393_v22  ;;  %v9449_v11 = vld [vmem:[%s12985_s1 + $0xe48] ss:$16 sps:$4 sm:$0xff]   ;;  %v9452_v22 = vld [vmem:[%s12985_s1 + $0xe60] ss:$16 sps:$4 sm:$0xff]  }
 0x1a5   :  { %v9506_v57 = vld [vmem:[%s12985_s1 + $0xf80] ss:$16 sps:$4 sm:$0xff]  }
 0x1a7   :  { %6182 = vmatpush1.bf16.msra.mxu0 %v9388_v14  ;;  %6871 = vmatpush1.bf16.msra.mxu1 %v9391_v23  ;;  %v9454_v14 = vld [vmem:[%s12985_s1 + $0xe64] ss:$16 sps:$4 sm:$0xff]   ;;  %v9457_v23 = vld [vmem:[%s12985_s1 + $0xe6c] ss:$16 sps:$4 sm:$0xff]  }
 0x1a8   :  { %6183 = vmatprep.subr.bf16.mxu0 %v9396_v24  ;;  %6872 = vmatprep.subr.bf16.mxu1 %v9399_v53  ;;  %v9455_v24 = vld [vmem:[%s12985_s1 + $0xe68] ss:$16 sps:$4 sm:$0xff]   ;;  %v9458_v53 = vld [vmem:[%s12985_s1 + $0xe80] ss:$16 sps:$4 sm:$0xff]  }
 0x1ab   :  { %6184 = vmatpush1.bf16.msra.mxu0 %v9394_v25  ;;  %6873 = vmatpush1.bf16.msra.mxu1 %v9397_v55  ;;  %v9460_v25 = vld [vmem:[%s12985_s1 + $0xe84] ss:$16 sps:$4 sm:$0xff]   ;;  %v9463_v55 = vld [vmem:[%s12985_s1 + $0xe8c] ss:$16 sps:$4 sm:$0xff]  }
 0x1ac   :  { %6185 = vmatprep.subr.bf16.mxu0 %v9402_v9  ;;  %6874 = vmatprep.subr.bf16.mxu1 %v9405_v26  ;;  %v9461_v9 = vld [vmem:[%s12985_s1 + $0xe88] ss:$16 sps:$4 sm:$0xff]   ;;  %v9466_v26 = vld [vmem:[%s12985_s1 + $0xea4] ss:$16 sps:$4 sm:$0xff]  }
 0x1af   :  { %6186 = vmatpush1.bf16.msra.mxu0 %v9400_v31  ;;  %6875 = vmatpush1.bf16.msra.mxu1 %v9403_v33  ;;  %v9470_v31 = vld [vmem:[%s12985_s1 + $0xec0] ss:$16 sps:$4 sm:$0xff]   ;;  %v9473_v33 = vld [vmem:[%s12985_s1 + $0xec8] ss:$16 sps:$4 sm:$0xff]  }
 0x1b0   :  { %6187 = vmatprep.subr.bf16.mxu0 %v9408_v34  ;;  %6876 = vmatprep.subr.bf16.mxu1 %v9411_v2  ;;  %v9478_v34 = vld [vmem:[%s12985_s1 + $0xee4] ss:$16 sps:$4 sm:$0xff]   ;;  %v9481_v2 = vld [vmem:[%s12985_s1 + $0xeec] ss:$16 sps:$4 sm:$0xff]  }
 0x1b3   :  { %6188 = vmatpush1.bf16.msra.mxu0 %v9406_v35  ;;  %6877 = vmatpush1.bf16.msra.mxu1 %v9409_v39  ;;  %v9476_v35 = vld [vmem:[%s12985_s1 + $0xee0] ss:$16 sps:$4 sm:$0xff]   ;;  %v9485_v39 = vld [vmem:[%s12985_s1 + $0xf08] ss:$16 sps:$4 sm:$0xff]  }
 0x1b4   :  { %6189 = vmatprep.subr.bf16.mxu0 %v9414_v41  ;;  %6878 = vmatprep.subr.bf16.mxu1 %v9417_v44  ;;  %v9490_v41 = vld [vmem:[%s12985_s1 + $0xf24] ss:$16 sps:$4 sm:$0xff]   ;;  %v9493_v44 = vld [vmem:[%s12985_s1 + $0xf2c] ss:$16 sps:$4 sm:$0xff]  }
 0x1b7   :  { %6190 = vmatpush1.bf16.msra.mxu0 %v9412_v42  ;;  %6879 = vmatpush1.bf16.msra.mxu1 %v9415_v51  ;;  %v9488_v42 = vld [vmem:[%s12985_s1 + $0xf20] ss:$16 sps:$4 sm:$0xff]   ;;  %v9497_v51 = vld [vmem:[%s12985_s1 + $0xf48] ss:$16 sps:$4 sm:$0xff]  }
 0x1b8   :  { %6191 = vmatprep.subr.bf16.mxu0 %v9420_v60  ;;  %6880 = vmatprep.subr.bf16.mxu1 %v9423_v6  ;;  %v9502_v60 = vld [vmem:[%s12985_s1 + $0xf64] ss:$16 sps:$4 sm:$0xff]   ;;  %v9505_v6 = vld [vmem:[%s12985_s1 + $0xf6c] ss:$16 sps:$4 sm:$0xff]  }
 0x1bb   :  { %6192 = vmatpush1.bf16.msra.mxu0 %v9418_v52  ;;  %6881 = vmatpush1.bf16.msra.mxu1 %v9421_v61  ;;  %v9500_v52 = vld [vmem:[%s12985_s1 + $0xf60] ss:$16 sps:$4 sm:$0xff]   ;;  %v9509_v61 = vld [vmem:[%s12985_s1 + $0xf88] ss:$16 sps:$4 sm:$0xff]  }
 0x1bc   :  { %6193 = vmatprep.subr.bf16.mxu0 %v9426_v62  ;;  %6882 = vmatprep.subr.bf16.mxu1 %v9429_v63  ;;  %v9514_v62 = vld [vmem:[%s12985_s1 + $0xfa4] ss:$16 sps:$4 sm:$0xff]   ;;  %v9512_v63 = vld [vmem:[%s12985_s1 + $0xfa0] ss:$16 sps:$4 sm:$0xff]  }
 0x1bf   :  { %6194 = vmatpush1.bf16.msra.mxu0 %v9424_v15  ;;  %6883 = vmatpush1.bf16.msra.mxu1 %v9427_v1  ;;  %v9517_v15 = vld [vmem:[%s12985_s1 + $0xfac] ss:$16 sps:$4 sm:$0xff]  }
 0x1c0   :  { %6216 = vmatprep.subr.bf16.mxu0 %v9436_v4  ;;  %6905 = vmatprep.subr.bf16.mxu1 %v9439_v7  ;;  %v9630_v1 = vld [vmem:[%s12984_s0 + $0x10] ss:$25 sps:$4 sm:$0xff]   ;;  %v9632_v4 = vld [vmem:[%s12984_s0 + $0x42] ss:$25 sps:$4 sm:$0xff]  }
 0x1c1   :  { %v9636_v7 = vld [vmem:[%s12984_s0 + $0xa6] ss:$25 sps:$4 sm:$0xff]  }
 0x1c2   :  { %6196 = vmatmul.mubr.bf16.vlgmr.msra.gmra.mrb[0].mxu0 %v1222_v12  ;;  %6885 = vmatmul.mubr.bf16.vlgmr.msra.gmra.mrb[0].mxu1 %v1222_v12  ;;  %v9515_v12 = vld [vmem:[%s12985_s1 + $0xfa8] ss:$16 sps:$4 sm:$0xff]  }
 0x1c3   :  { %6217 = vmatpush1.bf16.msra.mxu0 %v9434_v5  ;;  %6906 = vmatpush1.bf16.msra.mxu1 %v9437_v8  ;;  %v9634_v5 = vld [vmem:[%s12984_s0 + $0x74] ss:$25 sps:$4 sm:$0xff]  }
 0x1c4   :  { %6218 = vmatprep.subr.bf16.mxu0 %v9442_v16  ;;  %6907 = vmatprep.subr.bf16.mxu1 %v9445_v58  ;;  %v9524_v8 = vld [vmem:[%s12985_s1 + $0xfc4] ss:$16 sps:$4 sm:$0xff]   ;;  %v9522_v16 = vld [vmem:[%s12985_s1 + $0xfc0] ss:$16 sps:$4 sm:$0xff]   ;;  %v1242_v58 = vrot.slane %v9630_v1, %v10215_v54 }
 0x1c5   :  { %6205 = vmatprep.mubr.bf16.mxu0 %v1683_v40  ;;  %6894 = vmatprep.mubr.bf16.mxu1 %v1683_v40  ;;  %v1256_v40 = vrot.slane %v9632_v4, %v10215_v54  ;;  %v9582_v1 = vld [vmem:[%s12985_s1 + $0x1100] ss:$16 sps:$4 sm:$0xff]   ;;  %v9585_v4 = vld [vmem:[%s12985_s1 + $0x1108] ss:$16 sps:$4 sm:$0xff]  }
 0x1c7   :  { %6219 = vmatpush1.bf16.msra.mxu0 %v9440_v18  ;;  %6908 = vmatpush1.bf16.msra.mxu1 %v9443_v27  ;;  %v9527_v18 = vld [vmem:[%s12985_s1 + $0xfcc] ss:$16 sps:$4 sm:$0xff]   ;;  %v1270_v27 = vrot.slane %v9634_v5, %v10215_v54  ;;  %v9590_v5 = vld [vmem:[%s12985_s1 + $0x1124] ss:$16 sps:$4 sm:$0xff]  }
 0x1c8   :  { %6220 = vmatprep.subr.bf16.mxu0 %v9448_v13  ;;  %6909 = vmatprep.subr.bf16.mxu1 %v9451_v20  ;;  %v1284_v13 = vrot.slane %v9636_v7, %v10215_v54  ;;  %v9530_v20 = vld [vmem:[%s12985_s1 + $0xfe4] ss:$16 sps:$4 sm:$0xff]   ;;  %v9593_v7 = vld [vmem:[%s12985_s1 + $0x112c] ss:$16 sps:$4 sm:$0xff]  }
 0x1ca   :  { %6206 = vmatmul.mubr.bf16.gmra.mrb[4].mxu0 %v1679_v21  ;;  %6895 = vmatmul.mubr.bf16.gmra.mrb[4].mxu1 %v1679_v21  ;;  %v9528_v21 = vld [vmem:[%s12985_s1 + $0xfe0] ss:$16 sps:$4 sm:$0xff]  }
 0x1cb   :  { %6221 = vmatpush1.bf16.msra.mxu0 %v9446_v19  ;;  %6910 = vmatpush1.bf16.msra.mxu1 %v9449_v11  ;;  %v9525_v19 = vld [vmem:[%s12985_s1 + $0xfc8] ss:$16 sps:$4 sm:$0xff]   ;;  %v9533_v11 = vld [vmem:[%s12985_s1 + $0xfec] ss:$16 sps:$4 sm:$0xff]  }
 0x1cc   :  { %6222 = vmatprep.subr.bf16.mxu0 %v9454_v14  ;;  %6911 = vmatprep.subr.bf16.mxu1 %v9457_v23  ;;  %v1293_v14 = vcombine.high %v1242_v58, %v1256_v40  ;;  %v1292_v23 = vcombine.low %v1242_v58, %v1256_v40  ;;  %v9594_v58 = vld [vmem:[%s12985_s1 + $0x1140] ss:$16 sps:$4 sm:$0xff]   ;;  %v9597_v40 = vld [vmem:[%s12985_s1 + $0x1148] ss:$16 sps:$4 sm:$0xff]  }
 0x1cd   :  { %6248 = vmatprep.mubr.bf16.mxu0 %v11451_v43  ;;  %6937 = vmatprep.mubr.bf16.mxu1 %v11451_v43  ;;  %v9469_v43 = vld [vmem:[%s12985_s1 + $0xeac] ss:$16 sps:$4 sm:$0xff]  }
 0x1cf   :  { %6223 = vmatpush1.bf16.msra.mxu0 %v9452_v22  ;;  %6912 = vmatpush1.bf16.msra.mxu1 %v9455_v24  ;;  %v1297_v22 = vcombine.high %v1270_v27, %v1284_v13  ;;  %v1296_v24 = vcombine.low %v1270_v27, %v1284_v13  ;;  %v9602_v27 = vld [vmem:[%s12985_s1 + $0x1164] ss:$16 sps:$4 sm:$0xff]   ;;  %v9605_v13 = vld [vmem:[%s12985_s1 + $0x116c] ss:$16 sps:$4 sm:$0xff]  }
 0x1d0   :  { %6224 = vmatprep.subr.bf16.mxu0 %v9460_v25  ;;  %6913 = vmatprep.subr.bf16.mxu1 %v9463_v55  ;;  %v9531_v25 = vld [vmem:[%s12985_s1 + $0xfe8] ss:$16 sps:$4 sm:$0xff]   ;;  %v9534_v55 = vld [vmem:[%s12985_s1 + $0x1000] ss:$16 sps:$4 sm:$0xff]  }
 0x1d3   :  { %6225 = vmatpush1.bf16.msra.mxu0 %v9458_v53  ;;  %6914 = vmatpush1.bf16.msra.mxu1 %v9461_v9  ;;  %v9536_v53 = vld [vmem:[%s12985_s1 + $0x1004] ss:$16 sps:$4 sm:$0xff]   ;;  %v9539_v9 = vld [vmem:[%s12985_s1 + $0x100c] ss:$16 sps:$4 sm:$0xff]  }
 0x1d4   :  { %6226 = vmatprep.subr.bf16.mxu0 %v9466_v26  ;;  %6915 = vmatprep.subr.bf16.mxu1 %v9469_v43  ;;  %v1320_v26 = vrot.slane %v1293_v14, %v10215_v54  ;;  %v11888_v43 = vrot.slane %v1292_v23, %v10215_v54  ;;  %v9600_v14 = vld [vmem:[%s12985_s1 + $0x1160] ss:$16 sps:$4 sm:$0xff]   ;;  %v9608_v23 = vld [vmem:[%s12985_s1 + $0x1184] ss:$16 sps:$4 sm:$0xff]  }
 0x1d7   :  { %6227 = vmatpush1.bf16.msra.mxu0 %v9464_v28  ;;  %6916 = vmatpush1.bf16.msra.mxu1 %v9467_v29  ;;  %v1348_v28 = vrot.slane %v1297_v22, %v10215_v54  ;;  %v11891_v29 = vrot.slane %v1296_v24, %v10215_v54  ;;  %v9603_v22 = vld [vmem:[%s12985_s1 + $0x1168] ss:$16 sps:$4 sm:$0xff]   ;;  %v9611_v24 = vld [vmem:[%s12985_s1 + $0x118c] ss:$16 sps:$4 sm:$0xff]  }
 0x1d8   :  { %6228 = vmatprep.subr.bf16.mxu0 %v9472_v30  ;;  %6917 = vmatprep.subr.bf16.mxu1 %v9475_v32  ;;  %v9537_v30 = vld [vmem:[%s12985_s1 + $0x1008] ss:$16 sps:$4 sm:$0xff]  }
 0x1d9   :  { %v11899_v32 = vcombine.high %v1320_v26, %v1348_v28 }
 0x1db   :  { %6229 = vmatpush1.bf16.msra.mxu0 %v9470_v31  ;;  %6918 = vmatpush1.bf16.msra.mxu1 %v9473_v33  ;;  %v9542_v31 = vld [vmem:[%s12985_s1 + $0x1024] ss:$16 sps:$4 sm:$0xff]   ;;  %v9540_v33 = vld [vmem:[%s12985_s1 + $0x1020] ss:$16 sps:$4 sm:$0xff]  }
 0x1dc   :  { %6230 = vmatprep.subr.bf16.mxu0 %v9478_v34  ;;  %6919 = vmatprep.subr.bf16.mxu1 %v9481_v2  ;;  %v9545_v34 = vld [vmem:[%s12985_s1 + $0x102c] ss:$16 sps:$4 sm:$0xff]   ;;  %v9543_v2 = vld [vmem:[%s12985_s1 + $0x1028] ss:$16 sps:$4 sm:$0xff]  }
 0x1df   :  { %6231 = vmatpush1.bf16.msra.mxu0 %v9476_v35  ;;  %6920 = vmatpush1.bf16.msra.mxu1 %v9479_v3  ;;  %v11909_v35 = vcombine.high %v11888_v43, %v11891_v29  ;;  %v9548_v3 = vld [vmem:[%s12985_s1 + $0x1044] ss:$16 sps:$4 sm:$0xff]  }
 0x1e0   :  { %6232 = vmatprep.subr.bf16.mxu0 %v9484_v36  ;;  %6921 = vmatprep.subr.bf16.mxu1 %v9487_v38  ;;  %v9546_v36 = vld [vmem:[%s12985_s1 + $0x1040] ss:$16 sps:$4 sm:$0xff]   ;;  %v9554_v38 = vld [vmem:[%s12985_s1 + $0x1064] ss:$16 sps:$4 sm:$0xff]  }
 0x1e3   :  { %6233 = vmatpush1.bf16.msra.mxu0 %v9482_v37  ;;  %6922 = vmatpush1.bf16.msra.mxu1 %v9485_v39  ;;  %v9551_v37 = vld [vmem:[%s12985_s1 + $0x104c] ss:$16 sps:$4 sm:$0xff]   ;;  %v9552_v39 = vld [vmem:[%s12985_s1 + $0x1060] ss:$16 sps:$4 sm:$0xff]  }
 0x1e4   :  { %6234 = vmatprep.subr.bf16.mxu0 %v9490_v41  ;;  %6923 = vmatprep.subr.bf16.mxu1 %v9493_v44  ;;  %v1360_v41 = vcombine.low %v1320_v26, %v1348_v28  ;;  %v9560_v44 = vld [vmem:[%s12985_s1 + $0x1084] ss:$16 sps:$4 sm:$0xff]   ;;  %v9606_v26 = vld [vmem:[%s12985_s1 + $0x1180] ss:$16 sps:$4 sm:$0xff]   ;;  %v9609_v28 = vld [vmem:[%s12985_s1 + $0x1188] ss:$16 sps:$4 sm:$0xff]  }
 0x1e7   :  { %6235 = vmatpush1.bf16.msra.mxu0 %v9488_v42  ;;  %6924 = vmatpush1.bf16.msra.mxu1 %v9491_v45  ;;  %v9555_v42 = vld [vmem:[%s12985_s1 + $0x1068] ss:$16 sps:$4 sm:$0xff]   ;;  %v9558_v45 = vld [vmem:[%s12985_s1 + $0x1080] ss:$16 sps:$4 sm:$0xff]  }
 0x1e8   :  { %6236 = vmatprep.subr.bf16.mxu0 %v9496_v48  ;;  %6925 = vmatprep.subr.bf16.mxu1 %v9499_v50  ;;  %v9563_v48 = vld [vmem:[%s12985_s1 + $0x108c] ss:$16 sps:$4 sm:$0xff]   ;;  %v9564_v50 = vld [vmem:[%s12985_s1 + $0x10a0] ss:$16 sps:$4 sm:$0xff]  }
 0x1eb   :  { %6237 = vmatpush1.bf16.msra.mxu0 %v9494_v49  ;;  %6926 = vmatpush1.bf16.msra.mxu1 %v9497_v51  ;;  %v9566_v49 = vld [vmem:[%s12985_s1 + $0x10a4] ss:$16 sps:$4 sm:$0xff]   ;;  %v9569_v51 = vld [vmem:[%s12985_s1 + $0x10ac] ss:$16 sps:$4 sm:$0xff]  }
 0x1ec   :  { %6238 = vmatprep.subr.bf16.mxu0 %v9502_v60  ;;  %6927 = vmatprep.subr.bf16.mxu1 %v9505_v6  ;;  %v9567_v60 = vld [vmem:[%s12985_s1 + $0x10a8] ss:$16 sps:$4 sm:$0xff]   ;;  %v9570_v6 = vld [vmem:[%s12985_s1 + $0x10c0] ss:$16 sps:$4 sm:$0xff]  }
 0x1ef   :  { %6239 = vmatpush1.bf16.msra.mxu0 %v9500_v52  ;;  %6928 = vmatpush1.bf16.msra.mxu1 %v9503_v10  ;;  %v9572_v52 = vld [vmem:[%s12985_s1 + $0x10c4] ss:$16 sps:$4 sm:$0xff]   ;;  %v9575_v10 = vld [vmem:[%s12985_s1 + $0x10cc] ss:$16 sps:$4 sm:$0xff]  }
 0x1f0   :  { %6240 = vmatprep.subr.bf16.mxu0 %v9508_v56  ;;  %6929 = vmatprep.subr.bf16.mxu1 %v9511_v59  ;;  %v9573_v56 = vld [vmem:[%s12985_s1 + $0x10c8] ss:$16 sps:$4 sm:$0xff]   ;;  %v9581_v59 = vld [vmem:[%s12985_s1 + $0x10ec] ss:$16 sps:$4 sm:$0xff]  }
 0x1f3   :  { %6241 = vmatpush1.bf16.msra.mxu0 %v9506_v57  ;;  %6930 = vmatpush1.bf16.msra.mxu1 %v9509_v61  ;;  %v9578_v57 = vld [vmem:[%s12985_s1 + $0x10e4] ss:$16 sps:$4 sm:$0xff]   ;;  %v9576_v61 = vld [vmem:[%s12985_s1 + $0x10e0] ss:$16 sps:$4 sm:$0xff]  }
 0x1f4   :  { %6242 = vmatprep.subr.bf16.mxu0 %v9514_v62  ;;  %6931 = vmatprep.subr.bf16.mxu1 %v9517_v15  ;;  %v9579_v62 = vld [vmem:[%s12985_s1 + $0x10e8] ss:$16 sps:$4 sm:$0xff]   ;;  %v9587_v15 = vld [vmem:[%s12985_s1 + $0x110c] ss:$16 sps:$4 sm:$0xff]  }
 0x1f7   :  { %6243 = vmatpush1.bf16.msra.mxu0 %v9512_v63  ;;  %6932 = vmatpush1.bf16.msra.mxu1 %v9515_v12  ;;  %v9584_v63 = vld [vmem:[%s12985_s1 + $0x1104] ss:$16 sps:$4 sm:$0xff]   ;;  %v9588_v12 = vld [vmem:[%s12985_s1 + $0x1120] ss:$16 sps:$4 sm:$0xff]  }
 0x1f8   :  { %6244 = vmatprep.subr.bf16.mxu0 %v9524_v8  ;;  %6933 = vmatprep.subr.bf16.mxu1 %v9527_v18  ;;  %v9591_v8 = vld [vmem:[%s12985_s1 + $0x1128] ss:$16 sps:$4 sm:$0xff]   ;;  %v9599_v18 = vld [vmem:[%s12985_s1 + $0x114c] ss:$16 sps:$4 sm:$0xff]  }
 0x1fb   :  { %6245 = vmatpush1.bf16.msra.mxu0 %v9522_v16  ;;  %6934 = vmatpush1.bf16.msra.mxu1 %v9525_v19  ;;  %v9596_v16 = vld [vmem:[%s12985_s1 + $0x1144] ss:$16 sps:$4 sm:$0xff]  }
 0x1fc   :  { %6246 = vmatprep.subr.bf16.mxu0 %v9530_v20  ;;  %6935 = vmatprep.subr.bf16.mxu1 %v9533_v11  ;;  %v9722_v19 = vld [vmem:[%s12984_s0 + $0xd8] ss:$25 sps:$4 sm:$0xff]   ;;  %v9724_v20 = vld [vmem:[%s12984_s0 + $0x10a] ss:$25 sps:$4 sm:$0xff]  }
 0x1fd   :  { %v9728_v11 = vld [vmem:[%s12984_s0 + $0x16e] ss:$25 sps:$4 sm:$0xff]  }
 0x1ff   :  { %6247 = vmatpush1.bf16.msra.mxu0 %v9528_v21  ;;  %6936 = vmatpush1.bf16.msra.mxu1 %v9531_v25  ;;  %v9726_v21 = vld [vmem:[%s12984_s0 + $0x13c] ss:$25 sps:$4 sm:$0xff]   ;;  %v1699_v25 = vrot.slane %v9722_v19, %v10215_v54  ;;  %v9668_v19 = vld [vmem:[%s12985_s1 + $0x12a0] ss:$16 sps:$4 sm:$0xff]  }
 0x200   :  { %6269 = vmatprep.subr.bf16.mxu0 %v9536_v53  ;;  %6958 = vmatprep.subr.bf16.mxu1 %v9539_v9  ;;  %v1713_v53 = vrot.slane %v9724_v20, %v10215_v54  ;;  %v1741_v9 = vrot.slane %v9728_v11, %v10215_v54  ;;  %v9671_v20 = vld [vmem:[%s12985_s1 + $0x12a8] ss:$16 sps:$4 sm:$0xff]   ;;  %v9679_v11 = vld [vmem:[%s12985_s1 + $0x12cc] ss:$16 sps:$4 sm:$0xff]  }
 0x202   :  { %6249 = vmatmul.mubr.bf16.vlgmr.msra.gmra.mrb[0].mxu0 %v11461_v47  ;;  %6938 = vmatmul.mubr.bf16.vlgmr.msra.gmra.mrb[0].mxu1 %v11461_v47  ;;  %v9549_v47 = vld [vmem:[%s12985_s1 + $0x1048] ss:$16 sps:$4 sm:$0xff]  }
 0x203   :  { %6270 = vmatpush1.bf16.msra.mxu0 %v9534_v55  ;;  %6959 = vmatpush1.bf16.msra.mxu1 %v9537_v30  ;;  %v1727_v55 = vrot.slane %v9726_v21, %v10215_v54  ;;  %v9614_v30 = vld [vmem:[%s12985_s1 + $0x11a4] ss:$16 sps:$4 sm:$0xff]  }
 0x204   :  { %6271 = vmatprep.subr.bf16.mxu0 %v9542_v31  ;;  %6960 = vmatprep.subr.bf16.mxu1 %v9545_v34  ;;  %v9617_v31 = vld [vmem:[%s12985_s1 + $0x11ac] ss:$16 sps:$4 sm:$0xff]   ;;  %v9676_v21 = vld [vmem:[%s12985_s1 + $0x12c4] ss:$16 sps:$4 sm:$0xff]  }
 0x205   :  { %6258 = vmatprep.mubr.bf16.mxu0 %v11651_v17  ;;  %6947 = vmatprep.mubr.bf16.mxu1 %v11651_v17  ;;  %v9557_v17 = vld [vmem:[%s12985_s1 + $0x106c] ss:$16 sps:$4 sm:$0xff]   ;;  %v1754_v34 = vcombine.high %v1727_v55, %v1741_v9 }
 0x207   :  { %6272 = vmatpush1.bf16.msra.mxu0 %v9540_v33  ;;  %6961 = vmatpush1.bf16.msra.mxu1 %v9543_v2  ;;  %v1750_v33 = vcombine.high %v1699_v25, %v1713_v53  ;;  %v9612_v2 = vld [vmem:[%s12985_s1 + $0x11a0] ss:$16 sps:$4 sm:$0xff]  }
 0x208   :  { %6273 = vmatprep.subr.bf16.mxu0 %v9548_v3  ;;  %6962 = vmatprep.subr.bf16.mxu1 %v9551_v37  ;;  %v1749_v3 = vcombine.low %v1699_v25, %v1713_v53  ;;  %v9615_v37 = vld [vmem:[%s12985_s1 + $0x11a8] ss:$16 sps:$4 sm:$0xff]   ;;  %v9680_v25 = vld [vmem:[%s12985_s1 + $0x12e0] ss:$16 sps:$4 sm:$0xff]  }
 0x209   :  { %v9683_v53 = vld [vmem:[%s12985_s1 + $0x12e8] ss:$16 sps:$4 sm:$0xff]  }
 0x20a   :  { %6259 = vmatmul.mubr.bf16.gmra.mrb[4].mxu0 %v11656_v0  ;;  %6948 = vmatmul.mubr.bf16.gmra.mrb[4].mxu1 %v11656_v0  ;;  %v9561_v0 = vld [vmem:[%s12985_s1 + $0x1088] ss:$16 sps:$4 sm:$0xff]  }
 0x20b   :  { %6274 = vmatpush1.bf16.msra.mxu0 %v9546_v36  ;;  %6963 = vmatpush1.bf16.msra.mxu1 %v9549_v47  ;;  %v1753_v36 = vcombine.low %v1727_v55, %v1741_v9  ;;  %v9620_v47 = vld [vmem:[%s12985_s1 + $0x11c4] ss:$16 sps:$4 sm:$0xff]   ;;  %v9691_v9 = vld [vmem:[%s12985_s1 + $0x130c] ss:$16 sps:$4 sm:$0xff]  }
 0x20c   :  { %6275 = vmatprep.subr.bf16.mxu0 %v9554_v38  ;;  %6964 = vmatprep.subr.bf16.mxu1 %v9557_v17  ;;  %v9623_v38 = vld [vmem:[%s12985_s1 + $0x11cc] ss:$16 sps:$4 sm:$0xff]   ;;  %v1805_v17 = vrot.slane %v1754_v34, %v10215_v54  ;;  %v9688_v55 = vld [vmem:[%s12985_s1 + $0x1304] ss:$16 sps:$4 sm:$0xff]   ;;  %v9695_v34 = vld [vmem:[%s12985_s1 + $0x1328] ss:$16 sps:$4 sm:$0xff]  }
 0x20d   :  { %6301 = vmatprep.mubr.bf16.mxu0 %v1360_v41  ;;  %6990 = vmatprep.mubr.bf16.mxu1 %v1360_v41  ;;  %v9618_v41 = vld [vmem:[%s12985_s1 + $0x11c0] ss:$16 sps:$4 sm:$0xff]  }
 0x20f   :  { %6276 = vmatpush1.bf16.msra.mxu0 %v9552_v39  ;;  %6965 = vmatpush1.bf16.msra.mxu1 %v9555_v42  ;;  %v1777_v39 = vrot.slane %v1750_v33, %v10215_v54  ;;  %v1763_v42 = vrot.slane %v1749_v3, %v10215_v54  ;;  %v9692_v33 = vld [vmem:[%s12985_s1 + $0x1320] ss:$16 sps:$4 sm:$0xff]   ;;  %v9703_v3 = vld [vmem:[%s12985_s1 + $0x134c] ss:$16 sps:$4 sm:$0xff]  }
 0x210   :  { %6277 = vmatprep.subr.bf16.mxu0 %v9560_v44  ;;  %6966 = vmatprep.subr.bf16.mxu1 %v9563_v48  ;;  %v1791_v44 = vrot.slane %v1753_v36, %v10215_v54  ;;  %v9626_v48 = vld [vmem:[%s12985_s1 + $0x11e4] ss:$16 sps:$4 sm:$0xff]   ;;  %v9698_v36 = vld [vmem:[%s12985_s1 + $0x1340] ss:$16 sps:$4 sm:$0xff]  }
 0x213   :  { %6278 = vmatpush1.bf16.msra.mxu0 %v9558_v45  ;;  %6967 = vmatpush1.bf16.msra.mxu1 %v9561_v0  ;;  %v9621_v45 = vld [vmem:[%s12985_s1 + $0x11c8] ss:$16 sps:$4 sm:$0xff]   ;;  %v12099_v0 = vcombine.high %v1777_v39, %v1805_v17 }
 0x214   :  { %6279 = vmatprep.subr.bf16.mxu0 %v9566_v49  ;;  %6968 = vmatprep.subr.bf16.mxu1 %v9569_v51  ;;  %v9629_v49 = vld [vmem:[%s12985_s1 + $0x11ec] ss:$16 sps:$4 sm:$0xff]   ;;  %v9624_v51 = vld [vmem:[%s12985_s1 + $0x11e0] ss:$16 sps:$4 sm:$0xff]  }
 0x217   :  { %6280 = vmatpush1.bf16.msra.mxu0 %v9564_v50  ;;  %6969 = vmatpush1.bf16.msra.mxu1 %v9567_v60  ;;  %v12104_v50 = vcombine.high %v1763_v42, %v1791_v44  ;;  %v9627_v60 = vld [vmem:[%s12985_s1 + $0x11e8] ss:$16 sps:$4 sm:$0xff]  }
 0x218   :  { %6281 = vmatprep.subr.bf16.mxu0 %v9572_v52  ;;  %6970 = vmatprep.subr.bf16.mxu1 %v9575_v10  ;;  %v9640_v52 = vld [vmem:[%s12985_s1 + $0x1204] ss:$16 sps:$4 sm:$0xff]   ;;  %v1356_v10 = vcombine.low %v11888_v43, %v11891_v29  ;;  %v9649_v43 = vld [vmem:[%s12985_s1 + $0x122c] ss:$16 sps:$4 sm:$0xff]   ;;  %v1817_v29 = vcombine.low %v1777_v39, %v1805_v17  ;;  %v9704_v39 = vld [vmem:[%s12985_s1 + $0x1360] ss:$16 sps:$4 sm:$0xff]  }
 0x219   :  { %v9707_v17 = vld [vmem:[%s12985_s1 + $0x1368] ss:$16 sps:$4 sm:$0xff]  }
 0x21b   :  { %6282 = vmatpush1.bf16.msra.mxu0 %v9570_v6  ;;  %6971 = vmatpush1.bf16.msra.mxu1 %v9573_v56  ;;  %v9643_v6 = vld [vmem:[%s12985_s1 + $0x120c] ss:$16 sps:$4 sm:$0xff]   ;;  %v9638_v56 = vld [vmem:[%s12985_s1 + $0x1200] ss:$16 sps:$4 sm:$0xff]  }
 0x21c   :  { %6283 = vmatprep.subr.bf16.mxu0 %v9578_v57  ;;  %6972 = vmatprep.subr.bf16.mxu1 %v9581_v59  ;;  %v9641_v57 = vld [vmem:[%s12985_s1 + $0x1208] ss:$16 sps:$4 sm:$0xff]   ;;  %v9646_v59 = vld [vmem:[%s12985_s1 + $0x1224] ss:$16 sps:$4 sm:$0xff]  }
 0x21f   :  { %6284 = vmatpush1.bf16.msra.mxu0 %v9576_v61  ;;  %6973 = vmatpush1.bf16.msra.mxu1 %v9579_v62  ;;  %v9644_v61 = vld [vmem:[%s12985_s1 + $0x1220] ss:$16 sps:$4 sm:$0xff]   ;;  %v9647_v62 = vld [vmem:[%s12985_s1 + $0x1228] ss:$16 sps:$4 sm:$0xff]  }
 0x220   :  { %6285 = vmatprep.subr.bf16.mxu0 %v9584_v63  ;;  %6974 = vmatprep.subr.bf16.mxu1 %v9587_v15  ;;  %v9652_v63 = vld [vmem:[%s12985_s1 + $0x1244] ss:$16 sps:$4 sm:$0xff]   ;;  %v9655_v15 = vld [vmem:[%s12985_s1 + $0x124c] ss:$16 sps:$4 sm:$0xff]  }
 0x223   :  { %6286 = vmatpush1.bf16.msra.mxu0 %v9582_v1  ;;  %6975 = vmatpush1.bf16.msra.mxu1 %v9585_v4  ;;  %v1813_v1 = vcombine.low %v1763_v42, %v1791_v44  ;;  %v9650_v4 = vld [vmem:[%s12985_s1 + $0x1240] ss:$16 sps:$4 sm:$0xff]   ;;  %v9715_v42 = vld [vmem:[%s12985_s1 + $0x138c] ss:$16 sps:$4 sm:$0xff]  }
 0x224   :  { %6287 = vmatprep.subr.bf16.mxu0 %v9590_v5  ;;  %6976 = vmatprep.subr.bf16.mxu1 %v9593_v7  ;;  %v9653_v5 = vld [vmem:[%s12985_s1 + $0x1248] ss:$16 sps:$4 sm:$0xff]   ;;  %v9658_v7 = vld [vmem:[%s12985_s1 + $0x1264] ss:$16 sps:$4 sm:$0xff]   ;;  %v9710_v44 = vld [vmem:[%s12985_s1 + $0x1380] ss:$16 sps:$4 sm:$0xff]  }
 0x227   :  { %6288 = vmatpush1.bf16.msra.mxu0 %v9588_v12  ;;  %6977 = vmatpush1.bf16.msra.mxu1 %v9591_v8  ;;  %v9661_v12 = vld [vmem:[%s12985_s1 + $0x126c] ss:$16 sps:$4 sm:$0xff]   ;;  %v9656_v8 = vld [vmem:[%s12985_s1 + $0x1260] ss:$16 sps:$4 sm:$0xff]  }
 0x228   :  { %6289 = vmatprep.subr.bf16.mxu0 %v9596_v16  ;;  %6978 = vmatprep.subr.bf16.mxu1 %v9599_v18  ;;  %v9659_v16 = vld [vmem:[%s12985_s1 + $0x1268] ss:$16 sps:$4 sm:$0xff]   ;;  %v9664_v18 = vld [vmem:[%s12985_s1 + $0x1284] ss:$16 sps:$4 sm:$0xff]  }
 0x22b   :  { %6290 = vmatpush1.bf16.msra.mxu0 %v9594_v58  ;;  %6979 = vmatpush1.bf16.msra.mxu1 %v9597_v40  ;;  %v9667_v58 = vld [vmem:[%s12985_s1 + $0x128c] ss:$16 sps:$4 sm:$0xff]   ;;  %v9662_v40 = vld [vmem:[%s12985_s1 + $0x1280] ss:$16 sps:$4 sm:$0xff]  }
 0x22c   :  { %6291 = vmatprep.subr.bf16.mxu0 %v9602_v27  ;;  %6980 = vmatprep.subr.bf16.mxu1 %v9605_v13  ;;  %v9665_v27 = vld [vmem:[%s12985_s1 + $0x1288] ss:$16 sps:$4 sm:$0xff]   ;;  %v9670_v13 = vld [vmem:[%s12985_s1 + $0x12a4] ss:$16 sps:$4 sm:$0xff]  }
 0x22f   :  { %6292 = vmatpush1.bf16.msra.mxu0 %v9600_v14  ;;  %6981 = vmatpush1.bf16.msra.mxu1 %v9603_v22  ;;  %v9674_v14 = vld [vmem:[%s12985_s1 + $0x12c0] ss:$16 sps:$4 sm:$0xff]   ;;  %v9677_v22 = vld [vmem:[%s12985_s1 + $0x12c8] ss:$16 sps:$4 sm:$0xff]  }
 0x230   :  { %6293 = vmatprep.subr.bf16.mxu0 %v9608_v23  ;;  %6982 = vmatprep.subr.bf16.mxu1 %v9611_v24  ;;  %v9682_v23 = vld [vmem:[%s12985_s1 + $0x12e4] ss:$16 sps:$4 sm:$0xff]   ;;  %v9685_v24 = vld [vmem:[%s12985_s1 + $0x12ec] ss:$16 sps:$4 sm:$0xff]  }
 0x233   :  { %6294 = vmatpush1.bf16.msra.mxu0 %v9606_v26  ;;  %6983 = vmatpush1.bf16.msra.mxu1 %v9609_v28  ;;  %v9686_v26 = vld [vmem:[%s12985_s1 + $0x1300] ss:$16 sps:$4 sm:$0xff]   ;;  %v9689_v28 = vld [vmem:[%s12985_s1 + $0x1308] ss:$16 sps:$4 sm:$0xff]  }
 0x234   :  { %6295 = vmatprep.subr.bf16.mxu0 %v9614_v30  ;;  %6984 = vmatprep.subr.bf16.mxu1 %v9617_v31  ;;  %v9694_v30 = vld [vmem:[%s12985_s1 + $0x1324] ss:$16 sps:$4 sm:$0xff]   ;;  %v9697_v31 = vld [vmem:[%s12985_s1 + $0x132c] ss:$16 sps:$4 sm:$0xff]  }
 0x237   :  { %6296 = vmatpush1.bf16.msra.mxu0 %v9612_v2  ;;  %6985 = vmatpush1.bf16.msra.mxu1 %v9615_v37  ;;  %v9700_v2 = vld [vmem:[%s12985_s1 + $0x1344] ss:$16 sps:$4 sm:$0xff]   ;;  %v9701_v37 = vld [vmem:[%s12985_s1 + $0x1348] ss:$16 sps:$4 sm:$0xff]  }
 0x238   :  { %6297 = vmatprep.subr.bf16.mxu0 %v9620_v47  ;;  %6986 = vmatprep.subr.bf16.mxu1 %v9623_v38  ;;  %v9706_v47 = vld [vmem:[%s12985_s1 + $0x1364] ss:$16 sps:$4 sm:$0xff]   ;;  %v9709_v38 = vld [vmem:[%s12985_s1 + $0x136c] ss:$16 sps:$4 sm:$0xff]  }
 0x23b   :  { %6298 = vmatpush1.bf16.msra.mxu0 %v9618_v41  ;;  %6987 = vmatpush1.bf16.msra.mxu1 %v9621_v45  ;;  %v9712_v41 = vld [vmem:[%s12985_s1 + $0x1384] ss:$16 sps:$4 sm:$0xff]   ;;  %v9713_v45 = vld [vmem:[%s12985_s1 + $0x1388] ss:$16 sps:$4 sm:$0xff]  }
 0x23c   :  { %6299 = vmatprep.subr.bf16.mxu0 %v9626_v48  ;;  %6988 = vmatprep.subr.bf16.mxu1 %v9629_v49  ;;  %v9718_v48 = vld [vmem:[%s12985_s1 + $0x13a4] ss:$16 sps:$4 sm:$0xff]   ;;  %v9721_v49 = vld [vmem:[%s12985_s1 + $0x13ac] ss:$16 sps:$4 sm:$0xff]  }
 0x23f   :  { %6300 = vmatpush1.bf16.msra.mxu0 %v9624_v51  ;;  %6989 = vmatpush1.bf16.msra.mxu1 %v9627_v60  ;;  %v9838_v51 = vld [vmem:[%s12984_s0 + $0x14] ss:$25 sps:$4 sm:$0xff]   ;;  %v9839_v60 = vld [vmem:[%s12984_s0 + $0x46] ss:$25 sps:$4 sm:$0xff]  }
 0x240   :  { %6322 = vmatprep.subr.bf16.mxu0 %v9640_v52  ;;  %7011 = vmatprep.subr.bf16.mxu1 %v9643_v6  ;;  %v9840_v52 = vld [vmem:[%s12984_s0 + $0x78] ss:$25 sps:$4 sm:$0xff]   ;;  %v9841_v6 = vld [vmem:[%s12984_s0 + $0xaa] ss:$25 sps:$4 sm:$0xff]  }
 0x242   :  { %6302 = vmatmul.mubr.bf16.vlgmr.msra.gmra.mrb[0].mxu0 %v1356_v10  ;;  %6991 = vmatmul.mubr.bf16.vlgmr.msra.gmra.mrb[0].mxu1 %v1356_v10  ;;  %v9716_v10 = vld [vmem:[%s12985_s1 + $0x13a0] ss:$16 sps:$4 sm:$0xff]  }
 0x243   :  { %6323 = vmatpush1.bf16.msra.mxu0 %v9638_v56  ;;  %7012 = vmatpush1.bf16.msra.mxu1 %v9641_v57  ;;  %v9719_v56 = vld [vmem:[%s12985_s1 + $0x13a8] ss:$16 sps:$4 sm:$0xff]   ;;  %v9732_v57 = vld [vmem:[%s12985_s1 + $0x13c4] ss:$16 sps:$4 sm:$0xff]  }
 0x244   :  { %6324 = vmatprep.subr.bf16.mxu0 %v9646_v59  ;;  %7013 = vmatprep.subr.bf16.mxu1 %v9649_v43  ;;  %v9735_v59 = vld [vmem:[%s12985_s1 + $0x13cc] ss:$16 sps:$4 sm:$0xff]   ;;  %v1249_v43 = vrot.slane %v9838_v51, %v10215_v54  ;;  %v9760_v51 = vld [vmem:[%s12985_s1 + $0x1460] ss:$16 sps:$4 sm:$0xff]  }
 0x245   :  { %6311 = vmatprep.mubr.bf16.mxu0 %v1817_v29  ;;  %7000 = vmatprep.mubr.bf16.mxu1 %v1817_v29  ;;  %v1263_v29 = vrot.slane %v9839_v60, %v10215_v54  ;;  %v9763_v60 = vld [vmem:[%s12985_s1 + $0x1468] ss:$16 sps:$4 sm:$0xff]  }
 0x247   :  { %6325 = vmatpush1.bf16.msra.mxu0 %v9644_v61  ;;  %7014 = vmatpush1.bf16.msra.mxu1 %v9647_v62  ;;  %v1277_v61 = vrot.slane %v9840_v52, %v10215_v54  ;;  %v1291_v62 = vrot.slane %v9841_v6, %v10215_v54  ;;  %v9768_v52 = vld [vmem:[%s12985_s1 + $0x1484] ss:$16 sps:$4 sm:$0xff]   ;;  %v9771_v6 = vld [vmem:[%s12985_s1 + $0x148c] ss:$16 sps:$4 sm:$0xff]  }
 0x248   :  { %6326 = vmatprep.subr.bf16.mxu0 %v9652_v63  ;;  %7015 = vmatprep.subr.bf16.mxu1 %v9655_v15  ;;  %v9730_v63 = vld [vmem:[%s12985_s1 + $0x13c0] ss:$16 sps:$4 sm:$0xff]   ;;  %v9733_v15 = vld [vmem:[%s12985_s1 + $0x13c8] ss:$16 sps:$4 sm:$0xff]  }
 0x24a   :  { %6312 = vmatmul.mubr.bf16.gmra.mrb[4].mxu0 %v1813_v1  ;;  %7001 = vmatmul.mubr.bf16.gmra.mrb[4].mxu1 %v1813_v1  ;;  %v9738_v1 = vld [vmem:[%s12985_s1 + $0x13e4] ss:$16 sps:$4 sm:$0xff]  }
 0x24b   :  { %6327 = vmatpush1.bf16.msra.mxu0 %v9650_v4  ;;  %7016 = vmatpush1.bf16.msra.mxu1 %v9653_v5  ;;  %v9741_v4 = vld [vmem:[%s12985_s1 + $0x13ec] ss:$16 sps:$4 sm:$0xff]   ;;  %v1294_v5 = vcombine.low %v1249_v43, %v1263_v29 }
 0x24c   :  { %6328 = vmatprep.subr.bf16.mxu0 %v9658_v7  ;;  %7017 = vmatprep.subr.bf16.mxu1 %v9661_v12  ;;  %v1295_v7 = vcombine.high %v1249_v43, %v1263_v29  ;;  %v1298_v12 = vcombine.low %v1277_v61, %v1291_v62  ;;  %v9775_v43 = vld [vmem:[%s12985_s1 + $0x14a8] ss:$16 sps:$4 sm:$0xff]   ;;  %v9780_v29 = vld [vmem:[%s12985_s1 + $0x14c4] ss:$16 sps:$4 sm:$0xff]  }
 0x24d   :  { %6354 = vmatprep.mubr.bf16.mxu0 %v11899_v32  ;;  %7043 = vmatprep.mubr.bf16.mxu1 %v11899_v32  ;;  %v9673_v32 = vld [vmem:[%s12985_s1 + $0x12ac] ss:$16 sps:$4 sm:$0xff]  }
 0x24f   :  { %6329 = vmatpush1.bf16.msra.mxu0 %v9656_v8  ;;  %7018 = vmatpush1.bf16.msra.mxu1 %v9659_v16  ;;  %v1299_v8 = vcombine.high %v1277_v61, %v1291_v62  ;;  %v9926_v16 = vld [vmem:[%s12984_s0 + $0xdc] ss:$25 sps:$4 sm:$0xff]   ;;  %v9778_v62 = vld [vmem:[%s12985_s1 + $0x14c0] ss:$16 sps:$4 sm:$0xff]  }
 0x250   :  { %6330 = vmatprep.subr.bf16.mxu0 %v9664_v18  ;;  %7019 = vmatprep.subr.bf16.mxu1 %v9667_v58  ;;  %v9927_v18 = vld [vmem:[%s12984_s0 + $0x10e] ss:$25 sps:$4 sm:$0xff]   ;;  %v9928_v58 = vld [vmem:[%s12984_s0 + $0x140] ss:$25 sps:$4 sm:$0xff]  }
 0x251   :  { %v9783_v61 = vld [vmem:[%s12985_s1 + $0x14cc] ss:$16 sps:$4 sm:$0xff]  }
 0x253   :  { %6331 = vmatpush1.bf16.msra.mxu0 %v9662_v40  ;;  %7020 = vmatpush1.bf16.msra.mxu1 %v9665_v27  ;;  %v9929_v40 = vld [vmem:[%s12984_s0 + $0x172] ss:$25 sps:$4 sm:$0xff]  }
 0x254   :  { %6332 = vmatprep.subr.bf16.mxu0 %v9670_v13  ;;  %7021 = vmatprep.subr.bf16.mxu1 %v9673_v32  ;;  %v9736_v27 = vld [vmem:[%s12985_s1 + $0x13e0] ss:$16 sps:$4 sm:$0xff]   ;;  %v9739_v13 = vld [vmem:[%s12985_s1 + $0x13e8] ss:$16 sps:$4 sm:$0xff]   ;;  %v9744_v32 = vld [vmem:[%s12985_s1 + $0x1404] ss:$16 sps:$4 sm:$0xff]  }
 0x257   :  { %6333 = vmatpush1.bf16.msra.mxu0 %v9668_v19  ;;  %7022 = vmatpush1.bf16.msra.mxu1 %v9671_v20  ;;  %v9747_v19 = vld [vmem:[%s12985_s1 + $0x140c] ss:$16 sps:$4 sm:$0xff]   ;;  %v1327_v20 = vrot.slane %v1295_v7, %v10215_v54  ;;  %v9792_v7 = vld [vmem:[%s12985_s1 + $0x1504] ss:$16 sps:$4 sm:$0xff]  }
 0x258   :  { %6334 = vmatprep.subr.bf16.mxu0 %v9676_v21  ;;  %7023 = vmatprep.subr.bf16.mxu1 %v9679_v11  ;;  %v1355_v21 = vrot.slane %v1299_v8, %v10215_v54  ;;  %v12345_v11 = vrot.slane %v1294_v5, %v10215_v54  ;;  %v9787_v5 = vld [vmem:[%s12985_s1 + $0x14e8] ss:$16 sps:$4 sm:$0xff]   ;;  %v9790_v8 = vld [vmem:[%s12985_s1 + $0x1500] ss:$16 sps:$4 sm:$0xff]  }
 0x25b   :  { %6335 = vmatpush1.bf16.msra.mxu0 %v9674_v14  ;;  %7024 = vmatpush1.bf16.msra.mxu1 %v9677_v22  ;;  %v12348_v14 = vrot.slane %v1298_v12, %v10215_v54  ;;  %v1706_v22 = vrot.slane %v9926_v16, %v10215_v54  ;;  %v9795_v12 = vld [vmem:[%s12985_s1 + $0x150c] ss:$16 sps:$4 sm:$0xff]   ;;  %v9793_v16 = vld [vmem:[%s12985_s1 + $0x1508] ss:$16 sps:$4 sm:$0xff]  }
 0x25c   :  { %6336 = vmatprep.subr.bf16.mxu0 %v9682_v23  ;;  %7025 = vmatprep.subr.bf16.mxu1 %v9685_v24  ;;  %v1720_v23 = vrot.slane %v9927_v18, %v10215_v54  ;;  %v1734_v24 = vrot.slane %v9928_v58, %v10215_v54  ;;  %v9798_v18 = vld [vmem:[%s12985_s1 + $0x1524] ss:$16 sps:$4 sm:$0xff]   ;;  %v9801_v58 = vld [vmem:[%s12985_s1 + $0x152c] ss:$16 sps:$4 sm:$0xff]  }
 0x25f   :  { %6337 = vmatpush1.bf16.msra.mxu0 %v9680_v25  ;;  %7026 = vmatpush1.bf16.msra.mxu1 %v9683_v53  ;;  %v1748_v25 = vrot.slane %v9929_v40, %v10215_v54  ;;  %v9742_v53 = vld [vmem:[%s12985_s1 + $0x1400] ss:$16 sps:$4 sm:$0xff]  }
 0x260   :  { %6338 = vmatprep.subr.bf16.mxu0 %v9688_v55  ;;  %7027 = vmatprep.subr.bf16.mxu1 %v9691_v9  ;;  %v9745_v55 = vld [vmem:[%s12985_s1 + $0x1408] ss:$16 sps:$4 sm:$0xff]   ;;  %v9750_v9 = vld [vmem:[%s12985_s1 + $0x1424] ss:$16 sps:$4 sm:$0xff]   ;;  %v9796_v40 = vld [vmem:[%s12985_s1 + $0x1520] ss:$16 sps:$4 sm:$0xff]  }
 0x263   :  { %6339 = vmatpush1.bf16.msra.mxu0 %v9686_v26  ;;  %7028 = vmatpush1.bf16.msra.mxu1 %v9689_v28  ;;  %v12363_v26 = vcombine.high %v1327_v20, %v1355_v21  ;;  %v12367_v28 = vcombine.high %v12345_v11, %v12348_v14 }
 0x264   :  { %6340 = vmatprep.subr.bf16.mxu0 %v9694_v30  ;;  %7029 = vmatprep.subr.bf16.mxu1 %v9697_v31  ;;  %v9753_v30 = vld [vmem:[%s12985_s1 + $0x142c] ss:$16 sps:$4 sm:$0xff]   ;;  %v1752_v31 = vcombine.high %v1706_v22, %v1720_v23 }
 0x267   :  { %6341 = vmatpush1.bf16.msra.mxu0 %v9692_v33  ;;  %7030 = vmatpush1.bf16.msra.mxu1 %v9695_v34  ;;  %v1756_v33 = vcombine.high %v1734_v24, %v1748_v25  ;;  %v1751_v34 = vcombine.low %v1706_v22, %v1720_v23  ;;  %v9813_v22 = vld [vmem:[%s12985_s1 + $0x156c] ss:$16 sps:$4 sm:$0xff]   ;;  %v9808_v23 = vld [vmem:[%s12985_s1 + $0x1560] ss:$16 sps:$4 sm:$0xff]  }
 0x268   :  { %6342 = vmatprep.subr.bf16.mxu0 %v9700_v2  ;;  %7031 = vmatprep.subr.bf16.mxu1 %v9703_v3  ;;  %v1755_v2 = vcombine.low %v1734_v24, %v1748_v25  ;;  %v9748_v3 = vld [vmem:[%s12985_s1 + $0x1420] ss:$16 sps:$4 sm:$0xff]   ;;  %v9811_v24 = vld [vmem:[%s12985_s1 + $0x1568] ss:$16 sps:$4 sm:$0xff]   ;;  %v9816_v25 = vld [vmem:[%s12985_s1 + $0x1584] ss:$16 sps:$4 sm:$0xff]  }
 0x26b   :  { %6343 = vmatpush1.bf16.msra.mxu0 %v9698_v36  ;;  %7032 = vmatpush1.bf16.msra.mxu1 %v9701_v37  ;;  %v9751_v36 = vld [vmem:[%s12985_s1 + $0x1428] ss:$16 sps:$4 sm:$0xff]   ;;  %v9756_v37 = vld [vmem:[%s12985_s1 + $0x1444] ss:$16 sps:$4 sm:$0xff]  }
 0x26c   :  { %6344 = vmatprep.subr.bf16.mxu0 %v9706_v47  ;;  %7033 = vmatprep.subr.bf16.mxu1 %v9709_v38  ;;  %v9759_v47 = vld [vmem:[%s12985_s1 + $0x144c] ss:$16 sps:$4 sm:$0xff]   ;;  %v12392_v38 = vrot.slane %v1756_v33, %v10215_v54  ;;  %v9820_v33 = vld [vmem:[%s12985_s1 + $0x15a0] ss:$16 sps:$4 sm:$0xff]  }
 0x26f   :  { %6345 = vmatpush1.bf16.msra.mxu0 %v9704_v39  ;;  %7034 = vmatpush1.bf16.msra.mxu1 %v9707_v17  ;;  %v12395_v39 = vrot.slane %v1751_v34, %v10215_v54  ;;  %v12398_v17 = vrot.slane %v1755_v2, %v10215_v54  ;;  %v9823_v34 = vld [vmem:[%s12985_s1 + $0x15a8] ss:$16 sps:$4 sm:$0xff]   ;;  %v9828_v2 = vld [vmem:[%s12985_s1 + $0x15c4] ss:$16 sps:$4 sm:$0xff]  }
 0x270   :  { %6346 = vmatprep.subr.bf16.mxu0 %v9712_v41  ;;  %7035 = vmatprep.subr.bf16.mxu1 %v9715_v42  ;;  %v9754_v41 = vld [vmem:[%s12985_s1 + $0x1440] ss:$16 sps:$4 sm:$0xff]   ;;  %v9762_v42 = vld [vmem:[%s12985_s1 + $0x1464] ss:$16 sps:$4 sm:$0xff]  }
 0x273   :  { %6347 = vmatpush1.bf16.msra.mxu0 %v9710_v44  ;;  %7036 = vmatpush1.bf16.msra.mxu1 %v9713_v45  ;;  %v12415_v45 = vcombine.high %v12395_v39, %v12398_v17 }
 0x274   :  { %6348 = vmatprep.subr.bf16.mxu0 %v9718_v48  ;;  %7037 = vmatprep.subr.bf16.mxu1 %v9721_v49  ;;  %v9765_v48 = vld [vmem:[%s12985_s1 + $0x146c] ss:$16 sps:$4 sm:$0xff]   ;;  %v1362_v49 = vcombine.low %v1327_v20, %v1355_v21  ;;  %v9805_v20 = vld [vmem:[%s12985_s1 + $0x1548] ss:$16 sps:$4 sm:$0xff]   ;;  %v9810_v21 = vld [vmem:[%s12985_s1 + $0x1564] ss:$16 sps:$4 sm:$0xff]  }
 0x277   :  { %6349 = vmatpush1.bf16.msra.mxu0 %v9716_v10  ;;  %7038 = vmatpush1.bf16.msra.mxu1 %v9719_v56  ;;  %v9769_v10 = vld [vmem:[%s12985_s1 + $0x1488] ss:$16 sps:$4 sm:$0xff]   ;;  %v9774_v56 = vld [vmem:[%s12985_s1 + $0x14a4] ss:$16 sps:$4 sm:$0xff]  }
 0x278   :  { %6350 = vmatprep.subr.bf16.mxu0 %v9732_v57  ;;  %7039 = vmatprep.subr.bf16.mxu1 %v9735_v59  ;;  %v9777_v57 = vld [vmem:[%s12985_s1 + $0x14ac] ss:$16 sps:$4 sm:$0xff]   ;;  %v9772_v59 = vld [vmem:[%s12985_s1 + $0x14a0] ss:$16 sps:$4 sm:$0xff]  }
 0x27b   :  { %6351 = vmatpush1.bf16.msra.mxu0 %v9730_v63  ;;  %7040 = vmatpush1.bf16.msra.mxu1 %v9733_v15  ;;  %v9781_v63 = vld [vmem:[%s12985_s1 + $0x14c8] ss:$16 sps:$4 sm:$0xff]   ;;  %v9786_v15 = vld [vmem:[%s12985_s1 + $0x14e4] ss:$16 sps:$4 sm:$0xff]  }
 0x27c   :  { %6352 = vmatprep.subr.bf16.mxu0 %v9738_v1  ;;  %7041 = vmatprep.subr.bf16.mxu1 %v9741_v4  ;;  %v9789_v1 = vld [vmem:[%s12985_s1 + $0x14ec] ss:$16 sps:$4 sm:$0xff]   ;;  %v9784_v4 = vld [vmem:[%s12985_s1 + $0x14e0] ss:$16 sps:$4 sm:$0xff]  }
 0x27f   :  { %6353 = vmatpush1.bf16.msra.mxu0 %v9736_v27  ;;  %7042 = vmatpush1.bf16.msra.mxu1 %v9739_v13  ;;  %v9799_v27 = vld [vmem:[%s12985_s1 + $0x1528] ss:$16 sps:$4 sm:$0xff]   ;;  %v9804_v13 = vld [vmem:[%s12985_s1 + $0x1544] ss:$16 sps:$4 sm:$0xff]  }
 0x280   :  { %6375 = vmatprep.subr.bf16.mxu0 %v9744_v32  ;;  %7064 = vmatprep.subr.bf16.mxu1 %v9747_v19  ;;  %v9807_v32 = vld [vmem:[%s12985_s1 + $0x154c] ss:$16 sps:$4 sm:$0xff]   ;;  %v9802_v19 = vld [vmem:[%s12985_s1 + $0x1540] ss:$16 sps:$4 sm:$0xff]  }
 0x282   :  { %6355 = vmatmul.mubr.bf16.vlgmr.msra.gmra.mrb[0].mxu0 %v11909_v35  ;;  %7044 = vmatmul.mubr.bf16.vlgmr.msra.gmra.mrb[0].mxu1 %v11909_v35  ;;  %v12389_v35 = vrot.slane %v1752_v31, %v10215_v54  ;;  %v9825_v31 = vld [vmem:[%s12985_s1 + $0x15ac] ss:$16 sps:$4 sm:$0xff]  }
 0x283   :  { %6376 = vmatpush1.bf16.msra.mxu0 %v9742_v53  ;;  %7065 = vmatpush1.bf16.msra.mxu1 %v9745_v55  ;;  %v9819_v53 = vld [vmem:[%s12985_s1 + $0x158c] ss:$16 sps:$4 sm:$0xff]   ;;  %v9814_v55 = vld [vmem:[%s12985_s1 + $0x1580] ss:$16 sps:$4 sm:$0xff]  }
 0x284   :  { %6377 = vmatprep.subr.bf16.mxu0 %v9750_v9  ;;  %7066 = vmatprep.subr.bf16.mxu1 %v9753_v30  ;;  %v12411_v44 = vcombine.high %v12389_v35, %v12392_v38  ;;  %v9817_v9 = vld [vmem:[%s12985_s1 + $0x1588] ss:$16 sps:$4 sm:$0xff]   ;;  %v9822_v30 = vld [vmem:[%s12985_s1 + $0x15a4] ss:$16 sps:$4 sm:$0xff]  }
 0x285   :  { %6364 = vmatprep.mubr.bf16.mxu0 %v12099_v0  ;;  %7053 = vmatprep.mubr.bf16.mxu1 %v12099_v0  ;;  %v9757_v0 = vld [vmem:[%s12985_s1 + $0x1448] ss:$16 sps:$4 sm:$0xff]  }
 0x287   :  { %6378 = vmatpush1.bf16.msra.mxu0 %v9748_v3  ;;  %7067 = vmatpush1.bf16.msra.mxu1 %v9751_v36  ;;  %v9831_v3 = vld [vmem:[%s12985_s1 + $0x15cc] ss:$16 sps:$4 sm:$0xff]   ;;  %v9826_v36 = vld [vmem:[%s12985_s1 + $0x15c0] ss:$16 sps:$4 sm:$0xff]  }
 0x288   :  { %6379 = vmatprep.subr.bf16.mxu0 %v9756_v37  ;;  %7068 = vmatprep.subr.bf16.mxu1 %v9759_v47  ;;  %v9829_v37 = vld [vmem:[%s12985_s1 + $0x15c8] ss:$16 sps:$4 sm:$0xff]   ;;  %v9834_v47 = vld [vmem:[%s12985_s1 + $0x15e4] ss:$16 sps:$4 sm:$0xff]  }
 0x28a   :  { %6365 = vmatmul.mubr.bf16.gmra.mrb[4].mxu0 %v12104_v50  ;;  %7054 = vmatmul.mubr.bf16.gmra.mrb[4].mxu1 %v12104_v50  ;;  %v9766_v50 = vld [vmem:[%s12985_s1 + $0x1480] ss:$16 sps:$4 sm:$0xff]  }
 0x28b   :  { %6380 = vmatpush1.bf16.msra.mxu0 %v9754_v41  ;;  %7069 = vmatpush1.bf16.msra.mxu1 %v9757_v0  ;;  %v9837_v41 = vld [vmem:[%s12985_s1 + $0x15ec] ss:$16 sps:$4 sm:$0xff]   ;;  %v9832_v0 = vld [vmem:[%s12985_s1 + $0x15e0] ss:$16 sps:$4 sm:$0xff]  }
 0x28c   :  { %6381 = vmatprep.subr.bf16.mxu0 %v9762_v42  ;;  %7070 = vmatprep.subr.bf16.mxu1 %v9765_v48  ;;  %v9835_v42 = vld [vmem:[%s12985_s1 + $0x15e8] ss:$16 sps:$4 sm:$0xff]   ;;  %v9844_v48 = vld [vmem:[%s12985_s1 + $0x1604] ss:$16 sps:$4 sm:$0xff]  }
 0x28d   :  { %6407 = vmatprep.mubr.bf16.mxu0 %v1362_v49  ;;  %7096 = vmatprep.mubr.bf16.mxu1 %v1362_v49  ;;  %v9847_v49 = vld [vmem:[%s12985_s1 + $0x160c] ss:$16 sps:$4 sm:$0xff]  }
 0x28f   :  { %6382 = vmatpush1.bf16.msra.mxu0 %v9760_v51  ;;  %7071 = vmatpush1.bf16.msra.mxu1 %v9763_v60  ;;  %v1358_v51 = vcombine.low %v12345_v11, %v12348_v14  ;;  %v9842_v60 = vld [vmem:[%s12985_s1 + $0x1600] ss:$16 sps:$4 sm:$0xff]   ;;  %v9853_v11 = vld [vmem:[%s12985_s1 + $0x162c] ss:$16 sps:$4 sm:$0xff]   ;;  %v1819_v14 = vcombine.low %v12389_v35, %v12392_v38  ;;  %v1815_v38 = vcombine.low %v12395_v39, %v12398_v17 }
 0x290   :  { %6383 = vmatprep.subr.bf16.mxu0 %v9768_v52  ;;  %7072 = vmatprep.subr.bf16.mxu1 %v9771_v6  ;;  %v9845_v52 = vld [vmem:[%s12985_s1 + $0x1608] ss:$16 sps:$4 sm:$0xff]   ;;  %v9850_v6 = vld [vmem:[%s12985_s1 + $0x1624] ss:$16 sps:$4 sm:$0xff]   ;;  %v9859_v35 = vld [vmem:[%s12985_s1 + $0x164c] ss:$16 sps:$4 sm:$0xff]  }
 0x291   :  { %v9865_v39 = vld [vmem:[%s12985_s1 + $0x166c] ss:$16 sps:$4 sm:$0xff]   ;;  %v9860_v17 = vld [vmem:[%s12985_s1 + $0x1660] ss:$16 sps:$4 sm:$0xff]  }
 0x293   :  { %6384 = vmatpush1.bf16.msra.mxu0 %v9766_v50  ;;  %7073 = vmatpush1.bf16.msra.mxu1 %v9769_v10  ;;  %v9848_v50 = vld [vmem:[%s12985_s1 + $0x1620] ss:$16 sps:$4 sm:$0xff]   ;;  %v9851_v10 = vld [vmem:[%s12985_s1 + $0x1628] ss:$16 sps:$4 sm:$0xff]  }
 0x294   :  { %6385 = vmatprep.subr.bf16.mxu0 %v9774_v56  ;;  %7074 = vmatprep.subr.bf16.mxu1 %v9777_v57  ;;  %v9856_v56 = vld [vmem:[%s12985_s1 + $0x1644] ss:$16 sps:$4 sm:$0xff]   ;;  %v9854_v57 = vld [vmem:[%s12985_s1 + $0x1640] ss:$16 sps:$4 sm:$0xff]  }
 0x297   :  { %6386 = vmatpush1.bf16.msra.mxu0 %v9772_v59  ;;  %7075 = vmatpush1.bf16.msra.mxu1 %v9775_v43  ;;  %v9857_v59 = vld [vmem:[%s12985_s1 + $0x1648] ss:$16 sps:$4 sm:$0xff]   ;;  %v9862_v43 = vld [vmem:[%s12985_s1 + $0x1664] ss:$16 sps:$4 sm:$0xff]  }
 0x298   :  { %6387 = vmatprep.subr.bf16.mxu0 %v9780_v29  ;;  %7076 = vmatprep.subr.bf16.mxu1 %v9783_v61  ;;  %v9863_v29 = vld [vmem:[%s12985_s1 + $0x1668] ss:$16 sps:$4 sm:$0xff]   ;;  %v9868_v61 = vld [vmem:[%s12985_s1 + $0x1684] ss:$16 sps:$4 sm:$0xff]  }
 0x29b   :  { %6388 = vmatpush1.bf16.msra.mxu0 %v9778_v62  ;;  %7077 = vmatpush1.bf16.msra.mxu1 %v9781_v63  ;;  %v9871_v62 = vld [vmem:[%s12985_s1 + $0x168c] ss:$16 sps:$4 sm:$0xff]   ;;  %v9866_v63 = vld [vmem:[%s12985_s1 + $0x1680] ss:$16 sps:$4 sm:$0xff]  }
 0x29c   :  { %6389 = vmatprep.subr.bf16.mxu0 %v9786_v15  ;;  %7078 = vmatprep.subr.bf16.mxu1 %v9789_v1  ;;  %v9869_v15 = vld [vmem:[%s12985_s1 + $0x1688] ss:$16 sps:$4 sm:$0xff]   ;;  %v9874_v1 = vld [vmem:[%s12985_s1 + $0x16a4] ss:$16 sps:$4 sm:$0xff]  }
 0x29f   :  { %6390 = vmatpush1.bf16.msra.mxu0 %v9784_v4  ;;  %7079 = vmatpush1.bf16.msra.mxu1 %v9787_v5  ;;  %v9872_v4 = vld [vmem:[%s12985_s1 + $0x16a0] ss:$16 sps:$4 sm:$0xff]   ;;  %v9875_v5 = vld [vmem:[%s12985_s1 + $0x16a8] ss:$16 sps:$4 sm:$0xff]  }
 0x2a0   :  { %6391 = vmatprep.subr.bf16.mxu0 %v9792_v7  ;;  %7080 = vmatprep.subr.bf16.mxu1 %v9795_v12  ;;  %v9880_v7 = vld [vmem:[%s12985_s1 + $0x16c4] ss:$16 sps:$4 sm:$0xff]   ;;  %v9883_v12 = vld [vmem:[%s12985_s1 + $0x16cc] ss:$16 sps:$4 sm:$0xff]  }
 0x2a3   :  { %6392 = vmatpush1.bf16.msra.mxu0 %v9790_v8  ;;  %7081 = vmatpush1.bf16.msra.mxu1 %v9793_v16  ;;  %v9878_v8 = vld [vmem:[%s12985_s1 + $0x16c0] ss:$16 sps:$4 sm:$0xff]   ;;  %v9881_v16 = vld [vmem:[%s12985_s1 + $0x16c8] ss:$16 sps:$4 sm:$0xff]  }
 0x2a4   :  { %6393 = vmatprep.subr.bf16.mxu0 %v9798_v18  ;;  %7082 = vmatprep.subr.bf16.mxu1 %v9801_v58  ;;  %v9886_v18 = vld [vmem:[%s12985_s1 + $0x16e4] ss:$16 sps:$4 sm:$0xff]   ;;  %v9889_v58 = vld [vmem:[%s12985_s1 + $0x16ec] ss:$16 sps:$4 sm:$0xff]  }
 0x2a7   :  { %6394 = vmatpush1.bf16.msra.mxu0 %v9796_v40  ;;  %7083 = vmatpush1.bf16.msra.mxu1 %v9799_v27  ;;  %v9884_v40 = vld [vmem:[%s12985_s1 + $0x16e0] ss:$16 sps:$4 sm:$0xff]   ;;  %v9887_v27 = vld [vmem:[%s12985_s1 + $0x16e8] ss:$16 sps:$4 sm:$0xff]  }
 0x2a8   :  { %6395 = vmatprep.subr.bf16.mxu0 %v9804_v13  ;;  %7084 = vmatprep.subr.bf16.mxu1 %v9807_v32  ;;  %v9892_v13 = vld [vmem:[%s12985_s1 + $0x1704] ss:$16 sps:$4 sm:$0xff]   ;;  %v9895_v32 = vld [vmem:[%s12985_s1 + $0x170c] ss:$16 sps:$4 sm:$0xff]  }
 0x2ab   :  { %6396 = vmatpush1.bf16.msra.mxu0 %v9802_v19  ;;  %7085 = vmatpush1.bf16.msra.mxu1 %v9805_v20  ;;  %v9890_v19 = vld [vmem:[%s12985_s1 + $0x1700] ss:$16 sps:$4 sm:$0xff]   ;;  %v9893_v20 = vld [vmem:[%s12985_s1 + $0x1708] ss:$16 sps:$4 sm:$0xff]  }
 0x2ac   :  { %6397 = vmatprep.subr.bf16.mxu0 %v9810_v21  ;;  %7086 = vmatprep.subr.bf16.mxu1 %v9813_v22  ;;  %v9898_v21 = vld [vmem:[%s12985_s1 + $0x1724] ss:$16 sps:$4 sm:$0xff]   ;;  %v9901_v22 = vld [vmem:[%s12985_s1 + $0x172c] ss:$16 sps:$4 sm:$0xff]  }
 0x2af   :  { %6398 = vmatpush1.bf16.msra.mxu0 %v9808_v23  ;;  %7087 = vmatpush1.bf16.msra.mxu1 %v9811_v24  ;;  %v9896_v23 = vld [vmem:[%s12985_s1 + $0x1720] ss:$16 sps:$4 sm:$0xff]   ;;  %v9899_v24 = vld [vmem:[%s12985_s1 + $0x1728] ss:$16 sps:$4 sm:$0xff]  }
 0x2b0   :  { %6399 = vmatprep.subr.bf16.mxu0 %v9816_v25  ;;  %7088 = vmatprep.subr.bf16.mxu1 %v9819_v53  ;;  %v9904_v25 = vld [vmem:[%s12985_s1 + $0x1744] ss:$16 sps:$4 sm:$0xff]   ;;  %v9907_v53 = vld [vmem:[%s12985_s1 + $0x174c] ss:$16 sps:$4 sm:$0xff]  }
 0x2b3   :  { %6400 = vmatpush1.bf16.msra.mxu0 %v9814_v55  ;;  %7089 = vmatpush1.bf16.msra.mxu1 %v9817_v9  ;;  %v9902_v55 = vld [vmem:[%s12985_s1 + $0x1740] ss:$16 sps:$4 sm:$0xff]   ;;  %v9905_v9 = vld [vmem:[%s12985_s1 + $0x1748] ss:$16 sps:$4 sm:$0xff]  }
 0x2b4   :  { %6401 = vmatprep.subr.bf16.mxu0 %v9822_v30  ;;  %7090 = vmatprep.subr.bf16.mxu1 %v9825_v31  ;;  %v9910_v30 = vld [vmem:[%s12985_s1 + $0x1764] ss:$16 sps:$4 sm:$0xff]   ;;  %v9913_v31 = vld [vmem:[%s12985_s1 + $0x176c] ss:$16 sps:$4 sm:$0xff]  }
 0x2b7   :  { %6402 = vmatpush1.bf16.msra.mxu0 %v9820_v33  ;;  %7091 = vmatpush1.bf16.msra.mxu1 %v9823_v34  ;;  %v9908_v33 = vld [vmem:[%s12985_s1 + $0x1760] ss:$16 sps:$4 sm:$0xff]   ;;  %v9911_v34 = vld [vmem:[%s12985_s1 + $0x1768] ss:$16 sps:$4 sm:$0xff]  }
 0x2b8   :  { %6403 = vmatprep.subr.bf16.mxu0 %v9828_v2  ;;  %7092 = vmatprep.subr.bf16.mxu1 %v9831_v3  ;;  %v9916_v2 = vld [vmem:[%s12985_s1 + $0x1784] ss:$16 sps:$4 sm:$0xff]   ;;  %v9919_v3 = vld [vmem:[%s12985_s1 + $0x178c] ss:$16 sps:$4 sm:$0xff]  }
 0x2bb   :  { %6404 = vmatpush1.bf16.msra.mxu0 %v9826_v36  ;;  %7093 = vmatpush1.bf16.msra.mxu1 %v9829_v37  ;;  %v9914_v36 = vld [vmem:[%s12985_s1 + $0x1780] ss:$16 sps:$4 sm:$0xff]   ;;  %v9917_v37 = vld [vmem:[%s12985_s1 + $0x1788] ss:$16 sps:$4 sm:$0xff]  }
 0x2bc   :  { %6405 = vmatprep.subr.bf16.mxu0 %v9834_v47  ;;  %7094 = vmatprep.subr.bf16.mxu1 %v9837_v41  ;;  %v9922_v47 = vld [vmem:[%s12985_s1 + $0x17a4] ss:$16 sps:$4 sm:$0xff]   ;;  %v9925_v41 = vld [vmem:[%s12985_s1 + $0x17ac] ss:$16 sps:$4 sm:$0xff]  }
 0x2bf   :  { %6406 = vmatpush1.bf16.msra.mxu0 %v9832_v0  ;;  %7095 = vmatpush1.bf16.msra.mxu1 %v9835_v42  ;;  %v9920_v0 = vld [vmem:[%s12985_s1 + $0x17a0] ss:$16 sps:$4 sm:$0xff]   ;;  %v9923_v42 = vld [vmem:[%s12985_s1 + $0x17a8] ss:$16 sps:$4 sm:$0xff]  }
 0x2c0   :  { %6428 = vmatprep.subr.bf16.mxu0 %v9844_v48  ;;  %7117 = vmatprep.subr.bf16.mxu1 %v9847_v49  ;;  %v9932_v48 = vld [vmem:[%s12985_s1 + $0x17c4] ss:$16 sps:$4 sm:$0xff]   ;;  %v9935_v49 = vld [vmem:[%s12985_s1 + $0x17cc] ss:$16 sps:$4 sm:$0xff]  }
 0x2c2   :  { %6408 = vmatmul.mubr.bf16.vlgmr.msra.gmra.mrb[0].mxu0 %v1358_v51  ;;  %7097 = vmatmul.mubr.bf16.vlgmr.msra.gmra.mrb[0].mxu1 %v1358_v51  ;;  %v9930_v51 = vld [vmem:[%s12985_s1 + $0x17c0] ss:$16 sps:$4 sm:$0xff]  }
 0x2c3   :  { %6429 = vmatpush1.bf16.msra.mxu0 %v9842_v60  ;;  %7118 = vmatpush1.bf16.msra.mxu1 %v9845_v52  ;;  %v9933_v60 = vld [vmem:[%s12985_s1 + $0x17c8] ss:$16 sps:$4 sm:$0xff]   ;;  %v9938_v52 = vld [vmem:[%s12985_s1 + $0x17e4] ss:$16 sps:$4 sm:$0xff]  }
 0x2c4   :  { %6430 = vmatprep.subr.bf16.mxu0 %v9850_v6  ;;  %7119 = vmatprep.subr.bf16.mxu1 %v9853_v11  ;;  %v9941_v6 = vld [vmem:[%s12985_s1 + $0x17ec] ss:$16 sps:$4 sm:$0xff]   ;;  %v9936_v11 = vld [vmem:[%s12985_s1 + $0x17e0] ss:$16 sps:$4 sm:$0xff]  }
 0x2c5   :  { %6417 = vmatprep.mubr.bf16.mxu0 %v1819_v14  ;;  %7106 = vmatprep.mubr.bf16.mxu1 %v1819_v14  ;;  %v9939_v14 = vld [vmem:[%s12985_s1 + $0x17e8] ss:$16 sps:$4 sm:$0xff]  }
 0x2c7   :  { %6431 = vmatpush1.bf16.msra.mxu0 %v9848_v50  ;;  %7120 = vmatpush1.bf16.msra.mxu1 %v9851_v10  ;;  %v9944_v50 = vld [vmem:[%s12985_s1 + $0x1804] ss:$16 sps:$4 sm:$0xff]   ;;  %v9947_v10 = vld [vmem:[%s12985_s1 + $0x180c] ss:$16 sps:$4 sm:$0xff]  }
 0x2c8   :  { %6432 = vmatprep.subr.bf16.mxu0 %v9856_v56  ;;  %7121 = vmatprep.subr.bf16.mxu1 %v9859_v35  ;;  %v9966_v56 = vld [vmem:[%s12984_s0 + $0x18] ss:$25 sps:$4 sm:$0x11]   ;;  %v9967_v35 = vld [vmem:[%s12984_s0 + $0x4a] ss:$25 sps:$4 sm:$0x11]  }
 0x2ca   :  { %6418 = vmatmul.mubr.bf16.gmra.mrb[4].mxu0 %v1815_v38  ;;  %7107 = vmatmul.mubr.bf16.gmra.mrb[4].mxu1 %v1815_v38  ;;  %v9968_v38 = vld [vmem:[%s12984_s0 + $0x7c] ss:$25 sps:$4 sm:$0x11]  }
 0x2cb   :  { %6433 = vmatpush1.bf16.msra.mxu0 %v9854_v57  ;;  %7122 = vmatpush1.bf16.msra.mxu1 %v9857_v59  ;;  %v9969_v57 = vld [vmem:[%s12984_s0 + $0xae] ss:$25 sps:$4 sm:$0x11]   ;;  %v9942_v59 = vld [vmem:[%s12985_s1 + $0x1800] ss:$16 sps:$4 sm:$0xff]  }
 0x2cc   :  { %6434 = vmatprep.subr.bf16.mxu0 %v9862_v43  ;;  %7123 = vmatprep.subr.bf16.mxu1 %v9865_v39  ;;  %v9945_v43 = vld [vmem:[%s12985_s1 + $0x1808] ss:$16 sps:$4 sm:$0xff]   ;;  %v9950_v39 = vld [vmem:[%s12985_s1 + $0x1824] ss:$16 sps:$4 sm:$0xff]  }
 0x2cd   :  { %6460 = vmatprep.mubr.bf16.mxu0 %v12363_v26  ;;  %7149 = vmatprep.mubr.bf16.mxu1 %v12363_v26  ;;  %v9877_v26 = vld [vmem:[%s12985_s1 + $0x16ac] ss:$16 sps:$4 sm:$0xff]  }
 0x2cf   :  { %6435 = vmatpush1.bf16.msra.mxu0 %v9860_v17  ;;  %7124 = vmatpush1.bf16.msra.mxu1 %v9863_v29  ;;  %v9953_v17 = vld [vmem:[%s12985_s1 + $0x182c] ss:$16 sps:$4 sm:$0xff]   ;;  %v1374_v29 = vrot.slane %v9966_v56, %v10215_v54 }
 0x2d0   :  { %6436 = vmatprep.subr.bf16.mxu0 %v9868_v61  ;;  %7125 = vmatprep.subr.bf16.mxu1 %v9871_v62  ;;  %v1381_v61 = vrot.slane %v9967_v35, %v10215_v54  ;;  %v1388_v62 = vrot.slane %v9968_v38, %v10215_v54  ;;  %v9996_v56 = vld [vmem:[%s12987_s3 + $0x28] sm:$0xff]   ;;  %v9998_v38 = vld [vmem:[%s12987_s3 + $0x70] sm:$0xff]  }
 0x2d1   :  { %v9997_v35 = vld [vmem:[%s12987_s3 + $0xa8] sm:$0xff]  }
 0x2d3   :  { %6437 = vmatpush1.bf16.msra.mxu0 %v9866_v63  ;;  %7126 = vmatpush1.bf16.msra.mxu1 %v9869_v15  ;;  %v1395_v63 = vrot.slane %v9969_v57, %v10215_v54  ;;  %v9948_v15 = vld [vmem:[%s12985_s1 + $0x1820] ss:$16 sps:$4 sm:$0xff]  }
 0x2d4   :  { %6438 = vmatprep.subr.bf16.mxu0 %v9874_v1  ;;  %7127 = vmatprep.subr.bf16.mxu1 %v9877_v26  ;;  %v9951_v1 = vld [vmem:[%s12985_s1 + $0x1828] ss:$16 sps:$4 sm:$0xff]   ;;  %v9956_v26 = vld [vmem:[%s12985_s1 + $0x1844] ss:$16 sps:$4 sm:$0xff]  }
 0x2d5   :  { %v9999_v57 = vld [vmem:[%s12987_s3 + $0xf0] sm:$0xff]  }
 0x2d7   :  { %6439 = vmatpush1.bf16.msra.mxu0 %v9872_v4  ;;  %7128 = vmatpush1.bf16.msra.mxu1 %v9875_v5  ;;  %v9959_v4 = vld [vmem:[%s12985_s1 + $0x184c] ss:$16 sps:$4 sm:$0xff]   ;;  %v9970_v5 = vld [vmem:[%s12984_s0 + $0xe0] ss:$25 sps:$4 sm:$0x11]  }
 0x2d8   :  { %6440 = vmatprep.subr.bf16.mxu0 %v9880_v7  ;;  %7129 = vmatprep.subr.bf16.mxu1 %v9883_v12  ;;  %v9971_v7 = vld [vmem:[%s12984_s0 + $0x112] ss:$25 sps:$4 sm:$0x11]   ;;  %v1397_v12 = vcombine.low %v1388_v62, %v1395_v63  ;;  %v874_v62 = vsub.s32 0, %v10194_v46  ;;  %v870_v63 = vld [vmem:[%s12986_s2] sm:$0xf] }
 0x2db   :  { %6441 = vmatpush1.bf16.msra.mxu0 %v9878_v8  ;;  %7130 = vmatpush1.bf16.msra.mxu1 %v9881_v16  ;;  %v9972_v8 = vld [vmem:[%s12984_s0 + $0x144] ss:$25 sps:$4 sm:$0x11]   ;;  %v9973_v16 = vld [vmem:[%s12984_s0 + $0x176] ss:$25 sps:$4 sm:$0x11]  }
 0x2dc   :  { %6442 = vmatprep.subr.bf16.mxu0 %v9886_v18  ;;  %7131 = vmatprep.subr.bf16.mxu1 %v9889_v58  ;;  %v9954_v18 = vld [vmem:[%s12985_s1 + $0x1840] ss:$16 sps:$4 sm:$0xff]   ;;  %v9962_v58 = vld [vmem:[%s12985_s1 + $0x1864] ss:$16 sps:$4 sm:$0xff]  }
 0x2df   :  { %6443 = vmatpush1.bf16.msra.mxu0 %v9884_v40  ;;  %7132 = vmatpush1.bf16.msra.mxu1 %v9887_v27  ;;  %v9965_v40 = vld [vmem:[%s12985_s1 + $0x186c] ss:$16 sps:$4 sm:$0xff]  }
 0x2e0   :  { %6444 = vmatprep.subr.bf16.mxu0 %v9892_v13  ;;  %7133 = vmatprep.subr.bf16.mxu1 %v9895_v32  ;;  %v1831_v13 = vrot.slane %v9970_v5, %v10215_v54  ;;  %v1411_v32 = vrot.slane %v1397_v12, %v10215_v54 }
 0x2e3   :  { %6445 = vmatpush1.bf16.msra.mxu0 %v9890_v19  ;;  %7134 = vmatpush1.bf16.msra.mxu1 %v9893_v20  ;;  %v1838_v19 = vrot.slane %v9971_v7, %v10215_v54  ;;  %v1845_v20 = vrot.slane %v9972_v8, %v10215_v54 }
 0x2e4   :  { %6446 = vmatprep.subr.bf16.mxu0 %v9898_v21  ;;  %7135 = vmatprep.subr.bf16.mxu1 %v9901_v22  ;;  %v1852_v21 = vrot.slane %v9973_v16, %v10215_v54  ;;  %v9960_v22 = vld [vmem:[%s12985_s1 + $0x1860] ss:$16 sps:$4 sm:$0xff]  }
 0x2e7   :  { %6447 = vmatpush1.bf16.msra.mxu0 %v9896_v23  ;;  %7136 = vmatpush1.bf16.msra.mxu1 %v9899_v24  ;;  %v9963_v23 = vld [vmem:[%s12985_s1 + $0x1868] ss:$16 sps:$4 sm:$0xff]   ;;  %v9974_v24 = vld [vmem:[%s12987_s3 + $0x40] sm:$0xff]  }
 0x2e8   :  { %6448 = vmatprep.subr.bf16.mxu0 %v9904_v25  ;;  %7137 = vmatprep.subr.bf16.mxu1 %v9907_v53  ;;  %v10031_v25 = vmov 0  }
 0x2eb   :  { %6449 = vmatpush1.bf16.msra.mxu0 %v9902_v55  ;;  %7138 = vmatpush1.bf16.msra.mxu1 %v9905_v9  ;;  %v1853_v55 = vcombine.low %v1831_v13, %v1838_v19  ;;  %v1854_v9 = vcombine.low %v1845_v20, %v1852_v21 }
 0x2ec   :  { %6450 = vmatprep.subr.bf16.mxu0 %v9910_v30  ;;  %7139 = vmatprep.subr.bf16.mxu1 %v9913_v31  ;;  %v9976_v30 = vld [vmem:[%s12987_s3] sm:$0xff]  }
 0x2ed   :  { %v9977_v31 = vld [vmem:[%s12987_s3 + $0x80] sm:$0xff]  }
 0x2ef   :  { %6451 = vmatpush1.bf16.msra.mxu0 %v9908_v33  ;;  %7140 = vmatpush1.bf16.msra.mxu1 %v9911_v34  ;;  %v9978_v33 = vld [vmem:[%s12987_s3 + $0x48] sm:$0xff]   ;;  %v1861_v34 = vrot.slane %v1853_v55, %v10215_v54 }
 0x2f0   :  { %6452 = vmatprep.subr.bf16.mxu0 %v9916_v2  ;;  %7141 = vmatprep.subr.bf16.mxu1 %v9919_v3  ;;  %v1868_v2 = vrot.slane %v1854_v9, %v10215_v54  ;;  %v9979_v3 = vld [vmem:[%s12987_s3 + $0xc8] sm:$0xff]  }
 0x2f3   :  { %6453 = vmatpush1.bf16.msra.mxu0 %v9914_v36  ;;  %7142 = vmatpush1.bf16.msra.mxu1 %v9917_v37  ;;  %v9980_v36 = vld [vmem:[%s12987_s3 + $0x8] sm:$0xff]  }
 0x2f4   :  { %6454 = vmatprep.subr.bf16.mxu0 %v9922_v47  ;;  %7143 = vmatprep.subr.bf16.mxu1 %v9925_v41  ;;  %v9981_v37 = vld [vmem:[%s12987_s3 + $0x88] sm:$0xff]   ;;  %v1869_v47 = vcombine.low %v1861_v34, %v1868_v2  ;;  %v9983_v41 = vld [vmem:[%s12987_s3 + $0xd0] sm:$0xff]  }
 0x2f7   :  { %6455 = vmatpush1.bf16.msra.mxu0 %v9920_v0  ;;  %7144 = vmatpush1.bf16.msra.mxu1 %v9923_v42  ;;  %v9984_v0 = vld [vmem:[%s12987_s3 + $0x10] sm:$0xff]  }
 0x2f8   :  { %6456 = vmatprep.subr.bf16.mxu0 %v9932_v48  ;;  %7145 = vmatprep.subr.bf16.mxu1 %v9935_v49  ;;  %v9985_v42 = vld [vmem:[%s12987_s3 + $0x90] sm:$0xff]   ;;  %v9986_v48 = vld [vmem:[%s12987_s3 + $0x58] sm:$0xff]  }
 0x2f9   :  { %v9987_v49 = vld [vmem:[%s12987_s3 + $0xd8] sm:$0xff]  }
 0x2fb   :  { %6457 = vmatpush1.bf16.msra.mxu0 %v9930_v51  ;;  %7146 = vmatpush1.bf16.msra.mxu1 %v9933_v60  ;;  %v9988_v51 = vld [vmem:[%s12987_s3 + $0x18] sm:$0xff]  }
 0x2fc   :  { %6458 = vmatprep.subr.bf16.mxu0 %v9938_v52  ;;  %7147 = vmatprep.subr.bf16.mxu1 %v9941_v6  ;;  %v9989_v60 = vld [vmem:[%s12987_s3 + $0x98] sm:$0xff]   ;;  %v9990_v52 = vld [vmem:[%s12987_s3 + $0x60] sm:$0xff]  }
 0x2fd   :  { %v9991_v6 = vld [vmem:[%s12987_s3 + $0xe0] sm:$0xff]  }
 0x2ff   :  { %6459 = vmatpush1.bf16.msra.mxu0 %v9936_v11  ;;  %7148 = vmatpush1.bf16.msra.mxu1 %v9939_v14  ;;  %v9992_v11 = vld [vmem:[%s12987_s3 + $0x20] sm:$0xff]  }
 0x300   :  { %6481 = vmatprep.subr.bf16.mxu0 %v9944_v50  ;;  %7170 = vmatprep.subr.bf16.mxu1 %v9947_v10  ;;  %v9993_v14 = vld [vmem:[%s12987_s3 + $0xa0] sm:$0xff]   ;;  %v9994_v50 = vld [vmem:[%s12987_s3 + $0x68] sm:$0xff]  }
 0x301   :  { %v9995_v10 = vld [vmem:[%s12987_s3 + $0xe8] sm:$0xff]  }
 0x302   :  { %6461 = vmatmul.mubr.bf16.vlgmr.msra.gmra.mrb[0].mxu0 %v12367_v28  ;;  %7150 = vmatmul.mubr.bf16.vlgmr.msra.gmra.mrb[0].mxu1 %v12367_v28  ;;  %v1396_v28 = vcombine.low %v1374_v29, %v1381_v61  ;;  %v10004_v29 = vld [vmem:[%s12987_s3 + $0x38] sm:$0xff]  }
 0x303   :  { %6482 = vmatpush1.bf16.msra.mxu0 %v9942_v59  ;;  %7171 = vmatpush1.bf16.msra.mxu1 %v9945_v43  ;;  %v10000_v59 = vld [vmem:[%s12987_s3 + $0x30] sm:$0xff]   ;;  %v10005_v61 = vld [vmem:[%s12987_s3 + $0xb8] sm:$0xff]  }
 0x304   :  { %6483 = vmatprep.subr.bf16.mxu0 %v9950_v39  ;;  %7172 = vmatprep.subr.bf16.mxu1 %v9953_v17  ;;  %v1404_v27 = vrot.slane %v1396_v28, %v10215_v54  ;;  %v9982_v54 = vld [vmem:[%s12987_s3 + $0x50] sm:$0xff]   ;;  %v10002_v39 = vld [vmem:[%s12987_s3 + $0x78] sm:$0xff]  }
 0x305   :  { %6470 = vmatprep.mubr.bf16.mxu0 %v12411_v44  ;;  %7159 = vmatprep.mubr.bf16.mxu1 %v12411_v44  ;;  %v9957_v44 = vld [vmem:[%s12985_s1 + $0x1848] ss:$16 sps:$4 sm:$0xff]   ;;  %v10001_v43 = vld [vmem:[%s12987_s3 + $0xb0] sm:$0xff]  }
 0x306   :  { %v1412_v53 = vcombine.low %v1404_v27, %v1411_v32  ;;  %v10003_v17 = vld [vmem:[%s12987_s3 + $0xf8] sm:$0xff]  }
 0x307   :  { %6484 = vmatpush1.bf16.msra.mxu0 %v9948_v15  ;;  %7173 = vmatpush1.bf16.msra.mxu1 %v9951_v1  ;;  %v882_v15 = vsub.s32 2, %v10194_v46  ;;  %v878_v1 = vsub.s32 1, %v10194_v46 }
 0x308   :  { %6485 = vmatprep.subr.bf16.mxu0 %v9956_v26  ;;  %7174 = vmatprep.subr.bf16.mxu1 %v9959_v4  ;;  %v886_v26 = vsub.s32 3, %v10194_v46  ;;  %v875_v4 = vrot.slane %v870_v63, %v874_v62 }
 0x309   :  { %v883_v28 = vrot.slane %v870_v63, %v882_v15  ;;  %v879_v5 = vrot.slane %v870_v63, %v878_v1  ;;  %v8416_v1 = vld [vmem:[%s12988_s4] ss:$0 sm:$0xff] }
 0x30a   :  { %6471 = vmatmul.mubr.bf16.gmra.mrb[4].mxu0 %v12415_v45  ;;  %7160 = vmatmul.mubr.bf16.gmra.mrb[4].mxu1 %v12415_v45  ;;  %v9975_v45 = vld [vmem:[%s12987_s3 + $0xc0] sm:$0xff]   ;;  %v887_v7 = vrot.slane %v870_v63, %v886_v26 }
 0x30b   :  { %6486 = vmatpush1.bf16.msra.mxu0 %v9954_v18  ;;  %7175 = vmatpush1.bf16.msra.mxu1 %v9957_v44 }
 0x30c   :  { %6487 = vmatprep.subr.bf16.mxu0 %v9962_v58  ;;  %7176 = vmatprep.subr.bf16.mxu1 %v9965_v40 }
 0x30d   :  { %6513 = vmatprep.mubr.bf16.mxu0 %v10031_v25  ;;  %7202 = vmatprep.mubr.bf16.mxu1 %v10031_v25 }
 0x30f   :  { %6488 = vmatpush1.bf16.msra.mxu0 %v9960_v22  ;;  %7177 = vmatpush1.bf16.msra.mxu1 %v9963_v23 }
 0x310   :  { %8449 = vmatprep.subr.bf16.mxu0 %v9974_v24  ;;  %8477 = vmatprep.subr.bf16.mxu1 %v9975_v45 }
 0x312   :  { %8412 = vmatmul.mubr.msk.bf16.vlgmr.msra.gmra.mrb[0].mxu0 %vm5838_vm0, %v1412_v53  ;;  %8414 = vmatmul.mubr.msk.bf16.vlgmr.msra.gmra.mrb[0].mxu1 %vm5838_vm0, %v1412_v53 }
 0x313   :  { %6523 = vmatprep.mubr.bf16.mxu0 %v10031_v25  ;;  %7212 = vmatprep.mubr.bf16.mxu1 %v10031_v25 }
 0x314   :  { %8450 = vmatpush3.bf16.msra.mxu0 %v9976_v30  ;;  %8478 = vmatpush3.bf16.msra.mxu1 %v9977_v31 }
 0x315   :  { %8451 = vmatprep.subr.bf16.mxu0 %v9978_v33  ;;  %8479 = vmatprep.subr.bf16.mxu1 %v9979_v3 }
 0x318   :  { %8452 = vmatpush3.bf16.msra.mxu0 %v9980_v36  ;;  %8480 = vmatpush3.bf16.msra.mxu1 %v9981_v37 }
 0x319   :  { %8453 = vmatprep.subr.bf16.mxu0 %v9982_v54  ;;  %8481 = vmatprep.subr.bf16.mxu1 %v9983_v41 }
 0x31a   :  { %8413 = vmatmul.mubr.msk.bf16.gmra.mrb[4].mxu0 %vm5838_vm0, %v1869_v47  ;;  %8415 = vmatmul.mubr.msk.bf16.gmra.mrb[4].mxu1 %vm5838_vm0, %v1869_v47 }
 0x31c   :  { %8454 = vmatpush3.bf16.msra.mxu0 %v9984_v0  ;;  %8482 = vmatpush3.bf16.msra.mxu1 %v9985_v42 }
 0x31d   :  { %8455 = vmatprep.subr.bf16.mxu0 %v9986_v48  ;;  %8483 = vmatprep.subr.bf16.mxu1 %v9987_v49 }
 0x320   :  { %8456 = vmatpush3.bf16.msra.mxu0 %v9988_v51  ;;  %8484 = vmatpush3.bf16.msra.mxu1 %v9989_v60 }
 0x321   :  { %8457 = vmatprep.subr.bf16.mxu0 %v9990_v52  ;;  %8485 = vmatprep.subr.bf16.mxu1 %v9991_v6 }
 0x324   :  { %8458 = vmatpush3.bf16.msra.mxu0 %v9992_v11  ;;  %8486 = vmatpush3.bf16.msra.mxu1 %v9993_v14 }
 0x325   :  { %8459 = vmatprep.subr.bf16.mxu0 %v9994_v50  ;;  %8487 = vmatprep.subr.bf16.mxu1 %v9995_v10 }
 0x328   :  { %8460 = vmatpush3.bf16.msra.mxu0 %v9996_v56  ;;  %8488 = vmatpush3.bf16.msra.mxu1 %v9997_v35 }
 0x329   :  { %8461 = vmatprep.subr.bf16.mxu0 %v9998_v38  ;;  %8489 = vmatprep.subr.bf16.mxu1 %v9999_v57 }
 0x32c   :  { %8462 = vmatpush3.bf16.msra.mxu0 %v10000_v59  ;;  %8490 = vmatpush3.bf16.msra.mxu1 %v10001_v43 }
 0x32d   :  { %8463 = vmatprep.subr.bf16.mxu0 %v10002_v39  ;;  %8491 = vmatprep.subr.bf16.mxu1 %v10003_v17 }
 0x330   :  { %8464 = vmatpush3.bf16.msra.mxu0 %v10004_v29  ;;  %8492 = vmatpush3.bf16.msra.mxu1 %v10005_v61 }
 0x3e5   :  { %v6515_v12 = vpop.f32.mrb[0].mxu0  ;;  %v7204_v16 = vpop.f32.mrb[0].mxu1 }
 0x3e6   :  { %v8505_v8 = vadd.f32 %v6515_v12, %v875_v4  ;;  %v6517_v18 = vpop.f32.mrb[1].mxu0  ;;  %v8513_v44 = vadd.f32 %v7204_v16, %v883_v28  ;;  %v7206_v40 = vpop.f32.mrb[1].mxu1 }
 0x3e7   :  { %v8506_v58 = vadd.f32 %v6517_v18, %v879_v5  ;;  %v6519_v27 = vpop.f32.mrb[2].mxu0  ;;  %v8514_v13 = vadd.f32 %v7206_v40, %v887_v7  ;;  %v7208_v19 = vpop.f32.mrb[2].mxu1 }
 0x3e8   :  { %v8507_v32 = vadd.f32 %v6519_v27, %v875_v4  ;;  %v6521_v20 = vpop.f32.mrb[3].mxu0  ;;  %v8515_v21 = vadd.f32 %v7208_v19, %v883_v28  ;;  %v7210_v23 = vpop.f32.mrb[3].mxu1  ;;  %v7223_v46 = vmax.f32 %v8505_v8, 0.0  ;;  %v7225_v45 = vmax.f32 %v8513_v44, 0.0 }
 0x3e9   :  { %v8508_v22 = vadd.f32 %v6521_v20, %v879_v5  ;;  %v8516_v25 = vadd.f32 %v7210_v23, %v887_v7  ;;  %v7224_v53 = vmax.f32 %v8506_v58, 0.0  ;;  %v7226_v30 = vmax.f32 %v8514_v13, 0.0 }
 0x3ea   :  { %v7227_v24 = vmax.f32 %v8507_v32, 0.0  ;;  %v7229_v55 = vmax.f32 %v8515_v21, 0.0 }
 0x3eb   :  { %v7228_v9 = vmax.f32 %v8508_v22, 0.0  ;;  %v7230_v33 = vmax.f32 %v8516_v25, 0.0 }
 0x3ec   :  { %v7239_v31 = vpack.c.bf16 %v7227_v24, %v7223_v46  ;;  %v7241_v34 = vpack.c.bf16 %v7229_v55, %v7225_v45 }
 0x3ed   :  { %v7240_v2 = vpack.c.bf16 %v7228_v9, %v7224_v53  ;;  %v6525_v3 = vpop.f32.mrb[4].mxu0  ;;  %v7242_v36 = vpack.c.bf16 %v7230_v33, %v7226_v30  ;;  %v7214_v54 = vpop.f32.mrb[4].mxu1 }
 0x3ee   :  { %v8509_v37 = vadd.f32 %v6525_v3, %v875_v4  ;;  %v6527_v47 = vpop.f32.mrb[5].mxu0  ;;  %v8517_v41 = vadd.f32 %v7214_v54, %v883_v28  ;;  %v7216_v42 = vpop.f32.mrb[5].mxu1 }
 0x3ef   :  { %v8510_v0 = vadd.f32 %v6527_v47, %v879_v5  ;;  %v6529_v48 = vpop.f32.mrb[6].mxu0  ;;  %7542 = vmatprep.mubr.bf16.mxu0 %v7240_v2  ;;  %v8518_v49 = vadd.f32 %v7216_v42, %v887_v7  ;;  %v7218_v60 = vpop.f32.mrb[6].mxu1  ;;  %7591 = vmatprep.mubr.bf16.mxu1 %v7242_v36 }
 0x3f0   :  { %v8511_v51 = vadd.f32 %v6529_v48, %v875_v4  ;;  %v6531_v52 = vpop.f32.mrb[7].mxu0  ;;  %7543 = vmatmul.mubr.bf16.vlgmr.msra.gmra.mrb[8].mxu0 %v7239_v31  ;;  %v8519_v6 = vadd.f32 %v7218_v60, %v883_v28  ;;  %v7220_v14 = vpop.f32.mrb[7].mxu1  ;;  %7592 = vmatmul.mubr.bf16.vlgmr.msra.gmra.mrb[8].mxu1 %v7241_v34  ;;  %v7231_v50 = vmax.f32 %v8509_v37, 0.0  ;;  %v7233_v35 = vmax.f32 %v8517_v41, 0.0 }
 0x3f1   :  { %v8512_v11 = vadd.f32 %v6531_v52, %v879_v5  ;;  %v8520_v56 = vadd.f32 %v7220_v14, %v887_v7  ;;  %v7232_v38 = vmax.f32 %v8510_v0, 0.0  ;;  %v7234_v43 = vmax.f32 %v8518_v49, 0.0 }
 0x3f2   :  { %v7235_v10 = vmax.f32 %v8511_v51, 0.0  ;;  %v7237_v57 = vmax.f32 %v8519_v6, 0.0 }
 0x3f3   :  { %v7236_v59 = vmax.f32 %v8512_v11, 0.0  ;;  %v7238_v17 = vmax.f32 %v8520_v56, 0.0 }
 0x3f4   :  { %v7243_v39 = vpack.c.bf16 %v7235_v10, %v7231_v50  ;;  %v7245_v29 = vpack.c.bf16 %v7237_v57, %v7233_v35 }
 0x3f5   :  { %v7244_v61 = vpack.c.bf16 %v7236_v59, %v7232_v38  ;;  %v7246_v62 = vpack.c.bf16 %v7238_v17, %v7234_v43 }
 0x3f7   :  { %7550 = vmatprep.mubr.bf16.mxu0 %v7244_v61  ;;  %7599 = vmatprep.mubr.bf16.mxu1 %v7246_v62 }
 0x3f8   :  { %7551 = vmatmul.mubr.bf16.gmra.mrb[12].mxu0 %v7243_v39  ;;  %7600 = vmatmul.mubr.bf16.gmra.mrb[12].mxu1 %v7245_v29 }
 0x4c3   :  { %v8465_v63 = vpop.f32.mrb[8].mxu0  ;;  %v8493_v15 = vpop.f32.mrb[8].mxu1 }
 0x4c4   :  { %v8466_v26 = vpop.f32.mrb[9].mxu0  ;;  %v8494_v28 = vpop.f32.mrb[9].mxu1 }
 0x4c5   :  { %v8467_v4 = vadd.f32 %v8466_v26, %v8465_v63  ;;  %v8468_v5 = vpop.f32.mrb[10].mxu0  ;;  %v8495_v7 = vadd.f32 %v8494_v28, %v8493_v15  ;;  %v8496_v12 = vpop.f32.mrb[10].mxu1 }
 0x4c6   :  { %v8469_v8 = vpop.f32.mrb[11].mxu0  ;;  %v8497_v44 = vpop.f32.mrb[11].mxu1 }
 0x4c7   :  { %v7545_v16 = vadd.f32 %v8467_v4, %v8416_v1  ;;  %v8470_v18 = vadd.f32 %v8469_v8, %v8468_v5  ;;  %v8498_v58 = vadd.f32 %v8497_v44, %v8496_v12 }
 0x4c9   :  { %v7594_v40 = vadd.f32 %v8495_v7, %v7545_v16  ;;  %v7548_v27 = vadd.f32 %v8470_v18, %v8416_v1 }
 0x4cb   :  { %7608 = vst [vmem:[#allocation2] sm:$0xff] %v7594_v40  ;;  %v7597_v13 = vadd.f32 %v8498_v58, %v7548_v27  ;;  %v8471_v32 = vpop.f32.mrb[12].mxu0  ;;  %v8499_v19 = vpop.f32.mrb[12].mxu1 }
 0x4cc   :  { %v8472_v20 = vpop.f32.mrb[13].mxu0  ;;  %v8500_v22 = vpop.f32.mrb[13].mxu1 }
 0x4cd   :  { %7609 = vst [vmem:[#allocation2 + $0x8] sm:$0xff] %v7597_v13  ;;  %v8473_v21 = vadd.f32 %v8472_v20, %v8471_v32  ;;  %v8474_v23 = vpop.f32.mrb[14].mxu0  ;;  %v8501_v46 = vadd.f32 %v8500_v22, %v8499_v19  ;;  %v8502_v24 = vpop.f32.mrb[14].mxu1 }
 0x4ce   :  { %v8475_v25 = vpop.f32.mrb[15].mxu0  ;;  %v8503_v55 = vpop.f32.mrb[15].mxu1 }
 0x4cf   :  { %v7553_v45 = vadd.f32 %v8473_v21, %v8416_v1  ;;  %v8476_v53 = vadd.f32 %v8475_v25, %v8474_v23  ;;  %v8504_v9 = vadd.f32 %v8503_v55, %v8502_v24 }
 0x4d1   :  { %v7602_v30 = vadd.f32 %v8501_v46, %v7553_v45  ;;  %v7556_v31 = vadd.f32 %v8476_v53, %v8416_v1 }
 0x4d3   :  { %7610 = vst [vmem:[#allocation2 + $0x10] sm:$0xff] %v7602_v30  ;;  %v7605_v33 = vadd.f32 %v8504_v9, %v7556_v31 }
 0x4d5   :  { %7611 = vst [vmem:[#allocation2 + $0x18] sm:$0xff] %v7605_v33 }
 0x4d6   :  { %7616 = vsyncadd [#allocation3], 480  ;;  %s10032_s4 = smov [#allocation2]  }
 0x4d7   :  { %s7617_s8 = sshll.u32 %s10032_s4, 4  ;;  %s7618_s8 = int_to_ptr.vmem [resolvable:$true] %s7617_s8 }
 0x4d8   :  { %s10006_s9 = scalar_lea.vmem %s7618_s8, 32  ;;  %s10010_s10 = scalar_lea.vmem %s7618_s8, 512 }
 0x4d9   :  { %p10007_p0 = scmp.ne.s32.totalorder %s7618_s8, %s10006_s9  ;;  %p10011_p1 = scmp.lt.s32.totalorder %s7618_s8, %s7618_s8 }
 0x4da   :  { %p10012_p2 = scmp.lt.s32.totalorder %s10010_s10, %s10006_s9 }
 0x4dc   :  { %p10013_p3 = por %p10012_p2, %p10011_p1 }
 0x4de   :  { %p10014_p4 = pnand %p10013_p3, %p10007_p0 }
 0x4e0   :  { %10017 = shalt.err (!%p10014_p4)
}
 0x4e1   :  { %s10018_s13 = scalar_lea.hbm %s12989_s5, 32 }
 0x4e2   :  { %p10019_p5 = scmp.ne.s32.totalorder %s12989_s5, %s10018_s13  ;;  %p10022_p6 = scmp.lt.u32.totalorder %s10018_s13, %s12989_s5 }
 0x4e4   :  { %p10024_p7 = pnand %p10022_p6, %p10019_p5 }
 0x4e6   :  { %10027 = shalt.err (!%p10024_p7)
}
 0x4e7   :  { %s10033_s18 = smov 32   ;;  %s10034_s0 = smov 2  }
 0x4e8   :  { %7623 = dma.vmem_to_hbm [thread:$0]  %s7618_s8, 32, %s12989_s5, [#allocation3], %s10033_s18, %s10033_s18, %s10034_s0  }
 0x4e9   :  { %10028 = dma.done.wait [#allocation3], 512  }
 0x4ea   :  { %10029 = vsyncadd [#allocation3], 4294966784 }
 0x4eb   :  { %7627 = vsyncpa [#allocation3], 1 }

</bundles_post_ra>
